<compile_context>
chip_gen: v6e
topology: v6e:2x2x1
jax: 0.10.0
libtpu: 0.0.40
codegen_flags: <defaults>
</compile_context>

<pallas_src>
import functools

import jax
import jax.numpy as jnp
from jax.experimental import pallas as pl
from jax.experimental.pallas import tpu as pltpu

_BF16 = jnp.bfloat16
_F32 = jnp.float32
_VMEM_LIMIT = 32 * 1024 * 1024


def _cdiv(a, b):
    return -(-a // b)


def _round_up(a, b):
    return _cdiv(a, b) * b


def _choose_point_tile(n, max_tile=512):
    """Pick a point-tile (multiple of 8, <= ~max_tile) and the padded length."""
    nt = _cdiv(n, max_tile)
    tile = _round_up(_cdiv(n, nt), 8)
    return tile, _round_up(n, tile)


# ---------------------------------------------------------------------------
# Kernel 1/3: per-point 3-layer MLP fused with max-over-points reduction
# ---------------------------------------------------------------------------
def _point_mlp_max_kernel(x_ref, w1_ref, s1_ref, b1_ref,
                          w2_ref, s2_ref, b2_ref,
                          w3_ref, s3_ref, b3_ref,
                          out_ref, *, relu3):
    t = pl.program_id(1)

    x = x_ref[0].astype(_BF16)                                          # (tn, 3)
    h = jnp.dot(x, w1_ref[0], preferred_element_type=_F32)              # (tn, 64)
    h = jnp.maximum(h * s1_ref[...] + b1_ref[...], 0.0)
    h = jnp.dot(h.astype(_BF16), w2_ref[...], preferred_element_type=_F32)
    h = jnp.maximum(h * s2_ref[...] + b2_ref[...], 0.0)                 # (tn, 128)
    h = jnp.dot(h.astype(_BF16), w3_ref[...], preferred_element_type=_F32)
    h = h * s3_ref[...] + b3_ref[...]                                   # (tn, 1024)
    if relu3:
        h = jnp.maximum(h, 0.0)

    tile_max = jnp.max(h, axis=0, keepdims=True)[None]                  # (1,1,1024)

    @pl.when(t == 0)
    def _():
        out_ref[...] = tile_max

    @pl.when(t > 0)
    def _():
        out_ref[...] = jnp.maximum(out_ref[...], tile_max)


def point_mlp_max(x_pts, w1, s1, b1, w2, s2, b2, w3, s3, b3, *, relu3, tn):
    """x_pts: (B, Np, 3); w1: (G, 3, c1) with G in {1, B}. Returns (B, 1, c3)."""
    B, Np, _ = x_pts.shape
    nt = Np // tn
    c1, c2, c3 = w1.shape[-1], w2.shape[-1], w3.shape[-1]
    per_batch = w1.shape[0] > 1
    w1_map = (lambda b, t: (b, 0, 0)) if per_batch else (lambda b, t: (0, 0, 0))
    z2 = lambda b, t: (0, 0)

    return pl.pallas_call(
        functools.partial(_point_mlp_max_kernel, relu3=relu3),
        out_shape=jax.ShapeDtypeStruct((B, 1, c3), _F32),
        grid=(B, nt),
        in_specs=[
            pl.BlockSpec((1, tn, 3), lambda b, t: (b, t, 0)),
            pl.BlockSpec((1, 3, c1), w1_map),
            pl.BlockSpec((1, c1), z2), pl.BlockSpec((1, c1), z2),
            pl.BlockSpec((c1, c2), z2),
            pl.BlockSpec((1, c2), z2), pl.BlockSpec((1, c2), z2),
            pl.BlockSpec((c2, c3), z2),
            pl.BlockSpec((1, c3), z2), pl.BlockSpec((1, c3), z2),
        ],
        out_specs=pl.BlockSpec((1, 1, c3), lambda b, t: (b, 0, 0)),
        compiler_params=pltpu.CompilerParams(
            dimension_semantics=("parallel", "arbitrary"),
            vmem_limit_bytes=_VMEM_LIMIT),
    )(x_pts, w1, s1, b1, w2, s2, b2, w3, s3, b3)


# ---------------------------------------------------------------------------
# Kernel 2: STN fc1 -> fc2 -> fc3 fused (rows = padded batch)
# ---------------------------------------------------------------------------
def _stn_fc_kernel(x_ref, w1_ref, s1_ref, b1_ref,
                   w2_ref, s2_ref, b2_ref, w3_ref, b3_ref, out_ref):
    h = jnp.dot(x_ref[...].astype(_BF16), w1_ref[...],
                preferred_element_type=_F32)
    h = jnp.maximum(h * s1_ref[...] + b1_ref[...], 0.0)                 # (Bp, 512)
    h = jnp.dot(h.astype(_BF16), w2_ref[...], preferred_element_type=_F32)
    h = jnp.maximum(h * s2_ref[...] + b2_ref[...], 0.0)                 # (Bp, 256)
    h = jnp.dot(h, w3_ref[...], preferred_element_type=_F32)            # (Bp, 9)
    out_ref[...] = h + b3_ref[...]


def stn_fc_chain(x, w1, s1, b1, w2, s2, b2, w3, b3):
    Bp, cin = x.shape
    c1, c2, c3 = w1.shape[-1], w2.shape[-1], w3.shape[-1]
    z = lambda i: (0, 0)
    return pl.pallas_call(
        _stn_fc_kernel,
        out_shape=jax.ShapeDtypeStruct((Bp, c3), _F32),
        grid=(1,),
        in_specs=[
            pl.BlockSpec((Bp, cin), z),
            pl.BlockSpec((cin, c1), z), pl.BlockSpec((1, c1), z), pl.BlockSpec((1, c1), z),
            pl.BlockSpec((c1, c2), z), pl.BlockSpec((1, c2), z), pl.BlockSpec((1, c2), z),
            pl.BlockSpec((c2, c3), z), pl.BlockSpec((1, c3), z),
        ],
        out_specs=pl.BlockSpec((Bp, c3), z),
        compiler_params=pltpu.CompilerParams(
            dimension_semantics=("arbitrary",),
            vmem_limit_bytes=_VMEM_LIMIT),
    )(x, w1, s1, b1, w2, s2, b2, w3, b3)


# ---------------------------------------------------------------------------
# Kernel 4: segmentation head, fully fused (incl. pointfeat recompute, the
# 1088-channel split matmul, conv4 and log_softmax)
# ---------------------------------------------------------------------------
def _head_kernel(x_ref, w1f_ref, s1f_ref, b1f_ref,
                 gcon_ref, wpf_ref, s1h_ref, b1h_ref,
                 w2_ref, s2_ref, b2_ref,
                 w3_ref, s3_ref, b3_ref,
                 w4_ref, b4_ref, out_ref):
    x = x_ref[0].astype(_BF16)                                          # (tn, 3)
    pf = jnp.dot(x, w1f_ref[0], preferred_element_type=_F32)            # recompute
    pf = jnp.maximum(pf * s1f_ref[...] + b1f_ref[...], 0.0)             # (tn, 64)

    h = jnp.dot(pf.astype(_BF16), wpf_ref[...], preferred_element_type=_F32)
    h = h + gcon_ref[0]                                                 # + glob@Wglob^T
    h = jnp.maximum(h * s1h_ref[...] + b1h_ref[...], 0.0)               # (tn, 512)
    h = jnp.dot(h.astype(_BF16), w2_ref[...], preferred_element_type=_F32)
    h = jnp.maximum(h * s2_ref[...] + b2_ref[...], 0.0)                 # (tn, 256)
    h = jnp.dot(h.astype(_BF16), w3_ref[...], preferred_element_type=_F32)
    h = jnp.maximum(h * s3_ref[...] + b3_ref[...], 0.0)                 # (tn, 128)
    logits = jnp.dot(h, w4_ref[...], preferred_element_type=_F32)       # (tn, k)
    logits = logits + b4_ref[...]

    m = jnp.max(logits, axis=-1, keepdims=True)
    s = logits - m
    lse = jnp.log(jnp.sum(jnp.exp(s), axis=-1, keepdims=True))
    out_ref[0] = s - lse


def head_chain(x_pts, w1f, s1f, b1f, gcon, wpf, s1h, b1h,
               w2, s2, b2, w3, s3, b3, w4, b4, *, tn):
    B, Np, _ = x_pts.shape
    nt = Np // tn
    c0, c1 = wpf.shape               # 64, 512
    c2 = w2.shape[1]                 # 256
    c3 = w3.shape[1]                 # 128
    k = w4.shape[1]
    z = lambda b, t: (0, 0)

    return pl.pallas_call(
        _head_kernel,
        out_shape=jax.ShapeDtypeStruct((B, Np, k), _F32),
        grid=(B, nt),
        in_specs=[
            pl.BlockSpec((1, tn, 3), lambda b, t: (b, t, 0)),
            pl.BlockSpec((1, 3, c0), lambda b, t: (b, 0, 0)),
            pl.BlockSpec((1, c0), z), pl.BlockSpec((1, c0), z),
            pl.BlockSpec((1, 1, c1), lambda b, t: (b, 0, 0)),
            pl.BlockSpec((c0, c1), z),
            pl.BlockSpec((1, c1), z), pl.BlockSpec((1, c1), z),
            pl.BlockSpec((c1, c2), z),
            pl.BlockSpec((1, c2), z), pl.BlockSpec((1, c2), z),
            pl.BlockSpec((c2, c3), z),
            pl.BlockSpec((1, c3), z), pl.BlockSpec((1, c3), z),
            pl.BlockSpec((c3, k), z), pl.BlockSpec((1, k), z),
        ],
        out_specs=pl.BlockSpec((1, tn, k), lambda b, t: (b, t, 0)),
        compiler_params=pltpu.CompilerParams(
            dimension_semantics=("parallel", "parallel"),
            vmem_limit_bytes=_VMEM_LIMIT),
    )(x_pts, w1f, s1f, b1f, gcon, wpf, s1h, b1h, w2, s2, b2, w3, s3, b3, w4, b4)


# ---------------------------------------------------------------------------
# Deterministic synthetic parameters (Conv/Linear weights + folded BatchNorm)
# ---------------------------------------------------------------------------
def conv_bn_params(key, cin, cout, with_bn=True, w_dtype=_BF16):
    ks = jax.random.split(key, 6)
    w = jax.random.normal(ks[0], (cout, cin), _F32) / jnp.sqrt(cin)
    b = 0.01 * jax.random.normal(ks[1], (cout,), _F32)
    if with_bn:
        gamma = 1.0 + 0.1 * jax.random.normal(ks[2], (cout,), _F32)
        beta = 0.1 * jax.random.normal(ks[3], (cout,), _F32)
        mean = 0.1 * jax.random.normal(ks[4], (cout,), _F32)
        var = 1.0 + 0.5 * jax.random.uniform(ks[5], (cout,), _F32)
        eps = 1e-5
        scale = gamma / jnp.sqrt(var + eps)
        bias = (b - mean) * scale + beta
    else:
        scale = jnp.ones((cout,), _F32)
        bias = b
    return (w.T.astype(w_dtype),                 # W^T: (cin, cout)
            scale.reshape(1, cout).astype(_F32),
            bias.reshape(1, cout).astype(_F32))


def init_params(key, k=2):
    keys = jax.random.split(key, 13)
    stn = {
        "c1": conv_bn_params(keys[0], 3, 64),
        "c2": conv_bn_params(keys[1], 64, 128),
        "c3": conv_bn_params(keys[2], 128, 1024),
        "fc1": conv_bn_params(keys[3], 1024, 512),
        "fc2": conv_bn_params(keys[4], 512, 256),
        "fc3": conv_bn_params(keys[5], 256, 9, with_bn=False, w_dtype=_F32),
    }
    feat = {
        "c1": conv_bn_params(keys[6], 3, 64),
        "c2": conv_bn_params(keys[7], 64, 128),
        "c3": conv_bn_params(keys[8], 128, 1024),
    }
    w1h, s1h, b1h = conv_bn_params(keys[9], 1088, 512)
    head = {
        "c1_glob": w1h[:1024],                   # (1024, 512) bf16 (global half)
        "c1_pf": w1h[1024:],                     # (64, 512)   bf16 (pointfeat half)
        "c1_scale": s1h, "c1_bias": b1h,
        "c2": conv_bn_params(keys[10], 512, 256),
        "c3": conv_bn_params(keys[11], 256, 128),
        "c4": conv_bn_params(keys[12], 128, k, with_bn=False, w_dtype=_F32),
    }
    return {"stn": stn, "feat": feat, "head": head}


# ---------------------------------------------------------------------------
# Model forward (cheap per-batch glue in plain JAX; hot paths in the kernels)
# ---------------------------------------------------------------------------
def pointnet_dense_cls(x, params, k=2):
    """x: (B, 3, N) float32, matching the PyTorch NCW Conv1d layout."""
    B, _, N = x.shape
    x_pts = jnp.transpose(x, (0, 2, 1)).astype(_F32)          # (B, N, 3)

    tn, Np = _choose_point_tile(N)
    if Np != N:
        # duplicate edge points: max-pool is unchanged; padded rows of the
        # per-point output are sliced off below.
        x_pts = jnp.pad(x_pts, ((0, 0), (0, Np - N), (0, 0)), mode="edge")

    # ---- STN3d ----
    ps = params["stn"]
    w1s = ps["c1"][0][None]                                   # (1, 3, 64)
    stn_max = point_mlp_max(x_pts, w1s, ps["c1"][1], ps["c1"][2],
                            *ps["c2"], *ps["c3"], relu3=True, tn=tn)   # (B,1,1024)
    Bp = _round_up(B, 8)
    stn_in = jnp.pad(stn_max.reshape(B, 1024), ((0, Bp - B), (0, 0)))
    fc_out = stn_fc_chain(stn_in, *ps["fc1"], *ps["fc2"],
                          ps["fc3"][0], ps["fc3"][2])                  # (Bp, 9)
    trans = fc_out[:B].reshape(B, 3, 3) + jnp.eye(3, dtype=_F32)[None]

    # ---- PointNetfeat point chain (3x3 transform folded into conv1 weight) ----
    pf = params["feat"]
    w1f = jnp.einsum("bij,jc->bic", trans,
                     pf["c1"][0].astype(_F32)).astype(_BF16)           # (B, 3, 64)
    glob = point_mlp_max(x_pts, w1f, pf["c1"][1], pf["c1"][2],
                         *pf["c2"], *pf["c3"], relu3=False, tn=tn)     # (B,1,1024)

    # TODO(synk): PointNetfeat as provided returns only the pooled (B,1024)
    # global feature, which makes conv1(1088,...) unrunnable; restored the
    # canonical concat [global(1024), pointfeat(64)] -> 1088 channels/point
    # (realized here without materializing the concat).

    # ---- segmentation head ----
    ph = params["head"]
    gcon = jnp.dot(glob.reshape(B, 1024).astype(_BF16), ph["c1_glob"],
                   preferred_element_type=_F32).reshape(B, 1, 512)     # glob@Wglob^T
    logp = head_chain(x_pts, w1f, pf["c1"][1], pf["c1"][2], gcon,
                      ph["c1_pf"], ph["c1_scale"], ph["c1_bias"],
                      *ph["c2"], *ph["c3"],
                      ph["c4"][0], ph["c4"][2], tn=tn)                 # (B, Np, k)
    logp = logp[:, :N, :]
    return logp, trans, None


if __name__ == "__main__":
    key = jax.random.PRNGKey(0)
    B, N, K_CLS = 2, 128, 2
    kx, kp = jax.random.split(key)
    x = jax.random.normal(kx, (B, 3, N), jnp.float32)
    params = init_params(kp, k=K_CLS)

    fwd = jax.jit(functools.partial(pointnet_dense_cls, k=K_CLS))
    logp, trans, trans_feat = fwd(x, params)
    jax.block_until_ready((logp, trans))

    assert logp.shape == (B, N, K_CLS), logp.shape
    assert trans.shape == (B, 3, 3), trans.shape
    assert trans_feat is None
    # each row of log_softmax output should exp-sum to 1
    assert bool(jnp.allclose(jnp.exp(logp).sum(-1), 1.0, atol=1e-4))
    print("KERNEL_OK")
</pallas_src>

<mosaic_0001>
module attributes {stable_mosaic.version = 11 : i64} {
  func.func @_point_mlp_max_kernel(%arg0: i32, %arg1: i32, %arg2: memref<1x128x3xf32, #tpu.memory_space<vmem>>, %arg3: memref<1x3x64xbf16, #tpu.memory_space<vmem>>, %arg4: memref<1x64xf32, #tpu.memory_space<vmem>>, %arg5: memref<1x64xf32, #tpu.memory_space<vmem>>, %arg6: memref<64x128xbf16, #tpu.memory_space<vmem>>, %arg7: memref<1x128xf32, #tpu.memory_space<vmem>>, %arg8: memref<1x128xf32, #tpu.memory_space<vmem>>, %arg9: memref<128x1024xbf16, #tpu.memory_space<vmem>>, %arg10: memref<1x1024xf32, #tpu.memory_space<vmem>>, %arg11: memref<1x1024xf32, #tpu.memory_space<vmem>>, %arg12: memref<1x1x1024xf32, #tpu.memory_space<vmem>>) attributes {dimension_semantics = [#tpu.dimension_semantics<parallel>, #tpu.dimension_semantics<arbitrary>], iteration_bounds = array<i64: 2, 1>, scalar_prefetch = 0 : i64, scratch_operands = 0 : i64, tpu.core_type = #tpu.core_type<tc>, window_params = [{transform_indices = @transform_0, window_bounds = array<i64: 1, 128, 3>}, {pipeline_mode = #tpu.pipeline_mode<synchronous>, transform_indices = @transform_1, window_bounds = array<i64: 1, 3, 64>}, {pipeline_mode = #tpu.pipeline_mode<synchronous>, transform_indices = @transform_2, window_bounds = array<i64: 1, 64>}, {pipeline_mode = #tpu.pipeline_mode<synchronous>, transform_indices = @transform_3, window_bounds = array<i64: 1, 64>}, {pipeline_mode = #tpu.pipeline_mode<synchronous>, transform_indices = @transform_4, window_bounds = array<i64: 64, 128>}, {pipeline_mode = #tpu.pipeline_mode<synchronous>, transform_indices = @transform_5, window_bounds = array<i64: 1, 128>}, {pipeline_mode = #tpu.pipeline_mode<synchronous>, transform_indices = @transform_6, window_bounds = array<i64: 1, 128>}, {pipeline_mode = #tpu.pipeline_mode<synchronous>, transform_indices = @transform_7, window_bounds = array<i64: 128, 1024>}, {pipeline_mode = #tpu.pipeline_mode<synchronous>, transform_indices = @transform_8, window_bounds = array<i64: 1, 1024>}, {pipeline_mode = #tpu.pipeline_mode<synchronous>, transform_indices = @transform_9, window_bounds = array<i64: 1, 1024>}, {transform_indices = @transform_10, window_bounds = array<i64: 1, 1, 1024>}]} {
    %c0 = arith.constant 0 : index
    %c0_0 = arith.constant 0 : index
    %c0_1 = arith.constant 0 : index
    %0 = vector.load %arg2[%c0, %c0_0, %c0_1] : memref<1x128x3xf32, #tpu.memory_space<vmem>>, vector<1x128x3xf32>
    %1 = vector.shape_cast %0 : vector<1x128x3xf32> to vector<128x3xf32>
    %2 = arith.truncf %1 : vector<128x3xf32> to vector<128x3xbf16>
    %c0_2 = arith.constant 0 : index
    %c0_3 = arith.constant 0 : index
    %c0_4 = arith.constant 0 : index
    %3 = vector.load %arg3[%c0_2, %c0_3, %c0_4] : memref<1x3x64xbf16, #tpu.memory_space<vmem>>, vector<1x3x64xbf16>
    %4 = vector.shape_cast %3 : vector<1x3x64xbf16> to vector<3x64xbf16>
    %cst = arith.constant dense<0.000000e+00> : vector<128x64xf32>
    %5 = tpu.matmul %2, %4, %cst {dimension_numbers = #tpu.dot_dimension_numbers<[1], [0], [0], [1], [0, 0, 1, 1], [], []>} : vector<128x3xbf16>, vector<3x64xbf16>, vector<128x64xf32> -> vector<128x64xf32>
    %c0_5 = arith.constant 0 : index
    %c0_6 = arith.constant 0 : index
    %6 = vector.load %arg4[%c0_5, %c0_6] : memref<1x64xf32, #tpu.memory_space<vmem>>, vector<1x64xf32>
    %7 = vector.broadcast %6 : vector<1x64xf32> to vector<128x64xf32>
    %8 = arith.mulf %5, %7 : vector<128x64xf32>
    %c0_7 = arith.constant 0 : index
    %c0_8 = arith.constant 0 : index
    %9 = vector.load %arg5[%c0_7, %c0_8] : memref<1x64xf32, #tpu.memory_space<vmem>>, vector<1x64xf32>
    %10 = vector.broadcast %9 : vector<1x64xf32> to vector<128x64xf32>
    %11 = arith.addf %8, %10 : vector<128x64xf32>
    %cst_9 = arith.constant 0.000000e+00 : f32
    %12 = vector.broadcast %cst_9 : f32 to vector<128x64xf32>
    %13 = arith.maximumf %11, %12 : vector<128x64xf32>
    %14 = arith.truncf %13 : vector<128x64xf32> to vector<128x64xbf16>
    %c0_10 = arith.constant 0 : index
    %c0_11 = arith.constant 0 : index
    %15 = vector.load %arg6[%c0_10, %c0_11] : memref<64x128xbf16, #tpu.memory_space<vmem>>, vector<64x128xbf16>
    %cst_12 = arith.constant dense<0.000000e+00> : vector<128x128xf32>
    %16 = tpu.matmul %14, %15, %cst_12 {dimension_numbers = #tpu.dot_dimension_numbers<[1], [0], [0], [1], [0, 0, 1, 1], [], []>} : vector<128x64xbf16>, vector<64x128xbf16>, vector<128x128xf32> -> vector<128x128xf32>
    %c0_13 = arith.constant 0 : index
    %c0_14 = arith.constant 0 : index
    %17 = vector.load %arg7[%c0_13, %c0_14] : memref<1x128xf32, #tpu.memory_space<vmem>>, vector<1x128xf32>
    %18 = vector.broadcast %17 : vector<1x128xf32> to vector<128x128xf32>
    %19 = arith.mulf %16, %18 : vector<128x128xf32>
    %c0_15 = arith.constant 0 : index
    %c0_16 = arith.constant 0 : index
    %20 = vector.load %arg8[%c0_15, %c0_16] : memref<1x128xf32, #tpu.memory_space<vmem>>, vector<1x128xf32>
    %21 = vector.broadcast %20 : vector<1x128xf32> to vector<128x128xf32>
    %22 = arith.addf %19, %21 : vector<128x128xf32>
    %cst_17 = arith.constant 0.000000e+00 : f32
    %23 = vector.broadcast %cst_17 : f32 to vector<128x128xf32>
    %24 = arith.maximumf %22, %23 : vector<128x128xf32>
    %25 = arith.truncf %24 : vector<128x128xf32> to vector<128x128xbf16>
    %c0_18 = arith.constant 0 : index
    %c0_19 = arith.constant 0 : index
    %26 = vector.load %arg9[%c0_18, %c0_19] : memref<128x1024xbf16, #tpu.memory_space<vmem>>, vector<128x1024xbf16>
    %cst_20 = arith.constant dense<0.000000e+00> : vector<128x1024xf32>
    %27 = tpu.matmul %25, %26, %cst_20 {dimension_numbers = #tpu.dot_dimension_numbers<[1], [0], [0], [1], [0, 0, 1, 1], [], []>} : vector<128x128xbf16>, vector<128x1024xbf16>, vector<128x1024xf32> -> vector<128x1024xf32>
    %c0_21 = arith.constant 0 : index
    %c0_22 = arith.constant 0 : index
    %28 = vector.load %arg10[%c0_21, %c0_22] : memref<1x1024xf32, #tpu.memory_space<vmem>>, vector<1x1024xf32>
    %29 = vector.broadcast %28 : vector<1x1024xf32> to vector<128x1024xf32>
    %30 = arith.mulf %27, %29 : vector<128x1024xf32>
    %c0_23 = arith.constant 0 : index
    %c0_24 = arith.constant 0 : index
    %31 = vector.load %arg11[%c0_23, %c0_24] : memref<1x1024xf32, #tpu.memory_space<vmem>>, vector<1x1024xf32>
    %32 = vector.broadcast %31 : vector<1x1024xf32> to vector<128x1024xf32>
    %33 = arith.addf %30, %32 : vector<128x1024xf32>
    %cst_25 = arith.constant 0.000000e+00 : f32
    %34 = vector.broadcast %cst_25 : f32 to vector<128x1024xf32>
    %35 = arith.maximumf %33, %34 : vector<128x1024xf32>
    %cst_26 = arith.constant dense<0xFF800000> : vector<1024xf32>
    %36 = vector.multi_reduction <maximumf>, %35, %cst_26 [0] : vector<128x1024xf32> to vector<1024xf32>
    %37 = vector.shape_cast %36 : vector<1024xf32> to vector<1x1024xf32>
    %38 = vector.shape_cast %37 : vector<1x1024xf32> to vector<1x1x1024xf32>
    %c0_i32 = arith.constant 0 : i32
    %39 = arith.cmpi eq, %arg1, %c0_i32 : i32
    %40 = arith.extui %39 : i1 to i32
    %c0_i32_27 = arith.constant 0 : i32
    %41 = arith.cmpi ne, %40, %c0_i32_27 : i32
    scf.if %41 {
      %c0_30 = arith.constant 0 : index
      %c0_31 = arith.constant 0 : index
      %c0_32 = arith.constant 0 : index
      %45 = vector.load %arg12[%c0_30, %c0_31, %c0_32] : memref<1x1x1024xf32, #tpu.memory_space<vmem>>, vector<1x1x1024xf32>
      tpu.vector_store %arg12[%c0_30, %c0_31, %c0_32], %38 {strides = array<i32>} : memref<1x1x1024xf32, #tpu.memory_space<vmem>>, vector<1x1x1024xf32>,
    } else {
    }
    %c0_i32_28 = arith.constant 0 : i32
    %42 = arith.cmpi sgt, %arg1, %c0_i32_28 : i32
    %43 = arith.extui %42 : i1 to i32
    %c0_i32_29 = arith.constant 0 : i32
    %44 = arith.cmpi ne, %43, %c0_i32_29 : i32
    scf.if %44 {
      %c0_30 = arith.constant 0 : index
      %c0_31 = arith.constant 0 : index
      %c0_32 = arith.constant 0 : index
      %45 = vector.load %arg12[%c0_30, %c0_31, %c0_32] : memref<1x1x1024xf32, #tpu.memory_space<vmem>>, vector<1x1x1024xf32>
      %46 = arith.maximumf %45, %38 : vector<1x1x1024xf32>
      %c0_33 = arith.constant 0 : index
      %c0_34 = arith.constant 0 : index
      %c0_35 = arith.constant 0 : index
      %47 = vector.load %arg12[%c0_33, %c0_34, %c0_35] : memref<1x1x1024xf32, #tpu.memory_space<vmem>>, vector<1x1x1024xf32>
      tpu.vector_store %arg12[%c0_33, %c0_34, %c0_35], %46 {strides = array<i32>} : memref<1x1x1024xf32, #tpu.memory_space<vmem>>, vector<1x1x1024xf32>,
    } else {
    }
    return
  }
  func.func @transform_0(%arg0: i32, %arg1: i32) -> (i32, i32, i32) {
    %c0_i32 = arith.constant 0 : i32
    %c0_i32_0 = arith.constant 0 : i32
    return %arg0, %arg1, %c0_i32 : i32, i32, i32
  }
  func.func @transform_1(%arg0: i32, %arg1: i32) -> (i32, i32, i32) {
    %c0_i32 = arith.constant 0 : i32
    %c0_i32_0 = arith.constant 0 : i32
    %c0_i32_1 = arith.constant 0 : i32
    %c0_i32_2 = arith.constant 0 : i32
    return %c0_i32, %c0_i32_0, %c0_i32_1 : i32, i32, i32
  }
  func.func @transform_2(%arg0: i32, %arg1: i32) -> (i32, i32) {
    %c0_i32 = arith.constant 0 : i32
    %c0_i32_0 = arith.constant 0 : i32
    %c0_i32_1 = arith.constant 0 : i32
    return %c0_i32, %c0_i32_0 : i32, i32
  }
  func.func @transform_3(%arg0: i32, %arg1: i32) -> (i32, i32) {
    %c0_i32 = arith.constant 0 : i32
    %c0_i32_0 = arith.constant 0 : i32
    %c0_i32_1 = arith.constant 0 : i32
    return %c0_i32, %c0_i32_0 : i32, i32
  }
  func.func @transform_4(%arg0: i32, %arg1: i32) -> (i32, i32) {
    %c0_i32 = arith.constant 0 : i32
    %c0_i32_0 = arith.constant 0 : i32
    %c0_i32_1 = arith.constant 0 : i32
    return %c0_i32, %c0_i32_0 : i32, i32
  }
  func.func @transform_5(%arg0: i32, %arg1: i32) -> (i32, i32) {
    %c0_i32 = arith.constant 0 : i32
    %c0_i32_0 = arith.constant 0 : i32
    %c0_i32_1 = arith.constant 0 : i32
    return %c0_i32, %c0_i32_0 : i32, i32
  }
  func.func @transform_6(%arg0: i32, %arg1: i32) -> (i32, i32) {
    %c0_i32 = arith.constant 0 : i32
    %c0_i32_0 = arith.constant 0 : i32
    %c0_i32_1 = arith.constant 0 : i32
    return %c0_i32, %c0_i32_0 : i32, i32
  }
  func.func @transform_7(%arg0: i32, %arg1: i32) -> (i32, i32) {
    %c0_i32 = arith.constant 0 : i32
    %c0_i32_0 = arith.constant 0 : i32
    %c0_i32_1 = arith.constant 0 : i32
    return %c0_i32, %c0_i32_0 : i32, i32
  }
  func.func @transform_8(%arg0: i32, %arg1: i32) -> (i32, i32) {
    %c0_i32 = arith.constant 0 : i32
    %c0_i32_0 = arith.constant 0 : i32
    %c0_i32_1 = arith.constant 0 : i32
    return %c0_i32, %c0_i32_0 : i32, i32
  }
  func.func @transform_9(%arg0: i32, %arg1: i32) -> (i32, i32) {
    %c0_i32 = arith.constant 0 : i32
    %c0_i32_0 = arith.constant 0 : i32
    %c0_i32_1 = arith.constant 0 : i32
    return %c0_i32, %c0_i32_0 : i32, i32
  }
  func.func @transform_10(%arg0: i32, %arg1: i32) -> (i32, i32, i32) {
    %c0_i32 = arith.constant 0 : i32
    %c0_i32_0 = arith.constant 0 : i32
    %c0_i32_1 = arith.constant 0 : i32
    return %arg0, %c0_i32, %c0_i32_0 : i32, i32, i32
  }
}

module attributes {stable_mosaic.version = 11 : i64} {
  func.func @_stn_fc_kernel(%arg0: i32, %arg1: memref<8x1024xf32, #tpu.memory_space<vmem>>, %arg2: memref<1024x512xbf16, #tpu.memory_space<vmem>>, %arg3: memref<1x512xf32, #tpu.memory_space<vmem>>, %arg4: memref<1x512xf32, #tpu.memory_space<vmem>>, %arg5: memref<512x256xbf16, #tpu.memory_space<vmem>>, %arg6: memref<1x256xf32, #tpu.memory_space<vmem>>, %arg7: memref<1x256xf32, #tpu.memory_space<vmem>>, %arg8: memref<256x9xf32, #tpu.memory_space<vmem>>, %arg9: memref<1x9xf32, #tpu.memory_space<vmem>>, %arg10: memref<8x9xf32, #tpu.memory_space<vmem>>) attributes {dimension_semantics = [#tpu.dimension_semantics<arbitrary>], iteration_bounds = array<i64: 1>, scalar_prefetch = 0 : i64, scratch_operands = 0 : i64, tpu.core_type = #tpu.core_type<tc>, window_params = [{pipeline_mode = #tpu.pipeline_mode<synchronous>, transform_indices = @transform_0, window_bounds = array<i64: 8, 1024>}, {pipeline_mode = #tpu.pipeline_mode<synchronous>, transform_indices = @transform_1, window_bounds = array<i64: 1024, 512>}, {pipeline_mode = #tpu.pipeline_mode<synchronous>, transform_indices = @transform_2, window_bounds = array<i64: 1, 512>}, {pipeline_mode = #tpu.pipeline_mode<synchronous>, transform_indices = @transform_3, window_bounds = array<i64: 1, 512>}, {pipeline_mode = #tpu.pipeline_mode<synchronous>, transform_indices = @transform_4, window_bounds = array<i64: 512, 256>}, {pipeline_mode = #tpu.pipeline_mode<synchronous>, transform_indices = @transform_5, window_bounds = array<i64: 1, 256>}, {pipeline_mode = #tpu.pipeline_mode<synchronous>, transform_indices = @transform_6, window_bounds = array<i64: 1, 256>}, {pipeline_mode = #tpu.pipeline_mode<synchronous>, transform_indices = @transform_7, window_bounds = array<i64: 256, 9>}, {pipeline_mode = #tpu.pipeline_mode<synchronous>, transform_indices = @transform_8, window_bounds = array<i64: 1, 9>}, {pipeline_mode = #tpu.pipeline_mode<synchronous>, transform_indices = @transform_9, window_bounds = array<i64: 8, 9>}]} {
    %c0 = arith.constant 0 : index
    %c0_0 = arith.constant 0 : index
    %0 = vector.load %arg1[%c0, %c0_0] : memref<8x1024xf32, #tpu.memory_space<vmem>>, vector<8x1024xf32>
    %1 = arith.truncf %0 : vector<8x1024xf32> to vector<8x1024xbf16>
    %c0_1 = arith.constant 0 : index
    %c0_2 = arith.constant 0 : index
    %2 = vector.load %arg2[%c0_1, %c0_2] : memref<1024x512xbf16, #tpu.memory_space<vmem>>, vector<1024x512xbf16>
    %cst = arith.constant dense<0.000000e+00> : vector<8x512xf32>
    %3 = tpu.matmul %1, %2, %cst {dimension_numbers = #tpu.dot_dimension_numbers<[1], [0], [0], [1], [0, 0, 1, 1], [], []>} : vector<8x1024xbf16>, vector<1024x512xbf16>, vector<8x512xf32> -> vector<8x512xf32>
    %c0_3 = arith.constant 0 : index
    %c0_4 = arith.constant 0 : index
    %4 = vector.load %arg3[%c0_3, %c0_4] : memref<1x512xf32, #tpu.memory_space<vmem>>, vector<1x512xf32>
    %5 = vector.broadcast %4 : vector<1x512xf32> to vector<8x512xf32>
    %6 = arith.mulf %3, %5 : vector<8x512xf32>
    %c0_5 = arith.constant 0 : index
    %c0_6 = arith.constant 0 : index
    %7 = vector.load %arg4[%c0_5, %c0_6] : memref<1x512xf32, #tpu.memory_space<vmem>>, vector<1x512xf32>
    %8 = vector.broadcast %7 : vector<1x512xf32> to vector<8x512xf32>
    %9 = arith.addf %6, %8 : vector<8x512xf32>
    %cst_7 = arith.constant 0.000000e+00 : f32
    %10 = vector.broadcast %cst_7 : f32 to vector<8x512xf32>
    %11 = arith.maximumf %9, %10 : vector<8x512xf32>
    %12 = arith.truncf %11 : vector<8x512xf32> to vector<8x512xbf16>
    %c0_8 = arith.constant 0 : index
    %c0_9 = arith.constant 0 : index
    %13 = vector.load %arg5[%c0_8, %c0_9] : memref<512x256xbf16, #tpu.memory_space<vmem>>, vector<512x256xbf16>
    %cst_10 = arith.constant dense<0.000000e+00> : vector<8x256xf32>
    %14 = tpu.matmul %12, %13, %cst_10 {dimension_numbers = #tpu.dot_dimension_numbers<[1], [0], [0], [1], [0, 0, 1, 1], [], []>} : vector<8x512xbf16>, vector<512x256xbf16>, vector<8x256xf32> -> vector<8x256xf32>
    %c0_11 = arith.constant 0 : index
    %c0_12 = arith.constant 0 : index
    %15 = vector.load %arg6[%c0_11, %c0_12] : memref<1x256xf32, #tpu.memory_space<vmem>>, vector<1x256xf32>
    %16 = vector.broadcast %15 : vector<1x256xf32> to vector<8x256xf32>
    %17 = arith.mulf %14, %16 : vector<8x256xf32>
    %c0_13 = arith.constant 0 : index
    %c0_14 = arith.constant 0 : index
    %18 = vector.load %arg7[%c0_13, %c0_14] : memref<1x256xf32, #tpu.memory_space<vmem>>, vector<1x256xf32>
    %19 = vector.broadcast %18 : vector<1x256xf32> to vector<8x256xf32>
    %20 = arith.addf %17, %19 : vector<8x256xf32>
    %cst_15 = arith.constant 0.000000e+00 : f32
    %21 = vector.broadcast %cst_15 : f32 to vector<8x256xf32>
    %22 = arith.maximumf %20, %21 : vector<8x256xf32>
    %c0_16 = arith.constant 0 : index
    %c0_17 = arith.constant 0 : index
    %23 = vector.load %arg8[%c0_16, %c0_17] : memref<256x9xf32, #tpu.memory_space<vmem>>, vector<256x9xf32>
    %cst_18 = arith.constant dense<0.000000e+00> : vector<8x9xf32>
    %24 = tpu.matmul %22, %23, %cst_18 {dimension_numbers = #tpu.dot_dimension_numbers<[1], [0], [0], [1], [0, 0, 1, 1], [], []>} : vector<8x256xf32>, vector<256x9xf32>, vector<8x9xf32> -> vector<8x9xf32>
    %c0_19 = arith.constant 0 : index
    %c0_20 = arith.constant 0 : index
    %25 = vector.load %arg9[%c0_19, %c0_20] : memref<1x9xf32, #tpu.memory_space<vmem>>, vector<1x9xf32>
    %26 = vector.broadcast %25 : vector<1x9xf32> to vector<8x9xf32>
    %27 = arith.addf %24, %26 : vector<8x9xf32>
    %c0_21 = arith.constant 0 : index
    %c0_22 = arith.constant 0 : index
    %28 = vector.load %arg10[%c0_21, %c0_22] : memref<8x9xf32, #tpu.memory_space<vmem>>, vector<8x9xf32>
    tpu.vector_store %arg10[%c0_21, %c0_22], %27 {strides = array<i32>} : memref<8x9xf32, #tpu.memory_space<vmem>>, vector<8x9xf32>,
    return
  }
  func.func @transform_0(%arg0: i32) -> (i32, i32) {
    %c0_i32 = arith.constant 0 : i32
    %c0_i32_0 = arith.constant 0 : i32
    %c0_i32_1 = arith.constant 0 : i32
    return %c0_i32, %c0_i32_0 : i32, i32
  }
  func.func @transform_1(%arg0: i32) -> (i32, i32) {
    %c0_i32 = arith.constant 0 : i32
    %c0_i32_0 = arith.constant 0 : i32
    %c0_i32_1 = arith.constant 0 : i32
    return %c0_i32, %c0_i32_0 : i32, i32
  }
  func.func @transform_2(%arg0: i32) -> (i32, i32) {
    %c0_i32 = arith.constant 0 : i32
    %c0_i32_0 = arith.constant 0 : i32
    %c0_i32_1 = arith.constant 0 : i32
    return %c0_i32, %c0_i32_0 : i32, i32
  }
  func.func @transform_3(%arg0: i32) -> (i32, i32) {
    %c0_i32 = arith.constant 0 : i32
    %c0_i32_0 = arith.constant 0 : i32
    %c0_i32_1 = arith.constant 0 : i32
    return %c0_i32, %c0_i32_0 : i32, i32
  }
  func.func @transform_4(%arg0: i32) -> (i32, i32) {
    %c0_i32 = arith.constant 0 : i32
    %c0_i32_0 = arith.constant 0 : i32
    %c0_i32_1 = arith.constant 0 : i32
    return %c0_i32, %c0_i32_0 : i32, i32
  }
  func.func @transform_5(%arg0: i32) -> (i32, i32) {
    %c0_i32 = arith.constant 0 : i32
    %c0_i32_0 = arith.constant 0 : i32
    %c0_i32_1 = arith.constant 0 : i32
    return %c0_i32, %c0_i32_0 : i32, i32
  }
  func.func @transform_6(%arg0: i32) -> (i32, i32) {
    %c0_i32 = arith.constant 0 : i32
    %c0_i32_0 = arith.constant 0 : i32
    %c0_i32_1 = arith.constant 0 : i32
    return %c0_i32, %c0_i32_0 : i32, i32
  }
  func.func @transform_7(%arg0: i32) -> (i32, i32) {
    %c0_i32 = arith.constant 0 : i32
    %c0_i32_0 = arith.constant 0 : i32
    %c0_i32_1 = arith.constant 0 : i32
    return %c0_i32, %c0_i32_0 : i32, i32
  }
  func.func @transform_8(%arg0: i32) -> (i32, i32) {
    %c0_i32 = arith.constant 0 : i32
    %c0_i32_0 = arith.constant 0 : i32
    %c0_i32_1 = arith.constant 0 : i32
    return %c0_i32, %c0_i32_0 : i32, i32
  }
  func.func @transform_9(%arg0: i32) -> (i32, i32) {
    %c0_i32 = arith.constant 0 : i32
    %c0_i32_0 = arith.constant 0 : i32
    %c0_i32_1 = arith.constant 0 : i32
    return %c0_i32, %c0_i32_0 : i32, i32
  }
}

module attributes {stable_mosaic.version = 11 : i64} {
  func.func @_point_mlp_max_kernel(%arg0: i32, %arg1: i32, %arg2: memref<1x128x3xf32, #tpu.memory_space<vmem>>, %arg3: memref<1x3x64xbf16, #tpu.memory_space<vmem>>, %arg4: memref<1x64xf32, #tpu.memory_space<vmem>>, %arg5: memref<1x64xf32, #tpu.memory_space<vmem>>, %arg6: memref<64x128xbf16, #tpu.memory_space<vmem>>, %arg7: memref<1x128xf32, #tpu.memory_space<vmem>>, %arg8: memref<1x128xf32, #tpu.memory_space<vmem>>, %arg9: memref<128x1024xbf16, #tpu.memory_space<vmem>>, %arg10: memref<1x1024xf32, #tpu.memory_space<vmem>>, %arg11: memref<1x1024xf32, #tpu.memory_space<vmem>>, %arg12: memref<1x1x1024xf32, #tpu.memory_space<vmem>>) attributes {dimension_semantics = [#tpu.dimension_semantics<parallel>, #tpu.dimension_semantics<arbitrary>], iteration_bounds = array<i64: 2, 1>, scalar_prefetch = 0 : i64, scratch_operands = 0 : i64, tpu.core_type = #tpu.core_type<tc>, window_params = [{transform_indices = @transform_0, window_bounds = array<i64: 1, 128, 3>}, {transform_indices = @transform_1, window_bounds = array<i64: 1, 3, 64>}, {pipeline_mode = #tpu.pipeline_mode<synchronous>, transform_indices = @transform_2, window_bounds = array<i64: 1, 64>}, {pipeline_mode = #tpu.pipeline_mode<synchronous>, transform_indices = @transform_3, window_bounds = array<i64: 1, 64>}, {pipeline_mode = #tpu.pipeline_mode<synchronous>, transform_indices = @transform_4, window_bounds = array<i64: 64, 128>}, {pipeline_mode = #tpu.pipeline_mode<synchronous>, transform_indices = @transform_5, window_bounds = array<i64: 1, 128>}, {pipeline_mode = #tpu.pipeline_mode<synchronous>, transform_indices = @transform_6, window_bounds = array<i64: 1, 128>}, {pipeline_mode = #tpu.pipeline_mode<synchronous>, transform_indices = @transform_7, window_bounds = array<i64: 128, 1024>}, {pipeline_mode = #tpu.pipeline_mode<synchronous>, transform_indices = @transform_8, window_bounds = array<i64: 1, 1024>}, {pipeline_mode = #tpu.pipeline_mode<synchronous>, transform_indices = @transform_9, window_bounds = array<i64: 1, 1024>}, {transform_indices = @transform_10, window_bounds = array<i64: 1, 1, 1024>}]} {
    %c0 = arith.constant 0 : index
    %c0_0 = arith.constant 0 : index
    %c0_1 = arith.constant 0 : index
    %0 = vector.load %arg2[%c0, %c0_0, %c0_1] : memref<1x128x3xf32, #tpu.memory_space<vmem>>, vector<1x128x3xf32>
    %1 = vector.shape_cast %0 : vector<1x128x3xf32> to vector<128x3xf32>
    %2 = arith.truncf %1 : vector<128x3xf32> to vector<128x3xbf16>
    %c0_2 = arith.constant 0 : index
    %c0_3 = arith.constant 0 : index
    %c0_4 = arith.constant 0 : index
    %3 = vector.load %arg3[%c0_2, %c0_3, %c0_4] : memref<1x3x64xbf16, #tpu.memory_space<vmem>>, vector<1x3x64xbf16>
    %4 = vector.shape_cast %3 : vector<1x3x64xbf16> to vector<3x64xbf16>
    %cst = arith.constant dense<0.000000e+00> : vector<128x64xf32>
    %5 = tpu.matmul %2, %4, %cst {dimension_numbers = #tpu.dot_dimension_numbers<[1], [0], [0], [1], [0, 0, 1, 1], [], []>} : vector<128x3xbf16>, vector<3x64xbf16>, vector<128x64xf32> -> vector<128x64xf32>
    %c0_5 = arith.constant 0 : index
    %c0_6 = arith.constant 0 : index
    %6 = vector.load %arg4[%c0_5, %c0_6] : memref<1x64xf32, #tpu.memory_space<vmem>>, vector<1x64xf32>
    %7 = vector.broadcast %6 : vector<1x64xf32> to vector<128x64xf32>
    %8 = arith.mulf %5, %7 : vector<128x64xf32>
    %c0_7 = arith.constant 0 : index
    %c0_8 = arith.constant 0 : index
    %9 = vector.load %arg5[%c0_7, %c0_8] : memref<1x64xf32, #tpu.memory_space<vmem>>, vector<1x64xf32>
    %10 = vector.broadcast %9 : vector<1x64xf32> to vector<128x64xf32>
    %11 = arith.addf %8, %10 : vector<128x64xf32>
    %cst_9 = arith.constant 0.000000e+00 : f32
    %12 = vector.broadcast %cst_9 : f32 to vector<128x64xf32>
    %13 = arith.maximumf %11, %12 : vector<128x64xf32>
    %14 = arith.truncf %13 : vector<128x64xf32> to vector<128x64xbf16>
    %c0_10 = arith.constant 0 : index
    %c0_11 = arith.constant 0 : index
    %15 = vector.load %arg6[%c0_10, %c0_11] : memref<64x128xbf16, #tpu.memory_space<vmem>>, vector<64x128xbf16>
    %cst_12 = arith.constant dense<0.000000e+00> : vector<128x128xf32>
    %16 = tpu.matmul %14, %15, %cst_12 {dimension_numbers = #tpu.dot_dimension_numbers<[1], [0], [0], [1], [0, 0, 1, 1], [], []>} : vector<128x64xbf16>, vector<64x128xbf16>, vector<128x128xf32> -> vector<128x128xf32>
    %c0_13 = arith.constant 0 : index
    %c0_14 = arith.constant 0 : index
    %17 = vector.load %arg7[%c0_13, %c0_14] : memref<1x128xf32, #tpu.memory_space<vmem>>, vector<1x128xf32>
    %18 = vector.broadcast %17 : vector<1x128xf32> to vector<128x128xf32>
    %19 = arith.mulf %16, %18 : vector<128x128xf32>
    %c0_15 = arith.constant 0 : index
    %c0_16 = arith.constant 0 : index
    %20 = vector.load %arg8[%c0_15, %c0_16] : memref<1x128xf32, #tpu.memory_space<vmem>>, vector<1x128xf32>
    %21 = vector.broadcast %20 : vector<1x128xf32> to vector<128x128xf32>
    %22 = arith.addf %19, %21 : vector<128x128xf32>
    %cst_17 = arith.constant 0.000000e+00 : f32
    %23 = vector.broadcast %cst_17 : f32 to vector<128x128xf32>
    %24 = arith.maximumf %22, %23 : vector<128x128xf32>
    %25 = arith.truncf %24 : vector<128x128xf32> to vector<128x128xbf16>
    %c0_18 = arith.constant 0 : index
    %c0_19 = arith.constant 0 : index
    %26 = vector.load %arg9[%c0_18, %c0_19] : memref<128x1024xbf16, #tpu.memory_space<vmem>>, vector<128x1024xbf16>
    %cst_20 = arith.constant dense<0.000000e+00> : vector<128x1024xf32>
    %27 = tpu.matmul %25, %26, %cst_20 {dimension_numbers = #tpu.dot_dimension_numbers<[1], [0], [0], [1], [0, 0, 1, 1], [], []>} : vector<128x128xbf16>, vector<128x1024xbf16>, vector<128x1024xf32> -> vector<128x1024xf32>
    %c0_21 = arith.constant 0 : index
    %c0_22 = arith.constant 0 : index
    %28 = vector.load %arg10[%c0_21, %c0_22] : memref<1x1024xf32, #tpu.memory_space<vmem>>, vector<1x1024xf32>
    %29 = vector.broadcast %28 : vector<1x1024xf32> to vector<128x1024xf32>
    %30 = arith.mulf %27, %29 : vector<128x1024xf32>
    %c0_23 = arith.constant 0 : index
    %c0_24 = arith.constant 0 : index
    %31 = vector.load %arg11[%c0_23, %c0_24] : memref<1x1024xf32, #tpu.memory_space<vmem>>, vector<1x1024xf32>
    %32 = vector.broadcast %31 : vector<1x1024xf32> to vector<128x1024xf32>
    %33 = arith.addf %30, %32 : vector<128x1024xf32>
    %cst_25 = arith.constant dense<0xFF800000> : vector<1024xf32>
    %34 = vector.multi_reduction <maximumf>, %33, %cst_25 [0] : vector<128x1024xf32> to vector<1024xf32>
    %35 = vector.shape_cast %34 : vector<1024xf32> to vector<1x1024xf32>
    %36 = vector.shape_cast %35 : vector<1x1024xf32> to vector<1x1x1024xf32>
    %c0_i32 = arith.constant 0 : i32
    %37 = arith.cmpi eq, %arg1, %c0_i32 : i32
    %38 = arith.extui %37 : i1 to i32
    %c0_i32_26 = arith.constant 0 : i32
    %39 = arith.cmpi ne, %38, %c0_i32_26 : i32
    scf.if %39 {
      %c0_29 = arith.constant 0 : index
      %c0_30 = arith.constant 0 : index
      %c0_31 = arith.constant 0 : index
      %43 = vector.load %arg12[%c0_29, %c0_30, %c0_31] : memref<1x1x1024xf32, #tpu.memory_space<vmem>>, vector<1x1x1024xf32>
      tpu.vector_store %arg12[%c0_29, %c0_30, %c0_31], %36 {strides = array<i32>} : memref<1x1x1024xf32, #tpu.memory_space<vmem>>, vector<1x1x1024xf32>,
    } else {
    }
    %c0_i32_27 = arith.constant 0 : i32
    %40 = arith.cmpi sgt, %arg1, %c0_i32_27 : i32
    %41 = arith.extui %40 : i1 to i32
    %c0_i32_28 = arith.constant 0 : i32
    %42 = arith.cmpi ne, %41, %c0_i32_28 : i32
    scf.if %42 {
      %c0_29 = arith.constant 0 : index
      %c0_30 = arith.constant 0 : index
      %c0_31 = arith.constant 0 : index
      %43 = vector.load %arg12[%c0_29, %c0_30, %c0_31] : memref<1x1x1024xf32, #tpu.memory_space<vmem>>, vector<1x1x1024xf32>
      %44 = arith.maximumf %43, %36 : vector<1x1x1024xf32>
      %c0_32 = arith.constant 0 : index
      %c0_33 = arith.constant 0 : index
      %c0_34 = arith.constant 0 : index
      %45 = vector.load %arg12[%c0_32, %c0_33, %c0_34] : memref<1x1x1024xf32, #tpu.memory_space<vmem>>, vector<1x1x1024xf32>
      tpu.vector_store %arg12[%c0_32, %c0_33, %c0_34], %44 {strides = array<i32>} : memref<1x1x1024xf32, #tpu.memory_space<vmem>>, vector<1x1x1024xf32>,
    } else {
    }
    return
  }
  func.func @transform_0(%arg0: i32, %arg1: i32) -> (i32, i32, i32) {
    %c0_i32 = arith.constant 0 : i32
    %c0_i32_0 = arith.constant 0 : i32
    return %arg0, %arg1, %c0_i32 : i32, i32, i32
  }
  func.func @transform_1(%arg0: i32, %arg1: i32) -> (i32, i32, i32) {
    %c0_i32 = arith.constant 0 : i32
    %c0_i32_0 = arith.constant 0 : i32
    %c0_i32_1 = arith.constant 0 : i32
    return %arg0, %c0_i32, %c0_i32_0 : i32, i32, i32
  }
  func.func @transform_2(%arg0: i32, %arg1: i32) -> (i32, i32) {
    %c0_i32 = arith.constant 0 : i32
    %c0_i32_0 = arith.constant 0 : i32
    %c0_i32_1 = arith.constant 0 : i32
    return %c0_i32, %c0_i32_0 : i32, i32
  }
  func.func @transform_3(%arg0: i32, %arg1: i32) -> (i32, i32) {
    %c0_i32 = arith.constant 0 : i32
    %c0_i32_0 = arith.constant 0 : i32
    %c0_i32_1 = arith.constant 0 : i32
    return %c0_i32, %c0_i32_0 : i32, i32
  }
  func.func @transform_4(%arg0: i32, %arg1: i32) -> (i32, i32) {
    %c0_i32 = arith.constant 0 : i32
    %c0_i32_0 = arith.constant 0 : i32
    %c0_i32_1 = arith.constant 0 : i32
    return %c0_i32, %c0_i32_0 : i32, i32
  }
  func.func @transform_5(%arg0: i32, %arg1: i32) -> (i32, i32) {
    %c0_i32 = arith.constant 0 : i32
    %c0_i32_0 = arith.constant 0 : i32
    %c0_i32_1 = arith.constant 0 : i32
    return %c0_i32, %c0_i32_0 : i32, i32
  }
  func.func @transform_6(%arg0: i32, %arg1: i32) -> (i32, i32) {
    %c0_i32 = arith.constant 0 : i32
    %c0_i32_0 = arith.constant 0 : i32
    %c0_i32_1 = arith.constant 0 : i32
    return %c0_i32, %c0_i32_0 : i32, i32
  }
  func.func @transform_7(%arg0: i32, %arg1: i32) -> (i32, i32) {
    %c0_i32 = arith.constant 0 : i32
    %c0_i32_0 = arith.constant 0 : i32
    %c0_i32_1 = arith.constant 0 : i32
    return %c0_i32, %c0_i32_0 : i32, i32
  }
  func.func @transform_8(%arg0: i32, %arg1: i32) -> (i32, i32) {
    %c0_i32 = arith.constant 0 : i32
    %c0_i32_0 = arith.constant 0 : i32
    %c0_i32_1 = arith.constant 0 : i32
    return %c0_i32, %c0_i32_0 : i32, i32
  }
  func.func @transform_9(%arg0: i32, %arg1: i32) -> (i32, i32) {
    %c0_i32 = arith.constant 0 : i32
    %c0_i32_0 = arith.constant 0 : i32
    %c0_i32_1 = arith.constant 0 : i32
    return %c0_i32, %c0_i32_0 : i32, i32
  }
  func.func @transform_10(%arg0: i32, %arg1: i32) -> (i32, i32, i32) {
    %c0_i32 = arith.constant 0 : i32
    %c0_i32_0 = arith.constant 0 : i32
    %c0_i32_1 = arith.constant 0 : i32
    return %arg0, %c0_i32, %c0_i32_0 : i32, i32, i32
  }
}

module attributes {stable_mosaic.version = 11 : i64} {
  func.func @_head_kernel(%arg0: i32, %arg1: i32, %arg2: memref<1x128x3xf32, #tpu.memory_space<vmem>>, %arg3: memref<1x3x64xbf16, #tpu.memory_space<vmem>>, %arg4: memref<1x64xf32, #tpu.memory_space<vmem>>, %arg5: memref<1x64xf32, #tpu.memory_space<vmem>>, %arg6: memref<1x1x512xf32, #tpu.memory_space<vmem>>, %arg7: memref<64x512xbf16, #tpu.memory_space<vmem>>, %arg8: memref<1x512xf32, #tpu.memory_space<vmem>>, %arg9: memref<1x512xf32, #tpu.memory_space<vmem>>, %arg10: memref<512x256xbf16, #tpu.memory_space<vmem>>, %arg11: memref<1x256xf32, #tpu.memory_space<vmem>>, %arg12: memref<1x256xf32, #tpu.memory_space<vmem>>, %arg13: memref<256x128xbf16, #tpu.memory_space<vmem>>, %arg14: memref<1x128xf32, #tpu.memory_space<vmem>>, %arg15: memref<1x128xf32, #tpu.memory_space<vmem>>, %arg16: memref<128x2xf32, #tpu.memory_space<vmem>>, %arg17: memref<1x2xf32, #tpu.memory_space<vmem>>, %arg18: memref<1x128x2xf32, #tpu.memory_space<vmem>>) attributes {dimension_semantics = [#tpu.dimension_semantics<parallel>, #tpu.dimension_semantics<parallel>], iteration_bounds = array<i64: 2, 1>, scalar_prefetch = 0 : i64, scratch_operands = 0 : i64, tpu.core_type = #tpu.core_type<tc>, window_params = [{transform_indices = @transform_0, window_bounds = array<i64: 1, 128, 3>}, {transform_indices = @transform_1, window_bounds = array<i64: 1, 3, 64>}, {pipeline_mode = #tpu.pipeline_mode<synchronous>, transform_indices = @transform_2, window_bounds = array<i64: 1, 64>}, {pipeline_mode = #tpu.pipeline_mode<synchronous>, transform_indices = @transform_3, window_bounds = array<i64: 1, 64>}, {transform_indices = @transform_4, window_bounds = array<i64: 1, 1, 512>}, {pipeline_mode = #tpu.pipeline_mode<synchronous>, transform_indices = @transform_5, window_bounds = array<i64: 64, 512>}, {pipeline_mode = #tpu.pipeline_mode<synchronous>, transform_indices = @transform_6, window_bounds = array<i64: 1, 512>}, {pipeline_mode = #tpu.pipeline_mode<synchronous>, transform_indices = @transform_7, window_bounds = array<i64: 1, 512>}, {pipeline_mode = #tpu.pipeline_mode<synchronous>, transform_indices = @transform_8, window_bounds = array<i64: 512, 256>}, {pipeline_mode = #tpu.pipeline_mode<synchronous>, transform_indices = @transform_9, window_bounds = array<i64: 1, 256>}, {pipeline_mode = #tpu.pipeline_mode<synchronous>, transform_indices = @transform_10, window_bounds = array<i64: 1, 256>}, {pipeline_mode = #tpu.pipeline_mode<synchronous>, transform_indices = @transform_11, window_bounds = array<i64: 256, 128>}, {pipeline_mode = #tpu.pipeline_mode<synchronous>, transform_indices = @transform_12, window_bounds = array<i64: 1, 128>}, {pipeline_mode = #tpu.pipeline_mode<synchronous>, transform_indices = @transform_13, window_bounds = array<i64: 1, 128>}, {pipeline_mode = #tpu.pipeline_mode<synchronous>, transform_indices = @transform_14, window_bounds = array<i64: 128, 2>}, {pipeline_mode = #tpu.pipeline_mode<synchronous>, transform_indices = @transform_15, window_bounds = array<i64: 1, 2>}, {transform_indices = @transform_16, window_bounds = array<i64: 1, 128, 2>}]} {
    %c0 = arith.constant 0 : index
    %c0_0 = arith.constant 0 : index
    %c0_1 = arith.constant 0 : index
    %0 = vector.load %arg2[%c0, %c0_0, %c0_1] : memref<1x128x3xf32, #tpu.memory_space<vmem>>, vector<1x128x3xf32>
    %1 = vector.shape_cast %0 : vector<1x128x3xf32> to vector<128x3xf32>
    %2 = arith.truncf %1 : vector<128x3xf32> to vector<128x3xbf16>
    %c0_2 = arith.constant 0 : index
    %c0_3 = arith.constant 0 : index
    %c0_4 = arith.constant 0 : index
    %3 = vector.load %arg3[%c0_2, %c0_3, %c0_4] : memref<1x3x64xbf16, #tpu.memory_space<vmem>>, vector<1x3x64xbf16>
    %4 = vector.shape_cast %3 : vector<1x3x64xbf16> to vector<3x64xbf16>
    %cst = arith.constant dense<0.000000e+00> : vector<128x64xf32>
    %5 = tpu.matmul %2, %4, %cst {dimension_numbers = #tpu.dot_dimension_numbers<[1], [0], [0], [1], [0, 0, 1, 1], [], []>} : vector<128x3xbf16>, vector<3x64xbf16>, vector<128x64xf32> -> vector<128x64xf32>
    %c0_5 = arith.constant 0 : index
    %c0_6 = arith.constant 0 : index
    %6 = vector.load %arg4[%c0_5, %c0_6] : memref<1x64xf32, #tpu.memory_space<vmem>>, vector<1x64xf32>
    %7 = vector.broadcast %6 : vector<1x64xf32> to vector<128x64xf32>
    %8 = arith.mulf %5, %7 : vector<128x64xf32>
    %c0_7 = arith.constant 0 : index
    %c0_8 = arith.constant 0 : index
    %9 = vector.load %arg5[%c0_7, %c0_8] : memref<1x64xf32, #tpu.memory_space<vmem>>, vector<1x64xf32>
    %10 = vector.broadcast %9 : vector<1x64xf32> to vector<128x64xf32>
    %11 = arith.addf %8, %10 : vector<128x64xf32>
    %cst_9 = arith.constant 0.000000e+00 : f32
    %12 = vector.broadcast %cst_9 : f32 to vector<128x64xf32>
    %13 = arith.maximumf %11, %12 : vector<128x64xf32>
    %14 = arith.truncf %13 : vector<128x64xf32> to vector<128x64xbf16>
    %c0_10 = arith.constant 0 : index
    %c0_11 = arith.constant 0 : index
    %15 = vector.load %arg7[%c0_10, %c0_11] : memref<64x512xbf16, #tpu.memory_space<vmem>>, vector<64x512xbf16>
    %cst_12 = arith.constant dense<0.000000e+00> : vector<128x512xf32>
    %16 = tpu.matmul %14, %15, %cst_12 {dimension_numbers = #tpu.dot_dimension_numbers<[1], [0], [0], [1], [0, 0, 1, 1], [], []>} : vector<128x64xbf16>, vector<64x512xbf16>, vector<128x512xf32> -> vector<128x512xf32>
    %c0_13 = arith.constant 0 : index
    %c0_14 = arith.constant 0 : index
    %c0_15 = arith.constant 0 : index
    %17 = vector.load %arg6[%c0_13, %c0_14, %c0_15] : memref<1x1x512xf32, #tpu.memory_space<vmem>>, vector<1x1x512xf32>
    %18 = vector.shape_cast %17 : vector<1x1x512xf32> to vector<1x512xf32>
    %19 = vector.broadcast %18 : vector<1x512xf32> to vector<128x512xf32>
    %20 = arith.addf %16, %19 : vector<128x512xf32>
    %c0_16 = arith.constant 0 : index
    %c0_17 = arith.constant 0 : index
    %21 = vector.load %arg8[%c0_16, %c0_17] : memref<1x512xf32, #tpu.memory_space<vmem>>, vector<1x512xf32>
    %22 = vector.broadcast %21 : vector<1x512xf32> to vector<128x512xf32>
    %23 = arith.mulf %20, %22 : vector<128x512xf32>
    %c0_18 = arith.constant 0 : index
    %c0_19 = arith.constant 0 : index
    %24 = vector.load %arg9[%c0_18, %c0_19] : memref<1x512xf32, #tpu.memory_space<vmem>>, vector<1x512xf32>
    %25 = vector.broadcast %24 : vector<1x512xf32> to vector<128x512xf32>
    %26 = arith.addf %23, %25 : vector<128x512xf32>
    %cst_20 = arith.constant 0.000000e+00 : f32
    %27 = vector.broadcast %cst_20 : f32 to vector<128x512xf32>
    %28 = arith.maximumf %26, %27 : vector<128x512xf32>
    %29 = arith.truncf %28 : vector<128x512xf32> to vector<128x512xbf16>
    %c0_21 = arith.constant 0 : index
    %c0_22 = arith.constant 0 : index
    %30 = vector.load %arg10[%c0_21, %c0_22] : memref<512x256xbf16, #tpu.memory_space<vmem>>, vector<512x256xbf16>
    %cst_23 = arith.constant dense<0.000000e+00> : vector<128x256xf32>
    %31 = tpu.matmul %29, %30, %cst_23 {dimension_numbers = #tpu.dot_dimension_numbers<[1], [0], [0], [1], [0, 0, 1, 1], [], []>} : vector<128x512xbf16>, vector<512x256xbf16>, vector<128x256xf32> -> vector<128x256xf32>
    %c0_24 = arith.constant 0 : index
    %c0_25 = arith.constant 0 : index
    %32 = vector.load %arg11[%c0_24, %c0_25] : memref<1x256xf32, #tpu.memory_space<vmem>>, vector<1x256xf32>
    %33 = vector.broadcast %32 : vector<1x256xf32> to vector<128x256xf32>
    %34 = arith.mulf %31, %33 : vector<128x256xf32>
    %c0_26 = arith.constant 0 : index
    %c0_27 = arith.constant 0 : index
    %35 = vector.load %arg12[%c0_26, %c0_27] : memref<1x256xf32, #tpu.memory_space<vmem>>, vector<1x256xf32>
    %36 = vector.broadcast %35 : vector<1x256xf32> to vector<128x256xf32>
    %37 = arith.addf %34, %36 : vector<128x256xf32>
    %cst_28 = arith.constant 0.000000e+00 : f32
    %38 = vector.broadcast %cst_28 : f32 to vector<128x256xf32>
    %39 = arith.maximumf %37, %38 : vector<128x256xf32>
    %40 = arith.truncf %39 : vector<128x256xf32> to vector<128x256xbf16>
    %c0_29 = arith.constant 0 : index
    %c0_30 = arith.constant 0 : index
    %41 = vector.load %arg13[%c0_29, %c0_30] : memref<256x128xbf16, #tpu.memory_space<vmem>>, vector<256x128xbf16>
    %cst_31 = arith.constant dense<0.000000e+00> : vector<128x128xf32>
    %42 = tpu.matmul %40, %41, %cst_31 {dimension_numbers = #tpu.dot_dimension_numbers<[1], [0], [0], [1], [0, 0, 1, 1], [], []>} : vector<128x256xbf16>, vector<256x128xbf16>, vector<128x128xf32> -> vector<128x128xf32>
    %c0_32 = arith.constant 0 : index
    %c0_33 = arith.constant 0 : index
    %43 = vector.load %arg14[%c0_32, %c0_33] : memref<1x128xf32, #tpu.memory_space<vmem>>, vector<1x128xf32>
    %44 = vector.broadcast %43 : vector<1x128xf32> to vector<128x128xf32>
    %45 = arith.mulf %42, %44 : vector<128x128xf32>
    %c0_34 = arith.constant 0 : index
    %c0_35 = arith.constant 0 : index
    %46 = vector.load %arg15[%c0_34, %c0_35] : memref<1x128xf32, #tpu.memory_space<vmem>>, vector<1x128xf32>
    %47 = vector.broadcast %46 : vector<1x128xf32> to vector<128x128xf32>
    %48 = arith.addf %45, %47 : vector<128x128xf32>
    %cst_36 = arith.constant 0.000000e+00 : f32
    %49 = vector.broadcast %cst_36 : f32 to vector<128x128xf32>
    %50 = arith.maximumf %48, %49 : vector<128x128xf32>
    %c0_37 = arith.constant 0 : index
    %c0_38 = arith.constant 0 : index
    %51 = vector.load %arg16[%c0_37, %c0_38] : memref<128x2xf32, #tpu.memory_space<vmem>>, vector<128x2xf32>
    %cst_39 = arith.constant dense<0.000000e+00> : vector<128x2xf32>
    %52 = tpu.matmul %50, %51, %cst_39 {dimension_numbers = #tpu.dot_dimension_numbers<[1], [0], [0], [1], [0, 0, 1, 1], [], []>} : vector<128x128xf32>, vector<128x2xf32>, vector<128x2xf32> -> vector<128x2xf32>
    %c0_40 = arith.constant 0 : index
    %c0_41 = arith.constant 0 : index
    %53 = vector.load %arg17[%c0_40, %c0_41] : memref<1x2xf32, #tpu.memory_space<vmem>>, vector<1x2xf32>
    %54 = vector.broadcast %53 : vector<1x2xf32> to vector<128x2xf32>
    %55 = arith.addf %52, %54 : vector<128x2xf32>
    %cst_42 = arith.constant dense<0xFF800000> : vector<128xf32>
    %56 = vector.multi_reduction <maximumf>, %55, %cst_42 [1] : vector<128x2xf32> to vector<128xf32>
    %57 = vector.shape_cast %56 : vector<128xf32> to vector<128x1xf32>
    %58 = vector.broadcast %57 : vector<128x1xf32> to vector<128x2xf32>
    %59 = arith.subf %55, %58 : vector<128x2xf32>
    %60 = math.exp %59 : vector<128x2xf32>
    %cst_43 = arith.constant dense<0.000000e+00> : vector<128xf32>
    %61 = vector.multi_reduction <add>, %60, %cst_43 [1] : vector<128x2xf32> to vector<128xf32>
    %62 = vector.shape_cast %61 : vector<128xf32> to vector<128x1xf32>
    %63 = math.log %62 : vector<128x1xf32>
    %64 = vector.broadcast %63 : vector<128x1xf32> to vector<128x2xf32>
    %65 = arith.subf %59, %64 : vector<128x2xf32>
    %c0_44 = arith.constant 0 : index
    %c0_45 = arith.constant 0 : index
    %c0_46 = arith.constant 0 : index
    %66 = vector.load %arg18[%c0_44, %c0_45, %c0_46] : memref<1x128x2xf32, #tpu.memory_space<vmem>>, vector<1x128x2xf32>
    %67 = vector.shape_cast %66 : vector<1x128x2xf32> to vector<128x2xf32>
    %68 = vector.shape_cast %65 : vector<128x2xf32> to vector<1x128x2xf32>
    tpu.vector_store %arg18[%c0_44, %c0_45, %c0_46], %68 {strides = array<i32>} : memref<1x128x2xf32, #tpu.memory_space<vmem>>, vector<1x128x2xf32>,
    return
  }
  func.func @transform_0(%arg0: i32, %arg1: i32) -> (i32, i32, i32) {
    %c0_i32 = arith.constant 0 : i32
    %c0_i32_0 = arith.constant 0 : i32
    return %arg0, %arg1, %c0_i32 : i32, i32, i32
  }
  func.func @transform_1(%arg0: i32, %arg1: i32) -> (i32, i32, i32) {
    %c0_i32 = arith.constant 0 : i32
    %c0_i32_0 = arith.constant 0 : i32
    %c0_i32_1 = arith.constant 0 : i32
    return %arg0, %c0_i32, %c0_i32_0 : i32, i32, i32
  }
  func.func @transform_2(%arg0: i32, %arg1: i32) -> (i32, i32) {
    %c0_i32 = arith.constant 0 : i32
    %c0_i32_0 = arith.constant 0 : i32
    %c0_i32_1 = arith.constant 0 : i32
    return %c0_i32, %c0_i32_0 : i32, i32
  }
  func.func @transform_3(%arg0: i32, %arg1: i32) -> (i32, i32) {
    %c0_i32 = arith.constant 0 : i32
    %c0_i32_0 = arith.constant 0 : i32
    %c0_i32_1 = arith.constant 0 : i32
    return %c0_i32, %c0_i32_0 : i32, i32
  }
  func.func @transform_4(%arg0: i32, %arg1: i32) -> (i32, i32, i32) {
    %c0_i32 = arith.constant 0 : i32
    %c0_i32_0 = arith.constant 0 : i32
    %c0_i32_1 = arith.constant 0 : i32
    return %arg0, %c0_i32, %c0_i32_0 : i32, i32, i32
  }
  func.func @transform_5(%arg0: i32, %arg1: i32) -> (i32, i32) {
    %c0_i32 = arith.constant 0 : i32
    %c0_i32_0 = arith.constant 0 : i32
    %c0_i32_1 = arith.constant 0 : i32
    return %c0_i32, %c0_i32_0 : i32, i32
  }
  func.func @transform_6(%arg0: i32, %arg1: i32) -> (i32, i32) {
    %c0_i32 = arith.constant 0 : i32
    %c0_i32_0 = arith.constant 0 : i32
    %c0_i32_1 = arith.constant 0 : i32
    return %c0_i32, %c0_i32_0 : i32, i32
  }
  func.func @transform_7(%arg0: i32, %arg1: i32) -> (i32, i32) {
    %c0_i32 = arith.constant 0 : i32
    %c0_i32_0 = arith.constant 0 : i32
    %c0_i32_1 = arith.constant 0 : i32
    return %c0_i32, %c0_i32_0 : i32, i32
  }
  func.func @transform_8(%arg0: i32, %arg1: i32) -> (i32, i32) {
    %c0_i32 = arith.constant 0 : i32
    %c0_i32_0 = arith.constant 0 : i32
    %c0_i32_1 = arith.constant 0 : i32
    return %c0_i32, %c0_i32_0 : i32, i32
  }
  func.func @transform_9(%arg0: i32, %arg1: i32) -> (i32, i32) {
    %c0_i32 = arith.constant 0 : i32
    %c0_i32_0 = arith.constant 0 : i32
    %c0_i32_1 = arith.constant 0 : i32
    return %c0_i32, %c0_i32_0 : i32, i32
  }
  func.func @transform_10(%arg0: i32, %arg1: i32) -> (i32, i32) {
    %c0_i32 = arith.constant 0 : i32
    %c0_i32_0 = arith.constant 0 : i32
    %c0_i32_1 = arith.constant 0 : i32
    return %c0_i32, %c0_i32_0 : i32, i32
  }
  func.func @transform_11(%arg0: i32, %arg1: i32) -> (i32, i32) {
    %c0_i32 = arith.constant 0 : i32
    %c0_i32_0 = arith.constant 0 : i32
    %c0_i32_1 = arith.constant 0 : i32
    return %c0_i32, %c0_i32_0 : i32, i32
  }
  func.func @transform_12(%arg0: i32, %arg1: i32) -> (i32, i32) {
    %c0_i32 = arith.constant 0 : i32
    %c0_i32_0 = arith.constant 0 : i32
    %c0_i32_1 = arith.constant 0 : i32
    return %c0_i32, %c0_i32_0 : i32, i32
  }
  func.func @transform_13(%arg0: i32, %arg1: i32) -> (i32, i32) {
    %c0_i32 = arith.constant 0 : i32
    %c0_i32_0 = arith.constant 0 : i32
    %c0_i32_1 = arith.constant 0 : i32
    return %c0_i32, %c0_i32_0 : i32, i32
  }
  func.func @transform_14(%arg0: i32, %arg1: i32) -> (i32, i32) {
    %c0_i32 = arith.constant 0 : i32
    %c0_i32_0 = arith.constant 0 : i32
    %c0_i32_1 = arith.constant 0 : i32
    return %c0_i32, %c0_i32_0 : i32, i32
  }
  func.func @transform_15(%arg0: i32, %arg1: i32) -> (i32, i32) {
    %c0_i32 = arith.constant 0 : i32
    %c0_i32_0 = arith.constant 0 : i32
    %c0_i32_1 = arith.constant 0 : i32
    return %c0_i32, %c0_i32_0 : i32, i32
  }
  func.func @transform_16(%arg0: i32, %arg1: i32) -> (i32, i32, i32) {
    %c0_i32 = arith.constant 0 : i32
    %c0_i32_0 = arith.constant 0 : i32
    return %arg0, %arg1, %c0_i32 : i32, i32, i32
  }
}

</mosaic_0001>

<bundles_post_ra>
// kernel: pointnet_dense_cls.6
= control target key start
LH: loop header
LB: loop body
LE: loop exit
PB: predicated region body
PF: predicated region fallthrough
CT: control target
= control target key end

     0   :  { %s2679_s13 = smov 0   ;;  %s2681_s14 = smov 0   ;;  %s3472_s0 = inlined_call_operand.vmem [shape: f32[2,128,3], index: 0, kind: input, shape index: {}]   ;;  %s3473_s1 = inlined_call_operand.vmem [shape: bf16[2,3,64], index: 1, kind: input, shape index: {}]   ;;  %s3474_s2 = inlined_call_operand.vmem [shape: f32[1,64], index: 2, kind: input, shape index: {}]   ;;  %s3475_s3 = inlined_call_operand.vmem [shape: f32[1,64], index: 3, kind: input, shape index: {}]   ;;  %s3476_s4 = inlined_call_operand.vmem [shape: bf16[64,128], index: 4, kind: input, shape index: {}]   ;;  %s3477_s5 = inlined_call_operand.vmem [shape: f32[1,128], index: 5, kind: input, shape index: {}]   ;;  %s3478_s6 = inlined_call_operand.vmem [shape: f32[1,128], index: 6, kind: input, shape index: {}]   ;;  %s3479_s7 = inlined_call_operand.vmem [shape: bf16[128,1024], index: 7, kind: input, shape index: {}]   ;;  %s3480_s8 = inlined_call_operand.vmem [shape: f32[1,1024], index: 8, kind: input, shape index: {}]   ;;  %s3481_s9 = inlined_call_operand.vmem [shape: f32[1,1024], index: 9, kind: input, shape index: {}]   ;;  %s3482_s10 = inlined_call_operand.vmem [shape: f32[2,1,1024], index: 10, kind: output, shape index: {}]  }
   0x1   :  { %s2683_s15 = smov 0  }
   0x2 LB: > { %s32_s16 = sadd.s32 1, %s2615_s14  ;;  %p2407_p0 = scmp.ge.s32.totalorder %s2619_s15, 1  ;;  %s2619_s15 = sphi %s2683_s15, %s20_s15   ;;  %s2615_s14 = sphi %s2681_s14, %s3484_s14   ;;  %s2611_s13 = sphi %s2679_s13, %s3483_s13  }
   0x3   : > { %p34_p1 = scmp.ge.s32.totalorder %s32_s16, 2  ;;  %p340_p2 = scmp.lt.s32.totalorder %s2619_s15, 3 }
   0x5   : > { %s3486_s16 = smov (%p34_p1, %s32_s16), 0  ;;  %p341_p3 = pnand %p2407_p0, %p340_p2 }
   0x6   : > { %p386_p4 = scmp.lt.s32.totalorder (!%p341_p3), %s2611_s13, 1 }
   0x7   : > { %344 = sbr.rel (%p341_p3) target bundleno = 785 (0x311), region = 60 }
   0xc   : > { %vm454_vm0 = vcmask 1040384   ;;  %vm455_vm1 = vcmask 1041408   ;;  %v2621_v0 = vmov 65535   ;;  %s3488_s13 = smov (!%p386_p4, %s2611_s13), 1  ;;  %vm429_vm2 = vcmask 23552   ;;  %v2593_v29 = vld [vmem:[%s3476_s4 + $0x18] sm:$0xff]  }
   0xd   : > { %v456_v1 = vsel %vm454_vm0, 4294967295, %v2621_v0  ;;  %s2502_s17 = sshll.u32 %s3488_s13, 7  ;;  %s2410_s18 = sshll.u32 %s3488_s13, 1  ;;  %2542 = vmatprep.subr.bf16.mxu1 %v2593_v29  ;;  %v2594_v30 = vld [vmem:[%s3476_s4 + $0x10] sm:$0xff]   ;;  %v2595_v31 = vld [vmem:[%s3476_s4 + $0x8] sm:$0xff]   ;;  %v2596_v32 = vld [vmem:[%s3476_s4] sm:$0xff]  }
   0xe   : > { %v457_v2 = vsel %vm455_vm1, %v456_v1, 0  ;;  %s2704_s21 = scalar_lea.vmem %s3472_s0, %s2502_s17  ;;  %s398_s24 = scalar_lea.vmem %s3473_s1, %s2410_s18  ;;  %2543 = vmatpush3.bf16.msra.mxu1 %v2593_v29  ;;  %v908_v33 = vld [vmem:[%s3479_s7 + $0x1c0] sm:$0xff]  ;;  %v2754_v35 = vld [vmem:[%s3479_s7 + $0x1c8] sm:$0xff]  ;;  %vm660_vm3 = vcmask 523264  }
   0xf   : > { %v428_v3 = vld [vmem:[%s398_s24] sm:$0x3]  ;;  %v405_v5 = vld [vmem:[%s2704_s21 + $0x8] sm:$0xff]  ;;  %v406_v8 = vld [vmem:[%s2704_s21 + $0x10] sm:$0xff]  ;;  %2544 = vmatprep.subr.bf16.mxu1 %v2594_v30  ;;  %s2411_s29 = sshll.u32 %s3488_s13, 3 }
  0x10   : > { %v404_v4 = vld [vmem:[%s2704_s21] sm:$0xff]  ;;  %v459_v6 = vand.u32 %v457_v2, %v428_v3  ;;  %v407_v9 = vld [vmem:[%s2704_s21 + $0x18] sm:$0xff]  ;;  %v409_v11 = vld [vmem:[%s2704_s21 + $0x28] sm:$0xff]  ;;  %s402_s12 = scalar_lea.vmem %s3482_s10, %s2411_s29 }
  0x11   : > { %v420_v7 = vpack.c.bf16 %v405_v5, %v404_v4  ;;  %v408_v10 = vld [vmem:[%s2704_s21 + $0x20] sm:$0xff]  ;;  %v421_v12 = vpack.c.bf16 %v407_v9, %v406_v8  ;;  %v410_v14 = vld [vmem:[%s2704_s21 + $0x30] sm:$0xff]  ;;  %v411_v15 = vld [vmem:[%s2704_s21 + $0x38] sm:$0xff] }
  0x12   : > { %2524 = vmatprep.subr.bf16.mxu0 %v459_v6  ;;  %v422_v13 = vpack.c.bf16 %v409_v11, %v408_v10  ;;  %v412_v16 = vld [vmem:[%s2704_s21 + $0x40] sm:$0xff]  ;;  %v413_v17 = vld [vmem:[%s2704_s21 + $0x48] sm:$0xff]  ;;  %v423_v18 = vpack.c.bf16 %v411_v15, %v410_v14  ;;  %v414_v20 = vld [vmem:[%s2704_s21 + $0x50] sm:$0xff]  ;;  %2545 = vmatpush3.bf16.msra.mxu1 %v2594_v30 }
  0x13   : > { %2526 = vmatprep.mubr.msk.bf16.mxu0 %vm429_vm2, %v420_v7  ;;  %2525 = vmatpush3.bf16.msra.mxu0 %v459_v6  ;;  %v424_v19 = vpack.c.bf16 %v413_v17, %v412_v16  ;;  %v415_v21 = vld [vmem:[%s2704_s21 + $0x58] sm:$0xff]  ;;  %v416_v22 = vld [vmem:[%s2704_s21 + $0x60] sm:$0xff]  ;;  %v417_v23 = vld [vmem:[%s2704_s21 + $0x68] sm:$0xff] }
  0x14   : > { %v425_v24 = vpack.c.bf16 %v415_v21, %v414_v20  ;;  %v426_v25 = vpack.c.bf16 %v417_v23, %v416_v22  ;;  %v418_v26 = vld [vmem:[%s2704_s21 + $0x70] sm:$0xff]  ;;  %v419_v27 = vld [vmem:[%s2704_s21 + $0x78] sm:$0xff]  ;;  %2546 = vmatprep.subr.bf16.mxu1 %v2595_v31  ;;  %v912_v34 = vld [vmem:[%s3479_s7 + $0x1e0] sm:$0xff] }
  0x15   : > { %v427_v28 = vpack.c.bf16 %v419_v27, %v418_v26  ;;  %v2492_v36 = vcombine.low %v908_v33, %v912_v34  ;;  %v2493_v37 = vcombine.high %v908_v33, %v912_v34  ;;  %v2759_v38 = vld [vmem:[%s3479_s7 + $0x1e8] sm:$0xff]  ;;  %v900_v39 = vld [vmem:[%s3479_s7 + $0x180] sm:$0xff] }
  0x16   : > { %2527 = vmatmul.mubr.msk.bf16.vlgmr.msra.gmra.mxu0 %vm429_vm2, %v421_v12  ;;  %2547 = vmatpush3.bf16.msra.mxu1 %v2595_v31  ;;  %v904_v40 = vld [vmem:[%s3479_s7 + $0x1a0] sm:$0xff]  ;;  %v2494_v41 = vcombine.low %v2754_v35, %v2759_v38  ;;  %v2495_v42 = vcombine.high %v2754_v35, %v2759_v38  ;;  %v901_v14 = vld [vmem:[%s3479_s7 + $0x188] sm:$0xff] }
  0x17   : > { %2530 = vmatprep.mubr.msk.bf16.mxu0 %vm429_vm2, %v422_v13  ;;  %2548 = vmatprep.subr.bf16.mxu1 %v2596_v32  ;;  %v2485_v43 = vcombine.high %v900_v39, %v904_v40  ;;  %v892_v44 = vld [vmem:[%s3479_s7 + $0x140] sm:$0xff]  ;;  %v2484_v46 = vcombine.low %v900_v39, %v904_v40  ;;  %v905_v15 = vld [vmem:[%s3479_s7 + $0x1a8] sm:$0xff] }
  0x18   : > { %1236 = vmatprep.subr.bf16.mxu0 %v2493_v37  ;;  %v896_v45 = vld [vmem:[%s3479_s7 + $0x160] sm:$0xff]  ;;  %v893_v27 = vld [vmem:[%s3479_s7 + $0x148] sm:$0xff]  ;;  %v2486_v31 = vcombine.low %v901_v14, %v905_v15 }
  0x19   : > { %1237 = vmatpush1.bf16.msra.mxu0 %v2492_v36  ;;  %v2477_v47 = vcombine.high %v892_v44, %v896_v45  ;;  %v884_v48 = vld [vmem:[%s3479_s7 + $0x100] sm:$0xff]  ;;  %v2476_v50 = vcombine.low %v892_v44, %v896_v45  ;;  %v889_v44 = vld [vmem:[%s3479_s7 + $0x128] sm:$0xff] }
  0x1a   : > { %2549 = vmatpush3.bf16.msra.mxu1 %v2596_v32  ;;  %1238 = vmatprep.subr.bf16.mxu0 %v2485_v43  ;;  %v888_v49 = vld [vmem:[%s3479_s7 + $0x120] sm:$0xff]  ;;  %v885_v43 = vld [vmem:[%s3479_s7 + $0x108] sm:$0xff] }
  0x1b   : > { %1349 = vmatprep.subr.bf16.mxu1 %v2495_v42  ;;  %v2469_v51 = vcombine.high %v884_v48, %v888_v49  ;;  %v876_v52 = vld [vmem:[%s3479_s7 + $0xc0] sm:$0xff]  ;;  %v2468_v54 = vcombine.low %v884_v48, %v888_v49 }
  0x1c   : > { %v880_v53 = vld [vmem:[%s3479_s7 + $0xe0] sm:$0xff] }
  0x1d   : > { %1239 = vmatpush1.bf16.msra.mxu0 %v2484_v46  ;;  %v2461_v55 = vcombine.high %v876_v52, %v880_v53  ;;  %v2460_v56 = vcombine.low %v876_v52, %v880_v53  ;;  %v2792_v58 = vld [vmem:[%s3474_s2] ss:$0 sm:$0xff]  ;;  %v877_v53 = vld [vmem:[%s3479_s7 + $0xc8] sm:$0xff] }
  0x1e   : > { %2531 = vmatmul.mubr.msk.bf16.gmra.mxu0 %vm429_vm2, %v423_v18  ;;  %1240 = vmatprep.subr.bf16.mxu0 %v2477_v47  ;;  %v2799_v63 = vld [vmem:[%s3475_s3] ss:$0 sm:$0xff] }
  0x1f   : > { %2534 = vmatprep.mubr.msk.bf16.mxu0 %vm429_vm2, %v424_v19 }
  0x21   : > { %1241 = vmatpush1.bf16.msra.mxu0 %v2476_v50  ;;  %v2471_v50 = vcombine.high %v885_v43, %v889_v44 }
  0x22   : > { %1242 = vmatprep.subr.bf16.mxu0 %v2469_v51 }
  0x25   : > { %1243 = vmatpush1.bf16.msra.mxu0 %v2468_v54  ;;  %v881_v54 = vld [vmem:[%s3479_s7 + $0xe8] sm:$0xff] }
  0x26   : > { %2535 = vmatmul.mubr.msk.bf16.gmra.mxu0 %vm429_vm2, %v425_v24  ;;  %1244 = vmatprep.subr.bf16.mxu0 %v2461_v55  ;;  %v2487_v24 = vcombine.high %v901_v14, %v905_v15 }
  0x27   : > { %2538 = vmatprep.mubr.msk.bf16.mxu0 %vm429_vm2, %v426_v25 }
  0x29   : > { %1245 = vmatpush1.bf16.msra.mxu0 %v2460_v56 }
  0x2e   : > { %2539 = vmatmul.mubr.msk.bf16.gmra.mxu0 %vm429_vm2, %v427_v28  ;;  %v897_v28 = vld [vmem:[%s3479_s7 + $0x168] sm:$0xff] }
  0x2f   : > { %v2479_v39 = vcombine.high %v893_v27, %v897_v28  ;;  %v2478_v48 = vcombine.low %v893_v27, %v897_v28  ;;  %v860_v27 = vld [vmem:[%s3479_s7 + $0x40] sm:$0xff] }
  0x30   : > { %v864_v28 = vld [vmem:[%s3479_s7 + $0x60] sm:$0xff] }
  0xd6   : > { %v2528_v57 = vpop.f32.mrf.mxu0 }
  0xd7   : > { %v567_v61 = vmul.f32 %v2528_v57, %v2792_v58  ;;  %v2470_v57 = vcombine.low %v885_v43, %v889_v44 }
  0xd8   : > { %v495_v59 = vpop.f32.mrf.mxu0 }
  0xd9   : > { %v565_v60 = vmul.f32 %v2792_v58, %v495_v59  ;;  %v590_v5 = vadd.f32 %v2799_v63, %v567_v61 }
  0xda   : > { %v2529_v62 = vpop.f32.mrf.mxu0 }
  0xdb   : > { %v568_v0 = vmul.f32 %v2529_v62, %v2792_v58  ;;  %v588_v2 = vadd.f32 %v2799_v63, %v565_v60  ;;  %v606_v16 = vmax.f32 %v590_v5, 0.0 }
  0xdc   : > { %v498_v1 = vpop.f32.mrf.mxu0 }
  0xdd   : > { %v591_v3 = vadd.f32 %v2799_v63, %v568_v0  ;;  %v566_v4 = vmul.f32 %v2792_v58, %v498_v1  ;;  %v604_v11 = vmax.f32 %v588_v2, 0.0  ;;  %v2463_v1 = vcombine.high %v877_v53, %v881_v54 }
  0xde   : > { %v2532_v6 = vpop.f32.mrf.mxu0 }
  0xdf   : > { %v589_v7 = vadd.f32 %v2799_v63, %v566_v4  ;;  %v571_v8 = vmul.f32 %v2532_v6, %v2792_v58  ;;  %v607_v9 = vmax.f32 %v591_v3, 0.0 }
  0xe0   : > { %v511_v10 = vpop.f32.mrf.mxu0 }
  0xe1   : > { %v605_v12 = vmax.f32 %v589_v7, 0.0  ;;  %v569_v13 = vmul.f32 %v2792_v58, %v511_v10  ;;  %v594_v17 = vadd.f32 %v2799_v63, %v571_v8  ;;  %v621_v22 = vpack.c.bf16 %v607_v9, %v606_v16 }
  0xe2   : > { %v2533_v18 = vpop.f32.mrf.mxu0  ;;  %v2462_v10 = vcombine.low %v877_v53, %v881_v54  ;;  %v2919_v53 = vld [vmem:[%s3477_s5] ss:$0 sm:$0xff] }
  0xe3   : > { %v592_v19 = vadd.f32 %v2799_v63, %v569_v13  ;;  %v572_v20 = vmul.f32 %v2533_v18, %v2792_v58  ;;  %v620_v21 = vpack.c.bf16 %v605_v12, %v604_v11  ;;  %v610_v29 = vmax.f32 %v594_v17, 0.0 }
  0xe4   : > { %v514_v23 = vpop.f32.mrf.mxu0 }
  0xe5   : > { %v595_v25 = vadd.f32 %v2799_v63, %v572_v20  ;;  %v570_v26 = vmul.f32 %v2792_v58, %v514_v23  ;;  %2550 = vmatprep.mubr.msk.bf16.mxu1 %vm660_vm3, %v620_v21  ;;  %v608_v32 = vmax.f32 %v592_v19, 0.0  ;;  %v868_v21 = vld [vmem:[%s3479_s7 + $0x80] sm:$0xff]  ;;  %v873_v23 = vld [vmem:[%s3479_s7 + $0xa8] sm:$0xff] }
  0xe6   : > { %2551 = vmatmul.mubr.msk.bf16.vlgmr.msra.gmra.mxu1 %vm660_vm3, %v621_v22  ;;  %v2536_v30 = vpop.f32.mrf.mxu0 }
  0xe7   : > { %v611_v33 = vmax.f32 %v595_v25, 0.0  ;;  %v593_v34 = vadd.f32 %v2799_v63, %v570_v26  ;;  %v575_v36 = vmul.f32 %v2536_v30, %v2792_v58  ;;  %1350 = vmatpush1.bf16.msra.mxu1 %v2494_v41  ;;  %v2445_v30 = vcombine.high %v860_v27, %v864_v28 }
  0xe8   : > { %v527_v37 = vpop.f32.mrf.mxu0  ;;  %1351 = vmatprep.subr.bf16.mxu1 %v2487_v24 }
  0xe9   : > { %v609_v40 = vmax.f32 %v593_v34, 0.0  ;;  %v573_v42 = vmul.f32 %v2792_v58, %v527_v37  ;;  %v623_v45 = vpack.c.bf16 %v611_v33, %v610_v29  ;;  %v598_v46 = vadd.f32 %v2799_v63, %v575_v36  ;;  %v861_v29 = vld [vmem:[%s3479_s7 + $0x48] sm:$0xff]  ;;  %v852_v36 = vld [vmem:[%s3479_s7] sm:$0xff] }
  0xea   : > { %v2537_v47 = vpop.f32.mrf.mxu0  ;;  %v856_v37 = vld [vmem:[%s3479_s7 + $0x20] sm:$0xff] }
  0xeb   : > { %v622_v35 = vpack.c.bf16 %v609_v40, %v608_v32  ;;  %v596_v38 = vadd.f32 %v2799_v63, %v573_v42  ;;  %v576_v41 = vmul.f32 %v2537_v47, %v2792_v58  ;;  %1352 = vmatpush1.bf16.msra.mxu1 %v2486_v31  ;;  %v614_v55 = vmax.f32 %v598_v46, 0.0  ;;  %v865_v31 = vld [vmem:[%s3479_s7 + $0x68] sm:$0xff]  ;;  %v910_v47 = vld [vmem:[%s3479_s7 + $0x1d0] sm:$0xff] }
  0xec   : > { %v530_v49 = vpop.f32.mrf.mxu0  ;;  %1353 = vmatprep.subr.bf16.mxu1 %v2479_v39  ;;  %v2444_v32 = vcombine.low %v860_v27, %v864_v28  ;;  %v2446_v33 = vcombine.low %v861_v29, %v865_v31  ;;  %v2447_v34 = vcombine.high %v861_v29, %v865_v31  ;;  %v853_v39 = vld [vmem:[%s3479_s7 + $0x8] sm:$0xff]  ;;  %v2437_v40 = vcombine.high %v852_v36, %v856_v37  ;;  %v890_v29 = vld [vmem:[%s3479_s7 + $0x130] sm:$0xff]  ;;  %v891_v31 = vld [vmem:[%s3479_s7 + $0x138] sm:$0xff] }
  0xed   : > { %v599_v51 = vadd.f32 %v2799_v63, %v576_v41  ;;  %2554 = vmatprep.mubr.msk.bf16.mxu1 %vm660_vm3, %v622_v35  ;;  %v574_v52 = vmul.f32 %v2792_v58, %v530_v49  ;;  %v612_v59 = vmax.f32 %v596_v38, 0.0  ;;  %v857_v42 = vld [vmem:[%s3479_s7 + $0x28] sm:$0xff]  ;;  %v2436_v43 = vcombine.low %v852_v36, %v856_v37  ;;  %v914_v35 = vld [vmem:[%s3479_s7 + $0x1f0] sm:$0xff]  ;;  %v911_v38 = vld [vmem:[%s3479_s7 + $0x1d8] sm:$0xff] }
  0xee   : > { %2555 = vmatmul.mubr.msk.bf16.gmra.mxu1 %vm660_vm3, %v623_v45  ;;  %v2540_v56 = vpop.f32.mrf.mxu0  ;;  %v2438_v44 = vcombine.low %v853_v39, %v857_v42  ;;  %v2439_v45 = vcombine.high %v853_v39, %v857_v42  ;;  %v2622_v46 = vmov 0   ;;  %v2496_v41 = vcombine.low %v910_v47, %v914_v35  ;;  %v915_v49 = vld [vmem:[%s3479_s7 + $0x1f8] sm:$0xff]  ;;  %v878_v42 = vld [vmem:[%s3479_s7 + $0xd0] sm:$0xff] }
  0xef   : > { %v615_v60 = vmax.f32 %v599_v51, 0.0  ;;  %v597_v61 = vadd.f32 %v2799_v63, %v574_v52  ;;  %v579_v62 = vmul.f32 %v2540_v56, %v2792_v58  ;;  %1354 = vmatpush1.bf16.msra.mxu1 %v2478_v48  ;;  %1268 = vmatprep.mubr.bf16.mxu0 %v2622_v46  ;;  %v2497_v48 = vcombine.high %v910_v47, %v914_v35  ;;  %v883_v47 = vld [vmem:[%s3479_s7 + $0xf8] sm:$0xff] }
  0xf0   : > { %v543_v0 = vpop.f32.mrf.mxu0  ;;  %1355 = vmatprep.subr.bf16.mxu1 %v2471_v50  ;;  %v2498_v50 = vcombine.low %v911_v38, %v915_v49  ;;  %v2499_v51 = vcombine.high %v911_v38, %v915_v49 }
  0xf1   : > { %v613_v2 = vmax.f32 %v597_v61, 0.0  ;;  %v577_v3 = vmul.f32 %v2792_v58, %v543_v0  ;;  %v625_v4 = vpack.c.bf16 %v615_v60, %v614_v55  ;;  %v602_v5 = vadd.f32 %v2799_v63, %v579_v62 }
  0xf2   : > { %v2541_v6 = vpop.f32.mrf.mxu0 }
  0xf3   : > { %v624_v7 = vpack.c.bf16 %v613_v2, %v612_v59  ;;  %v600_v8 = vadd.f32 %v2799_v63, %v577_v3  ;;  %v580_v9 = vmul.f32 %v2541_v6, %v2792_v58  ;;  %1356 = vmatpush1.bf16.msra.mxu1 %v2470_v57  ;;  %v618_v14 = vmax.f32 %v602_v5, 0.0  ;;  %v2925_v57 = vld [vmem:[%s3478_s6] ss:$0 sm:$0xff]  ;;  %v902_v3 = vld [vmem:[%s3479_s7 + $0x190] sm:$0xff] }
  0xf4   : > { %v546_v11 = vpop.f32.mrf.mxu0  ;;  %1357 = vmatprep.subr.bf16.mxu1 %v2463_v1 }
  0xf5   : > { %2558 = vmatprep.mubr.msk.bf16.mxu1 %vm660_vm3, %v624_v7  ;;  %v603_v12 = vadd.f32 %v2799_v63, %v580_v9  ;;  %v578_v13 = vmul.f32 %v2792_v58, %v546_v11  ;;  %v616_v15 = vmax.f32 %v600_v8, 0.0  ;;  %v872_v58 = vld [vmem:[%s3479_s7 + $0xa0] sm:$0xff]  ;;  %v906_v7 = vld [vmem:[%s3479_s7 + $0x1b0] sm:$0xff]  ;;  %v903_v8 = vld [vmem:[%s3479_s7 + $0x198] sm:$0xff] }
  0xf6   : > { %2559 = vmatmul.mubr.msk.bf16.gmra.mxu1 %vm660_vm3, %v625_v4  ;;  %v2453_v22 = vcombine.high %v868_v21, %v872_v58  ;;  %v2452_v24 = vcombine.low %v868_v21, %v872_v58  ;;  %v907_v9 = vld [vmem:[%s3479_s7 + $0x1b8] sm:$0xff]  ;;  %v2488_v21 = vcombine.low %v902_v3, %v906_v7 }
  0xf7   : > { %v619_v16 = vmax.f32 %v603_v12, 0.0  ;;  %v601_v17 = vadd.f32 %v2799_v63, %v578_v13  ;;  %1358 = vmatpush1.bf16.msra.mxu1 %v2462_v10  ;;  %v869_v63 = vld [vmem:[%s3479_s7 + $0x88] sm:$0xff]  ;;  %v894_v13 = vld [vmem:[%s3479_s7 + $0x150] sm:$0xff]  ;;  %v2490_v58 = vcombine.low %v903_v8, %v907_v9 }
  0xf8   : > { %v2454_v25 = vcombine.low %v869_v63, %v873_v23  ;;  %v2455_v26 = vcombine.high %v869_v63, %v873_v23  ;;  %1246 = vmatprep.subr.bf16.mxu0 %v2453_v22 }
  0xf9   : > { %v617_v18 = vmax.f32 %v601_v17, 0.0  ;;  %v627_v19 = vpack.c.bf16 %v619_v16, %v618_v14  ;;  %1247 = vmatpush1.bf16.msra.mxu0 %v2452_v24  ;;  %v2491_v16 = vcombine.high %v903_v8, %v907_v9  ;;  %v898_v17 = vld [vmem:[%s3479_s7 + $0x170] sm:$0xff]  ;;  %v863_v8 = vld [vmem:[%s3479_s7 + $0x58] sm:$0xff] }
  0xfa   : > { %1359 = vmatprep.subr.bf16.mxu1 %v2455_v26  ;;  %1248 = vmatprep.subr.bf16.mxu0 %v2445_v30  ;;  %v2481_v23 = vcombine.high %v894_v13, %v898_v17  ;;  %v886_v26 = vld [vmem:[%s3479_s7 + $0x110] sm:$0xff]  ;;  %v887_v30 = vld [vmem:[%s3479_s7 + $0x118] sm:$0xff] }
  0xfb   : > { %v626_v20 = vpack.c.bf16 %v617_v18, %v616_v15  ;;  %1360 = vmatpush1.bf16.msra.mxu1 %v2454_v25  ;;  %v2489_v15 = vcombine.high %v902_v3, %v906_v7  ;;  %v895_v18 = vld [vmem:[%s3479_s7 + $0x158] sm:$0xff]  ;;  %v2473_v39 = vcombine.high %v886_v26, %v890_v29  ;;  %v866_v7 = vld [vmem:[%s3479_s7 + $0x70] sm:$0xff] }
  0xfc   : > { %1361 = vmatprep.subr.bf16.mxu1 %v2447_v34  ;;  %v867_v9 = vld [vmem:[%s3479_s7 + $0x78] sm:$0xff] }
  0xfd   : > { %2562 = vmatprep.mubr.msk.bf16.mxu1 %vm660_vm3, %v626_v20  ;;  %1249 = vmatpush1.bf16.msra.mxu0 %v2444_v32  ;;  %v2480_v32 = vcombine.low %v894_v13, %v898_v17 }
  0xfe   : > { %2563 = vmatmul.mubr.msk.bf16.gmra.mxu1 %vm660_vm3, %v627_v19  ;;  %1250 = vmatprep.subr.bf16.mxu0 %v2437_v40  ;;  %v899_v19 = vld [vmem:[%s3479_s7 + $0x178] sm:$0xff]  ;;  %v2475_v40 = vcombine.high %v887_v30, %v891_v31 }
  0xff   : > { %1362 = vmatpush1.bf16.msra.mxu1 %v2446_v33  ;;  %1381 = vmatprep.mubr.bf16.mxu1 %v2622_v46  ;;  %v2483_v24 = vcombine.high %v895_v18, %v899_v19  ;;  %v2482_v36 = vcombine.low %v895_v18, %v899_v19  ;;  %v2451_v18 = vcombine.high %v863_v8, %v867_v9  ;;  %v854_v19 = vld [vmem:[%s3479_s7 + $0x10] sm:$0xff] }
 0x100   : > { %1363 = vmatprep.subr.bf16.mxu1 %v2439_v45  ;;  %v879_v45 = vld [vmem:[%s3479_s7 + $0xd8] sm:$0xff] }
 0x101   : > { %1251 = vmatpush1.bf16.msra.mxu0 %v2436_v43 }
 0x102   : > { %1462 = vmatprep.subr.bf16.mxu0 %v2497_v48  ;;  %v2474_v48 = vcombine.low %v887_v30, %v891_v31 }
 0x103   : > { %1364 = vmatpush1.bf16.msra.mxu1 %v2438_v44  ;;  %v882_v44 = vld [vmem:[%s3479_s7 + $0xf0] sm:$0xff] }
 0x104   : > { %1575 = vmatprep.subr.bf16.mxu1 %v2499_v51  ;;  %v2467_v51 = vcombine.high %v879_v45, %v883_v47 }
 0x1a6   : > { %v2552_v52 = vpop.f32.mrf.mxu1 }
 0x1a7   : > { %v791_v4 = vmul.f32 %v2552_v52, %v2919_v53  ;;  %v870_v52 = vld [vmem:[%s3479_s7 + $0x90] sm:$0xff] }
 0x1a8   : > { %v719_v54 = vpop.f32.mrf.mxu1 }
 0x1a9   : > { %v789_v55 = vmul.f32 %v2919_v53, %v719_v54  ;;  %v814_v20 = vadd.f32 %v2925_v57, %v791_v4 }
 0x1aa   : > { %v2553_v56 = vpop.f32.mrf.mxu1 }
 0x1ab   : > { %v812_v60 = vadd.f32 %v2925_v57, %v789_v55  ;;  %v792_v0 = vmul.f32 %v2553_v56, %v2919_v53  ;;  %v830_v27 = vmax.f32 %v814_v20, 0.0  ;;  %v874_v56 = vld [vmem:[%s3479_s7 + $0xb0] sm:$0xff] }
 0x1ac   : > { %v722_v59 = vpop.f32.mrf.mxu1  ;;  %v2457_v3 = vcombine.high %v870_v52, %v874_v56 }
 0x1ad   : > { %v790_v61 = vmul.f32 %v2919_v53, %v722_v59  ;;  %v828_v5 = vmax.f32 %v812_v60, 0.0  ;;  %v815_v11 = vadd.f32 %v2925_v57, %v792_v0  ;;  %v871_v59 = vld [vmem:[%s3479_s7 + $0x98] sm:$0xff] }
 0x1ae   : > { %v2929_v62 = vpop.f32.mrf.mxu1  ;;  %v875_v60 = vld [vmem:[%s3479_s7 + $0xb8] sm:$0xff] }
 0x1af   : > { %v813_v1 = vadd.f32 %v2925_v57, %v790_v61  ;;  %v831_v22 = vmax.f32 %v815_v11, 0.0  ;;  %v795_v54 = vmul.f32 %v2929_v62, %v2919_v53  ;;  %v2464_v61 = vcombine.low %v878_v42, %v882_v44 }
 0x1b0   : > { %v735_v2 = vpop.f32.mrf.mxu1  ;;  %v2466_v62 = vcombine.low %v879_v45, %v883_v47  ;;  %v2459_v4 = vcombine.high %v871_v59, %v875_v60 }
 0x1b1   : > { %v829_v6 = vmax.f32 %v813_v1, 0.0  ;;  %v793_v28 = vmul.f32 %v2919_v53, %v735_v2  ;;  %v2982_v33 = vpack.c.bf16 %v831_v22, %v830_v27  ;;  %v859_v22 = vld [vmem:[%s3479_s7 + $0x38] sm:$0xff] }
 0x1b2   : > { %v2557_v10 = vpop.f32.mrf.mxu1 }
 0x1b3   : > { %v2947_v12 = vpack.c.bf16 %v829_v6, %v828_v5  ;;  %v816_v43 = vadd.f32 %v2925_v57, %v793_v28  ;;  %v796_v35 = vmul.f32 %v2557_v10, %v2919_v53  ;;  %v862_v5 = vld [vmem:[%s3479_s7 + $0x50] sm:$0xff]  ;;  %v818_v6 = vadd.f32 %v2925_v57, %v795_v54 }
 0x1b4   : > { %v738_v14 = vpop.f32.mrf.mxu1  ;;  %v2456_v10 = vcombine.low %v870_v52, %v874_v56  ;;  %v2449_v17 = vcombine.high %v862_v5, %v866_v7 }
 0x1b5   : > { %1269 = vmatmul.mubr.bf16.vlgmr.msra.gmra.mxu0 %v2947_v12  ;;  %1382 = vmatmul.mubr.bf16.vlgmr.msra.gmra.mxu1 %v2947_v12  ;;  %v794_v63 = vmul.f32 %v2919_v53, %v738_v14  ;;  %v832_v55 = vmax.f32 %v816_v43, 0.0  ;;  %v819_v0 = vadd.f32 %v2925_v57, %v796_v35  ;;  %v834_v20 = vmax.f32 %v818_v6, 0.0 }
 0x1b6   : > { %1463 = vmatpush1.bf16.msra.mxu0 %v2496_v41  ;;  %1576 = vmatpush1.bf16.msra.mxu1 %v2498_v50  ;;  %v2967_v25 = vpop.f32.mrf.mxu1  ;;  %v2472_v41 = vcombine.low %v886_v26, %v890_v29  ;;  %v2465_v50 = vcombine.high %v878_v42, %v882_v44 }
 0x1b7   : > { %1278 = vmatprep.mubr.bf16.mxu0 %v2622_v46  ;;  %1391 = vmatprep.mubr.bf16.mxu1 %v2622_v46  ;;  %v817_v34 = vadd.f32 %v2925_v57, %v794_v63  ;;  %v835_v11 = vmax.f32 %v819_v0, 0.0  ;;  %v2448_v63 = vcombine.low %v862_v5, %v866_v7 }
 0x1b8   : > { %1464 = vmatprep.subr.bf16.mxu0 %v2489_v15  ;;  %1577 = vmatprep.subr.bf16.mxu1 %v2491_v16  ;;  %v751_v37 = vpop.f32.mrf.mxu1  ;;  %v2458_v15 = vcombine.low %v871_v59, %v875_v60 }
 0x1b9   : > { %v833_v38 = vmax.f32 %v817_v34, 0.0  ;;  %v797_v13 = vmul.f32 %v2919_v53, %v751_v37  ;;  %v799_v34 = vmul.f32 %v2967_v25, %v2919_v53 }
 0x1ba   : > { %1465 = vmatpush1.bf16.msra.mxu0 %v2488_v21  ;;  %1578 = vmatpush1.bf16.msra.mxu1 %v2490_v58  ;;  %v3003_v49 = vpop.f32.mrf.mxu1  ;;  %v858_v21 = vld [vmem:[%s3479_s7 + $0x30] sm:$0xff]  ;;  %v855_v58 = vld [vmem:[%s3479_s7 + $0x18] sm:$0xff] }
 0x1bb   : > { %1466 = vmatprep.subr.bf16.mxu0 %v2481_v23  ;;  %1579 = vmatprep.subr.bf16.mxu1 %v2483_v24  ;;  %v3020_v1 = vpack.c.bf16 %v833_v38, %v832_v55  ;;  %v2450_v23 = vcombine.low %v863_v8, %v867_v9  ;;  %v3053_v24 = vpack.c.bf16 %v835_v11, %v834_v20 }
 0x1bc   : > { %v754_v2 = vpop.f32.mrf.mxu1  ;;  %v820_v26 = vadd.f32 %v2925_v57, %v797_v13  ;;  %v2441_v29 = vcombine.high %v854_v19, %v858_v21  ;;  %v2443_v30 = vcombine.high %v855_v58, %v859_v22  ;;  %v2440_v31 = vcombine.low %v854_v19, %v858_v21 }
 0x1bd   : > { %1279 = vmatmul.mubr.bf16.gmra.mxu0 %v2982_v33  ;;  %1392 = vmatmul.mubr.bf16.gmra.mxu1 %v2982_v33  ;;  %v798_v14 = vmul.f32 %v2919_v53, %v754_v2  ;;  %v800_v37 = vmul.f32 %v3003_v49, %v2919_v53  ;;  %v822_v42 = vadd.f32 %v2925_v57, %v799_v34 }
 0x1be   : > { %1288 = vmatprep.mubr.bf16.mxu0 %v2622_v46  ;;  %1401 = vmatprep.mubr.bf16.mxu1 %v2622_v46  ;;  %v2564_v16 = vpop.f32.mrf.mxu1 }
 0x1bf   : > { %1467 = vmatpush1.bf16.msra.mxu0 %v2480_v32  ;;  %1580 = vmatpush1.bf16.msra.mxu1 %v2482_v36  ;;  %v821_v27 = vadd.f32 %v2925_v57, %v798_v14  ;;  %v2442_v32 = vcombine.low %v855_v58, %v859_v22  ;;  %v836_v36 = vmax.f32 %v820_v26, 0.0  ;;  %v823_v43 = vadd.f32 %v2925_v57, %v800_v37 }
 0x1c0   : > { %1468 = vmatprep.subr.bf16.mxu0 %v2473_v39  ;;  %1581 = vmatprep.subr.bf16.mxu1 %v2475_v40  ;;  %v767_v28 = vpop.f32.mrf.mxu1  ;;  %v838_v25 = vmax.f32 %v822_v42, 0.0 }
 0x1c1   : > { %v837_v39 = vmax.f32 %v821_v27, 0.0  ;;  %v839_v47 = vmax.f32 %v823_v43, 0.0  ;;  %v801_v35 = vmul.f32 %v2919_v53, %v767_v28 }
 0x1c2   : > { %v2565_v40 = vpop.f32.mrf.mxu1 }
 0x1c3   : > { %1469 = vmatpush1.bf16.msra.mxu0 %v2472_v41  ;;  %1582 = vmatpush1.bf16.msra.mxu1 %v2474_v48  ;;  %v848_v44 = vpack.c.bf16 %v837_v39, %v836_v36  ;;  %v849_v41 = vpack.c.bf16 %v839_v47, %v838_v25  ;;  %v824_v48 = vadd.f32 %v2925_v57, %v801_v35 }
 0x1c4   : > { %1470 = vmatprep.subr.bf16.mxu0 %v2465_v50  ;;  %1583 = vmatprep.subr.bf16.mxu1 %v2467_v51  ;;  %v770_v45 = vpop.f32.mrf.mxu1  ;;  %v803_v50 = vmul.f32 %v2564_v16, %v2919_v53  ;;  %v804_v52 = vmul.f32 %v2565_v40, %v2919_v53 }
 0x1c5   : > { %1289 = vmatmul.mubr.bf16.gmra.mxu0 %v3020_v1  ;;  %1402 = vmatmul.mubr.bf16.gmra.mxu1 %v3020_v1  ;;  %v802_v38 = vmul.f32 %v2919_v53, %v770_v45  ;;  %v840_v51 = vmax.f32 %v824_v48, 0.0  ;;  %v1690_v53 = vlaneseq }
 0x1c6   : > { %1298 = vmatprep.mubr.bf16.mxu0 %v2622_v46  ;;  %1411 = vmatprep.mubr.bf16.mxu1 %v2622_v46  ;;  %v826_v55 = vadd.f32 %v2925_v57, %v803_v50  ;;  %v827_v56 = vadd.f32 %v2925_v57, %v804_v52 }
 0x1c7   : > { %1471 = vmatpush1.bf16.msra.mxu0 %v2464_v61  ;;  %1584 = vmatpush1.bf16.msra.mxu1 %v2466_v62  ;;  %v825_v49 = vadd.f32 %v2925_v57, %v802_v38  ;;  %v3105_v57 = vshrl.u32 %v1690_v53, 7 }
 0x1c8   : > { %1472 = vmatprep.subr.bf16.mxu0 %v2457_v3  ;;  %1585 = vmatprep.subr.bf16.mxu1 %v2459_v4  ;;  %v842_v60 = vmax.f32 %v826_v55, 0.0  ;;  %v843_v61 = vmax.f32 %v827_v56, 0.0  ;;  %v3125_v4 = vld [vmem:[%s3481_s9] sm:$0xff] }
 0x1c9   : > { %v841_v54 = vmax.f32 %v825_v49, 0.0  ;;  %v1696_v62 = vsub.s32 1, %v3105_v57  ;;  %v1704_v2 = vsub.s32 3, %v3105_v57 }
 0x1ca   : > { %v851_v0 = vpack.c.bf16 %v843_v61, %v842_v60 }
 0x1cb   : > { %1473 = vmatpush1.bf16.msra.mxu0 %v2456_v10  ;;  %1586 = vmatpush1.bf16.msra.mxu1 %v2458_v15  ;;  %v850_v59 = vpack.c.bf16 %v841_v54, %v840_v51  ;;  %v3147_v19 = vrot.slane %v3125_v4, %v1704_v2 }
 0x1cc   : > { %1474 = vmatprep.subr.bf16.mxu0 %v2449_v17  ;;  %1587 = vmatprep.subr.bf16.mxu1 %v2451_v18  ;;  %v3143_v17 = vrot.slane %v3125_v4, %v1696_v62 }
 0x1cd   : > { %1299 = vmatmul.mubr.bf16.gmra.mxu0 %v3053_v24  ;;  %1412 = vmatmul.mubr.bf16.gmra.mxu1 %v3053_v24 }
 0x1ce   : > { %1308 = vmatprep.mubr.bf16.mxu0 %v2622_v46  ;;  %1421 = vmatprep.mubr.bf16.mxu1 %v2622_v46 }
 0x1cf   : > { %1475 = vmatpush1.bf16.msra.mxu0 %v2448_v63  ;;  %1588 = vmatpush1.bf16.msra.mxu1 %v2450_v23 }
 0x1d0   : > { %1476 = vmatprep.subr.bf16.mxu0 %v2441_v29  ;;  %1589 = vmatprep.subr.bf16.mxu1 %v2443_v30 }
 0x1d3   : > { %1477 = vmatpush1.bf16.msra.mxu0 %v2440_v31  ;;  %1590 = vmatpush1.bf16.msra.mxu1 %v2442_v32 }
 0x1d5   : > { %1309 = vmatmul.mubr.bf16.gmra.mxu0 %v848_v44  ;;  %1422 = vmatmul.mubr.bf16.gmra.mxu1 %v848_v44 }
 0x1d6   : > { %1318 = vmatprep.mubr.bf16.mxu0 %v2622_v46  ;;  %1431 = vmatprep.mubr.bf16.mxu1 %v2622_v46 }
 0x1dd   : > { %1319 = vmatmul.mubr.bf16.gmra.mxu0 %v849_v41  ;;  %1432 = vmatmul.mubr.bf16.gmra.mxu1 %v849_v41 }
 0x1de   : > { %1328 = vmatprep.mubr.bf16.mxu0 %v2622_v46  ;;  %1441 = vmatprep.mubr.bf16.mxu1 %v2622_v46 }
 0x1e5   : > { %1329 = vmatmul.mubr.bf16.gmra.mxu0 %v850_v59  ;;  %1442 = vmatmul.mubr.bf16.gmra.mxu1 %v850_v59 }
 0x1e6   : > { %1338 = vmatprep.mubr.bf16.mxu0 %v2622_v46  ;;  %1451 = vmatprep.mubr.bf16.mxu1 %v2622_v46 }
 0x1ed   : > { %1339 = vmatmul.mubr.bf16.gmra.mxu0 %v851_v0  ;;  %1452 = vmatmul.mubr.bf16.gmra.mxu1 %v851_v0 }
 0x1ee   : > { %1494 = vmatprep.mubr.bf16.mxu0 %v2622_v46  ;;  %1607 = vmatprep.mubr.bf16.mxu1 %v2622_v46 }
 0x1f5   : > { %1495 = vmatmul.mubr.bf16.vlgmr.msra.gmra.mxu0 %v2947_v12  ;;  %1608 = vmatmul.mubr.bf16.vlgmr.msra.gmra.mxu1 %v2947_v12  ;;  %v1692_v12 = vsub.s32 0, %v3105_v57 }
 0x1f6   : > { %1504 = vmatprep.mubr.bf16.mxu0 %v2622_v46  ;;  %1617 = vmatprep.mubr.bf16.mxu1 %v2622_v46 }
 0x1f7   : > { %v3135_v10 = vrot.slane %v3125_v4, %v1692_v12 }
 0x1fd   : > { %1505 = vmatmul.mubr.bf16.gmra.mxu0 %v2982_v33  ;;  %1618 = vmatmul.mubr.bf16.gmra.mxu1 %v2982_v33  ;;  %v1700_v33 = vsub.s32 2, %v3105_v57 }
 0x1fe   : > { %1514 = vmatprep.mubr.bf16.mxu0 %v2622_v46  ;;  %1627 = vmatprep.mubr.bf16.mxu1 %v2622_v46 }
 0x1ff   : > { %v3139_v13 = vrot.slane %v3125_v4, %v1700_v33 }
 0x205   : > { %1515 = vmatmul.mubr.bf16.gmra.mxu0 %v3020_v1  ;;  %1628 = vmatmul.mubr.bf16.gmra.mxu1 %v3020_v1  ;;  %v3112_v1 = vld [vmem:[%s3480_s8] sm:$0xff] }
 0x206   : > { %1524 = vmatprep.mubr.bf16.mxu0 %v2622_v46  ;;  %1637 = vmatprep.mubr.bf16.mxu1 %v2622_v46  ;;  %v3120_v3 = vrot.slane %v3112_v1, %v1700_v33  ;;  %v3128_v7 = vrot.slane %v3112_v1, %v1696_v62  ;;  %v3131_v8 = vrot.slane %v3112_v1, %v1704_v2 }
 0x20d   : > { %1525 = vmatmul.mubr.bf16.gmra.mxu0 %v3053_v24  ;;  %1638 = vmatmul.mubr.bf16.gmra.mxu1 %v3053_v24 }
 0x20e   : > { %1534 = vmatprep.mubr.bf16.mxu0 %v2622_v46  ;;  %1647 = vmatprep.mubr.bf16.mxu1 %v2622_v46 }
 0x215   : > { %1535 = vmatmul.mubr.bf16.gmra.mxu0 %v848_v44  ;;  %1648 = vmatmul.mubr.bf16.gmra.mxu1 %v848_v44 }
 0x216   : > { %1544 = vmatprep.mubr.bf16.mxu0 %v2622_v46  ;;  %1657 = vmatprep.mubr.bf16.mxu1 %v2622_v46 }
 0x21d   : > { %1545 = vmatmul.mubr.bf16.gmra.mxu0 %v849_v41  ;;  %1658 = vmatmul.mubr.bf16.gmra.mxu1 %v849_v41 }
 0x21e   : > { %1554 = vmatprep.mubr.bf16.mxu0 %v2622_v46  ;;  %1667 = vmatprep.mubr.bf16.mxu1 %v2622_v46 }
 0x225   : > { %1555 = vmatmul.mubr.bf16.gmra.mxu0 %v850_v59  ;;  %1668 = vmatmul.mubr.bf16.gmra.mxu1 %v850_v59 }
 0x226   : > { %1564 = vmatprep.mubr.bf16.mxu0 %v2622_v46  ;;  %1677 = vmatprep.mubr.bf16.mxu1 %v2622_v46  ;;  %v3117_v46 = vrot.slane %v3112_v1, %v1692_v12 }
 0x22d   : > { %1565 = vmatmul.mubr.bf16.gmra.mxu0 %v851_v0  ;;  %1678 = vmatmul.mubr.bf16.gmra.mxu1 %v851_v0 }
 0x275   : > { %v1270_v5 = vpop.f32.mrf.mxu0  ;;  %v1383_v6 = vpop.f32.mrf.mxu1 }
 0x276   : > { %v1730_v9 = vmul.f32 %v3117_v46, %v1270_v5  ;;  %v1732_v11 = vmul.f32 %v3120_v3, %v1383_v6 }
 0x277   : > { %v1272_v14 = vpop.f32.mrf.mxu0  ;;  %v1385_v15 = vpop.f32.mrf.mxu1 }
 0x278   : > { %v1731_v16 = vmul.f32 %v3128_v7, %v1272_v14  ;;  %v1733_v18 = vmul.f32 %v3131_v8, %v1385_v15  ;;  %v1900_v63 = vadd.f32 %v3135_v10, %v1730_v9  ;;  %v1902_v23 = vadd.f32 %v3139_v13, %v1732_v11 }
 0x279   : > { %v1274_v20 = vpop.f32.mrf.mxu0  ;;  %v1387_v21 = vpop.f32.mrf.mxu1 }
 0x27a   : > { %v1738_v58 = vmul.f32 %v3117_v46, %v1274_v20  ;;  %v1740_v22 = vmul.f32 %v3120_v3, %v1387_v21  ;;  %v1901_v31 = vadd.f32 %v3143_v17, %v1731_v16  ;;  %v1903_v32 = vadd.f32 %v3147_v19, %v1733_v18 }
 0x27b   : > { %v1276_v24 = vpop.f32.mrf.mxu0  ;;  %v1389_v26 = vpop.f32.mrf.mxu1 }
 0x27c   : > { %v1908_v27 = vadd.f32 %v3135_v10, %v1738_v58  ;;  %v1910_v28 = vadd.f32 %v3139_v13, %v1740_v22  ;;  %v1739_v29 = vmul.f32 %v3128_v7, %v1276_v24  ;;  %v1741_v30 = vmul.f32 %v3131_v8, %v1389_v26 }
 0x27d   : > { %v1280_v34 = vpop.f32.mrf.mxu0  ;;  %v1393_v36 = vpop.f32.mrf.mxu1 }
 0x27e   : > { %v2028_v37 = vmax.f32 %v1900_v63, %v1908_v27  ;;  %v2070_v39 = vmax.f32 %v1902_v23, %v1910_v28  ;;  %v1909_v40 = vadd.f32 %v3143_v17, %v1739_v29  ;;  %v1911_v42 = vadd.f32 %v3147_v19, %v1741_v30 }
 0x27f   : > { %v1746_v43 = vmul.f32 %v3117_v46, %v1280_v34  ;;  %v1748_v44 = vmul.f32 %v3120_v3, %v1393_v36  ;;  %v1282_v45 = vpop.f32.mrf.mxu0  ;;  %v1395_v25 = vpop.f32.mrf.mxu1 }
 0x280   : > { %v2049_v47 = vmax.f32 %v1901_v31, %v1909_v40  ;;  %v2091_v35 = vmax.f32 %v1903_v32, %v1911_v42  ;;  %v1747_v38 = vmul.f32 %v3128_v7, %v1282_v45  ;;  %v1749_v41 = vmul.f32 %v3131_v8, %v1395_v25 }
 0x281   : > { %v1916_v48 = vadd.f32 %v3135_v10, %v1746_v43  ;;  %v1918_v49 = vadd.f32 %v3139_v13, %v1748_v44  ;;  %v1284_v50 = vpop.f32.mrf.mxu0  ;;  %v1397_v51 = vpop.f32.mrf.mxu1 }
 0x282   : > { %v1917_v52 = vadd.f32 %v3143_v17, %v1747_v38  ;;  %v1919_v54 = vadd.f32 %v3147_v19, %v1749_v41  ;;  %v1754_v55 = vmul.f32 %v3117_v46, %v1284_v50  ;;  %v1756_v56 = vmul.f32 %v3120_v3, %v1397_v51 }
 0x283   : > { %v2029_v59 = vmax.f32 %v2028_v37, %v1916_v48  ;;  %v2071_v60 = vmax.f32 %v2070_v39, %v1918_v49  ;;  %v1286_v61 = vpop.f32.mrf.mxu0  ;;  %v1399_v0 = vpop.f32.mrf.mxu1 }
 0x284   : > { %v2050_v53 = vmax.f32 %v2049_v47, %v1917_v52  ;;  %v2092_v12 = vmax.f32 %v2091_v35, %v1919_v54  ;;  %v1924_v33 = vadd.f32 %v3135_v10, %v1754_v55  ;;  %v1926_v62 = vadd.f32 %v3139_v13, %v1756_v56 }
 0x285   : > { %v1755_v2 = vmul.f32 %v3128_v7, %v1286_v61  ;;  %v1757_v5 = vmul.f32 %v3131_v8, %v1399_v0  ;;  %v1290_v6 = vpop.f32.mrf.mxu0  ;;  %v1403_v9 = vpop.f32.mrf.mxu1 }
 0x286   : > { %v2030_v11 = vmax.f32 %v2029_v59, %v1924_v33  ;;  %v2072_v14 = vmax.f32 %v2071_v60, %v1926_v62  ;;  %v1762_v15 = vmul.f32 %v3117_v46, %v1290_v6  ;;  %v1764_v16 = vmul.f32 %v3120_v3, %v1403_v9 }
 0x287   : > { %v1925_v18 = vadd.f32 %v3143_v17, %v1755_v2  ;;  %v1927_v20 = vadd.f32 %v3147_v19, %v1757_v5  ;;  %v1292_v21 = vpop.f32.mrf.mxu0  ;;  %v1405_v58 = vpop.f32.mrf.mxu1 }
 0x288   : > { %v1932_v22 = vadd.f32 %v3135_v10, %v1762_v15  ;;  %v1934_v63 = vadd.f32 %v3139_v13, %v1764_v16  ;;  %v1763_v23 = vmul.f32 %v3128_v7, %v1292_v21  ;;  %v1765_v24 = vmul.f32 %v3131_v8, %v1405_v58 }
 0x289   : > { %v2051_v26 = vmax.f32 %v2050_v53, %v1925_v18  ;;  %v2093_v27 = vmax.f32 %v2092_v12, %v1927_v20  ;;  %v1294_v28 = vpop.f32.mrf.mxu0  ;;  %v1407_v29 = vpop.f32.mrf.mxu1 }
 0x28a   : > { %v2031_v30 = vmax.f32 %v2030_v11, %v1932_v22  ;;  %v2073_v31 = vmax.f32 %v2072_v14, %v1934_v63  ;;  %v1933_v32 = vadd.f32 %v3143_v17, %v1763_v23  ;;  %v1935_v34 = vadd.f32 %v3147_v19, %v1765_v24 }
 0x28b   : > { %v1770_v36 = vmul.f32 %v3117_v46, %v1294_v28  ;;  %v1772_v37 = vmul.f32 %v3120_v3, %v1407_v29  ;;  %v1296_v39 = vpop.f32.mrf.mxu0  ;;  %v1409_v40 = vpop.f32.mrf.mxu1 }
 0x28c   : > { %v2052_v42 = vmax.f32 %v2051_v26, %v1933_v32  ;;  %v2094_v43 = vmax.f32 %v2093_v27, %v1935_v34  ;;  %v1771_v44 = vmul.f32 %v3128_v7, %v1296_v39  ;;  %v1773_v45 = vmul.f32 %v3131_v8, %v1409_v40 }
 0x28d   : > { %v1940_v25 = vadd.f32 %v3135_v10, %v1770_v36  ;;  %v1942_v47 = vadd.f32 %v3139_v13, %v1772_v37  ;;  %v1300_v35 = vpop.f32.mrf.mxu0  ;;  %v1413_v38 = vpop.f32.mrf.mxu1 }
 0x28e   : > { %v1941_v41 = vadd.f32 %v3143_v17, %v1771_v44  ;;  %v1943_v48 = vadd.f32 %v3147_v19, %v1773_v45  ;;  %v1778_v49 = vmul.f32 %v3117_v46, %v1300_v35  ;;  %v1780_v50 = vmul.f32 %v3120_v3, %v1413_v38 }
 0x28f   : > { %v2032_v51 = vmax.f32 %v2031_v30, %v1940_v25  ;;  %v2074_v52 = vmax.f32 %v2073_v31, %v1942_v47  ;;  %v1302_v54 = vpop.f32.mrf.mxu0  ;;  %v1415_v55 = vpop.f32.mrf.mxu1 }
 0x290   : > { %v2053_v56 = vmax.f32 %v2052_v42, %v1941_v41  ;;  %v2095_v59 = vmax.f32 %v2094_v43, %v1943_v48  ;;  %v1948_v60 = vadd.f32 %v3135_v10, %v1778_v49  ;;  %v1950_v61 = vadd.f32 %v3139_v13, %v1780_v50 }
 0x291   : > { %v1779_v0 = vmul.f32 %v3128_v7, %v1302_v54  ;;  %v1781_v53 = vmul.f32 %v3131_v8, %v1415_v55  ;;  %v1304_v12 = vpop.f32.mrf.mxu0  ;;  %v1417_v33 = vpop.f32.mrf.mxu1 }
 0x292   : > { %v2033_v62 = vmax.f32 %v2032_v51, %v1948_v60  ;;  %v2075_v2 = vmax.f32 %v2074_v52, %v1950_v61  ;;  %v1786_v5 = vmul.f32 %v3117_v46, %v1304_v12  ;;  %v1788_v6 = vmul.f32 %v3120_v3, %v1417_v33 }
 0x293   : > { %v1949_v9 = vadd.f32 %v3143_v17, %v1779_v0  ;;  %v1951_v11 = vadd.f32 %v3147_v19, %v1781_v53  ;;  %v1306_v14 = vpop.f32.mrf.mxu0  ;;  %v1419_v15 = vpop.f32.mrf.mxu1 }
 0x294   : > { %v1956_v16 = vadd.f32 %v3135_v10, %v1786_v5  ;;  %v1958_v18 = vadd.f32 %v3139_v13, %v1788_v6  ;;  %v1787_v20 = vmul.f32 %v3128_v7, %v1306_v14  ;;  %v1789_v21 = vmul.f32 %v3131_v8, %v1419_v15 }
 0x295   : > { %v2054_v58 = vmax.f32 %v2053_v56, %v1949_v9  ;;  %v2096_v22 = vmax.f32 %v2095_v59, %v1951_v11  ;;  %v1310_v63 = vpop.f32.mrf.mxu0  ;;  %v1423_v23 = vpop.f32.mrf.mxu1 }
 0x296   : > { %v2034_v24 = vmax.f32 %v2033_v62, %v1956_v16  ;;  %v2076_v26 = vmax.f32 %v2075_v2, %v1958_v18  ;;  %v1957_v27 = vadd.f32 %v3143_v17, %v1787_v20  ;;  %v1959_v28 = vadd.f32 %v3147_v19, %v1789_v21 }
 0x297   : > { %v1794_v29 = vmul.f32 %v3117_v46, %v1310_v63  ;;  %v1796_v30 = vmul.f32 %v3120_v3, %v1423_v23  ;;  %v1312_v31 = vpop.f32.mrf.mxu0  ;;  %v1425_v32 = vpop.f32.mrf.mxu1 }
 0x298   : > { %v2055_v34 = vmax.f32 %v2054_v58, %v1957_v27  ;;  %v2097_v36 = vmax.f32 %v2096_v22, %v1959_v28  ;;  %v1795_v37 = vmul.f32 %v3128_v7, %v1312_v31  ;;  %v1797_v39 = vmul.f32 %v3131_v8, %v1425_v32 }
 0x299   : > { %v1964_v40 = vadd.f32 %v3135_v10, %v1794_v29  ;;  %v1966_v42 = vadd.f32 %v3139_v13, %v1796_v30  ;;  %v1314_v43 = vpop.f32.mrf.mxu0  ;;  %v1427_v44 = vpop.f32.mrf.mxu1 }
 0x29a   : > { %v1965_v45 = vadd.f32 %v3143_v17, %v1795_v37  ;;  %v1967_v25 = vadd.f32 %v3147_v19, %v1797_v39  ;;  %v1802_v47 = vmul.f32 %v3117_v46, %v1314_v43  ;;  %v1804_v35 = vmul.f32 %v3120_v3, %v1427_v44 }
 0x29b   : > { %v2035_v38 = vmax.f32 %v2034_v24, %v1964_v40  ;;  %v2077_v41 = vmax.f32 %v2076_v26, %v1966_v42  ;;  %v1316_v48 = vpop.f32.mrf.mxu0  ;;  %v1429_v49 = vpop.f32.mrf.mxu1 }
 0x29c   : > { %v2056_v50 = vmax.f32 %v2055_v34, %v1965_v45  ;;  %v2098_v51 = vmax.f32 %v2097_v36, %v1967_v25  ;;  %v1972_v52 = vadd.f32 %v3135_v10, %v1802_v47  ;;  %v1974_v54 = vadd.f32 %v3139_v13, %v1804_v35 }
 0x29d   : > { %v1803_v55 = vmul.f32 %v3128_v7, %v1316_v48  ;;  %v1805_v56 = vmul.f32 %v3131_v8, %v1429_v49  ;;  %v1320_v59 = vpop.f32.mrf.mxu0  ;;  %v1433_v60 = vpop.f32.mrf.mxu1 }
 0x29e   : > { %v2036_v61 = vmax.f32 %v2035_v38, %v1972_v52  ;;  %v2078_v0 = vmax.f32 %v2077_v41, %v1974_v54  ;;  %v1810_v53 = vmul.f32 %v3117_v46, %v1320_v59  ;;  %v1812_v12 = vmul.f32 %v3120_v3, %v1433_v60 }
 0x29f   : > { %v1973_v33 = vadd.f32 %v3143_v17, %v1803_v55  ;;  %v1975_v62 = vadd.f32 %v3147_v19, %v1805_v56  ;;  %v1322_v2 = vpop.f32.mrf.mxu0  ;;  %v1435_v5 = vpop.f32.mrf.mxu1 }
 0x2a0   : > { %v1980_v6 = vadd.f32 %v3135_v10, %v1810_v53  ;;  %v1982_v9 = vadd.f32 %v3139_v13, %v1812_v12  ;;  %v1811_v11 = vmul.f32 %v3128_v7, %v1322_v2  ;;  %v1813_v14 = vmul.f32 %v3131_v8, %v1435_v5 }
 0x2a1   : > { %v2057_v15 = vmax.f32 %v2056_v50, %v1973_v33  ;;  %v2099_v16 = vmax.f32 %v2098_v51, %v1975_v62  ;;  %v1324_v18 = vpop.f32.mrf.mxu0  ;;  %v1437_v20 = vpop.f32.mrf.mxu1 }
 0x2a2   : > { %v2037_v21 = vmax.f32 %v2036_v61, %v1980_v6  ;;  %v2079_v58 = vmax.f32 %v2078_v0, %v1982_v9  ;;  %v1981_v22 = vadd.f32 %v3143_v17, %v1811_v11  ;;  %v1983_v63 = vadd.f32 %v3147_v19, %v1813_v14 }
 0x2a3   : > { %v1818_v23 = vmul.f32 %v3117_v46, %v1324_v18  ;;  %v1820_v24 = vmul.f32 %v3120_v3, %v1437_v20  ;;  %v1326_v26 = vpop.f32.mrf.mxu0  ;;  %v1439_v27 = vpop.f32.mrf.mxu1 }
 0x2a4   : > { %v2058_v28 = vmax.f32 %v2057_v15, %v1981_v22  ;;  %v2100_v29 = vmax.f32 %v2099_v16, %v1983_v63  ;;  %v1819_v30 = vmul.f32 %v3128_v7, %v1326_v26  ;;  %v1821_v31 = vmul.f32 %v3131_v8, %v1439_v27 }
 0x2a5   : > { %v1988_v32 = vadd.f32 %v3135_v10, %v1818_v23  ;;  %v1990_v34 = vadd.f32 %v3139_v13, %v1820_v24  ;;  %v1330_v36 = vpop.f32.mrf.mxu0  ;;  %v1443_v37 = vpop.f32.mrf.mxu1 }
 0x2a6   : > { %v1989_v39 = vadd.f32 %v3143_v17, %v1819_v30  ;;  %v1991_v40 = vadd.f32 %v3147_v19, %v1821_v31  ;;  %v1826_v42 = vmul.f32 %v3117_v46, %v1330_v36  ;;  %v1828_v43 = vmul.f32 %v3120_v3, %v1443_v37 }
 0x2a7   : > { %v2038_v44 = vmax.f32 %v2037_v21, %v1988_v32  ;;  %v2080_v45 = vmax.f32 %v2079_v58, %v1990_v34  ;;  %v1332_v25 = vpop.f32.mrf.mxu0  ;;  %v1445_v47 = vpop.f32.mrf.mxu1 }
 0x2a8   : > { %v2059_v35 = vmax.f32 %v2058_v28, %v1989_v39  ;;  %v2101_v38 = vmax.f32 %v2100_v29, %v1991_v40  ;;  %v1996_v41 = vadd.f32 %v3135_v10, %v1826_v42  ;;  %v1998_v48 = vadd.f32 %v3139_v13, %v1828_v43 }
 0x2a9   : > { %v1827_v49 = vmul.f32 %v3128_v7, %v1332_v25  ;;  %v1829_v50 = vmul.f32 %v3131_v8, %v1445_v47  ;;  %v1334_v51 = vpop.f32.mrf.mxu0  ;;  %v1447_v52 = vpop.f32.mrf.mxu1 }
 0x2aa   : > { %v2039_v54 = vmax.f32 %v2038_v44, %v1996_v41  ;;  %v2081_v55 = vmax.f32 %v2080_v45, %v1998_v48  ;;  %v1834_v56 = vmul.f32 %v3117_v46, %v1334_v51  ;;  %v1836_v59 = vmul.f32 %v3120_v3, %v1447_v52 }
 0x2ab   : > { %v1997_v60 = vadd.f32 %v3143_v17, %v1827_v49  ;;  %v1999_v61 = vadd.f32 %v3147_v19, %v1829_v50  ;;  %v1336_v0 = vpop.f32.mrf.mxu0  ;;  %v1449_v53 = vpop.f32.mrf.mxu1 }
 0x2ac   : > { %v2004_v12 = vadd.f32 %v3135_v10, %v1834_v56  ;;  %v2006_v33 = vadd.f32 %v3139_v13, %v1836_v59  ;;  %v1835_v62 = vmul.f32 %v3128_v7, %v1336_v0  ;;  %v1837_v2 = vmul.f32 %v3131_v8, %v1449_v53 }
 0x2ad   : > { %v2060_v5 = vmax.f32 %v2059_v35, %v1997_v60  ;;  %v2102_v6 = vmax.f32 %v2101_v38, %v1999_v61  ;;  %v1340_v9 = vpop.f32.mrf.mxu0  ;;  %v1453_v11 = vpop.f32.mrf.mxu1 }
 0x2ae   : > { %v2040_v14 = vmax.f32 %v2039_v54, %v2004_v12  ;;  %v2082_v15 = vmax.f32 %v2081_v55, %v2006_v33  ;;  %v2005_v16 = vadd.f32 %v3143_v17, %v1835_v62  ;;  %v2007_v18 = vadd.f32 %v3147_v19, %v1837_v2 }
 0x2af   : > { %v1842_v20 = vmul.f32 %v3117_v46, %v1340_v9  ;;  %v1844_v21 = vmul.f32 %v3120_v3, %v1453_v11  ;;  %v1342_v58 = vpop.f32.mrf.mxu0  ;;  %v1455_v22 = vpop.f32.mrf.mxu1  ;;  %v2623_v12 = vmov 1966171168  }
 0x2b0   : > { %v2061_v63 = vmax.f32 %v2060_v5, %v2005_v16  ;;  %v2103_v23 = vmax.f32 %v2102_v6, %v2007_v18  ;;  %v1843_v24 = vmul.f32 %v3128_v7, %v1342_v58  ;;  %v1845_v26 = vmul.f32 %v3131_v8, %v1455_v22 }
 0x2b1   : > { %v2012_v27 = vadd.f32 %v3135_v10, %v1842_v20  ;;  %v2014_v28 = vadd.f32 %v3139_v13, %v1844_v21  ;;  %v1344_v29 = vpop.f32.mrf.mxu0  ;;  %v1457_v30 = vpop.f32.mrf.mxu1  ;;  %v1708_v20 = vsub.s32 4, %v3105_v57  ;;  %v1716_v21 = vsub.s32 6, %v3105_v57 }
 0x2b2   : > { %v2013_v31 = vadd.f32 %v3143_v17, %v1843_v24  ;;  %v2015_v32 = vadd.f32 %v3147_v19, %v1845_v26  ;;  %v1850_v34 = vmul.f32 %v3117_v46, %v1344_v29  ;;  %v1852_v36 = vmul.f32 %v3120_v3, %v1457_v30 }
 0x2b3   : > { %v2041_v37 = vmax.f32 %v2040_v14, %v2012_v27  ;;  %v2083_v39 = vmax.f32 %v2082_v15, %v2014_v28  ;;  %v1346_v40 = vpop.f32.mrf.mxu0  ;;  %v1459_v42 = vpop.f32.mrf.mxu1  ;;  %v1712_v27 = vsub.s32 5, %v3105_v57  ;;  %v1720_v28 = vsub.s32 7, %v3105_v57 }
 0x2b4   : > { %v2062_v43 = vmax.f32 %v2061_v63, %v2013_v31  ;;  %v2104_v44 = vmax.f32 %v2103_v23, %v2015_v32  ;;  %v2020_v45 = vadd.f32 %v3135_v10, %v1850_v34  ;;  %v2022_v25 = vadd.f32 %v3139_v13, %v1852_v36 }
 0x2b5   : > { %v1851_v47 = vmul.f32 %v3128_v7, %v1346_v40  ;;  %v1853_v35 = vmul.f32 %v3131_v8, %v1459_v42  ;;  %v3271_v38 = vpop.f32.mrf.mxu0  ;;  %v3273_v41 = vpop.f32.mrf.mxu1  ;;  %v3289_v36 = vrot.slane %v3112_v1, %v1708_v20 }
 0x2b6   : > { %v2042_v46 = vmax.f32 %v2041_v37, %v2020_v45  ;;  %v2084_v3 = vmax.f32 %v2083_v39, %v2022_v25  ;;  %v3292_v37 = vrot.slane %v3112_v1, %v1716_v21  ;;  %v3295_v25 = vrot.slane %v3125_v4, %v1708_v20 }
 0x2b7   : > { %v2021_v48 = vadd.f32 %v3143_v17, %v1851_v47  ;;  %v2023_v49 = vadd.f32 %v3147_v19, %v1853_v35  ;;  %v3277_v50 = vpop.f32.mrf.mxu0  ;;  %v3279_v51 = vpop.f32.mrf.mxu1  ;;  %v2213_v19 = vunpack.c.l.s4 %v2623_v12  ;;  %v3298_v47 = vrot.slane %v3112_v1, %v1712_v27 }
 0x2b8   : > { %v2043_v10 = vrot.slane %v2042_v46, 4  ;;  %v2085_v13 = vrot.slane %v2084_v3, 4 }
 0x2b9   : > { %v2063_v52 = vmax.f32 %v2062_v43, %v2021_v48  ;;  %v2105_v7 = vmax.f32 %v2104_v44, %v2023_v49  ;;  %v1500_v54 = vpop.f32.mrf.mxu0  ;;  %v1613_v8 = vpop.f32.mrf.mxu1  ;;  %v2214_v18 = vunpack.c.0.s8 %v2213_v19 }
 0x2ba   : > { %v2044_v55 = vmax.f32 %v2042_v46, %v2043_v10  ;;  %v2086_v56 = vmax.f32 %v2084_v3, %v2085_v13  ;;  %v1742_v3 = vmul.f32 %v3289_v36, %v1500_v54  ;;  %v1744_v48 = vmul.f32 %v3292_v37, %v1613_v8 }
 0x2bb   : > { %v2064_v59 = vrot.slane %v2063_v52, 4  ;;  %v2106_v60 = vrot.slane %v2105_v7, 4  ;;  %v1502_v61 = vpop.f32.mrf.mxu0  ;;  %v1615_v0 = vpop.f32.mrf.mxu1  ;;  %v3286_v34 = vsub.s32 %v2214_v18, %v3105_v57  ;;  %v3301_v57 = vrot.slane %v3112_v1, %v1720_v28 }
 0x2bc   : > { %v2045_v53 = vrot.slane %v2044_v55, 2  ;;  %v2087_v17 = vrot.slane %v2086_v56, 2  ;;  %v1734_v13 = vmul.f32 %v3289_v36, %v3271_v38  ;;  %v1743_v1 = vmul.f32 %v3298_v47, %v1502_v61 }
 0x2bd   : > { %v2065_v33 = vmax.f32 %v2063_v52, %v2064_v59  ;;  %v2107_v62 = vmax.f32 %v2105_v7, %v2106_v60  ;;  %v1506_v2 = vpop.f32.mrf.mxu0  ;;  %v1619_v5 = vpop.f32.mrf.mxu1  ;;  %v3308_v52 = vrot.slane %v3125_v4, %v1716_v21  ;;  %v3311_v7 = vrot.slane %v3125_v4, %v1712_v27 }
 0x2be   : > { %v2046_v6 = vmax.f32 %v2044_v55, %v2045_v53  ;;  %v2088_v9 = vmax.f32 %v2086_v56, %v2087_v17  ;;  %v1736_v8 = vmul.f32 %v3292_v37, %v3273_v41  ;;  %v1745_v56 = vmul.f32 %v3301_v57, %v1615_v0 }
 0x2bf   : > { %v2066_v11 = vrot.slane %v2065_v33, 2  ;;  %v2108_v14 = vrot.slane %v2107_v62, 2  ;;  %v1508_v15 = vpop.f32.mrf.mxu0  ;;  %v1621_v16 = vpop.f32.mrf.mxu1  ;;  %v1735_v60 = vmul.f32 %v3298_v47, %v3277_v50  ;;  %v1737_v53 = vmul.f32 %v3301_v57, %v3279_v51 }
 0x2c0   : > { %v2047_v58 = vrot.slane %v2046_v6, 1  ;;  %v2089_v22 = vrot.slane %v2088_v9, 1  ;;  %v3328_v61 = vrot.slane %v3125_v4, %v1720_v28  ;;  %v1750_v17 = vmul.f32 %v3289_v36, %v1506_v2 }
 0x2c1   : > { %v2067_v63 = vmax.f32 %v2065_v33, %v2066_v11  ;;  %v2109_v23 = vmax.f32 %v2107_v62, %v2108_v14  ;;  %v1510_v24 = vpop.f32.mrf.mxu0  ;;  %v1623_v26 = vpop.f32.mrf.mxu1  ;;  %v1912_v41 = vadd.f32 %v3295_v25, %v1742_v3  ;;  %v1914_v0 = vadd.f32 %v3308_v52, %v1744_v48 }
 0x2c2   : > { %v2048_v39 = vmax.f32 %v2046_v6, %v2047_v58  ;;  %v2090_v40 = vmax.f32 %v2088_v9, %v2089_v22  ;;  %v1752_v19 = vmul.f32 %v3292_v37, %v1619_v5  ;;  %v1913_v50 = vadd.f32 %v3311_v7, %v1743_v1 }
 0x2c3   : > { %v2068_v29 = vrot.slane %v2067_v63, 1  ;;  %v2110_v30 = vrot.slane %v2109_v23, 1  ;;  %v1512_v31 = vpop.f32.mrf.mxu0  ;;  %v1625_v32 = vpop.f32.mrf.mxu1  ;;  %v1751_v51 = vmul.f32 %v3298_v47, %v1508_v15  ;;  %v1753_v4 = vmul.f32 %v3301_v57, %v1621_v16 }
 0x2c4   : > { %v1758_v6 = vmul.f32 %v3289_v36, %v1510_v24  ;;  %v1904_v2 = vadd.f32 %v3295_v25, %v1734_v13  ;;  %v1906_v9 = vadd.f32 %v3308_v52, %v1736_v8  ;;  %v1915_v11 = vadd.f32 %v3328_v61, %v1745_v56 }
 0x2c5   : > { %v2069_v42 = vmax.f32 %v2067_v63, %v2068_v29  ;;  %v2111_v43 = vmax.f32 %v2109_v23, %v2110_v30  ;;  %v1516_v44 = vpop.f32.mrf.mxu0  ;;  %v1629_v45 = vpop.f32.mrf.mxu1  ;;  %v1760_v14 = vmul.f32 %v3292_v37, %v1623_v26  ;;  %v1905_v20 = vadd.f32 %v3311_v7, %v1735_v60 }
 0x2c6   : > { %v1907_v21 = vadd.f32 %v3328_v61, %v1737_v53  ;;  %v1920_v15 = vadd.f32 %v3295_v25, %v1750_v17  ;;  %v1759_v16 = vmul.f32 %v3298_v47, %v1512_v31  ;;  %v2112_v58 = vmax.f32 %v1904_v2, %v1912_v41 }
 0x2c7   : > { %v2208_v35 = vcombine.low %v2048_v39, %v2069_v42  ;;  %v2209_v46 = vcombine.low %v2090_v40, %v2111_v43  ;;  %v1518_v49 = vpop.f32.mrf.mxu0  ;;  %v1631_v10 = vpop.f32.mrf.mxu1  ;;  %v2154_v22 = vmax.f32 %v1906_v9, %v1914_v0  ;;  %v1922_v63 = vadd.f32 %v3308_v52, %v1752_v19 }
 0x2c8   : > { %v1761_v23 = vmul.f32 %v3301_v57, %v1625_v32  ;;  %v2133_v28 = vmax.f32 %v1905_v20, %v1913_v50  ;;  %v1921_v26 = vadd.f32 %v3311_v7, %v1751_v51  ;;  %v1923_v29 = vadd.f32 %v3328_v61, %v1753_v4 }
 0x2c9   : > { %v3315_v55 = vrot.slane %v2208_v35, %v3286_v34  ;;  %v3318_v54 = vrot.slane %v2209_v46, %v3286_v34  ;;  %v1520_v38 = vpop.f32.mrf.mxu0  ;;  %v1633_v59 = vpop.f32.mrf.mxu1  ;;  %v1928_v30 = vadd.f32 %v3295_v25, %v1758_v6  ;;  %v2175_v39 = vmax.f32 %v1907_v21, %v1915_v11 }
 0x2ca   : > { %v1930_v40 = vadd.f32 %v3308_v52, %v1760_v14  ;;  %v1766_v31 = vmul.f32 %v3289_v36, %v1516_v44  ;;  %v1768_v42 = vmul.f32 %v3292_v37, %v1629_v45  ;;  %v2113_v46 = vmax.f32 %v2112_v58, %v1920_v15 }
 0x2cb   : > { %v2240_v12 = vcombine.low %v3315_v55, %v3318_v54  ;;  %v1522_v33 = vpop.f32.mrf.mxu0  ;;  %v1635_v62 = vpop.f32.mrf.mxu1  ;;  %v1929_v32 = vadd.f32 %v3311_v7, %v1759_v16  ;;  %v1767_v3 = vmul.f32 %v3298_v47, %v1518_v49  ;;  %v1769_v48 = vmul.f32 %v3301_v57, %v1631_v10 }
 0x2cc   : > { %v2155_v13 = vmax.f32 %v2154_v22, %v1922_v63  ;;  %v1931_v1 = vadd.f32 %v3328_v61, %v1761_v23  ;;  %v1774_v8 = vmul.f32 %v3289_v36, %v1520_v38  ;;  %v1776_v56 = vmul.f32 %v3292_v37, %v1633_v59 }
 0x2cd   : > { %v1526_v18 = vpop.f32.mrf.mxu0  ;;  %v1639_v5 = vpop.f32.mrf.mxu1  ;;  %v2134_v53 = vmax.f32 %v2133_v28, %v1921_v26  ;;  %v2176_v45 = vmax.f32 %v2175_v39, %v1923_v29  ;;  %v2114_v17 = vmax.f32 %v2113_v46, %v1928_v30  ;;  %v1775_v41 = vmul.f32 %v3298_v47, %v1522_v33 }
 0x2ce   : > { %v2156_v0 = vmax.f32 %v2155_v13, %v1930_v40  ;;  %v1936_v19 = vadd.f32 %v3295_v25, %v1766_v31  ;;  %v1938_v49 = vadd.f32 %v3308_v52, %v1768_v42  ;;  %v1777_v10 = vmul.f32 %v3301_v57, %v1635_v62 }
 0x2cf   : > { %v1528_v24 = vpop.f32.mrf.mxu0  ;;  %v1641_v27 = vpop.f32.mrf.mxu1  ;;  %v2135_v4 = vmax.f32 %v2134_v53, %v1929_v32  ;;  %v1937_v38 = vadd.f32 %v3311_v7, %v1767_v3  ;;  %v1939_v59 = vadd.f32 %v3328_v61, %v1769_v48  ;;  %v1782_v6 = vmul.f32 %v3289_v36, %v1526_v18 }
 0x2d0   : > { %v2177_v2 = vmax.f32 %v2176_v45, %v1931_v1  ;;  %v1944_v9 = vadd.f32 %v3295_v25, %v1774_v8  ;;  %v1946_v33 = vadd.f32 %v3308_v52, %v1776_v56  ;;  %v1784_v11 = vmul.f32 %v3292_v37, %v1639_v5 }
 0x2d1   : > { %v1530_v43 = vpop.f32.mrf.mxu0  ;;  %v1643_v35 = vpop.f32.mrf.mxu1  ;;  %v1945_v62 = vadd.f32 %v3311_v7, %v1775_v41  ;;  %v1783_v21 = vmul.f32 %v3298_v47, %v1528_v24  ;;  %v1785_v15 = vmul.f32 %v3301_v57, %v1641_v27  ;;  %v2115_v58 = vmax.f32 %v2114_v17, %v1936_v19 }
 0x2d2   : > { %v1790_v16 = vmul.f32 %v3289_v36, %v1530_v43  ;;  %v2157_v22 = vmax.f32 %v2156_v0, %v1938_v49  ;;  %v1947_v18 = vadd.f32 %v3328_v61, %v1777_v10  ;;  %v1792_v63 = vmul.f32 %v3292_v37, %v1643_v35 }
 0x2d3   : > { %v1532_v60 = vpop.f32.mrf.mxu0  ;;  %v1645_v44 = vpop.f32.mrf.mxu1  ;;  %v2136_v26 = vmax.f32 %v2135_v4, %v1937_v38  ;;  %v2178_v5 = vmax.f32 %v2177_v2, %v1939_v59  ;;  %v1952_v29 = vadd.f32 %v3295_v25, %v1782_v6  ;;  %v2116_v39 = vmax.f32 %v2115_v58, %v1944_v9 }
 0x2d4   : > { %v1791_v30 = vmul.f32 %v3298_v47, %v1532_v60  ;;  %v2158_v24 = vmax.f32 %v2157_v22, %v1946_v33  ;;  %v1954_v27 = vadd.f32 %v3308_v52, %v1784_v11  ;;  %v1793_v40 = vmul.f32 %v3301_v57, %v1645_v44 }
 0x2d5   : > { %v1536_v50 = vpop.f32.mrf.mxu0  ;;  %v1649_v51 = vpop.f32.mrf.mxu1  ;;  %v2137_v43 = vmax.f32 %v2136_v26, %v1945_v62  ;;  %v1953_v46 = vadd.f32 %v3311_v7, %v1783_v21  ;;  %v1955_v35 = vadd.f32 %v3328_v61, %v1785_v15  ;;  %v1960_v32 = vadd.f32 %v3295_v25, %v1790_v16 }
 0x2d6   : > { %v2179_v3 = vmax.f32 %v2178_v5, %v1947_v18  ;;  %v1962_v48 = vadd.f32 %v3308_v52, %v1792_v63  ;;  %v1798_v13 = vmul.f32 %v3289_v36, %v1536_v50  ;;  %v1800_v1 = vmul.f32 %v3292_v37, %v1649_v51 }
 0x2d7   : > { %v1538_v14 = vpop.f32.mrf.mxu0  ;;  %v1651_v20 = vpop.f32.mrf.mxu1  ;;  %v2117_v60 = vmax.f32 %v2116_v39, %v1952_v29  ;;  %v1961_v44 = vadd.f32 %v3311_v7, %v1791_v30  ;;  %v2159_v17 = vmax.f32 %v2158_v24, %v1954_v27  ;;  %v1963_v41 = vadd.f32 %v3328_v61, %v1793_v40 }
 0x2d8   : > { %v1799_v53 = vmul.f32 %v3298_v47, %v1538_v14  ;;  %v1801_v45 = vmul.f32 %v3301_v57, %v1651_v20  ;;  %v2138_v50 = vmax.f32 %v2137_v43, %v1953_v46  ;;  %v2180_v51 = vmax.f32 %v2179_v3, %v1955_v35 }
 0x2d9   : > { %v1540_v23 = vpop.f32.mrf.mxu0  ;;  %v1653_v28 = vpop.f32.mrf.mxu1  ;;  %v2118_v4 = vmax.f32 %v2117_v60, %v1960_v32  ;;  %v2160_v59 = vmax.f32 %v2159_v17, %v1962_v48  ;;  %v1968_v6 = vadd.f32 %v3295_v25, %v1798_v13  ;;  %v1970_v2 = vadd.f32 %v3308_v52, %v1800_v1 }
 0x2da   : > { %v1806_v0 = vmul.f32 %v3289_v36, %v1540_v23  ;;  %v1808_v19 = vmul.f32 %v3292_v37, %v1653_v28  ;;  %v2139_v14 = vmax.f32 %v2138_v50, %v1961_v44  ;;  %v1969_v20 = vadd.f32 %v3311_v7, %v1799_v53 }
 0x2db   : > { %v1542_v31 = vpop.f32.mrf.mxu0  ;;  %v1655_v42 = vpop.f32.mrf.mxu1  ;;  %v1971_v62 = vadd.f32 %v3328_v61, %v1801_v45  ;;  %v2181_v15 = vmax.f32 %v2180_v51, %v1963_v41  ;;  %v2119_v29 = vmax.f32 %v2118_v4, %v1968_v6  ;;  %v2161_v30 = vmax.f32 %v2160_v59, %v1970_v2 }
 0x2dc   : > { %v1807_v38 = vmul.f32 %v3298_v47, %v1542_v31  ;;  %v1809_v9 = vmul.f32 %v3301_v57, %v1655_v42  ;;  %v1976_v16 = vadd.f32 %v3295_v25, %v1806_v0  ;;  %v1978_v58 = vadd.f32 %v3308_v52, %v1808_v19 }
 0x2dd   : > { %v1546_v8 = vpop.f32.mrf.mxu0  ;;  %v1659_v56 = vpop.f32.mrf.mxu1  ;;  %v2140_v31 = vmax.f32 %v2139_v14, %v1969_v20  ;;  %v2182_v42 = vmax.f32 %v2181_v15, %v1971_v62 }
 0x2de   : > { %v1814_v21 = vmul.f32 %v3289_v36, %v1546_v8  ;;  %v1816_v22 = vmul.f32 %v3292_v37, %v1659_v56  ;;  %v1977_v23 = vadd.f32 %v3311_v7, %v1807_v38  ;;  %v1979_v39 = vadd.f32 %v3328_v61, %v1809_v9 }
 0x2df   : > { %v1548_v49 = vpop.f32.mrf.mxu0  ;;  %v1661_v10 = vpop.f32.mrf.mxu1  ;;  %v2120_v35 = vmax.f32 %v2119_v29, %v1976_v16  ;;  %v2162_v32 = vmax.f32 %v2161_v30, %v1978_v58 }
 0x2e0   : > { %v1815_v28 = vmul.f32 %v3298_v47, %v1548_v49  ;;  %v1817_v26 = vmul.f32 %v3301_v57, %v1661_v10  ;;  %v1984_v43 = vadd.f32 %v3295_v25, %v1814_v21  ;;  %v1986_v3 = vadd.f32 %v3308_v52, %v1816_v22 }
 0x2e1   : > { %v1550_v33 = vpop.f32.mrf.mxu0  ;;  %v1663_v11 = vpop.f32.mrf.mxu1  ;;  %v2141_v8 = vmax.f32 %v2140_v31, %v1977_v23  ;;  %v2183_v53 = vmax.f32 %v2182_v42, %v1979_v39 }
 0x2e2   : > { %v1822_v5 = vmul.f32 %v3289_v36, %v1550_v33  ;;  %v1824_v24 = vmul.f32 %v3292_v37, %v1663_v11  ;;  %v1985_v56 = vadd.f32 %v3311_v7, %v1815_v28  ;;  %v1987_v60 = vadd.f32 %v3328_v61, %v1817_v26 }
 0x2e3   : > { %v1552_v18 = vpop.f32.mrf.mxu0  ;;  %v1665_v63 = vpop.f32.mrf.mxu1  ;;  %v2121_v49 = vmax.f32 %v2120_v35, %v1984_v43  ;;  %v2163_v4 = vmax.f32 %v2162_v32, %v1986_v3 }
 0x2e4   : > { %v1823_v46 = vmul.f32 %v3298_v47, %v1552_v18  ;;  %v1992_v44 = vadd.f32 %v3295_v25, %v1822_v5  ;;  %v1994_v45 = vadd.f32 %v3308_v52, %v1824_v24  ;;  %v1825_v17 = vmul.f32 %v3301_v57, %v1665_v63 }
 0x2e5   : > { %v1556_v27 = vpop.f32.mrf.mxu0  ;;  %v1669_v40 = vpop.f32.mrf.mxu1  ;;  %v2142_v33 = vmax.f32 %v2141_v8, %v1985_v56  ;;  %v2184_v11 = vmax.f32 %v2183_v53, %v1987_v60 }
 0x2e6   : > { %v1830_v48 = vmul.f32 %v3289_v36, %v1556_v27  ;;  %v1832_v41 = vmul.f32 %v3292_v37, %v1669_v40  ;;  %v1993_v10 = vadd.f32 %v3311_v7, %v1823_v46  ;;  %v2122_v14 = vmax.f32 %v2121_v49, %v1992_v44 }
 0x2e7   : > { %v1558_v13 = vpop.f32.mrf.mxu0  ;;  %v1671_v1 = vpop.f32.mrf.mxu1  ;;  %v2164_v62 = vmax.f32 %v2163_v4, %v1994_v45  ;;  %v1995_v21 = vadd.f32 %v3328_v61, %v1825_v17 }
 0x2e8   : > { %v1831_v50 = vmul.f32 %v3298_v47, %v1558_v13  ;;  %v2000_v38 = vadd.f32 %v3295_v25, %v1830_v48  ;;  %v1833_v59 = vmul.f32 %v3301_v57, %v1671_v1  ;;  %v2002_v15 = vadd.f32 %v3308_v52, %v1832_v41 }
 0x2e9   : > { %v1560_v0 = vpop.f32.mrf.mxu0  ;;  %v1673_v19 = vpop.f32.mrf.mxu1  ;;  %v2143_v18 = vmax.f32 %v2142_v33, %v1993_v10  ;;  %v2185_v43 = vmax.f32 %v2184_v11, %v1995_v21 }
 0x2ea   : > { %v1838_v51 = vmul.f32 %v3289_v36, %v1560_v0  ;;  %v1840_v6 = vmul.f32 %v3292_v37, %v1673_v19  ;;  %v2001_v63 = vadd.f32 %v3311_v7, %v1831_v50  ;;  %v2123_v26 = vmax.f32 %v2122_v14, %v2000_v38 }
 0x2eb   : > { %v1562_v2 = vpop.f32.mrf.mxu0  ;;  %v1675_v9 = vpop.f32.mrf.mxu1  ;;  %v2003_v5 = vadd.f32 %v3328_v61, %v1833_v59  ;;  %v2165_v46 = vmax.f32 %v2164_v62, %v2002_v15 }
 0x2ec   : > { %v1839_v20 = vmul.f32 %v3298_v47, %v1562_v2  ;;  %v1841_v16 = vmul.f32 %v3301_v57, %v1675_v9  ;;  %v2008_v23 = vadd.f32 %v3295_v25, %v1838_v51  ;;  %v2010_v29 = vadd.f32 %v3308_v52, %v1840_v6 }
 0x2ed   : > { %v1566_v58 = vpop.f32.mrf.mxu0  ;;  %v1679_v22 = vpop.f32.mrf.mxu1  ;;  %v2144_v13 = vmax.f32 %v2143_v18, %v2001_v63  ;;  %v2186_v60 = vmax.f32 %v2185_v43, %v2003_v5 }
 0x2ee   : > { %v1846_v28 = vmul.f32 %v3289_v36, %v1566_v58  ;;  %v1848_v30 = vmul.f32 %v3292_v37, %v1679_v22  ;;  %v2009_v27 = vadd.f32 %v3311_v7, %v1839_v20  ;;  %v2011_v35 = vadd.f32 %v3328_v61, %v1841_v16 }
 0x2ef   : > { %v1568_v39 = vpop.f32.mrf.mxu0  ;;  %v1681_v24 = vpop.f32.mrf.mxu1  ;;  %v2124_v1 = vmax.f32 %v2123_v26, %v2008_v23  ;;  %v2166_v44 = vmax.f32 %v2165_v46, %v2010_v29  ;;  %v2248_v46 = vrot.slane %v2240_v12, %v3286_v34 }
 0x2f0   : > { %v2016_v40 = vadd.f32 %v3295_v25, %v1846_v28  ;;  %v1847_v31 = vmul.f32 %v3298_v47, %v1568_v39  ;;  %v1849_v42 = vmul.f32 %v3301_v57, %v1681_v24  ;;  %v2018_v32 = vadd.f32 %v3308_v52, %v1848_v30 }
 0x2f1   : > { %v1570_v3 = vpop.f32.mrf.mxu0  ;;  %v1683_v48 = vpop.f32.mrf.mxu1  ;;  %v2145_v0 = vmax.f32 %v2144_v13, %v2009_v27  ;;  %v2187_v50 = vmax.f32 %v2186_v60, %v2011_v35 }
 0x2f2   : > { %v2017_v8 = vadd.f32 %v3311_v7, %v1847_v31  ;;  %v1854_v56 = vmul.f32 %v3289_v36, %v1570_v3  ;;  %v2019_v53 = vadd.f32 %v3328_v61, %v1849_v42  ;;  %v1856_v45 = vmul.f32 %v3292_v37, %v1683_v48 }
 0x2f3   : > { %v1572_v17 = vpop.f32.mrf.mxu0  ;;  %v1685_v41 = vpop.f32.mrf.mxu1  ;;  %v2125_v19 = vmax.f32 %v2124_v1, %v2016_v40  ;;  %v2167_v51 = vmax.f32 %v2166_v44, %v2018_v32 }
 0x2f4   : > { %v2024_v49 = vadd.f32 %v3295_v25, %v1854_v56  ;;  %v1855_v10 = vmul.f32 %v3298_v47, %v1572_v17  ;;  %v2026_v4 = vadd.f32 %v3308_v52, %v1856_v45  ;;  %v1857_v36 = vmul.f32 %v3301_v57, %v1685_v41 }
 0x2f5   : > { %v2146_v38 = vmax.f32 %v2145_v0, %v2017_v8  ;;  %v2188_v2 = vmax.f32 %v2187_v50, %v2019_v53 }
 0x2f6   : > { %v2126_v59 = vmax.f32 %v2125_v19, %v2024_v49  ;;  %v2025_v6 = vadd.f32 %v3311_v7, %v1855_v10  ;;  %v2168_v37 = vmax.f32 %v2167_v51, %v2026_v4  ;;  %v2027_v9 = vadd.f32 %v3328_v61, %v1857_v36 }
 0x2f8   : > { %v2127_v33 = vrot.slane %v2126_v59, 4  ;;  %v2147_v11 = vmax.f32 %v2146_v38, %v2025_v6  ;;  %v2169_v14 = vrot.slane %v2168_v37, 4  ;;  %v2189_v25 = vmax.f32 %v2188_v2, %v2027_v9 }
 0x2fa   : > { %v2128_v20 = vmax.f32 %v2126_v59, %v2127_v33  ;;  %v2148_v47 = vrot.slane %v2147_v11, 4  ;;  %v2170_v62 = vmax.f32 %v2168_v37, %v2169_v14  ;;  %v2190_v21 = vrot.slane %v2189_v25, 4 }
 0x2fc   : > { %v2129_v15 = vrot.slane %v2128_v20, 2  ;;  %v2149_v52 = vmax.f32 %v2147_v11, %v2148_v47  ;;  %v2171_v16 = vrot.slane %v2170_v62, 2  ;;  %v2191_v57 = vmax.f32 %v2189_v25, %v2190_v21 }
 0x2fe   : > { %v2130_v58 = vmax.f32 %v2128_v20, %v2129_v15  ;;  %v2150_v22 = vrot.slane %v2149_v52, 2  ;;  %v2172_v18 = vmax.f32 %v2170_v62, %v2171_v16  ;;  %v2192_v7 = vrot.slane %v2191_v57, 2 }
 0x300   : > { %v2131_v63 = vrot.slane %v2130_v58, 1  ;;  %v2151_v23 = vmax.f32 %v2149_v52, %v2150_v22  ;;  %v2173_v61 = vrot.slane %v2172_v18, 1  ;;  %v2193_v28 = vmax.f32 %v2191_v57, %v2192_v7 }
 0x302   : > { %v2152_v26 = vrot.slane %v2151_v23, 1  ;;  %v2194_v5 = vrot.slane %v2193_v28, 1  ;;  %v2132_v29 = vmax.f32 %v2130_v58, %v2131_v63  ;;  %v2174_v39 = vmax.f32 %v2172_v18, %v2173_v61 }
 0x304   : > { %v2153_v30 = vmax.f32 %v2151_v23, %v2152_v26  ;;  %v2195_v24 = vmax.f32 %v2193_v28, %v2194_v5 }
 0x306   : > { %v2210_v27 = vcombine.low %v2132_v29, %v2153_v30  ;;  %v2211_v40 = vcombine.low %v2174_v39, %v2195_v24 }
 0x308   : > { %v2232_v31 = vrot.slane %v2210_v27, %v3286_v34  ;;  %v2239_v42 = vrot.slane %v2211_v40, %v3286_v34 }
 0x30a   : > { %v2241_v43 = vcombine.low %v2232_v31, %v2239_v42 }
 0x30c   : > { %v2255_v35 = vrot.slane %v2241_v43, %v3286_v34 }
 0x30e   : > { %v2256_v32 = vcombine.low %v2248_v46, %v2255_v35 }
 0x310   : > { %2258 = vst [vmem:[%s402_s12] sm:$0xff] %v2256_v32 }
 0x311 PF: > { %s20_s15 = sadd.s32 1, %s2619_s15   ;;  %s3483_s13 = smov %s2615_s14 }
 0x312   : > { %p17_p5 = scmp.ge.s32.totalorder %s20_s15, 4   ;;  %s3484_s14 = smov %s3486_s16 }
 0x314   :  { %19 = sbr.rel (!%p17_p5) target bundleno = 2 (0x2), region = 101 }

// kernel: pointnet_dense_cls.4
= control target key start
LH: loop header
LB: loop body
LE: loop exit
PB: predicated region body
PF: predicated region fallthrough
CT: control target
= control target key end

     0   :  { %15 = vsyncpa [#allocation3], 0  ;;  %s2853_s13 = smov 0   ;;  %s2855_s14 = smov 0   ;;  %s3475_s0 = inlined_call_operand.vmem [shape: f32[2,128,3], index: 0, kind: input, shape index: {}]   ;;  %s3476_s1 = inlined_call_operand.vmem [shape: bf16[1,3,64], index: 1, kind: input, shape index: {}]   ;;  %s3477_s2 = inlined_call_operand.vmem [shape: f32[1,64], index: 2, kind: input, shape index: {}]   ;;  %s3478_s3 = inlined_call_operand.vmem [shape: f32[1,64], index: 3, kind: input, shape index: {}]   ;;  %s3479_s4 = inlined_call_operand.vmem [shape: bf16[64,128], index: 4, kind: input, shape index: {}]   ;;  %s3480_s5 = inlined_call_operand.vmem [shape: f32[1,128], index: 5, kind: input, shape index: {}]   ;;  %s3481_s6 = inlined_call_operand.vmem [shape: f32[1,128], index: 6, kind: input, shape index: {}]   ;;  %s3482_s7 = inlined_call_operand.hbm [shape: bf16[128,1024], index: 7, kind: input, shape index: {}]   ;;  %s3483_s8 = inlined_call_operand.vmem [shape: f32[1,1024], index: 8, kind: input, shape index: {}]   ;;  %s3484_s9 = inlined_call_operand.vmem [shape: f32[1,1024], index: 9, kind: input, shape index: {}]   ;;  %s3485_s10 = inlined_call_operand.vmem [shape: f32[2,1,1024], index: 10, kind: output, shape index: {}]  }
   0x1   :  { %s2857_s15 = smov 0  }
   0x2 LB: > { %s2530_s16 = sadd.s32 4294967295, %s2790_s15   ;;  %s33_s17 = sadd.s32 1, %s2786_s14  ;;  %s2790_s15 = sphi %s2857_s15, %s21_s15   ;;  %s2786_s14 = sphi %s2855_s14, %s3489_s14   ;;  %s2782_s13 = sphi %s2853_s13, %s3488_s13  }
   0x3   : > { %p35_p0 = scmp.ge.s32.totalorder %s33_s17, 2  ;;  %p2532_p1 = scmp.ge.s32.totalorder %s2790_s15, 1 }
   0x4   : > { %p281_p2 = scmp.lt.s32.totalorder %s2790_s15, 3  ;;  %p2878_p4 = scmp.eq.s32.totalorder %s2530_s16, 0 }
   0x5   : > { %s3491_s17 = smov (%p35_p0, %s33_s17), 0  ;;  %s2792_s20 = smov [#allocation2]  }
   0x6   : > { %p2874_p3 = pnand %p2532_p1, %p281_p2  ;;  %s311_s21 = sshll.u32 %s2792_s20, 4  ;;  %s312_s21 = int_to_ptr.vmem [resolvable:$true] %s311_s21 }
   0x7   : > { %s2749_s22 = scalar_lea.vmem %s312_s21, 8192  ;;  %p2757_p11 = scmp.lt.s32.totalorder %s312_s21, %s312_s21 }
   0x8   : > { %p2698_p5 = pneg %p2874_p3  ;;  %p2750_p8 = scmp.ne.s32.totalorder %s312_s21, %s2749_s22 }
   0x9   : > { %p2758_p12 = scmp.lt.s32.totalorder %s2749_s22, %s2749_s22 }
   0xa   : > { %p2699_p6 = pnand %p2878_p4, %p2698_p5 }
   0xb   : > { %p2759_p13 = por %p2758_p12, %p2757_p11 }
   0xc   : > { %p2740_p7 = pneg %p2699_p6 }
   0xe   : > { %p2752_p9 = pnand %p2750_p8, %p2740_p7 }
  0x10   : > { %p2753_p10 = pneg %p2752_p9 }
  0x12   : > { %p2760_p0 = pnand %p2759_p13, %p2753_p10 }
  0x14   : > { %2763 = shalt.err (!%p2760_p0)
}
  0x15   : > { %s2793_s23 = smov 512   ;;  %s2794_s24 = smov 32  }
  0x16   : > { %2701 = dma.hbm_to_vmem [thread:$0]  (!%p2699_p6), %s3482_s7, 8192, %s312_s21, [#allocation3], %s2793_s23, %s2793_s23, %s2794_s24  }
  0x17   : > { %346 = sbr.rel (%p2874_p3) target bundleno = 811 (0x32b), region = 60 }
  0x1c   : > { %2777 = dma.done.wait (%p2878_p4), [#allocation3], 8192  }
  0x1d   : > { %2779 = vsyncadd (%p2878_p4), [#allocation3], 4294959104  ;;  %vm452_vm0 = vcmask 1040384   ;;  %p388_p1 = scmp.lt.s32.totalorder %s2782_s13, 1  ;;  %vm453_vm1 = vcmask 1041408   ;;  %v2795_v0 = vmov 65535  }
  0x1e   : > { %v454_v1 = vsel %vm452_vm0, 4294967295, %v2795_v0  ;;  %v426_v3 = vld [vmem:[%s3476_s1] sm:$0x3]  ;;  %vm427_vm2 = vcmask 23552   ;;  %v2734_v29 = vld [vmem:[%s3479_s4 + $0x18] sm:$0xff]   ;;  %v2735_v30 = vld [vmem:[%s3479_s4 + $0x10] sm:$0xff]  }
  0x1f   : > { %s3493_s13 = smov (!%p388_p1, %s2782_s13), 1  ;;  %v455_v2 = vsel %vm453_vm1, %v454_v1, 0  ;;  %2670 = vmatprep.subr.bf16.mxu1 %v2734_v29  ;;  %v2736_v31 = vld [vmem:[%s3479_s4 + $0x8] sm:$0xff]   ;;  %v2737_v32 = vld [vmem:[%s3479_s4] sm:$0xff]   ;;  %vm658_vm3 = vcmask 523264  }
  0x20   : > { %s2630_s27 = sshll.u32 %s3493_s13, 7  ;;  %v457_v6 = vand.u32 %v455_v2, %v426_v3  ;;  %2671 = vmatpush3.bf16.msra.mxu1 %v2734_v29  ;;  %v906_v33 = vld [vmem:[#allocation2 + $0x1c0] sm:$0xff]  ;;  %v2944_v35 = vld [vmem:[#allocation2 + $0x1c8] sm:$0xff]  ;;  %s2539_s21 = sshll.u32 %s3493_s13, 3 }
  0x21   : > { %s2903_s30 = scalar_lea.vmem %s3475_s0, %s2630_s27  ;;  %2672 = vmatprep.subr.bf16.mxu1 %v2735_v30  ;;  %v910_v34 = vld [vmem:[#allocation2 + $0x1e0] sm:$0xff]  ;;  %v2946_v38 = vld [vmem:[#allocation2 + $0x1e8] sm:$0xff]  ;;  %s400_s24 = scalar_lea.vmem %s3485_s10, %s2539_s21 }
  0x22   : > { %v402_v4 = vld [vmem:[%s2903_s30] sm:$0xff]  ;;  %v403_v5 = vld [vmem:[%s2903_s30 + $0x8] sm:$0xff]  ;;  %v404_v8 = vld [vmem:[%s2903_s30 + $0x10] sm:$0xff]  ;;  %2652 = vmatprep.subr.bf16.mxu0 %v457_v6  ;;  %v2620_v36 = vcombine.low %v906_v33, %v910_v34  ;;  %v2621_v37 = vcombine.high %v906_v33, %v910_v34  ;;  %v2622_v41 = vcombine.low %v2944_v35, %v2946_v38  ;;  %v2623_v42 = vcombine.high %v2944_v35, %v2946_v38 }
  0x23   : > { %v418_v7 = vpack.c.bf16 %v403_v5, %v402_v4  ;;  %v405_v9 = vld [vmem:[%s2903_s30 + $0x18] sm:$0xff]  ;;  %v406_v10 = vld [vmem:[%s2903_s30 + $0x20] sm:$0xff]  ;;  %v407_v11 = vld [vmem:[%s2903_s30 + $0x28] sm:$0xff]  ;;  %2653 = vmatpush3.bf16.msra.mxu0 %v457_v6 }
  0x24   : > { %v419_v12 = vpack.c.bf16 %v405_v9, %v404_v8  ;;  %v420_v13 = vpack.c.bf16 %v407_v11, %v406_v10  ;;  %v408_v14 = vld [vmem:[%s2903_s30 + $0x30] sm:$0xff]  ;;  %v409_v15 = vld [vmem:[%s2903_s30 + $0x38] sm:$0xff]  ;;  %v410_v16 = vld [vmem:[%s2903_s30 + $0x40] sm:$0xff]  ;;  %2673 = vmatpush3.bf16.msra.mxu1 %v2735_v30  ;;  %1234 = vmatprep.subr.bf16.mxu0 %v2621_v37 }
  0x25   : > { %2654 = vmatprep.mubr.msk.bf16.mxu0 %vm427_vm2, %v418_v7  ;;  %v411_v17 = vld [vmem:[%s2903_s30 + $0x48] sm:$0xff]  ;;  %v421_v18 = vpack.c.bf16 %v409_v15, %v408_v14  ;;  %v412_v20 = vld [vmem:[%s2903_s30 + $0x50] sm:$0xff]  ;;  %v413_v21 = vld [vmem:[%s2903_s30 + $0x58] sm:$0xff]  ;;  %2674 = vmatprep.subr.bf16.mxu1 %v2736_v31 }
  0x26   : > { %2655 = vmatmul.mubr.msk.bf16.vlgmr.msra.gmra.mxu0 %vm427_vm2, %v419_v12  ;;  %v422_v19 = vpack.c.bf16 %v411_v17, %v410_v16  ;;  %v414_v22 = vld [vmem:[%s2903_s30 + $0x60] sm:$0xff]  ;;  %v415_v23 = vld [vmem:[%s2903_s30 + $0x68] sm:$0xff]  ;;  %v423_v24 = vpack.c.bf16 %v413_v21, %v412_v20  ;;  %v416_v26 = vld [vmem:[%s2903_s30 + $0x70] sm:$0xff] }
  0x27   : > { %2658 = vmatprep.mubr.msk.bf16.mxu0 %vm427_vm2, %v420_v13  ;;  %v424_v25 = vpack.c.bf16 %v415_v23, %v414_v22  ;;  %v417_v27 = vld [vmem:[%s2903_s30 + $0x78] sm:$0xff]  ;;  %v898_v39 = vld [vmem:[#allocation2 + $0x180] sm:$0xff]  ;;  %1235 = vmatpush1.bf16.msra.mxu0 %v2620_v36  ;;  %v899_v14 = vld [vmem:[#allocation2 + $0x188] sm:$0xff] }
  0x28   : > { %v425_v28 = vpack.c.bf16 %v417_v27, %v416_v26  ;;  %2675 = vmatpush3.bf16.msra.mxu1 %v2736_v31  ;;  %v902_v40 = vld [vmem:[#allocation2 + $0x1a0] sm:$0xff]  ;;  %v903_v15 = vld [vmem:[#allocation2 + $0x1a8] sm:$0xff] }
  0x29   : > { %2676 = vmatprep.subr.bf16.mxu1 %v2737_v32  ;;  %v2613_v43 = vcombine.high %v898_v39, %v902_v40  ;;  %v890_v44 = vld [vmem:[#allocation2 + $0x140] sm:$0xff]  ;;  %v2612_v46 = vcombine.low %v898_v39, %v902_v40  ;;  %v891_v27 = vld [vmem:[#allocation2 + $0x148] sm:$0xff]  ;;  %v2614_v31 = vcombine.low %v899_v14, %v903_v15 }
  0x2a   : > { %v894_v45 = vld [vmem:[#allocation2 + $0x160] sm:$0xff] }
  0x2b   : > { %1236 = vmatprep.subr.bf16.mxu0 %v2613_v43  ;;  %v2605_v47 = vcombine.high %v890_v44, %v894_v45  ;;  %v882_v48 = vld [vmem:[#allocation2 + $0x100] sm:$0xff]  ;;  %v2604_v50 = vcombine.low %v890_v44, %v894_v45  ;;  %v883_v43 = vld [vmem:[#allocation2 + $0x108] sm:$0xff] }
  0x2c   : > { %2677 = vmatpush3.bf16.msra.mxu1 %v2737_v32  ;;  %v886_v49 = vld [vmem:[#allocation2 + $0x120] sm:$0xff]  ;;  %1237 = vmatpush1.bf16.msra.mxu0 %v2612_v46  ;;  %v887_v44 = vld [vmem:[#allocation2 + $0x128] sm:$0xff] }
  0x2d   : > { %1347 = vmatprep.subr.bf16.mxu1 %v2623_v42  ;;  %1238 = vmatprep.subr.bf16.mxu0 %v2605_v47  ;;  %v2597_v51 = vcombine.high %v882_v48, %v886_v49  ;;  %v874_v52 = vld [vmem:[#allocation2 + $0xc0] sm:$0xff]  ;;  %v2596_v54 = vcombine.low %v882_v48, %v886_v49 }
  0x2e   : > { %2659 = vmatmul.mubr.msk.bf16.gmra.mxu0 %vm427_vm2, %v421_v18  ;;  %v878_v53 = vld [vmem:[#allocation2 + $0xe0] sm:$0xff] }
  0x2f   : > { %2662 = vmatprep.mubr.msk.bf16.mxu0 %vm427_vm2, %v422_v19  ;;  %v2589_v55 = vcombine.high %v874_v52, %v878_v53  ;;  %v2588_v56 = vcombine.low %v874_v52, %v878_v53  ;;  %v2955_v58 = vld [vmem:[%s3477_s2] ss:$0 sm:$0xff]  ;;  %v875_v53 = vld [vmem:[#allocation2 + $0xc8] sm:$0xff] }
  0x30   : > { %1239 = vmatpush1.bf16.msra.mxu0 %v2604_v50  ;;  %v2962_v63 = vld [vmem:[%s3478_s3] ss:$0 sm:$0xff] }
  0x31   : > { %1240 = vmatprep.subr.bf16.mxu0 %v2597_v51 }
  0x34   : > { %1241 = vmatpush1.bf16.msra.mxu0 %v2596_v54  ;;  %v879_v54 = vld [vmem:[#allocation2 + $0xe8] sm:$0xff] }
  0x35   : > { %1242 = vmatprep.subr.bf16.mxu0 %v2589_v55 }
  0x36   : > { %2663 = vmatmul.mubr.msk.bf16.gmra.mxu0 %vm427_vm2, %v423_v24  ;;  %v2615_v24 = vcombine.high %v899_v14, %v903_v15 }
  0x37   : > { %2666 = vmatprep.mubr.msk.bf16.mxu0 %vm427_vm2, %v424_v25 }
  0x38   : > { %1243 = vmatpush1.bf16.msra.mxu0 %v2588_v56 }
  0x3e   : > { %2667 = vmatmul.mubr.msk.bf16.gmra.mxu0 %vm427_vm2, %v425_v28  ;;  %v895_v28 = vld [vmem:[#allocation2 + $0x168] sm:$0xff] }
  0x3f   : > { %v2607_v39 = vcombine.high %v891_v27, %v895_v28  ;;  %v2606_v35 = vcombine.low %v891_v27, %v895_v28  ;;  %v862_v28 = vld [vmem:[#allocation2 + $0x60] sm:$0xff] }
  0xe6   : > { %v2656_v57 = vpop.f32.mrf.mxu0 }
  0xe7   : > { %v565_v61 = vmul.f32 %v2656_v57, %v2955_v58  ;;  %v2598_v57 = vcombine.low %v883_v43, %v887_v44 }
  0xe8   : > { %v493_v59 = vpop.f32.mrf.mxu0 }
  0xe9   : > { %v563_v60 = vmul.f32 %v2955_v58, %v493_v59  ;;  %v588_v5 = vadd.f32 %v2962_v63, %v565_v61 }
  0xea   : > { %v2657_v62 = vpop.f32.mrf.mxu0 }
  0xeb   : > { %v566_v0 = vmul.f32 %v2657_v62, %v2955_v58  ;;  %v586_v2 = vadd.f32 %v2962_v63, %v563_v60  ;;  %v604_v16 = vmax.f32 %v588_v5, 0.0 }
  0xec   : > { %v496_v1 = vpop.f32.mrf.mxu0 }
  0xed   : > { %v589_v3 = vadd.f32 %v2962_v63, %v566_v0  ;;  %v564_v4 = vmul.f32 %v2955_v58, %v496_v1  ;;  %v602_v11 = vmax.f32 %v586_v2, 0.0  ;;  %v2591_v1 = vcombine.high %v875_v53, %v879_v54 }
  0xee   : > { %v2660_v6 = vpop.f32.mrf.mxu0 }
  0xef   : > { %v587_v7 = vadd.f32 %v2962_v63, %v564_v4  ;;  %v569_v8 = vmul.f32 %v2660_v6, %v2955_v58  ;;  %v605_v9 = vmax.f32 %v589_v3, 0.0 }
  0xf0   : > { %v509_v10 = vpop.f32.mrf.mxu0 }
  0xf1   : > { %v603_v12 = vmax.f32 %v587_v7, 0.0  ;;  %v567_v13 = vmul.f32 %v2955_v58, %v509_v10  ;;  %v592_v17 = vadd.f32 %v2962_v63, %v569_v8  ;;  %v619_v22 = vpack.c.bf16 %v605_v9, %v604_v16 }
  0xf2   : > { %v2661_v18 = vpop.f32.mrf.mxu0  ;;  %v2590_v10 = vcombine.low %v875_v53, %v879_v54  ;;  %v3010_v53 = vld [vmem:[%s3480_s5] ss:$0 sm:$0xff] }
  0xf3   : > { %v590_v19 = vadd.f32 %v2962_v63, %v567_v13  ;;  %v570_v20 = vmul.f32 %v2661_v18, %v2955_v58  ;;  %v618_v21 = vpack.c.bf16 %v603_v12, %v602_v11  ;;  %v608_v29 = vmax.f32 %v592_v17, 0.0 }
  0xf4   : > { %v512_v23 = vpop.f32.mrf.mxu0 }
  0xf5   : > { %v593_v25 = vadd.f32 %v2962_v63, %v570_v20  ;;  %v568_v26 = vmul.f32 %v2955_v58, %v512_v23  ;;  %2678 = vmatprep.mubr.msk.bf16.mxu1 %vm658_vm3, %v618_v21  ;;  %v606_v32 = vmax.f32 %v590_v19, 0.0  ;;  %v866_v21 = vld [vmem:[#allocation2 + $0x80] sm:$0xff] }
  0xf6   : > { %2679 = vmatmul.mubr.msk.bf16.vlgmr.msra.gmra.mxu1 %vm658_vm3, %v619_v22  ;;  %v2664_v30 = vpop.f32.mrf.mxu0  ;;  %v870_v22 = vld [vmem:[#allocation2 + $0xa0] sm:$0xff] }
  0xf7   : > { %v609_v33 = vmax.f32 %v593_v25, 0.0  ;;  %v591_v34 = vadd.f32 %v2962_v63, %v568_v26  ;;  %v573_v36 = vmul.f32 %v2664_v30, %v2955_v58  ;;  %1348 = vmatpush1.bf16.msra.mxu1 %v2622_v41  ;;  %v2599_v41 = vcombine.high %v883_v43, %v887_v44 }
  0xf8   : > { %v525_v37 = vpop.f32.mrf.mxu0  ;;  %1349 = vmatprep.subr.bf16.mxu1 %v2615_v24  ;;  %v2581_v23 = vcombine.high %v866_v21, %v870_v22  ;;  %v867_v24 = vld [vmem:[#allocation2 + $0x88] sm:$0xff]  ;;  %v2580_v25 = vcombine.low %v866_v21, %v870_v22 }
  0xf9   : > { %v607_v40 = vmax.f32 %v591_v34, 0.0  ;;  %v571_v42 = vmul.f32 %v2955_v58, %v525_v37  ;;  %v621_v45 = vpack.c.bf16 %v609_v33, %v608_v29  ;;  %v596_v46 = vadd.f32 %v2962_v63, %v573_v36  ;;  %v859_v29 = vld [vmem:[#allocation2 + $0x48] sm:$0xff]  ;;  %v850_v36 = vld [vmem:[#allocation2] sm:$0xff] }
  0xfa   : > { %v2665_v47 = vpop.f32.mrf.mxu0  ;;  %1244 = vmatprep.subr.bf16.mxu0 %v2581_v23  ;;  %v854_v37 = vld [vmem:[#allocation2 + $0x20] sm:$0xff] }
  0xfb   : > { %v620_v48 = vpack.c.bf16 %v607_v40, %v606_v32  ;;  %v594_v49 = vadd.f32 %v2962_v63, %v571_v42  ;;  %v574_v50 = vmul.f32 %v2665_v47, %v2955_v58  ;;  %1350 = vmatpush1.bf16.msra.mxu1 %v2614_v31  ;;  %v612_v55 = vmax.f32 %v596_v46, 0.0  ;;  %1245 = vmatpush1.bf16.msra.mxu0 %v2580_v25  ;;  %v863_v31 = vld [vmem:[#allocation2 + $0x68] sm:$0xff]  ;;  %v908_v47 = vld [vmem:[#allocation2 + $0x1d0] sm:$0xff] }
  0xfc   : > { %v528_v38 = vpop.f32.mrf.mxu0  ;;  %1351 = vmatprep.subr.bf16.mxu1 %v2607_v39  ;;  %v2574_v33 = vcombine.low %v859_v29, %v863_v31  ;;  %v2575_v34 = vcombine.high %v859_v29, %v863_v31  ;;  %v851_v39 = vld [vmem:[#allocation2 + $0x8] sm:$0xff]  ;;  %v2565_v40 = vcombine.high %v850_v36, %v854_v37  ;;  %v2564_v43 = vcombine.low %v850_v36, %v854_v37  ;;  %v888_v29 = vld [vmem:[#allocation2 + $0x130] sm:$0xff]  ;;  %v889_v31 = vld [vmem:[#allocation2 + $0x138] sm:$0xff] }
  0xfd   : > { %v597_v51 = vadd.f32 %v2962_v63, %v574_v50  ;;  %2682 = vmatprep.mubr.msk.bf16.mxu1 %vm658_vm3, %v620_v48  ;;  %v572_v52 = vmul.f32 %v2955_v58, %v528_v38  ;;  %v610_v59 = vmax.f32 %v594_v49, 0.0  ;;  %v855_v42 = vld [vmem:[#allocation2 + $0x28] sm:$0xff]  ;;  %v2796_v46 = vmov 0   ;;  %v912_v48 = vld [vmem:[#allocation2 + $0x1f0] sm:$0xff]  ;;  %v909_v49 = vld [vmem:[#allocation2 + $0x1d8] sm:$0xff] }
  0xfe   : > { %2683 = vmatmul.mubr.msk.bf16.gmra.mxu1 %vm658_vm3, %v621_v45  ;;  %v2668_v56 = vpop.f32.mrf.mxu0  ;;  %v2566_v44 = vcombine.low %v851_v39, %v855_v42  ;;  %v2567_v45 = vcombine.high %v851_v39, %v855_v42  ;;  %1266 = vmatprep.mubr.bf16.mxu0 %v2796_v46  ;;  %v2624_v50 = vcombine.low %v908_v47, %v912_v48  ;;  %v913_v38 = vld [vmem:[#allocation2 + $0x1f8] sm:$0xff]  ;;  %v876_v42 = vld [vmem:[#allocation2 + $0xd0] sm:$0xff] }
  0xff   : > { %v613_v60 = vmax.f32 %v597_v51, 0.0  ;;  %v595_v61 = vadd.f32 %v2962_v63, %v572_v52  ;;  %v577_v62 = vmul.f32 %v2668_v56, %v2955_v58  ;;  %1352 = vmatpush1.bf16.msra.mxu1 %v2606_v35  ;;  %v2625_v35 = vcombine.high %v908_v47, %v912_v48  ;;  %v881_v47 = vld [vmem:[#allocation2 + $0xf8] sm:$0xff] }
 0x100   : > { %v541_v0 = vpop.f32.mrf.mxu0  ;;  %1353 = vmatprep.subr.bf16.mxu1 %v2599_v41  ;;  %v2626_v41 = vcombine.low %v909_v49, %v913_v38  ;;  %v2627_v51 = vcombine.high %v909_v49, %v913_v38 }
 0x101   : > { %v611_v2 = vmax.f32 %v595_v61, 0.0  ;;  %v575_v3 = vmul.f32 %v2955_v58, %v541_v0  ;;  %v623_v4 = vpack.c.bf16 %v613_v60, %v612_v55  ;;  %v600_v5 = vadd.f32 %v2962_v63, %v577_v62 }
 0x102   : > { %v2669_v6 = vpop.f32.mrf.mxu0 }
 0x103   : > { %v622_v7 = vpack.c.bf16 %v611_v2, %v610_v59  ;;  %v598_v8 = vadd.f32 %v2962_v63, %v575_v3  ;;  %v578_v9 = vmul.f32 %v2669_v6, %v2955_v58  ;;  %1354 = vmatpush1.bf16.msra.mxu1 %v2598_v57  ;;  %v616_v14 = vmax.f32 %v600_v5, 0.0  ;;  %v3016_v57 = vld [vmem:[%s3481_s6] ss:$0 sm:$0xff]  ;;  %v900_v3 = vld [vmem:[#allocation2 + $0x190] sm:$0xff] }
 0x104   : > { %v544_v11 = vpop.f32.mrf.mxu0  ;;  %1355 = vmatprep.subr.bf16.mxu1 %v2591_v1 }
 0x105   : > { %2686 = vmatprep.mubr.msk.bf16.mxu1 %vm658_vm3, %v622_v7  ;;  %v601_v12 = vadd.f32 %v2962_v63, %v578_v9  ;;  %v576_v13 = vmul.f32 %v2955_v58, %v544_v11  ;;  %v614_v15 = vmax.f32 %v598_v8, 0.0  ;;  %v871_v58 = vld [vmem:[#allocation2 + $0xa8] sm:$0xff]  ;;  %v904_v7 = vld [vmem:[#allocation2 + $0x1b0] sm:$0xff]  ;;  %v901_v8 = vld [vmem:[#allocation2 + $0x198] sm:$0xff] }
 0x106   : > { %2687 = vmatmul.mubr.msk.bf16.gmra.mxu1 %vm658_vm3, %v623_v4  ;;  %v2582_v26 = vcombine.low %v867_v24, %v871_v58  ;;  %v2583_v27 = vcombine.high %v867_v24, %v871_v58  ;;  %v905_v9 = vld [vmem:[#allocation2 + $0x1b8] sm:$0xff]  ;;  %v2616_v21 = vcombine.low %v900_v3, %v904_v7 }
 0x107   : > { %v617_v16 = vmax.f32 %v601_v12, 0.0  ;;  %v599_v17 = vadd.f32 %v2962_v63, %v576_v13  ;;  %1356 = vmatpush1.bf16.msra.mxu1 %v2590_v10  ;;  %v858_v63 = vld [vmem:[#allocation2 + $0x40] sm:$0xff]  ;;  %v892_v13 = vld [vmem:[#allocation2 + $0x150] sm:$0xff]  ;;  %v2618_v22 = vcombine.low %v901_v8, %v905_v9 }
 0x108   : > { %1357 = vmatprep.subr.bf16.mxu1 %v2583_v27  ;;  %v2573_v30 = vcombine.high %v858_v63, %v862_v28  ;;  %v2572_v32 = vcombine.low %v858_v63, %v862_v28  ;;  %v884_v27 = vld [vmem:[#allocation2 + $0x110] sm:$0xff] }
 0x109   : > { %v615_v18 = vmax.f32 %v599_v17, 0.0  ;;  %v625_v19 = vpack.c.bf16 %v617_v16, %v616_v14  ;;  %v2619_v16 = vcombine.high %v901_v8, %v905_v9  ;;  %v896_v17 = vld [vmem:[#allocation2 + $0x170] sm:$0xff]  ;;  %v2601_v39 = vcombine.high %v884_v27, %v888_v29  ;;  %v861_v8 = vld [vmem:[#allocation2 + $0x58] sm:$0xff] }
 0x10a   : > { %1246 = vmatprep.subr.bf16.mxu0 %v2573_v30  ;;  %v2609_v58 = vcombine.high %v892_v13, %v896_v17  ;;  %v885_v30 = vld [vmem:[#allocation2 + $0x118] sm:$0xff] }
 0x10b   : > { %v624_v20 = vpack.c.bf16 %v615_v18, %v614_v15  ;;  %1358 = vmatpush1.bf16.msra.mxu1 %v2582_v26  ;;  %1247 = vmatpush1.bf16.msra.mxu0 %v2572_v32  ;;  %v2617_v15 = vcombine.high %v900_v3, %v904_v7  ;;  %v893_v18 = vld [vmem:[#allocation2 + $0x158] sm:$0xff]  ;;  %v2608_v32 = vcombine.low %v892_v13, %v896_v17  ;;  %v864_v7 = vld [vmem:[#allocation2 + $0x70] sm:$0xff] }
 0x10c   : > { %1359 = vmatprep.subr.bf16.mxu1 %v2575_v34  ;;  %1248 = vmatprep.subr.bf16.mxu0 %v2565_v40  ;;  %v2603_v40 = vcombine.high %v885_v30, %v889_v31  ;;  %v865_v9 = vld [vmem:[#allocation2 + $0x78] sm:$0xff] }
 0x10d   : > { %2690 = vmatprep.mubr.msk.bf16.mxu1 %vm658_vm3, %v624_v20 }
 0x10e   : > { %2691 = vmatmul.mubr.msk.bf16.gmra.mxu1 %vm658_vm3, %v625_v19  ;;  %v897_v19 = vld [vmem:[#allocation2 + $0x178] sm:$0xff] }
 0x10f   : > { %1360 = vmatpush1.bf16.msra.mxu1 %v2574_v33  ;;  %1249 = vmatpush1.bf16.msra.mxu0 %v2564_v43  ;;  %v2611_v25 = vcombine.high %v893_v18, %v897_v19  ;;  %v2610_v36 = vcombine.low %v893_v18, %v897_v19  ;;  %v2579_v18 = vcombine.high %v861_v8, %v865_v9  ;;  %v852_v19 = vld [vmem:[#allocation2 + $0x10] sm:$0xff] }
 0x110   : > { %1361 = vmatprep.subr.bf16.mxu1 %v2567_v45  ;;  %1379 = vmatprep.mubr.bf16.mxu1 %v2796_v46  ;;  %v877_v45 = vld [vmem:[#allocation2 + $0xd8] sm:$0xff] }
 0x111   : > { %1460 = vmatprep.subr.bf16.mxu0 %v2625_v35  ;;  %v2602_v35 = vcombine.low %v885_v30, %v889_v31 }
 0x113   : > { %1362 = vmatpush1.bf16.msra.mxu1 %v2566_v44  ;;  %v880_v44 = vld [vmem:[#allocation2 + $0xf0] sm:$0xff] }
 0x114   : > { %1573 = vmatprep.subr.bf16.mxu1 %v2627_v51  ;;  %v2595_v51 = vcombine.high %v877_v45, %v881_v47 }
 0x1b6   : > { %v2680_v52 = vpop.f32.mrf.mxu1 }
 0x1b7   : > { %v789_v4 = vmul.f32 %v2680_v52, %v3010_v53  ;;  %v868_v52 = vld [vmem:[#allocation2 + $0x90] sm:$0xff] }
 0x1b8   : > { %v717_v54 = vpop.f32.mrf.mxu1 }
 0x1b9   : > { %v787_v55 = vmul.f32 %v3010_v53, %v717_v54  ;;  %v812_v20 = vadd.f32 %v3016_v57, %v789_v4 }
 0x1ba   : > { %v2681_v56 = vpop.f32.mrf.mxu1 }
 0x1bb   : > { %v810_v60 = vadd.f32 %v3016_v57, %v787_v55  ;;  %v790_v0 = vmul.f32 %v2681_v56, %v3010_v53  ;;  %v828_v63 = vmax.f32 %v812_v20, 0.0  ;;  %v872_v56 = vld [vmem:[#allocation2 + $0xb0] sm:$0xff] }
 0x1bc   : > { %v720_v59 = vpop.f32.mrf.mxu1  ;;  %v2585_v4 = vcombine.high %v868_v52, %v872_v56 }
 0x1bd   : > { %v788_v61 = vmul.f32 %v3010_v53, %v720_v59  ;;  %v826_v5 = vmax.f32 %v810_v60, 0.0  ;;  %v813_v11 = vadd.f32 %v3016_v57, %v790_v0  ;;  %v869_v59 = vld [vmem:[#allocation2 + $0x98] sm:$0xff] }
 0x1be   : > { %v3020_v62 = vpop.f32.mrf.mxu1  ;;  %v873_v60 = vld [vmem:[#allocation2 + $0xb8] sm:$0xff] }
 0x1bf   : > { %v811_v1 = vadd.f32 %v3016_v57, %v788_v61  ;;  %v829_v23 = vmax.f32 %v813_v11, 0.0  ;;  %v793_v54 = vmul.f32 %v3020_v62, %v3010_v53  ;;  %v2592_v61 = vcombine.low %v876_v42, %v880_v44 }
 0x1c0   : > { %v733_v2 = vpop.f32.mrf.mxu1 }
 0x1c1   : > { %v827_v6 = vmax.f32 %v811_v1, 0.0  ;;  %v791_v28 = vmul.f32 %v3010_v53, %v733_v2  ;;  %v3037_v33 = vpack.c.bf16 %v829_v23, %v828_v63  ;;  %v2594_v2 = vcombine.low %v877_v45, %v881_v47  ;;  %v857_v23 = vld [vmem:[#allocation2 + $0x38] sm:$0xff] }
 0x1c2   : > { %v2685_v10 = vpop.f32.mrf.mxu1  ;;  %v816_v62 = vadd.f32 %v3016_v57, %v793_v54 }
 0x1c3   : > { %v3026_v12 = vpack.c.bf16 %v827_v6, %v826_v5  ;;  %v814_v43 = vadd.f32 %v3016_v57, %v791_v28  ;;  %v794_v48 = vmul.f32 %v2685_v10, %v3010_v53  ;;  %v2587_v5 = vcombine.high %v869_v59, %v873_v60  ;;  %v860_v6 = vld [vmem:[#allocation2 + $0x50] sm:$0xff] }
 0x1c4   : > { %v736_v14 = vpop.f32.mrf.mxu1  ;;  %v2584_v10 = vcombine.low %v868_v52, %v872_v56  ;;  %v2577_v17 = vcombine.high %v860_v6, %v864_v7  ;;  %v832_v20 = vmax.f32 %v816_v62, 0.0 }
 0x1c5   : > { %1267 = vmatmul.mubr.bf16.vlgmr.msra.gmra.mxu0 %v3026_v12  ;;  %1380 = vmatmul.mubr.bf16.vlgmr.msra.gmra.mxu1 %v3026_v12  ;;  %v792_v24 = vmul.f32 %v3010_v53, %v736_v14  ;;  %v830_v55 = vmax.f32 %v814_v43, 0.0  ;;  %v817_v0 = vadd.f32 %v3016_v57, %v794_v48 }
 0x1c6   : > { %1461 = vmatpush1.bf16.msra.mxu0 %v2624_v50  ;;  %1574 = vmatpush1.bf16.msra.mxu1 %v2626_v41  ;;  %v3034_v26 = vpop.f32.mrf.mxu1  ;;  %v2600_v50 = vcombine.low %v884_v27, %v888_v29  ;;  %v2593_v41 = vcombine.high %v876_v42, %v880_v44 }
 0x1c7   : > { %1276 = vmatprep.mubr.bf16.mxu0 %v2796_v46  ;;  %1389 = vmatprep.mubr.bf16.mxu1 %v2796_v46  ;;  %v815_v34 = vadd.f32 %v3016_v57, %v792_v24  ;;  %v833_v11 = vmax.f32 %v817_v0, 0.0  ;;  %v2576_v24 = vcombine.low %v860_v6, %v864_v7 }
 0x1c8   : > { %1462 = vmatprep.subr.bf16.mxu0 %v2617_v15  ;;  %1575 = vmatprep.subr.bf16.mxu1 %v2619_v16  ;;  %v749_v37 = vpop.f32.mrf.mxu1  ;;  %v2586_v15 = vcombine.low %v869_v59, %v873_v60 }
 0x1c9   : > { %v831_v49 = vmax.f32 %v815_v34, 0.0  ;;  %v795_v13 = vmul.f32 %v3010_v53, %v749_v37  ;;  %v797_v34 = vmul.f32 %v3034_v26, %v3010_v53 }
 0x1ca   : > { %1463 = vmatpush1.bf16.msra.mxu0 %v2616_v21  ;;  %1576 = vmatpush1.bf16.msra.mxu1 %v2618_v22  ;;  %v3046_v38 = vpop.f32.mrf.mxu1  ;;  %v856_v21 = vld [vmem:[#allocation2 + $0x30] sm:$0xff]  ;;  %v853_v22 = vld [vmem:[#allocation2 + $0x18] sm:$0xff] }
 0x1cb   : > { %1464 = vmatprep.subr.bf16.mxu0 %v2609_v58  ;;  %1577 = vmatprep.subr.bf16.mxu1 %v2611_v25  ;;  %v3051_v1 = vpack.c.bf16 %v831_v49, %v830_v55  ;;  %v2578_v58 = vcombine.low %v861_v8, %v865_v9  ;;  %v3060_v25 = vpack.c.bf16 %v833_v11, %v832_v20 }
 0x1cc   : > { %v752_v3 = vpop.f32.mrf.mxu1  ;;  %v818_v27 = vadd.f32 %v3016_v57, %v795_v13  ;;  %v2569_v29 = vcombine.high %v852_v19, %v856_v21  ;;  %v2571_v30 = vcombine.high %v853_v22, %v857_v23  ;;  %v2568_v31 = vcombine.low %v852_v19, %v856_v21 }
 0x1cd   : > { %1277 = vmatmul.mubr.bf16.gmra.mxu0 %v3037_v33  ;;  %1390 = vmatmul.mubr.bf16.gmra.mxu1 %v3037_v33  ;;  %v796_v14 = vmul.f32 %v3010_v53, %v752_v3  ;;  %v798_v37 = vmul.f32 %v3046_v38, %v3010_v53  ;;  %v820_v42 = vadd.f32 %v3016_v57, %v797_v34 }
 0x1ce   : > { %1286 = vmatprep.mubr.bf16.mxu0 %v2796_v46  ;;  %1399 = vmatprep.mubr.bf16.mxu1 %v2796_v46  ;;  %v2692_v16 = vpop.f32.mrf.mxu1 }
 0x1cf   : > { %1465 = vmatpush1.bf16.msra.mxu0 %v2608_v32  ;;  %1578 = vmatpush1.bf16.msra.mxu1 %v2610_v36  ;;  %v819_v63 = vadd.f32 %v3016_v57, %v796_v14  ;;  %v2570_v32 = vcombine.low %v853_v22, %v857_v23  ;;  %v834_v36 = vmax.f32 %v818_v27, 0.0  ;;  %v821_v43 = vadd.f32 %v3016_v57, %v798_v37 }
 0x1d0   : > { %1466 = vmatprep.subr.bf16.mxu0 %v2601_v39  ;;  %1579 = vmatprep.subr.bf16.mxu1 %v2603_v40  ;;  %v765_v28 = vpop.f32.mrf.mxu1  ;;  %v836_v26 = vmax.f32 %v820_v42, 0.0 }
 0x1d1   : > { %v835_v39 = vmax.f32 %v819_v63, 0.0  ;;  %v837_v47 = vmax.f32 %v821_v43, 0.0  ;;  %v799_v48 = vmul.f32 %v3010_v53, %v765_v28 }
 0x1d2   : > { %v2693_v40 = vpop.f32.mrf.mxu1 }
 0x1d3   : > { %1467 = vmatpush1.bf16.msra.mxu0 %v2600_v50  ;;  %1580 = vmatpush1.bf16.msra.mxu1 %v2602_v35  ;;  %v846_v44 = vpack.c.bf16 %v835_v39, %v834_v36  ;;  %v847_v50 = vpack.c.bf16 %v837_v47, %v836_v26  ;;  %v822_v35 = vadd.f32 %v3016_v57, %v799_v48 }
 0x1d4   : > { %1468 = vmatprep.subr.bf16.mxu0 %v2593_v41  ;;  %1581 = vmatprep.subr.bf16.mxu1 %v2595_v51  ;;  %v768_v45 = vpop.f32.mrf.mxu1  ;;  %v801_v41 = vmul.f32 %v2692_v16, %v3010_v53  ;;  %v802_v52 = vmul.f32 %v2693_v40, %v3010_v53 }
 0x1d5   : > { %1287 = vmatmul.mubr.bf16.gmra.mxu0 %v3051_v1  ;;  %1400 = vmatmul.mubr.bf16.gmra.mxu1 %v3051_v1  ;;  %v800_v49 = vmul.f32 %v3010_v53, %v768_v45  ;;  %v838_v51 = vmax.f32 %v822_v35, 0.0  ;;  %v1688_v53 = vlaneseq }
 0x1d6   : > { %1296 = vmatprep.mubr.bf16.mxu0 %v2796_v46  ;;  %1409 = vmatprep.mubr.bf16.mxu1 %v2796_v46  ;;  %v824_v55 = vadd.f32 %v3016_v57, %v801_v41  ;;  %v825_v56 = vadd.f32 %v3016_v57, %v802_v52 }
 0x1d7   : > { %1469 = vmatpush1.bf16.msra.mxu0 %v2592_v61  ;;  %1582 = vmatpush1.bf16.msra.mxu1 %v2594_v2  ;;  %v823_v38 = vadd.f32 %v3016_v57, %v800_v49  ;;  %v3112_v57 = vshrl.u32 %v1688_v53, 7 }
 0x1d8   : > { %1470 = vmatprep.subr.bf16.mxu0 %v2585_v4  ;;  %1583 = vmatprep.subr.bf16.mxu1 %v2587_v5  ;;  %v840_v60 = vmax.f32 %v824_v55, 0.0  ;;  %v841_v61 = vmax.f32 %v825_v56, 0.0 }
 0x1d9   : > { %v839_v54 = vmax.f32 %v823_v38, 0.0  ;;  %v1694_v2 = vsub.s32 1, %v3112_v57  ;;  %v1702_v3 = vsub.s32 3, %v3112_v57  ;;  %v1706_v11 = vsub.s32 4, %v3112_v57 }
 0x1da   : > { %v849_v0 = vpack.c.bf16 %v841_v61, %v840_v60  ;;  %v1714_v13 = vsub.s32 6, %v3112_v57  ;;  %v1710_v16 = vsub.s32 5, %v3112_v57 }
 0x1db   : > { %1471 = vmatpush1.bf16.msra.mxu0 %v2584_v10  ;;  %1584 = vmatpush1.bf16.msra.mxu1 %v2586_v15  ;;  %v848_v59 = vpack.c.bf16 %v839_v54, %v838_v51 }
 0x1dc   : > { %1472 = vmatprep.subr.bf16.mxu0 %v2577_v17  ;;  %1585 = vmatprep.subr.bf16.mxu1 %v2579_v18  ;;  %v1718_v17 = vsub.s32 7, %v3112_v57 }
 0x1dd   : > { %1297 = vmatmul.mubr.bf16.gmra.mxu0 %v3060_v25  ;;  %1410 = vmatmul.mubr.bf16.gmra.mxu1 %v3060_v25 }
 0x1de   : > { %1306 = vmatprep.mubr.bf16.mxu0 %v2796_v46  ;;  %1419 = vmatprep.mubr.bf16.mxu1 %v2796_v46 }
 0x1df   : > { %1473 = vmatpush1.bf16.msra.mxu0 %v2576_v24  ;;  %1586 = vmatpush1.bf16.msra.mxu1 %v2578_v58  ;;  %v2797_v24 = vmov 1966171168  }
 0x1e0   : > { %1474 = vmatprep.subr.bf16.mxu0 %v2569_v29  ;;  %1587 = vmatprep.subr.bf16.mxu1 %v2571_v30  ;;  %v3154_v58 = vunpack.c.l.s4 %v2797_v24 }
 0x1e2   : > { %v2340_v47 = vunpack.c.0.s8 %v3154_v58 }
 0x1e3   : > { %1475 = vmatpush1.bf16.msra.mxu0 %v2568_v31  ;;  %1588 = vmatpush1.bf16.msra.mxu1 %v2570_v32 }
 0x1e5   : > { %1307 = vmatmul.mubr.bf16.gmra.mxu0 %v846_v44  ;;  %1420 = vmatmul.mubr.bf16.gmra.mxu1 %v846_v44 }
 0x1e6   : > { %1316 = vmatprep.mubr.bf16.mxu0 %v2796_v46  ;;  %1429 = vmatprep.mubr.bf16.mxu1 %v2796_v46 }
 0x1ed   : > { %1317 = vmatmul.mubr.bf16.gmra.mxu0 %v847_v50  ;;  %1430 = vmatmul.mubr.bf16.gmra.mxu1 %v847_v50 }
 0x1ee   : > { %1326 = vmatprep.mubr.bf16.mxu0 %v2796_v46  ;;  %1439 = vmatprep.mubr.bf16.mxu1 %v2796_v46 }
 0x1f5   : > { %1327 = vmatmul.mubr.bf16.gmra.mxu0 %v848_v59  ;;  %1440 = vmatmul.mubr.bf16.gmra.mxu1 %v848_v59 }
 0x1f6   : > { %1336 = vmatprep.mubr.bf16.mxu0 %v2796_v46  ;;  %1449 = vmatprep.mubr.bf16.mxu1 %v2796_v46 }
 0x1fd   : > { %1337 = vmatmul.mubr.bf16.gmra.mxu0 %v849_v0  ;;  %1450 = vmatmul.mubr.bf16.gmra.mxu1 %v849_v0 }
 0x1fe   : > { %1492 = vmatprep.mubr.bf16.mxu0 %v2796_v46  ;;  %1605 = vmatprep.mubr.bf16.mxu1 %v2796_v46 }
 0x205   : > { %1493 = vmatmul.mubr.bf16.vlgmr.msra.gmra.mxu0 %v3026_v12  ;;  %1606 = vmatmul.mubr.bf16.vlgmr.msra.gmra.mxu1 %v3026_v12  ;;  %v1690_v12 = vsub.s32 0, %v3112_v57 }
 0x206   : > { %1502 = vmatprep.mubr.bf16.mxu0 %v2796_v46  ;;  %1615 = vmatprep.mubr.bf16.mxu1 %v2796_v46 }
 0x20d   : > { %1503 = vmatmul.mubr.bf16.gmra.mxu0 %v3037_v33  ;;  %1616 = vmatmul.mubr.bf16.gmra.mxu1 %v3037_v33  ;;  %v1698_v33 = vsub.s32 2, %v3112_v57 }
 0x20e   : > { %1512 = vmatprep.mubr.bf16.mxu0 %v2796_v46  ;;  %1625 = vmatprep.mubr.bf16.mxu1 %v2796_v46 }
 0x215   : > { %1513 = vmatmul.mubr.bf16.gmra.mxu0 %v3051_v1  ;;  %1626 = vmatmul.mubr.bf16.gmra.mxu1 %v3051_v1  ;;  %v1686_v1 = vld [vmem:[%s3483_s8] sm:$0xff] }
 0x216   : > { %1522 = vmatprep.mubr.bf16.mxu0 %v2796_v46  ;;  %1635 = vmatprep.mubr.bf16.mxu1 %v2796_v46  ;;  %v3126_v4 = vrot.slane %v1686_v1, %v1690_v12  ;;  %v3128_v5 = vrot.slane %v1686_v1, %v1698_v33  ;;  %v3133_v62 = vrot.slane %v1686_v1, %v1694_v2 }
 0x217   : > { %v3135_v7 = vrot.slane %v1686_v1, %v1702_v3  ;;  %v3158_v29 = vrot.slane %v1686_v1, %v1706_v11  ;;  %v3160_v30 = vrot.slane %v1686_v1, %v1714_v13  ;;  %v3168_v34 = vrot.slane %v1686_v1, %v1710_v16 }
 0x218   : > { %v3172_v36 = vrot.slane %v1686_v1, %v1718_v17 }
 0x21d   : > { %1523 = vmatmul.mubr.bf16.gmra.mxu0 %v3060_v25  ;;  %1636 = vmatmul.mubr.bf16.gmra.mxu1 %v3060_v25 }
 0x21e   : > { %1532 = vmatprep.mubr.bf16.mxu0 %v2796_v46  ;;  %1645 = vmatprep.mubr.bf16.mxu1 %v2796_v46 }
 0x225   : > { %1533 = vmatmul.mubr.bf16.gmra.mxu0 %v846_v44  ;;  %1646 = vmatmul.mubr.bf16.gmra.mxu1 %v846_v44 }
 0x226   : > { %1542 = vmatprep.mubr.bf16.mxu0 %v2796_v46  ;;  %1655 = vmatprep.mubr.bf16.mxu1 %v2796_v46 }
 0x22d   : > { %1543 = vmatmul.mubr.bf16.gmra.mxu0 %v847_v50  ;;  %1656 = vmatmul.mubr.bf16.gmra.mxu1 %v847_v50 }
 0x22e   : > { %1552 = vmatprep.mubr.bf16.mxu0 %v2796_v46  ;;  %1665 = vmatprep.mubr.bf16.mxu1 %v2796_v46 }
 0x235   : > { %1553 = vmatmul.mubr.bf16.gmra.mxu0 %v848_v59  ;;  %1666 = vmatmul.mubr.bf16.gmra.mxu1 %v848_v59 }
 0x236   : > { %1562 = vmatprep.mubr.bf16.mxu0 %v2796_v46  ;;  %1675 = vmatprep.mubr.bf16.mxu1 %v2796_v46  ;;  %v3124_v46 = vld [vmem:[%s3484_s9] sm:$0xff] }
 0x237   : > { %v3131_v6 = vrot.slane %v3124_v46, %v1690_v12  ;;  %v3138_v10 = vrot.slane %v3124_v46, %v1698_v33  ;;  %v3147_v19 = vrot.slane %v3124_v46, %v1694_v2  ;;  %v3150_v21 = vrot.slane %v3124_v46, %v1702_v3 }
 0x238   : > { %v3163_v31 = vrot.slane %v3124_v46, %v1706_v11  ;;  %v3166_v32 = vrot.slane %v3124_v46, %v1714_v13  ;;  %v3182_v48 = vrot.slane %v3124_v46, %v1710_v16 }
 0x23d   : > { %1563 = vmatmul.mubr.bf16.gmra.mxu0 %v849_v0  ;;  %1676 = vmatmul.mubr.bf16.gmra.mxu1 %v849_v0 }
 0x285   : > { %v1268_v8 = vpop.f32.mrf.mxu0  ;;  %v1381_v9 = vpop.f32.mrf.mxu1 }
 0x286   : > { %v1728_v14 = vmul.f32 %v3126_v4, %v1268_v8  ;;  %v1730_v15 = vmul.f32 %v3128_v5, %v1381_v9 }
 0x287   : > { %v1270_v18 = vpop.f32.mrf.mxu0  ;;  %v1383_v20 = vpop.f32.mrf.mxu1 }
 0x288   : > { %v1729_v22 = vmul.f32 %v3133_v62, %v1270_v18  ;;  %v1731_v23 = vmul.f32 %v3135_v7, %v1383_v20  ;;  %v1898_v25 = vadd.f32 %v3131_v6, %v1728_v14  ;;  %v1900_v27 = vadd.f32 %v3138_v10, %v1730_v15 }
 0x289   : > { %v1272_v63 = vpop.f32.mrf.mxu0  ;;  %v1385_v28 = vpop.f32.mrf.mxu1 }
 0x28a   : > { %v1899_v37 = vadd.f32 %v3147_v19, %v1729_v22  ;;  %v1901_v39 = vadd.f32 %v3150_v21, %v1731_v23  ;;  %v1736_v40 = vmul.f32 %v3126_v4, %v1272_v63  ;;  %v1738_v42 = vmul.f32 %v3128_v5, %v1385_v28 }
 0x28b   : > { %v1274_v43 = vpop.f32.mrf.mxu0  ;;  %v1387_v44 = vpop.f32.mrf.mxu1  ;;  %v2026_v49 = vmax.f32 %v1898_v25, 0.0  ;;  %v2028_v50 = vmax.f32 %v1900_v27, 0.0 }
 0x28c   : > { %v1737_v45 = vmul.f32 %v3133_v62, %v1274_v43  ;;  %v1739_v26 = vmul.f32 %v3135_v7, %v1387_v44  ;;  %v1906_v35 = vadd.f32 %v3131_v6, %v1736_v40  ;;  %v1908_v38 = vadd.f32 %v3138_v10, %v1738_v42 }
 0x28d   : > { %v1278_v41 = vpop.f32.mrf.mxu0  ;;  %v1391_v51 = vpop.f32.mrf.mxu1  ;;  %v2027_v59 = vmax.f32 %v1899_v37, 0.0  ;;  %v2029_v60 = vmax.f32 %v1901_v39, 0.0 }
 0x28e   : > { %v1907_v52 = vadd.f32 %v3147_v19, %v1737_v45  ;;  %v1909_v54 = vadd.f32 %v3150_v21, %v1739_v26  ;;  %v1744_v55 = vmul.f32 %v3126_v4, %v1278_v41  ;;  %v1746_v56 = vmul.f32 %v3128_v5, %v1391_v51 }
 0x28f   : > { %v2034_v61 = vmax.f32 %v1906_v35, 0.0  ;;  %v2036_v0 = vmax.f32 %v1908_v38, 0.0  ;;  %v1280_v53 = vpop.f32.mrf.mxu0  ;;  %v1393_v12 = vpop.f32.mrf.mxu1 }
 0x290   : > { %v2035_v33 = vmax.f32 %v1907_v52, 0.0  ;;  %v2037_v1 = vmax.f32 %v1909_v54, 0.0  ;;  %v1914_v2 = vadd.f32 %v3131_v6, %v1744_v55  ;;  %v1916_v3 = vadd.f32 %v3138_v10, %v1746_v56 }
 0x291   : > { %v2154_v8 = vmax.f32 %v2026_v49, %v2034_v61  ;;  %v2196_v9 = vmax.f32 %v2028_v50, %v2036_v0  ;;  %v1745_v11 = vmul.f32 %v3133_v62, %v1280_v53  ;;  %v1747_v13 = vmul.f32 %v3135_v7, %v1393_v12  ;;  %v1282_v14 = vpop.f32.mrf.mxu0  ;;  %v1395_v15 = vpop.f32.mrf.mxu1 }
 0x292   : > { %v2175_v16 = vmax.f32 %v2027_v59, %v2035_v33  ;;  %v2217_v18 = vmax.f32 %v2029_v60, %v2037_v1  ;;  %v2042_v20 = vmax.f32 %v1914_v2, 0.0  ;;  %v2044_v22 = vmax.f32 %v1916_v3, 0.0 }
 0x293   : > { %v1915_v23 = vadd.f32 %v3147_v19, %v1745_v11  ;;  %v1917_v24 = vadd.f32 %v3150_v21, %v1747_v13  ;;  %v1752_v25 = vmul.f32 %v3126_v4, %v1282_v14  ;;  %v1754_v27 = vmul.f32 %v3128_v5, %v1395_v15  ;;  %v1284_v63 = vpop.f32.mrf.mxu0  ;;  %v1397_v28 = vpop.f32.mrf.mxu1 }
 0x294   : > { %v2155_v37 = vmax.f32 %v2154_v8, %v2042_v20  ;;  %v2197_v39 = vmax.f32 %v2196_v9, %v2044_v22  ;;  %v1753_v40 = vmul.f32 %v3133_v62, %v1284_v63  ;;  %v1755_v42 = vmul.f32 %v3135_v7, %v1397_v28 }
 0x295   : > { %v2043_v43 = vmax.f32 %v1915_v23, 0.0  ;;  %v2045_v44 = vmax.f32 %v1917_v24, 0.0  ;;  %v1922_v45 = vadd.f32 %v3131_v6, %v1752_v25  ;;  %v1924_v26 = vadd.f32 %v3138_v10, %v1754_v27  ;;  %v1288_v49 = vpop.f32.mrf.mxu0  ;;  %v1401_v50 = vpop.f32.mrf.mxu1 }
 0x296   : > { %v1923_v35 = vadd.f32 %v3147_v19, %v1753_v40  ;;  %v1925_v38 = vadd.f32 %v3150_v21, %v1755_v42  ;;  %v1760_v41 = vmul.f32 %v3126_v4, %v1288_v49  ;;  %v1762_v51 = vmul.f32 %v3128_v5, %v1401_v50 }
 0x297   : > { %v2176_v52 = vmax.f32 %v2175_v16, %v2043_v43  ;;  %v2218_v54 = vmax.f32 %v2217_v18, %v2045_v44  ;;  %v2050_v55 = vmax.f32 %v1922_v45, 0.0  ;;  %v2052_v56 = vmax.f32 %v1924_v26, 0.0  ;;  %v1290_v59 = vpop.f32.mrf.mxu0  ;;  %v1403_v60 = vpop.f32.mrf.mxu1 }
 0x298   : > { %v2051_v61 = vmax.f32 %v1923_v35, 0.0  ;;  %v2053_v0 = vmax.f32 %v1925_v38, 0.0  ;;  %v1930_v53 = vadd.f32 %v3131_v6, %v1760_v41  ;;  %v1932_v12 = vadd.f32 %v3138_v10, %v1762_v51 }
 0x299   : > { %v2156_v33 = vmax.f32 %v2155_v37, %v2050_v55  ;;  %v2198_v1 = vmax.f32 %v2197_v39, %v2052_v56  ;;  %v1761_v2 = vmul.f32 %v3133_v62, %v1290_v59  ;;  %v1763_v3 = vmul.f32 %v3135_v7, %v1403_v60  ;;  %v1292_v8 = vpop.f32.mrf.mxu0  ;;  %v1405_v9 = vpop.f32.mrf.mxu1 }
 0x29a   : > { %v2177_v11 = vmax.f32 %v2176_v52, %v2051_v61  ;;  %v2219_v13 = vmax.f32 %v2218_v54, %v2053_v0  ;;  %v2058_v14 = vmax.f32 %v1930_v53, 0.0  ;;  %v2060_v15 = vmax.f32 %v1932_v12, 0.0 }
 0x29b   : > { %v1931_v16 = vadd.f32 %v3147_v19, %v1761_v2  ;;  %v1933_v18 = vadd.f32 %v3150_v21, %v1763_v3  ;;  %v1768_v20 = vmul.f32 %v3126_v4, %v1292_v8  ;;  %v1770_v22 = vmul.f32 %v3128_v5, %v1405_v9  ;;  %v1294_v23 = vpop.f32.mrf.mxu0  ;;  %v1407_v24 = vpop.f32.mrf.mxu1 }
 0x29c   : > { %v2157_v25 = vmax.f32 %v2156_v33, %v2058_v14  ;;  %v2199_v27 = vmax.f32 %v2198_v1, %v2060_v15  ;;  %v1769_v63 = vmul.f32 %v3133_v62, %v1294_v23  ;;  %v1771_v28 = vmul.f32 %v3135_v7, %v1407_v24 }
 0x29d   : > { %v2059_v37 = vmax.f32 %v1931_v16, 0.0  ;;  %v2061_v39 = vmax.f32 %v1933_v18, 0.0  ;;  %v1938_v40 = vadd.f32 %v3131_v6, %v1768_v20  ;;  %v1940_v42 = vadd.f32 %v3138_v10, %v1770_v22  ;;  %v1298_v43 = vpop.f32.mrf.mxu0  ;;  %v1411_v44 = vpop.f32.mrf.mxu1 }
 0x29e   : > { %v1939_v45 = vadd.f32 %v3147_v19, %v1769_v63  ;;  %v1941_v26 = vadd.f32 %v3150_v21, %v1771_v28  ;;  %v1776_v49 = vmul.f32 %v3126_v4, %v1298_v43  ;;  %v1778_v50 = vmul.f32 %v3128_v5, %v1411_v44 }
 0x29f   : > { %v2178_v35 = vmax.f32 %v2177_v11, %v2059_v37  ;;  %v2220_v38 = vmax.f32 %v2219_v13, %v2061_v39  ;;  %v2066_v41 = vmax.f32 %v1938_v40, 0.0  ;;  %v2068_v51 = vmax.f32 %v1940_v42, 0.0  ;;  %v1300_v52 = vpop.f32.mrf.mxu0  ;;  %v1413_v54 = vpop.f32.mrf.mxu1 }
 0x2a0   : > { %v2067_v55 = vmax.f32 %v1939_v45, 0.0  ;;  %v2069_v56 = vmax.f32 %v1941_v26, 0.0  ;;  %v1946_v59 = vadd.f32 %v3131_v6, %v1776_v49  ;;  %v1948_v60 = vadd.f32 %v3138_v10, %v1778_v50 }
 0x2a1   : > { %v2158_v61 = vmax.f32 %v2157_v25, %v2066_v41  ;;  %v2200_v0 = vmax.f32 %v2199_v27, %v2068_v51  ;;  %v1777_v53 = vmul.f32 %v3133_v62, %v1300_v52  ;;  %v1779_v12 = vmul.f32 %v3135_v7, %v1413_v54  ;;  %v1302_v33 = vpop.f32.mrf.mxu0  ;;  %v1415_v1 = vpop.f32.mrf.mxu1 }
 0x2a2   : > { %v2179_v2 = vmax.f32 %v2178_v35, %v2067_v55  ;;  %v2221_v3 = vmax.f32 %v2220_v38, %v2069_v56  ;;  %v2074_v8 = vmax.f32 %v1946_v59, 0.0  ;;  %v2076_v9 = vmax.f32 %v1948_v60, 0.0 }
 0x2a3   : > { %v1947_v11 = vadd.f32 %v3147_v19, %v1777_v53  ;;  %v1949_v13 = vadd.f32 %v3150_v21, %v1779_v12  ;;  %v1784_v14 = vmul.f32 %v3126_v4, %v1302_v33  ;;  %v1786_v15 = vmul.f32 %v3128_v5, %v1415_v1  ;;  %v1304_v16 = vpop.f32.mrf.mxu0  ;;  %v1417_v18 = vpop.f32.mrf.mxu1 }
 0x2a4   : > { %v2159_v20 = vmax.f32 %v2158_v61, %v2074_v8  ;;  %v2201_v22 = vmax.f32 %v2200_v0, %v2076_v9  ;;  %v1785_v23 = vmul.f32 %v3133_v62, %v1304_v16  ;;  %v1787_v24 = vmul.f32 %v3135_v7, %v1417_v18 }
 0x2a5   : > { %v2075_v25 = vmax.f32 %v1947_v11, 0.0  ;;  %v2077_v27 = vmax.f32 %v1949_v13, 0.0  ;;  %v1954_v63 = vadd.f32 %v3131_v6, %v1784_v14  ;;  %v1956_v28 = vadd.f32 %v3138_v10, %v1786_v15  ;;  %v1308_v37 = vpop.f32.mrf.mxu0  ;;  %v1421_v39 = vpop.f32.mrf.mxu1 }
 0x2a6   : > { %v1955_v40 = vadd.f32 %v3147_v19, %v1785_v23  ;;  %v1957_v42 = vadd.f32 %v3150_v21, %v1787_v24  ;;  %v1792_v43 = vmul.f32 %v3126_v4, %v1308_v37  ;;  %v1794_v44 = vmul.f32 %v3128_v5, %v1421_v39 }
 0x2a7   : > { %v2180_v45 = vmax.f32 %v2179_v2, %v2075_v25  ;;  %v2222_v26 = vmax.f32 %v2221_v3, %v2077_v27  ;;  %v2082_v49 = vmax.f32 %v1954_v63, 0.0  ;;  %v2084_v50 = vmax.f32 %v1956_v28, 0.0  ;;  %v1310_v35 = vpop.f32.mrf.mxu0  ;;  %v1423_v38 = vpop.f32.mrf.mxu1 }
 0x2a8   : > { %v2083_v41 = vmax.f32 %v1955_v40, 0.0  ;;  %v2085_v51 = vmax.f32 %v1957_v42, 0.0  ;;  %v1962_v52 = vadd.f32 %v3131_v6, %v1792_v43  ;;  %v1964_v54 = vadd.f32 %v3138_v10, %v1794_v44 }
 0x2a9   : > { %v2160_v55 = vmax.f32 %v2159_v20, %v2082_v49  ;;  %v2202_v56 = vmax.f32 %v2201_v22, %v2084_v50  ;;  %v1793_v59 = vmul.f32 %v3133_v62, %v1310_v35  ;;  %v1795_v60 = vmul.f32 %v3135_v7, %v1423_v38  ;;  %v1312_v61 = vpop.f32.mrf.mxu0  ;;  %v1425_v0 = vpop.f32.mrf.mxu1 }
 0x2aa   : > { %v2181_v53 = vmax.f32 %v2180_v45, %v2083_v41  ;;  %v2223_v12 = vmax.f32 %v2222_v26, %v2085_v51  ;;  %v2090_v33 = vmax.f32 %v1962_v52, 0.0  ;;  %v2092_v1 = vmax.f32 %v1964_v54, 0.0 }
 0x2ab   : > { %v1963_v2 = vadd.f32 %v3147_v19, %v1793_v59  ;;  %v1965_v3 = vadd.f32 %v3150_v21, %v1795_v60  ;;  %v1800_v8 = vmul.f32 %v3126_v4, %v1312_v61  ;;  %v1802_v9 = vmul.f32 %v3128_v5, %v1425_v0  ;;  %v1314_v11 = vpop.f32.mrf.mxu0  ;;  %v1427_v13 = vpop.f32.mrf.mxu1 }
 0x2ac   : > { %v2161_v14 = vmax.f32 %v2160_v55, %v2090_v33  ;;  %v2203_v15 = vmax.f32 %v2202_v56, %v2092_v1  ;;  %v1801_v16 = vmul.f32 %v3133_v62, %v1314_v11  ;;  %v1803_v18 = vmul.f32 %v3135_v7, %v1427_v13 }
 0x2ad   : > { %v2091_v20 = vmax.f32 %v1963_v2, 0.0  ;;  %v2093_v22 = vmax.f32 %v1965_v3, 0.0  ;;  %v1970_v23 = vadd.f32 %v3131_v6, %v1800_v8  ;;  %v1972_v24 = vadd.f32 %v3138_v10, %v1802_v9  ;;  %v1318_v25 = vpop.f32.mrf.mxu0  ;;  %v1431_v27 = vpop.f32.mrf.mxu1 }
 0x2ae   : > { %v1971_v63 = vadd.f32 %v3147_v19, %v1801_v16  ;;  %v1973_v28 = vadd.f32 %v3150_v21, %v1803_v18  ;;  %v1808_v37 = vmul.f32 %v3126_v4, %v1318_v25  ;;  %v1810_v39 = vmul.f32 %v3128_v5, %v1431_v27 }
 0x2af   : > { %v2182_v40 = vmax.f32 %v2181_v53, %v2091_v20  ;;  %v2224_v42 = vmax.f32 %v2223_v12, %v2093_v22  ;;  %v2098_v43 = vmax.f32 %v1970_v23, 0.0  ;;  %v2100_v44 = vmax.f32 %v1972_v24, 0.0  ;;  %v1320_v45 = vpop.f32.mrf.mxu0  ;;  %v1433_v26 = vpop.f32.mrf.mxu1 }
 0x2b0   : > { %v2099_v49 = vmax.f32 %v1971_v63, 0.0  ;;  %v2101_v50 = vmax.f32 %v1973_v28, 0.0  ;;  %v1978_v35 = vadd.f32 %v3131_v6, %v1808_v37  ;;  %v1980_v38 = vadd.f32 %v3138_v10, %v1810_v39 }
 0x2b1   : > { %v2162_v41 = vmax.f32 %v2161_v14, %v2098_v43  ;;  %v2204_v51 = vmax.f32 %v2203_v15, %v2100_v44  ;;  %v1809_v52 = vmul.f32 %v3133_v62, %v1320_v45  ;;  %v1811_v54 = vmul.f32 %v3135_v7, %v1433_v26  ;;  %v1322_v55 = vpop.f32.mrf.mxu0  ;;  %v1435_v56 = vpop.f32.mrf.mxu1 }
 0x2b2   : > { %v2183_v59 = vmax.f32 %v2182_v40, %v2099_v49  ;;  %v2225_v60 = vmax.f32 %v2224_v42, %v2101_v50  ;;  %v2106_v61 = vmax.f32 %v1978_v35, 0.0  ;;  %v2108_v0 = vmax.f32 %v1980_v38, 0.0 }
 0x2b3   : > { %v1979_v53 = vadd.f32 %v3147_v19, %v1809_v52  ;;  %v1981_v12 = vadd.f32 %v3150_v21, %v1811_v54  ;;  %v1816_v33 = vmul.f32 %v3126_v4, %v1322_v55  ;;  %v1818_v1 = vmul.f32 %v3128_v5, %v1435_v56  ;;  %v1324_v2 = vpop.f32.mrf.mxu0  ;;  %v1437_v3 = vpop.f32.mrf.mxu1 }
 0x2b4   : > { %v2163_v8 = vmax.f32 %v2162_v41, %v2106_v61  ;;  %v2205_v9 = vmax.f32 %v2204_v51, %v2108_v0  ;;  %v1817_v11 = vmul.f32 %v3133_v62, %v1324_v2  ;;  %v1819_v13 = vmul.f32 %v3135_v7, %v1437_v3 }
 0x2b5   : > { %v2107_v14 = vmax.f32 %v1979_v53, 0.0  ;;  %v2109_v15 = vmax.f32 %v1981_v12, 0.0  ;;  %v1986_v16 = vadd.f32 %v3131_v6, %v1816_v33  ;;  %v1988_v18 = vadd.f32 %v3138_v10, %v1818_v1  ;;  %v1328_v20 = vpop.f32.mrf.mxu0  ;;  %v1441_v22 = vpop.f32.mrf.mxu1 }
 0x2b6   : > { %v1987_v23 = vadd.f32 %v3147_v19, %v1817_v11  ;;  %v1989_v24 = vadd.f32 %v3150_v21, %v1819_v13  ;;  %v1824_v25 = vmul.f32 %v3126_v4, %v1328_v20  ;;  %v1826_v27 = vmul.f32 %v3128_v5, %v1441_v22 }
 0x2b7   : > { %v2184_v63 = vmax.f32 %v2183_v59, %v2107_v14  ;;  %v2226_v28 = vmax.f32 %v2225_v60, %v2109_v15  ;;  %v2114_v37 = vmax.f32 %v1986_v16, 0.0  ;;  %v2116_v39 = vmax.f32 %v1988_v18, 0.0  ;;  %v1330_v40 = vpop.f32.mrf.mxu0  ;;  %v1443_v42 = vpop.f32.mrf.mxu1 }
 0x2b8   : > { %v2115_v43 = vmax.f32 %v1987_v23, 0.0  ;;  %v2117_v44 = vmax.f32 %v1989_v24, 0.0  ;;  %v1994_v45 = vadd.f32 %v3131_v6, %v1824_v25  ;;  %v1996_v26 = vadd.f32 %v3138_v10, %v1826_v27 }
 0x2b9   : > { %v2164_v49 = vmax.f32 %v2163_v8, %v2114_v37  ;;  %v2206_v50 = vmax.f32 %v2205_v9, %v2116_v39  ;;  %v1825_v35 = vmul.f32 %v3133_v62, %v1330_v40  ;;  %v1827_v38 = vmul.f32 %v3135_v7, %v1443_v42  ;;  %v1332_v41 = vpop.f32.mrf.mxu0  ;;  %v1445_v51 = vpop.f32.mrf.mxu1 }
 0x2ba   : > { %v2185_v52 = vmax.f32 %v2184_v63, %v2115_v43  ;;  %v2227_v54 = vmax.f32 %v2226_v28, %v2117_v44  ;;  %v2122_v55 = vmax.f32 %v1994_v45, 0.0  ;;  %v2124_v56 = vmax.f32 %v1996_v26, 0.0 }
 0x2bb   : > { %v1995_v59 = vadd.f32 %v3147_v19, %v1825_v35  ;;  %v1997_v60 = vadd.f32 %v3150_v21, %v1827_v38  ;;  %v1832_v61 = vmul.f32 %v3126_v4, %v1332_v41  ;;  %v1834_v0 = vmul.f32 %v3128_v5, %v1445_v51  ;;  %v1334_v53 = vpop.f32.mrf.mxu0  ;;  %v1447_v12 = vpop.f32.mrf.mxu1 }
 0x2bc   : > { %v2165_v33 = vmax.f32 %v2164_v49, %v2122_v55  ;;  %v2207_v1 = vmax.f32 %v2206_v50, %v2124_v56  ;;  %v1833_v2 = vmul.f32 %v3133_v62, %v1334_v53  ;;  %v1835_v3 = vmul.f32 %v3135_v7, %v1447_v12 }
 0x2bd   : > { %v2123_v8 = vmax.f32 %v1995_v59, 0.0  ;;  %v2125_v9 = vmax.f32 %v1997_v60, 0.0  ;;  %v2002_v11 = vadd.f32 %v3131_v6, %v1832_v61  ;;  %v2004_v13 = vadd.f32 %v3138_v10, %v1834_v0  ;;  %v1338_v14 = vpop.f32.mrf.mxu0  ;;  %v1451_v15 = vpop.f32.mrf.mxu1 }
 0x2be   : > { %v2003_v16 = vadd.f32 %v3147_v19, %v1833_v2  ;;  %v2005_v18 = vadd.f32 %v3150_v21, %v1835_v3  ;;  %v1840_v20 = vmul.f32 %v3126_v4, %v1338_v14  ;;  %v1842_v22 = vmul.f32 %v3128_v5, %v1451_v15 }
 0x2bf   : > { %v2186_v23 = vmax.f32 %v2185_v52, %v2123_v8  ;;  %v2228_v24 = vmax.f32 %v2227_v54, %v2125_v9  ;;  %v2130_v25 = vmax.f32 %v2002_v11, 0.0  ;;  %v2132_v27 = vmax.f32 %v2004_v13, 0.0  ;;  %v1340_v63 = vpop.f32.mrf.mxu0  ;;  %v1453_v28 = vpop.f32.mrf.mxu1 }
 0x2c0   : > { %v2131_v37 = vmax.f32 %v2003_v16, 0.0  ;;  %v2133_v39 = vmax.f32 %v2005_v18, 0.0  ;;  %v2010_v40 = vadd.f32 %v3131_v6, %v1840_v20  ;;  %v2012_v42 = vadd.f32 %v3138_v10, %v1842_v22 }
 0x2c1   : > { %v2166_v43 = vmax.f32 %v2165_v33, %v2130_v25  ;;  %v2208_v44 = vmax.f32 %v2207_v1, %v2132_v27  ;;  %v1841_v45 = vmul.f32 %v3133_v62, %v1340_v63  ;;  %v1843_v26 = vmul.f32 %v3135_v7, %v1453_v28  ;;  %v1342_v49 = vpop.f32.mrf.mxu0  ;;  %v1455_v50 = vpop.f32.mrf.mxu1 }
 0x2c2   : > { %v2187_v35 = vmax.f32 %v2186_v23, %v2131_v37  ;;  %v2229_v38 = vmax.f32 %v2228_v24, %v2133_v39  ;;  %v2138_v41 = vmax.f32 %v2010_v40, 0.0  ;;  %v2140_v51 = vmax.f32 %v2012_v42, 0.0 }
 0x2c3   : > { %v2011_v52 = vadd.f32 %v3147_v19, %v1841_v45  ;;  %v2013_v54 = vadd.f32 %v3150_v21, %v1843_v26  ;;  %v1848_v55 = vmul.f32 %v3126_v4, %v1342_v49  ;;  %v1850_v56 = vmul.f32 %v3128_v5, %v1455_v50  ;;  %v1344_v59 = vpop.f32.mrf.mxu0  ;;  %v1457_v60 = vpop.f32.mrf.mxu1 }
 0x2c4   : > { %v2167_v61 = vmax.f32 %v2166_v43, %v2138_v41  ;;  %v2209_v0 = vmax.f32 %v2208_v44, %v2140_v51  ;;  %v1849_v53 = vmul.f32 %v3133_v62, %v1344_v59  ;;  %v1851_v12 = vmul.f32 %v3135_v7, %v1457_v60 }
 0x2c5   : > { %v2139_v33 = vmax.f32 %v2011_v52, 0.0  ;;  %v2141_v1 = vmax.f32 %v2013_v54, 0.0  ;;  %v2018_v2 = vadd.f32 %v3131_v6, %v1848_v55  ;;  %v2020_v3 = vadd.f32 %v3138_v10, %v1850_v56  ;;  %v1494_v8 = vpop.f32.mrf.mxu0  ;;  %v1607_v9 = vpop.f32.mrf.mxu1 }
 0x2c6   : > { %v2019_v4 = vadd.f32 %v3147_v19, %v1849_v53  ;;  %v2021_v5 = vadd.f32 %v3150_v21, %v1851_v12  ;;  %v1732_v11 = vmul.f32 %v3158_v29, %v1494_v8  ;;  %v1734_v13 = vmul.f32 %v3160_v30, %v1607_v9 }
 0x2c7   : > { %v2188_v14 = vmax.f32 %v2187_v35, %v2139_v33  ;;  %v2230_v62 = vmax.f32 %v2229_v38, %v2141_v1  ;;  %v2146_v15 = vmax.f32 %v2018_v2, 0.0  ;;  %v2148_v7 = vmax.f32 %v2020_v3, 0.0  ;;  %v1496_v16 = vpop.f32.mrf.mxu0  ;;  %v1609_v18 = vpop.f32.mrf.mxu1 }
 0x2c8   : > { %v2147_v20 = vmax.f32 %v2019_v4, 0.0  ;;  %v2149_v6 = vmax.f32 %v2021_v5, 0.0  ;;  %v1902_v10 = vadd.f32 %v3163_v31, %v1732_v11  ;;  %v3306_v19 = vrot.slane %v3124_v46, %v1718_v17 }
 0x2c9   : > { %v2168_v21 = vmax.f32 %v2167_v61, %v2146_v15  ;;  %v2210_v22 = vmax.f32 %v2209_v0, %v2148_v7  ;;  %v1733_v23 = vmul.f32 %v3168_v34, %v1496_v16  ;;  %v1735_v24 = vmul.f32 %v3172_v36, %v1609_v18  ;;  %v1498_v25 = vpop.f32.mrf.mxu0  ;;  %v1611_v27 = vpop.f32.mrf.mxu1 }
 0x2ca   : > { %v2189_v63 = vmax.f32 %v2188_v14, %v2147_v20  ;;  %v3313_v28 = vsub.s32 %v2340_v47, %v3112_v57  ;;  %v2231_v37 = vmax.f32 %v2230_v62, %v2149_v6  ;;  %v2030_v42 = vmax.f32 %v1902_v10, 0.0 }
 0x2cb   : > { %v2169_v39 = vrot.slane %v2168_v21, 4  ;;  %v2211_v40 = vrot.slane %v2210_v22, 4  ;;  %v3316_v46 = vadd.f32 %v3166_v32, %v1734_v13  ;;  %v1500_v17 = vpop.f32.mrf.mxu0  ;;  %v1613_v43 = vpop.f32.mrf.mxu1  ;;  %v1740_v26 = vmul.f32 %v3158_v29, %v1498_v25 }
 0x2cc   : > { %v2190_v44 = vrot.slane %v2189_v63, 4  ;;  %v2232_v45 = vrot.slane %v2231_v37, 4  ;;  %v1742_v49 = vmul.f32 %v3160_v30, %v1611_v27  ;;  %v3321_v57 = vadd.f32 %v3182_v48, %v1733_v23 }
 0x2cd   : > { %v2170_v50 = vmax.f32 %v2168_v21, %v2169_v39  ;;  %v2212_v35 = vmax.f32 %v2210_v22, %v2211_v40  ;;  %v3324_v58 = vadd.f32 %v3306_v19, %v1735_v24  ;;  %v1504_v47 = vpop.f32.mrf.mxu0  ;;  %v1617_v38 = vpop.f32.mrf.mxu1  ;;  %v1910_v52 = vadd.f32 %v3163_v31, %v1740_v26 }
 0x2ce   : > { %v2191_v41 = vmax.f32 %v2189_v63, %v2190_v44  ;;  %v2233_v51 = vmax.f32 %v2231_v37, %v2232_v45  ;;  %v1912_v54 = vadd.f32 %v3166_v32, %v1742_v49  ;;  %v1741_v59 = vmul.f32 %v3168_v34, %v1500_v17 }
 0x2cf   : > { %v2171_v55 = vrot.slane %v2170_v50, 2  ;;  %v2213_v56 = vrot.slane %v2212_v35, 2  ;;  %v1743_v60 = vmul.f32 %v3172_v36, %v1613_v43  ;;  %v1506_v61 = vpop.f32.mrf.mxu0  ;;  %v1619_v0 = vpop.f32.mrf.mxu1  ;;  %v2032_v33 = vmax.f32 %v3316_v46, 0.0 }
 0x2d0   : > { %v2192_v53 = vrot.slane %v2191_v41, 2  ;;  %v2234_v12 = vrot.slane %v2233_v51, 2  ;;  %v2038_v1 = vmax.f32 %v1910_v52, 0.0  ;;  %v1911_v8 = vadd.f32 %v3182_v48, %v1741_v59 }
 0x2d1   : > { %v2172_v2 = vmax.f32 %v2170_v50, %v2171_v55  ;;  %v2214_v3 = vmax.f32 %v2212_v35, %v2213_v56  ;;  %v1913_v9 = vadd.f32 %v3306_v19, %v1743_v60  ;;  %v1508_v4 = vpop.f32.mrf.mxu0  ;;  %v1621_v5 = vpop.f32.mrf.mxu1  ;;  %v2031_v14 = vmax.f32 %v3321_v57, 0.0 }
 0x2d2   : > { %v2193_v11 = vmax.f32 %v2191_v41, %v2192_v53  ;;  %v2235_v13 = vmax.f32 %v2233_v51, %v2234_v12  ;;  %v2033_v62 = vmax.f32 %v3324_v58, 0.0  ;;  %v2238_v16 = vmax.f32 %v2030_v42, %v2038_v1 }
 0x2d3   : > { %v2173_v15 = vrot.slane %v2172_v2, 1  ;;  %v2215_v7 = vrot.slane %v2214_v3, 1  ;;  %v2040_v18 = vmax.f32 %v1912_v54, 0.0  ;;  %v1510_v20 = vpop.f32.mrf.mxu0  ;;  %v1623_v6 = vpop.f32.mrf.mxu1  ;;  %v1748_v22 = vmul.f32 %v3158_v29, %v1504_v47 }
 0x2d4   : > { %v2194_v10 = vrot.slane %v2193_v11, 1  ;;  %v2236_v21 = vrot.slane %v2235_v13, 1  ;;  %v1750_v23 = vmul.f32 %v3160_v30, %v1617_v38  ;;  %v2039_v27 = vmax.f32 %v1911_v8, 0.0 }
 0x2d5   : > { %v2174_v24 = vmax.f32 %v2172_v2, %v2173_v15  ;;  %v2216_v25 = vmax.f32 %v2214_v3, %v2215_v7  ;;  %v2041_v63 = vmax.f32 %v1913_v9, 0.0  ;;  %v1514_v37 = vpop.f32.mrf.mxu0  ;;  %v1627_v39 = vpop.f32.mrf.mxu1  ;;  %v1918_v17 = vadd.f32 %v3163_v31, %v1748_v22 }
 0x2d6   : > { %v2195_v40 = vmax.f32 %v2193_v11, %v2194_v10  ;;  %v2237_v46 = vmax.f32 %v2235_v13, %v2236_v21  ;;  %v1920_v42 = vadd.f32 %v3166_v32, %v1750_v23  ;;  %v1749_v43 = vmul.f32 %v3168_v34, %v1506_v61 }
 0x2d7   : > { %v1751_v44 = vmul.f32 %v3172_v36, %v1619_v0  ;;  %v1756_v45 = vmul.f32 %v3158_v29, %v1508_v4  ;;  %v1758_v26 = vmul.f32 %v3160_v30, %v1621_v5  ;;  %v1516_v49 = vpop.f32.mrf.mxu0  ;;  %v1629_v50 = vpop.f32.mrf.mxu1  ;;  %v2046_v58 = vmax.f32 %v1918_v17, 0.0 }
 0x2d8   : > { %v2334_v35 = vcombine.low %v2174_v24, %v2195_v40  ;;  %v2335_v57 = vcombine.low %v2216_v25, %v2237_v46  ;;  %v2048_v47 = vmax.f32 %v1920_v42, 0.0  ;;  %v1919_v38 = vadd.f32 %v3182_v48, %v1749_v43 }
 0x2d9   : > { %v1921_v41 = vadd.f32 %v3306_v19, %v1751_v44  ;;  %v1926_v51 = vadd.f32 %v3163_v31, %v1756_v45  ;;  %v1928_v52 = vadd.f32 %v3166_v32, %v1758_v26  ;;  %v1518_v54 = vpop.f32.mrf.mxu0  ;;  %v1631_v55 = vpop.f32.mrf.mxu1  ;;  %v2280_v60 = vmax.f32 %v2032_v33, %v2040_v18 }
 0x2da   : > { %v3348_v56 = vrot.slane %v2334_v35, %v3313_v28  ;;  %v3351_v59 = vrot.slane %v2335_v57, %v3313_v28  ;;  %v2259_v61 = vmax.f32 %v2031_v14, %v2039_v27  ;;  %v2301_v0 = vmax.f32 %v2033_v62, %v2041_v63 }
 0x2db   : > { %v2239_v53 = vmax.f32 %v2238_v16, %v2046_v58  ;;  %v2047_v12 = vmax.f32 %v1919_v38, 0.0  ;;  %v2049_v1 = vmax.f32 %v1921_v41, 0.0  ;;  %v1520_v2 = vpop.f32.mrf.mxu0  ;;  %v1633_v3 = vpop.f32.mrf.mxu1  ;;  %v1757_v9 = vmul.f32 %v3168_v34, %v1510_v20 }
 0x2dc   : > { %v2366_v8 = vcombine.low %v3348_v56, %v3351_v59  ;;  %v1759_v4 = vmul.f32 %v3172_v36, %v1623_v6  ;;  %v1764_v5 = vmul.f32 %v3158_v29, %v1514_v37  ;;  %v2281_v11 = vmax.f32 %v2280_v60, %v2048_v47 }
 0x2dd   : > { %v2260_v13 = vmax.f32 %v2259_v61, %v2047_v12  ;;  %v2054_v15 = vmax.f32 %v1926_v51, 0.0  ;;  %v2056_v33 = vmax.f32 %v1928_v52, 0.0  ;;  %v1524_v14 = vpop.f32.mrf.mxu0  ;;  %v1637_v62 = vpop.f32.mrf.mxu1  ;;  %v2302_v7 = vmax.f32 %v2301_v0, %v2049_v1 }
 0x2de   : > { %v1927_v16 = vadd.f32 %v3182_v48, %v1757_v9  ;;  %v1929_v18 = vadd.f32 %v3306_v19, %v1759_v4  ;;  %v1934_v10 = vadd.f32 %v3163_v31, %v1764_v5  ;;  %v1766_v21 = vmul.f32 %v3160_v30, %v1627_v39 }
 0x2df   : > { %v1765_v20 = vmul.f32 %v3168_v34, %v1516_v49  ;;  %v1767_v6 = vmul.f32 %v3172_v36, %v1629_v50  ;;  %v1772_v22 = vmul.f32 %v3158_v29, %v1518_v54  ;;  %v1526_v23 = vpop.f32.mrf.mxu0  ;;  %v1639_v24 = vpop.f32.mrf.mxu1  ;;  %v1774_v37 = vmul.f32 %v3160_v30, %v1631_v55 }
 0x2e0   : > { %v2055_v25 = vmax.f32 %v1927_v16, 0.0  ;;  %v2057_v27 = vmax.f32 %v1929_v18, 0.0  ;;  %v2062_v63 = vmax.f32 %v1934_v10, 0.0  ;;  %v1936_v40 = vadd.f32 %v3166_v32, %v1766_v21 }
 0x2e1   : > { %v1935_v46 = vadd.f32 %v3182_v48, %v1765_v20  ;;  %v1937_v17 = vadd.f32 %v3306_v19, %v1767_v6  ;;  %v1942_v39 = vadd.f32 %v3163_v31, %v1772_v22  ;;  %v1528_v42 = vpop.f32.mrf.mxu0  ;;  %v1641_v43 = vpop.f32.mrf.mxu1  ;;  %v2240_v44 = vmax.f32 %v2239_v53, %v2054_v15 }
 0x2e2   : > { %v2282_v45 = vmax.f32 %v2281_v11, %v2056_v33  ;;  %v2261_v26 = vmax.f32 %v2260_v13, %v2055_v25  ;;  %v1944_v49 = vadd.f32 %v3166_v32, %v1774_v37  ;;  %v2303_v50 = vmax.f32 %v2302_v7, %v2057_v27 }
 0x2e3   : > { %v2064_v35 = vmax.f32 %v1936_v40, 0.0  ;;  %v2063_v57 = vmax.f32 %v1935_v46, 0.0  ;;  %v2065_v58 = vmax.f32 %v1937_v17, 0.0  ;;  %v1530_v47 = vpop.f32.mrf.mxu0  ;;  %v1643_v38 = vpop.f32.mrf.mxu1  ;;  %v2241_v41 = vmax.f32 %v2240_v44, %v2062_v63 }
 0x2e4   : > { %v1773_v51 = vmul.f32 %v3168_v34, %v1520_v2  ;;  %v1775_v52 = vmul.f32 %v3172_v36, %v1633_v3  ;;  %v1780_v54 = vmul.f32 %v3158_v29, %v1524_v14  ;;  %v2070_v61 = vmax.f32 %v1942_v39, 0.0 }
 0x2e5   : > { %v2283_v55 = vmax.f32 %v2282_v45, %v2064_v35  ;;  %v2262_v60 = vmax.f32 %v2261_v26, %v2063_v57  ;;  %v2072_v0 = vmax.f32 %v1944_v49, 0.0  ;;  %v1534_v53 = vpop.f32.mrf.mxu0  ;;  %v1647_v12 = vpop.f32.mrf.mxu1  ;;  %v1782_v5 = vmul.f32 %v3160_v30, %v1637_v62 }
 0x2e6   : > { %v1943_v1 = vadd.f32 %v3182_v48, %v1773_v51  ;;  %v1945_v9 = vadd.f32 %v3306_v19, %v1775_v52  ;;  %v1950_v4 = vadd.f32 %v3163_v31, %v1780_v54  ;;  %v2304_v11 = vmax.f32 %v2303_v50, %v2065_v58 }
 0x2e7   : > { %v1781_v2 = vmul.f32 %v3168_v34, %v1526_v23  ;;  %v1783_v3 = vmul.f32 %v3172_v36, %v1639_v24  ;;  %v1788_v13 = vmul.f32 %v3158_v29, %v1528_v42  ;;  %v1536_v15 = vpop.f32.mrf.mxu0  ;;  %v1649_v33 = vpop.f32.mrf.mxu1  ;;  %v1952_v18 = vadd.f32 %v3166_v32, %v1782_v5 }
 0x2e8   : > { %v2071_v14 = vmax.f32 %v1943_v1, 0.0  ;;  %v2073_v7 = vmax.f32 %v1945_v9, 0.0  ;;  %v2078_v16 = vmax.f32 %v1950_v4, 0.0  ;;  %v1790_v20 = vmul.f32 %v3160_v30, %v1641_v43 }
 0x2e9   : > { %v1951_v10 = vadd.f32 %v3182_v48, %v1781_v2  ;;  %v1953_v21 = vadd.f32 %v3306_v19, %v1783_v3  ;;  %v1958_v62 = vadd.f32 %v3163_v31, %v1788_v13  ;;  %v1538_v6 = vpop.f32.mrf.mxu0  ;;  %v1651_v22 = vpop.f32.mrf.mxu1  ;;  %v2242_v23 = vmax.f32 %v2241_v41, %v2070_v61 }
 0x2ea   : > { %v2284_v24 = vmax.f32 %v2283_v55, %v2072_v0  ;;  %v2263_v25 = vmax.f32 %v2262_v60, %v2071_v14  ;;  %v2080_v27 = vmax.f32 %v1952_v18, 0.0  ;;  %v2305_v63 = vmax.f32 %v2304_v11, %v2073_v7 }
 0x2eb   : > { %v2079_v37 = vmax.f32 %v1951_v10, 0.0  ;;  %v2081_v40 = vmax.f32 %v1953_v21, 0.0  ;;  %v1960_v46 = vadd.f32 %v3166_v32, %v1790_v20  ;;  %v1540_v17 = vpop.f32.mrf.mxu0  ;;  %v1653_v39 = vpop.f32.mrf.mxu1  ;;  %v2243_v42 = vmax.f32 %v2242_v23, %v2078_v16 }
 0x2ec   : > { %v1789_v44 = vmul.f32 %v3168_v34, %v1530_v47  ;;  %v1791_v45 = vmul.f32 %v3172_v36, %v1643_v38  ;;  %v1796_v43 = vmul.f32 %v3158_v29, %v1534_v53  ;;  %v2285_v26 = vmax.f32 %v2284_v24, %v2080_v27 }
 0x2ed   : > { %v2264_v49 = vmax.f32 %v2263_v25, %v2079_v37  ;;  %v2086_v50 = vmax.f32 %v1958_v62, 0.0  ;;  %v2088_v35 = vmax.f32 %v1960_v46, 0.0  ;;  %v1544_v57 = vpop.f32.mrf.mxu0  ;;  %v1657_v58 = vpop.f32.mrf.mxu1  ;;  %v1798_v54 = vmul.f32 %v3160_v30, %v1647_v12 }
 0x2ee   : > { %v1959_v41 = vadd.f32 %v3182_v48, %v1789_v44  ;;  %v1961_v51 = vadd.f32 %v3306_v19, %v1791_v45  ;;  %v1966_v52 = vadd.f32 %v3163_v31, %v1796_v43  ;;  %v2306_v55 = vmax.f32 %v2305_v63, %v2081_v40 }
 0x2ef   : > { %v1797_v47 = vmul.f32 %v3168_v34, %v1536_v15  ;;  %v1799_v38 = vmul.f32 %v3172_v36, %v1649_v33  ;;  %v1804_v60 = vmul.f32 %v3158_v29, %v1538_v6  ;;  %v1546_v61 = vpop.f32.mrf.mxu0  ;;  %v1659_v0 = vpop.f32.mrf.mxu1  ;;  %v1968_v4 = vadd.f32 %v3166_v32, %v1798_v54 }
 0x2f0   : > { %v2087_v53 = vmax.f32 %v1959_v41, 0.0  ;;  %v2089_v1 = vmax.f32 %v1961_v51, 0.0  ;;  %v2094_v9 = vmax.f32 %v1966_v52, 0.0  ;;  %v1806_v2 = vmul.f32 %v3160_v30, %v1651_v22 }
 0x2f1   : > { %v1967_v5 = vadd.f32 %v3182_v48, %v1797_v47  ;;  %v1969_v11 = vadd.f32 %v3306_v19, %v1799_v38  ;;  %v1974_v12 = vadd.f32 %v3163_v31, %v1804_v60  ;;  %v1548_v3 = vpop.f32.mrf.mxu0  ;;  %v1661_v13 = vpop.f32.mrf.mxu1  ;;  %v2244_v15 = vmax.f32 %v2243_v42, %v2086_v50 }
 0x2f2   : > { %v2286_v33 = vmax.f32 %v2285_v26, %v2088_v35  ;;  %v2265_v14 = vmax.f32 %v2264_v49, %v2087_v53  ;;  %v2096_v7 = vmax.f32 %v1968_v4, 0.0  ;;  %v2307_v16 = vmax.f32 %v2306_v55, %v2089_v1 }
 0x2f3   : > { %v2095_v18 = vmax.f32 %v1967_v5, 0.0  ;;  %v2097_v10 = vmax.f32 %v1969_v11, 0.0  ;;  %v1976_v21 = vadd.f32 %v3166_v32, %v1806_v2  ;;  %v1550_v62 = vpop.f32.mrf.mxu0  ;;  %v1663_v20 = vpop.f32.mrf.mxu1  ;;  %v2245_v6 = vmax.f32 %v2244_v15, %v2094_v9 }
 0x2f4   : > { %v1805_v23 = vmul.f32 %v3168_v34, %v1540_v17  ;;  %v1807_v24 = vmul.f32 %v3172_v36, %v1653_v39  ;;  %v1812_v22 = vmul.f32 %v3158_v29, %v1544_v57  ;;  %v2287_v25 = vmax.f32 %v2286_v33, %v2096_v7 }
 0x2f5   : > { %v2266_v27 = vmax.f32 %v2265_v14, %v2095_v18  ;;  %v2102_v63 = vmax.f32 %v1974_v12, 0.0  ;;  %v2104_v37 = vmax.f32 %v1976_v21, 0.0  ;;  %v1554_v40 = vpop.f32.mrf.mxu0  ;;  %v1667_v46 = vpop.f32.mrf.mxu1  ;;  %v1814_v43 = vmul.f32 %v3160_v30, %v1657_v58 }
 0x2f6   : > { %v1975_v42 = vadd.f32 %v3182_v48, %v1805_v23  ;;  %v1977_v44 = vadd.f32 %v3306_v19, %v1807_v24  ;;  %v1982_v45 = vadd.f32 %v3163_v31, %v1812_v22  ;;  %v2308_v26 = vmax.f32 %v2307_v16, %v2097_v10 }
 0x2f7   : > { %v1813_v17 = vmul.f32 %v3168_v34, %v1546_v61  ;;  %v1815_v39 = vmul.f32 %v3172_v36, %v1659_v0  ;;  %v1820_v49 = vmul.f32 %v3158_v29, %v1548_v3  ;;  %v1556_v50 = vpop.f32.mrf.mxu0  ;;  %v1669_v35 = vpop.f32.mrf.mxu1  ;;  %v1984_v52 = vadd.f32 %v3166_v32, %v1814_v43 }
 0x2f8   : > { %v2103_v57 = vmax.f32 %v1975_v42, 0.0  ;;  %v2105_v41 = vmax.f32 %v1977_v44, 0.0  ;;  %v2110_v51 = vmax.f32 %v1982_v45, 0.0  ;;  %v1822_v47 = vmul.f32 %v3160_v30, %v1661_v13 }
 0x2f9   : > { %v1983_v54 = vadd.f32 %v3182_v48, %v1813_v17  ;;  %v1985_v55 = vadd.f32 %v3306_v19, %v1815_v39  ;;  %v1990_v58 = vadd.f32 %v3163_v31, %v1820_v49  ;;  %v1558_v38 = vpop.f32.mrf.mxu0  ;;  %v1671_v60 = vpop.f32.mrf.mxu1  ;;  %v2246_v61 = vmax.f32 %v2245_v6, %v2102_v63 }
 0x2fa   : > { %v2288_v0 = vmax.f32 %v2287_v25, %v2104_v37  ;;  %v2112_v53 = vmax.f32 %v1984_v52, 0.0  ;;  %v2267_v1 = vmax.f32 %v2266_v27, %v2103_v57  ;;  %v2309_v9 = vmax.f32 %v2308_v26, %v2105_v41 }
 0x2fb   : > { %v2111_v4 = vmax.f32 %v1983_v54, 0.0  ;;  %v1992_v5 = vadd.f32 %v3166_v32, %v1822_v47  ;;  %v1560_v11 = vpop.f32.mrf.mxu0  ;;  %v1673_v12 = vpop.f32.mrf.mxu1  ;;  %v2247_v2 = vmax.f32 %v2246_v61, %v2110_v51  ;;  %v1821_v3 = vmul.f32 %v3168_v34, %v1550_v62 }
 0x2fc   : > { %v1823_v15 = vmul.f32 %v3172_v36, %v1663_v20  ;;  %v1828_v33 = vmul.f32 %v3158_v29, %v1554_v40  ;;  %v2289_v13 = vmax.f32 %v2288_v0, %v2112_v53  ;;  %v2113_v7 = vmax.f32 %v1985_v55, 0.0 }
 0x2fd   : > { %v2268_v14 = vmax.f32 %v2267_v1, %v2111_v4  ;;  %v2118_v16 = vmax.f32 %v1990_v58, 0.0  ;;  %v1564_v18 = vpop.f32.mrf.mxu0  ;;  %v1677_v10 = vpop.f32.mrf.mxu1  ;;  %v1991_v21 = vadd.f32 %v3182_v48, %v1821_v3  ;;  %v1830_v24 = vmul.f32 %v3160_v30, %v1667_v46 }
 0x2fe   : > { %v1993_v6 = vadd.f32 %v3306_v19, %v1823_v15  ;;  %v1998_v23 = vadd.f32 %v3163_v31, %v1828_v33  ;;  %v2120_v22 = vmax.f32 %v1992_v5, 0.0  ;;  %v1829_v62 = vmul.f32 %v3168_v34, %v1556_v50 }
 0x2ff   : > { %v1831_v20 = vmul.f32 %v3172_v36, %v1669_v35  ;;  %v1836_v25 = vmul.f32 %v3158_v29, %v1558_v38  ;;  %v2119_v27 = vmax.f32 %v1991_v21, 0.0  ;;  %v2000_v40 = vadd.f32 %v3166_v32, %v1830_v24  ;;  %v1566_v42 = vpop.f32.mrf.mxu0  ;;  %v1679_v26 = vpop.f32.mrf.mxu1 }
 0x300   : > { %v2121_v63 = vmax.f32 %v1993_v6, 0.0  ;;  %v2126_v37 = vmax.f32 %v1998_v23, 0.0  ;;  %v1999_v44 = vadd.f32 %v3182_v48, %v1829_v62  ;;  %v1838_v46 = vmul.f32 %v3160_v30, %v1671_v60 }
 0x301   : > { %v2001_v45 = vadd.f32 %v3306_v19, %v1831_v20  ;;  %v2006_v43 = vadd.f32 %v3163_v31, %v1836_v25  ;;  %v2310_v17 = vmax.f32 %v2309_v9, %v2113_v7  ;;  %v2248_v39 = vmax.f32 %v2247_v2, %v2118_v16  ;;  %v1568_v58 = vpop.f32.mrf.mxu0  ;;  %v1681_v0 = vpop.f32.mrf.mxu1 }
 0x302   : > { %v2128_v49 = vmax.f32 %v2000_v40, 0.0  ;;  %v2290_v50 = vmax.f32 %v2289_v13, %v2120_v22  ;;  %v2269_v35 = vmax.f32 %v2268_v14, %v2119_v27  ;;  %v2127_v57 = vmax.f32 %v1999_v44, 0.0 }
 0x303   : > { %v2008_v41 = vadd.f32 %v3166_v32, %v1838_v46  ;;  %v2134_v51 = vmax.f32 %v2006_v43, 0.0  ;;  %v1837_v52 = vmul.f32 %v3168_v34, %v1560_v11  ;;  %v1839_v54 = vmul.f32 %v3172_v36, %v1673_v12  ;;  %v1683_v21 = vpop.f32.mrf.mxu1 }
 0x304   : > { %v1844_v55 = vmul.f32 %v3158_v29, %v1564_v18  ;;  %v2311_v47 = vmax.f32 %v2310_v17, %v2121_v63  ;;  %v2249_v38 = vmax.f32 %v2248_v39, %v2126_v37  ;;  %v2291_v60 = vmax.f32 %v2290_v50, %v2128_v49 }
 0x305   : > { %v2129_v61 = vmax.f32 %v2001_v45, 0.0  ;;  %v2007_v53 = vadd.f32 %v3182_v48, %v1837_v52  ;;  %v2009_v1 = vadd.f32 %v3306_v19, %v1839_v54  ;;  %v1846_v4 = vmul.f32 %v3160_v30, %v1677_v10  ;;  %v1570_v10 = vpop.f32.mrf.mxu0 }
 0x306   : > { %v2014_v9 = vadd.f32 %v3163_v31, %v1844_v55  ;;  %v2136_v5 = vmax.f32 %v2008_v41, 0.0  ;;  %v1845_v11 = vmul.f32 %v3168_v34, %v1566_v42  ;;  %v1847_v12 = vmul.f32 %v3172_v36, %v1679_v26 }
 0x307   : > { %v1852_v2 = vmul.f32 %v3158_v29, %v1568_v58  ;;  %v2270_v3 = vmax.f32 %v2269_v35, %v2127_v57  ;;  %v2250_v15 = vmax.f32 %v2249_v38, %v2134_v51  ;;  %v2016_v13 = vadd.f32 %v3166_v32, %v1846_v4 }
 0x308   : > { %v2142_v33 = vmax.f32 %v2014_v9, 0.0  ;;  %v2015_v14 = vadd.f32 %v3182_v48, %v1845_v11  ;;  %v2017_v7 = vadd.f32 %v3306_v19, %v1847_v12  ;;  %v1854_v18 = vmul.f32 %v3160_v30, %v1681_v0 }
 0x309   : > { %v2022_v16 = vadd.f32 %v3163_v31, %v1852_v2  ;;  %v2312_v6 = vmax.f32 %v2311_v47, %v2129_v61  ;;  %v2135_v23 = vmax.f32 %v2007_v53, 0.0  ;;  %v2137_v24 = vmax.f32 %v2009_v1, 0.0 }
 0x30a   : > { %v2144_v22 = vmax.f32 %v2016_v13, 0.0  ;;  %v2292_v29 = vmax.f32 %v2291_v60, %v2136_v5  ;;  %v2251_v62 = vmax.f32 %v2250_v15, %v2142_v33  ;;  %v2024_v25 = vadd.f32 %v3166_v32, %v1854_v18 }
 0x30b   : > { %v2150_v20 = vmax.f32 %v2022_v16, 0.0  ;;  %v2143_v27 = vmax.f32 %v2015_v14, 0.0  ;;  %v2145_v63 = vmax.f32 %v2017_v7, 0.0  ;;  %v1853_v37 = vmul.f32 %v3168_v34, %v1570_v10 }
 0x30c   : > { %v1855_v40 = vmul.f32 %v3172_v36, %v1683_v21  ;;  %v2293_v31 = vmax.f32 %v2292_v29, %v2144_v22  ;;  %v2152_v30 = vmax.f32 %v2024_v25, 0.0  ;;  %v2271_v44 = vmax.f32 %v2270_v3, %v2135_v23 }
 0x30d   : > { %v2252_v42 = vmax.f32 %v2251_v62, %v2150_v20  ;;  %v2313_v45 = vmax.f32 %v2312_v6, %v2137_v24  ;;  %v2023_v43 = vadd.f32 %v3182_v48, %v1853_v37  ;;  %v2374_v7 = vrot.slane %v2366_v8, %v3313_v28 }
 0x30e   : > { %v2025_v46 = vadd.f32 %v3306_v19, %v1855_v40  ;;  %v2294_v17 = vmax.f32 %v2293_v31, %v2152_v30  ;;  %v2272_v39 = vmax.f32 %v2271_v44, %v2143_v27 }
 0x30f   : > { %v2253_v26 = vrot.slane %v2252_v42, 4  ;;  %v2314_v49 = vmax.f32 %v2313_v45, %v2145_v63  ;;  %v2151_v32 = vmax.f32 %v2023_v43, 0.0 }
 0x310   : > { %v2153_v50 = vmax.f32 %v2025_v46, 0.0  ;;  %v2295_v57 = vrot.slane %v2294_v17, 4 }
 0x311   : > { %v2254_v35 = vmax.f32 %v2252_v42, %v2253_v26  ;;  %v2273_v34 = vmax.f32 %v2272_v39, %v2151_v32 }
 0x312   : > { %v2315_v41 = vmax.f32 %v2314_v49, %v2153_v50  ;;  %v2296_v51 = vmax.f32 %v2294_v17, %v2295_v57 }
 0x313   : > { %v2255_v36 = vrot.slane %v2254_v35, 2  ;;  %v2274_v52 = vrot.slane %v2273_v34, 4 }
 0x314   : > { %v2316_v54 = vrot.slane %v2315_v41, 4  ;;  %v2297_v55 = vrot.slane %v2296_v51, 2 }
 0x315   : > { %v2256_v58 = vmax.f32 %v2254_v35, %v2255_v36  ;;  %v2275_v47 = vmax.f32 %v2273_v34, %v2274_v52 }
 0x316   : > { %v2317_v48 = vmax.f32 %v2315_v41, %v2316_v54  ;;  %v2298_v38 = vmax.f32 %v2296_v51, %v2297_v55 }
 0x317   : > { %v2276_v19 = vrot.slane %v2275_v47, 2  ;;  %v2257_v61 = vrot.slane %v2256_v58, 1 }
 0x318   : > { %v2318_v60 = vrot.slane %v2317_v48, 2  ;;  %v2299_v0 = vrot.slane %v2298_v38, 1 }
 0x319   : > { %v2277_v53 = vmax.f32 %v2275_v47, %v2276_v19  ;;  %v2258_v5 = vmax.f32 %v2256_v58, %v2257_v61 }
 0x31a   : > { %v2319_v1 = vmax.f32 %v2317_v48, %v2318_v60  ;;  %v2300_v11 = vmax.f32 %v2298_v38, %v2299_v0 }
 0x31b   : > { %v2278_v9 = vrot.slane %v2277_v53, 1 }
 0x31c   : > { %v2320_v4 = vrot.slane %v2319_v1, 1 }
 0x31d   : > { %v2279_v12 = vmax.f32 %v2277_v53, %v2278_v9 }
 0x31e   : > { %v2321_v2 = vmax.f32 %v2319_v1, %v2320_v4 }
 0x31f   : > { %v2336_v3 = vcombine.low %v2258_v5, %v2279_v12 }
 0x320   : > { %v2337_v15 = vcombine.low %v2300_v11, %v2321_v2 }
 0x321   : > { %v2358_v33 = vrot.slane %v2336_v3, %v3313_v28 }
 0x322   : > { %v2365_v13 = vrot.slane %v2337_v15, %v3313_v28 }
 0x324   : > { %v2367_v14 = vcombine.low %v2358_v33, %v2365_v13 }
 0x326   : > { %v2381_v16 = vrot.slane %v2367_v14, %v3313_v28 }
 0x328   : > { %v2382_v18 = vcombine.low %v2374_v7, %v2381_v16 }
 0x32a   : > { %2384 = vst [vmem:[%s400_s24] sm:$0xff] %v2382_v18 }
 0x32b PF: > { %s21_s15 = sadd.s32 1, %s2790_s15   ;;  %s3488_s13 = smov %s2786_s14 }
 0x32c   : > { %p18_p2 = scmp.ge.s32.totalorder %s21_s15, 4   ;;  %s3489_s14 = smov %s3491_s17 }
 0x32e   :  { %20 = sbr.rel (!%p18_p2) target bundleno = 2 (0x2), region = 103 }
 0x333   :  { %2469 = vsyncpa [#allocation3], 1 }
 0x334   :  { %2471 = vsyncpa [#allocation3 + $0x1], 1 }

// kernel: pointnet_dense_cls.5
= control target key start
LH: loop header
LB: loop body
LE: loop exit
PB: predicated region body
PF: predicated region fallthrough
CT: control target
= control target key end

     0   :  { %14 = vsyncpa [#allocation3], 0  ;;  %s3459_s30 = smov [#allocation2]   ;;  %s3916_s0 = inlined_call_operand.vmem [shape: f32[8,1024], index: 0, kind: input, shape index: {}]   ;;  %s3917_s1 = inlined_call_operand.hbm [shape: bf16[1024,512], index: 1, kind: input, shape index: {}]   ;;  %s3918_s2 = inlined_call_operand.vmem [shape: f32[1,512], index: 2, kind: input, shape index: {}]   ;;  %s3919_s3 = inlined_call_operand.vmem [shape: f32[1,512], index: 3, kind: input, shape index: {}]   ;;  %s3920_s4 = inlined_call_operand.vmem [shape: bf16[512,256], index: 4, kind: input, shape index: {}]   ;;  %s3921_s5 = inlined_call_operand.vmem [shape: f32[1,256], index: 5, kind: input, shape index: {}]   ;;  %s3922_s6 = inlined_call_operand.vmem [shape: f32[1,256], index: 6, kind: input, shape index: {}]   ;;  %s3923_s7 = inlined_call_operand.vmem [shape: f32[256,9], index: 7, kind: input, shape index: {}]   ;;  %s3924_s8 = inlined_call_operand.vmem [shape: f32[1,9], index: 8, kind: input, shape index: {}]   ;;  %s3925_s9 = inlined_call_operand.vmem [shape: f32[8,9], index: 9, kind: output, shape index: {}]  }
   0x1   :  { %s22_s10 = sshll.u32 %s3459_s30, 4  ;;  %s23_s10 = int_to_ptr.vmem [resolvable:$true] %s22_s10 }
   0x2   :  { %s3445_s11 = scalar_lea.vmem %s23_s10, 32768  ;;  %p3450_p1 = scmp.lt.s32.totalorder %s23_s10, %s23_s10 }
   0x3   :  { %p3446_p0 = scmp.ne.s32.totalorder %s23_s10, %s3445_s11  ;;  %p3451_p2 = scmp.lt.s32.totalorder %s3445_s11, %s3445_s11 }
   0x5   :  { %p3452_p3 = por %p3451_p2, %p3450_p1 }
   0x7   :  { %p3453_p4 = pnand %p3452_p3, %p3446_p0 }
   0x9   :  { %3456 = shalt.err (!%p3453_p4)
}
   0xa   :  { %s3460_s12 = smov 256   ;;  %s3461_s13 = smov 16  }
   0xb   :  { %28 = dma.hbm_to_vmem [thread:$0]  %s3917_s1, 32768, %s23_s10, [#allocation3], %s3460_s12, %s3460_s12, %s3461_s13  }
   0xc   :  { %3457 = dma.done.wait [#allocation3], 32768  }
   0xd   :  { %3458 = vsyncadd [#allocation3], 4294934528  ;;  %v2957_v0 = vld [vmem:[#allocation2 + $0xe4] ss:$16 sps:$4 sm:$0xff]   ;;  %v2961_v2 = vld [vmem:[#allocation2 + $0xe0] ss:$16 sps:$4 sm:$0xff]  }
   0xe   :  { %v2959_v1 = vld [vmem:[#allocation2 + $0x2e4] ss:$16 sps:$4 sm:$0xff]   ;;  %1598 = vmatprep.subr.bf16.mxu0 %v2957_v0  ;;  %v2962_v3 = vld [vmem:[#allocation2 + $0x2e0] ss:$16 sps:$4 sm:$0xff]   ;;  %v47_v46 = vld [vmem:[%s3916_s0 + $0x8] sm:$0xff]  ;;  %vm2591_vm0 = vcmask 72704  }
   0xf   :  { %1639 = vmatprep.subr.bf16.mxu1 %v2959_v1  ;;  %v2963_v4 = vld [vmem:[#allocation2 + $0xc4] ss:$16 sps:$4 sm:$0xff]   ;;  %1599 = vmatpush1.bf16.msra.mxu0 %v2961_v2  ;;  %v2967_v6 = vld [vmem:[#allocation2 + $0xc0] ss:$16 sps:$4 sm:$0xff]   ;;  %v3518_v49 = vpack.c.bf16 %v47_v46, %v47_v46  ;;  %v49_v50 = vld [vmem:[%s3916_s0 + $0x18] sm:$0xff] }
  0x10   :  { %1640 = vmatpush1.bf16.msra.mxu1 %v2962_v3  ;;  %v2965_v5 = vld [vmem:[#allocation2 + $0x2c4] ss:$16 sps:$4 sm:$0xff]   ;;  %1600 = vmatprep.subr.bf16.mxu0 %v2963_v4  ;;  %v2968_v7 = vld [vmem:[#allocation2 + $0x2c0] ss:$16 sps:$4 sm:$0xff]   ;;  %v3523_v52 = vpack.c.bf16 %v49_v50, %v49_v50 }
  0x11   :  { %1641 = vmatprep.subr.bf16.mxu1 %v2965_v5  ;;  %v2969_v8 = vld [vmem:[#allocation2 + $0xa4] ss:$16 sps:$4 sm:$0xff]   ;;  %v2973_v10 = vld [vmem:[#allocation2 + $0xa0] ss:$16 sps:$4 sm:$0xff]   ;;  %1630 = vmatprep.mubr.bf16.mxu0 %v3518_v49 }
  0x12   :  { %v2971_v9 = vld [vmem:[#allocation2 + $0x2a4] ss:$16 sps:$4 sm:$0xff]   ;;  %v2974_v11 = vld [vmem:[#allocation2 + $0x2a0] ss:$16 sps:$4 sm:$0xff]   ;;  %1671 = vmatprep.mubr.bf16.mxu1 %v3523_v52 }
  0x13   :  { %1601 = vmatpush1.bf16.msra.mxu0 %v2967_v6  ;;  %v2975_v12 = vld [vmem:[#allocation2 + $0x84] ss:$16 sps:$4 sm:$0xff]   ;;  %v2979_v14 = vld [vmem:[#allocation2 + $0x80] ss:$16 sps:$4 sm:$0xff]  }
  0x14   :  { %1642 = vmatpush1.bf16.msra.mxu1 %v2968_v7  ;;  %1602 = vmatprep.subr.bf16.mxu0 %v2969_v8  ;;  %v2977_v13 = vld [vmem:[#allocation2 + $0x284] ss:$16 sps:$4 sm:$0xff]   ;;  %v2980_v15 = vld [vmem:[#allocation2 + $0x280] ss:$16 sps:$4 sm:$0xff]  }
  0x15   :  { %1643 = vmatprep.subr.bf16.mxu1 %v2971_v9  ;;  %v2981_v16 = vld [vmem:[#allocation2 + $0x64] ss:$16 sps:$4 sm:$0xff]   ;;  %v2985_v18 = vld [vmem:[#allocation2 + $0x60] ss:$16 sps:$4 sm:$0xff]  }
  0x16   :  { %v2983_v17 = vld [vmem:[#allocation2 + $0x264] ss:$16 sps:$4 sm:$0xff]   ;;  %v2986_v19 = vld [vmem:[#allocation2 + $0x260] ss:$16 sps:$4 sm:$0xff]  }
  0x17   :  { %1603 = vmatpush1.bf16.msra.mxu0 %v2973_v10  ;;  %v2987_v20 = vld [vmem:[#allocation2 + $0x44] ss:$16 sps:$4 sm:$0xff]   ;;  %v2991_v22 = vld [vmem:[#allocation2 + $0x40] ss:$16 sps:$4 sm:$0xff]  }
  0x18   :  { %1644 = vmatpush1.bf16.msra.mxu1 %v2974_v11  ;;  %1604 = vmatprep.subr.bf16.mxu0 %v2975_v12  ;;  %v2989_v21 = vld [vmem:[#allocation2 + $0x244] ss:$16 sps:$4 sm:$0xff]   ;;  %v2992_v23 = vld [vmem:[#allocation2 + $0x240] ss:$16 sps:$4 sm:$0xff]  }
  0x19   :  { %1645 = vmatprep.subr.bf16.mxu1 %v2977_v13  ;;  %v2993_v24 = vld [vmem:[#allocation2 + $0x24] ss:$16 sps:$4 sm:$0xff]   ;;  %v2997_v26 = vld [vmem:[#allocation2 + $0x20] ss:$16 sps:$4 sm:$0xff]  }
  0x1a   :  { %v2995_v25 = vld [vmem:[#allocation2 + $0x224] ss:$16 sps:$4 sm:$0xff]   ;;  %v2998_v27 = vld [vmem:[#allocation2 + $0x220] ss:$16 sps:$4 sm:$0xff]  }
  0x1b   :  { %1605 = vmatpush1.bf16.msra.mxu0 %v2979_v14  ;;  %v2999_v28 = vld [vmem:[#allocation2 + $0x4] ss:$16 sps:$4 sm:$0xff]   ;;  %v3003_v30 = vld [vmem:[#allocation2] ss:$16 sps:$4 sm:$0xff]  }
  0x1c   :  { %1646 = vmatpush1.bf16.msra.mxu1 %v2980_v15  ;;  %1606 = vmatprep.subr.bf16.mxu0 %v2981_v16  ;;  %v3001_v29 = vld [vmem:[#allocation2 + $0x204] ss:$16 sps:$4 sm:$0xff]   ;;  %v3004_v31 = vld [vmem:[#allocation2 + $0x200] ss:$16 sps:$4 sm:$0xff]  }
  0x1d   :  { %1647 = vmatprep.subr.bf16.mxu1 %v2983_v17  ;;  %v3005_v32 = vld [vmem:[#allocation2 + $0x1e4] ss:$16 sps:$4 sm:$0xff]   ;;  %v3009_v34 = vld [vmem:[#allocation2 + $0x1e0] ss:$16 sps:$4 sm:$0xff]  }
  0x1e   :  { %v3007_v33 = vld [vmem:[#allocation2 + $0x3e4] ss:$16 sps:$4 sm:$0xff]   ;;  %v3010_v35 = vld [vmem:[#allocation2 + $0x3e0] ss:$16 sps:$4 sm:$0xff]  }
  0x1f   :  { %1607 = vmatpush1.bf16.msra.mxu0 %v2985_v18  ;;  %v3011_v36 = vld [vmem:[#allocation2 + $0x1c4] ss:$16 sps:$4 sm:$0xff]   ;;  %v3015_v38 = vld [vmem:[#allocation2 + $0x1c0] ss:$16 sps:$4 sm:$0xff]  }
  0x20   :  { %1648 = vmatpush1.bf16.msra.mxu1 %v2986_v19  ;;  %1608 = vmatprep.subr.bf16.mxu0 %v2987_v20  ;;  %v3013_v37 = vld [vmem:[#allocation2 + $0x3c4] ss:$16 sps:$4 sm:$0xff]   ;;  %v3016_v39 = vld [vmem:[#allocation2 + $0x3c0] ss:$16 sps:$4 sm:$0xff]  }
  0x21   :  { %1649 = vmatprep.subr.bf16.mxu1 %v2989_v21  ;;  %v3017_v40 = vld [vmem:[#allocation2 + $0x1a4] ss:$16 sps:$4 sm:$0xff]   ;;  %v3021_v42 = vld [vmem:[#allocation2 + $0x1a0] ss:$16 sps:$4 sm:$0xff]  }
  0x22   :  { %v3019_v41 = vld [vmem:[#allocation2 + $0x3a4] ss:$16 sps:$4 sm:$0xff]   ;;  %v3022_v43 = vld [vmem:[#allocation2 + $0x3a0] ss:$16 sps:$4 sm:$0xff]  }
  0x23   :  { %1609 = vmatpush1.bf16.msra.mxu0 %v2991_v22  ;;  %v3023_v44 = vld [vmem:[#allocation2 + $0x184] ss:$16 sps:$4 sm:$0xff]   ;;  %v3027_v47 = vld [vmem:[#allocation2 + $0x180] ss:$16 sps:$4 sm:$0xff]  }
  0x24   :  { %1650 = vmatpush1.bf16.msra.mxu1 %v2992_v23  ;;  %1610 = vmatprep.subr.bf16.mxu0 %v2993_v24  ;;  %v3025_v45 = vld [vmem:[#allocation2 + $0x384] ss:$16 sps:$4 sm:$0xff]   ;;  %v3028_v48 = vld [vmem:[#allocation2 + $0x380] ss:$16 sps:$4 sm:$0xff]  }
  0x25   :  { %1651 = vmatprep.subr.bf16.mxu1 %v2995_v25  ;;  %v3029_v51 = vld [vmem:[#allocation2 + $0x164] ss:$16 sps:$4 sm:$0xff]   ;;  %v3033_v54 = vld [vmem:[#allocation2 + $0x160] ss:$16 sps:$4 sm:$0xff]  }
  0x26   :  { %v3031_v53 = vld [vmem:[#allocation2 + $0x364] ss:$16 sps:$4 sm:$0xff]   ;;  %v3034_v55 = vld [vmem:[#allocation2 + $0x360] ss:$16 sps:$4 sm:$0xff]  }
  0x27   :  { %1611 = vmatpush1.bf16.msra.mxu0 %v2997_v26  ;;  %v3035_v56 = vld [vmem:[#allocation2 + $0x144] ss:$16 sps:$4 sm:$0xff]   ;;  %v3039_v58 = vld [vmem:[#allocation2 + $0x140] ss:$16 sps:$4 sm:$0xff]  }
  0x28   :  { %1652 = vmatpush1.bf16.msra.mxu1 %v2998_v27  ;;  %1612 = vmatprep.subr.bf16.mxu0 %v2999_v28  ;;  %v3037_v57 = vld [vmem:[#allocation2 + $0x344] ss:$16 sps:$4 sm:$0xff]   ;;  %v3040_v59 = vld [vmem:[#allocation2 + $0x340] ss:$16 sps:$4 sm:$0xff]  }
  0x29   :  { %1653 = vmatprep.subr.bf16.mxu1 %v3001_v29  ;;  %v3041_v60 = vld [vmem:[#allocation2 + $0x124] ss:$16 sps:$4 sm:$0xff]   ;;  %v3045_v62 = vld [vmem:[#allocation2 + $0x120] ss:$16 sps:$4 sm:$0xff]  }
  0x2a   :  { %v3043_v61 = vld [vmem:[#allocation2 + $0x324] ss:$16 sps:$4 sm:$0xff]   ;;  %v3046_v63 = vld [vmem:[#allocation2 + $0x320] ss:$16 sps:$4 sm:$0xff]  }
  0x2b   :  { %1613 = vmatpush1.bf16.msra.mxu0 %v3003_v30  ;;  %v3047_v0 = vld [vmem:[#allocation2 + $0x104] ss:$16 sps:$4 sm:$0xff]   ;;  %v3051_v2 = vld [vmem:[#allocation2 + $0x100] ss:$16 sps:$4 sm:$0xff]  }
  0x2c   :  { %1654 = vmatpush1.bf16.msra.mxu1 %v3004_v31  ;;  %1614 = vmatprep.subr.bf16.mxu0 %v3005_v32  ;;  %v3049_v1 = vld [vmem:[#allocation2 + $0x304] ss:$16 sps:$4 sm:$0xff]   ;;  %v3052_v3 = vld [vmem:[#allocation2 + $0x300] ss:$16 sps:$4 sm:$0xff]  }
  0x2d   :  { %1655 = vmatprep.subr.bf16.mxu1 %v3007_v33  ;;  %v46_v4 = vld [vmem:[%s3916_s0] sm:$0xff]  ;;  %v48_v5 = vld [vmem:[%s3916_s0 + $0x10] sm:$0xff] }
  0x2e   :  { %v3055_v6 = vld [vmem:[#allocation2 + $0x4e4] ss:$16 sps:$4 sm:$0xff]   ;;  %v3533_v8 = vpack.c.bf16 %v46_v4, %v46_v4  ;;  %v3535_v9 = vpack.c.bf16 %v48_v5, %v48_v5  ;;  %v3053_v10 = vld [vmem:[#allocation2 + $0x4e0] ss:$16 sps:$4 sm:$0xff]  }
  0x2f   :  { %1615 = vmatpush2.bf16.msra.mxu0 %v3009_v34  ;;  %v3058_v7 = vld [vmem:[#allocation2 + $0x6e4] ss:$16 sps:$4 sm:$0xff]   ;;  %v3056_v11 = vld [vmem:[#allocation2 + $0x6e0] ss:$16 sps:$4 sm:$0xff]   ;;  %v51_v34 = vld [vmem:[%s3916_s0 + $0x28] sm:$0xff] }
  0x30   :  { %1656 = vmatpush2.bf16.msra.mxu1 %v3010_v35  ;;  %1616 = vmatprep.subr.bf16.mxu0 %v3011_v36  ;;  %v3061_v12 = vld [vmem:[#allocation2 + $0x4c4] ss:$16 sps:$4 sm:$0xff]   ;;  %v3059_v14 = vld [vmem:[#allocation2 + $0x4c0] ss:$16 sps:$4 sm:$0xff]  }
  0x31   :  { %1657 = vmatprep.subr.bf16.mxu1 %v3013_v37  ;;  %v3064_v13 = vld [vmem:[#allocation2 + $0x6c4] ss:$16 sps:$4 sm:$0xff]   ;;  %v3062_v15 = vld [vmem:[#allocation2 + $0x6c0] ss:$16 sps:$4 sm:$0xff]   ;;  %v3542_v37 = vpack.c.bf16 %v51_v34, %v51_v34  ;;  %v3167_v34 = vld [vmem:[#allocation2 + $0x88] ss:$16 sps:$4 sm:$0xff]  }
  0x32   :  { %v3067_v16 = vld [vmem:[#allocation2 + $0x4a4] ss:$16 sps:$4 sm:$0xff]   ;;  %v3065_v18 = vld [vmem:[#allocation2 + $0x4a0] ss:$16 sps:$4 sm:$0xff]  }
  0x33   :  { %1617 = vmatpush2.bf16.msra.mxu0 %v3015_v38  ;;  %v3070_v17 = vld [vmem:[#allocation2 + $0x6a4] ss:$16 sps:$4 sm:$0xff]   ;;  %v3068_v19 = vld [vmem:[#allocation2 + $0x6a0] ss:$16 sps:$4 sm:$0xff]   ;;  %v53_v38 = vld [vmem:[%s3916_s0 + $0x38] sm:$0xff] }
  0x34   :  { %1658 = vmatpush2.bf16.msra.mxu1 %v3016_v39  ;;  %1618 = vmatprep.subr.bf16.mxu0 %v3017_v40  ;;  %v3073_v20 = vld [vmem:[#allocation2 + $0x484] ss:$16 sps:$4 sm:$0xff]   ;;  %v3071_v22 = vld [vmem:[#allocation2 + $0x480] ss:$16 sps:$4 sm:$0xff]   ;;  %v3547_v40 = vpack.c.bf16 %v53_v38, %v53_v38  ;;  %v3178_v38 = vld [vmem:[#allocation2 + $0x26c] ss:$16 sps:$4 sm:$0xff]  }
  0x35   :  { %1659 = vmatprep.subr.bf16.mxu1 %v3019_v41  ;;  %v3076_v21 = vld [vmem:[#allocation2 + $0x684] ss:$16 sps:$4 sm:$0xff]   ;;  %v3074_v23 = vld [vmem:[#allocation2 + $0x680] ss:$16 sps:$4 sm:$0xff]  }
  0x36   :  { %v3079_v24 = vld [vmem:[#allocation2 + $0x464] ss:$16 sps:$4 sm:$0xff]   ;;  %v3077_v26 = vld [vmem:[#allocation2 + $0x460] ss:$16 sps:$4 sm:$0xff]  }
  0x37   :  { %1619 = vmatpush2.bf16.msra.mxu0 %v3021_v42  ;;  %v3082_v25 = vld [vmem:[#allocation2 + $0x664] ss:$16 sps:$4 sm:$0xff]   ;;  %v3080_v27 = vld [vmem:[#allocation2 + $0x660] ss:$16 sps:$4 sm:$0xff]  }
  0x38   :  { %1660 = vmatpush2.bf16.msra.mxu1 %v3022_v43  ;;  %1620 = vmatprep.subr.bf16.mxu0 %v3023_v44  ;;  %v3085_v28 = vld [vmem:[#allocation2 + $0x444] ss:$16 sps:$4 sm:$0xff]   ;;  %v3083_v30 = vld [vmem:[#allocation2 + $0x440] ss:$16 sps:$4 sm:$0xff]  }
  0x39   :  { %1661 = vmatprep.subr.bf16.mxu1 %v3025_v45  ;;  %v3088_v29 = vld [vmem:[#allocation2 + $0x644] ss:$16 sps:$4 sm:$0xff]   ;;  %v3086_v31 = vld [vmem:[#allocation2 + $0x640] ss:$16 sps:$4 sm:$0xff]  }
  0x3a   :  { %v3091_v32 = vld [vmem:[#allocation2 + $0x424] ss:$16 sps:$4 sm:$0xff]   ;;  %v3089_v35 = vld [vmem:[#allocation2 + $0x420] ss:$16 sps:$4 sm:$0xff]  }
  0x3b   :  { %1621 = vmatpush2.bf16.msra.mxu0 %v3027_v47  ;;  %v3094_v33 = vld [vmem:[#allocation2 + $0x624] ss:$16 sps:$4 sm:$0xff]   ;;  %v3092_v36 = vld [vmem:[#allocation2 + $0x620] ss:$16 sps:$4 sm:$0xff]  }
  0x3c   :  { %1662 = vmatpush2.bf16.msra.mxu1 %v3028_v48  ;;  %1622 = vmatprep.subr.bf16.mxu0 %v3029_v51  ;;  %v3097_v39 = vld [vmem:[#allocation2 + $0x404] ss:$16 sps:$4 sm:$0xff]   ;;  %v3095_v42 = vld [vmem:[#allocation2 + $0x400] ss:$16 sps:$4 sm:$0xff]  }
  0x3d   :  { %1663 = vmatprep.subr.bf16.mxu1 %v3031_v53  ;;  %v3100_v41 = vld [vmem:[#allocation2 + $0x604] ss:$16 sps:$4 sm:$0xff]   ;;  %v3098_v43 = vld [vmem:[#allocation2 + $0x600] ss:$16 sps:$4 sm:$0xff]  }
  0x3e   :  { %v3103_v44 = vld [vmem:[#allocation2 + $0x5e4] ss:$16 sps:$4 sm:$0xff]   ;;  %v3101_v46 = vld [vmem:[#allocation2 + $0x5e0] ss:$16 sps:$4 sm:$0xff]  }
  0x3f   :  { %1623 = vmatpush2.bf16.msra.mxu0 %v3033_v54  ;;  %v3106_v45 = vld [vmem:[#allocation2 + $0x7e4] ss:$16 sps:$4 sm:$0xff]   ;;  %v3104_v47 = vld [vmem:[#allocation2 + $0x7e0] ss:$16 sps:$4 sm:$0xff]  }
  0x40   :  { %1664 = vmatpush2.bf16.msra.mxu1 %v3034_v55  ;;  %1624 = vmatprep.subr.bf16.mxu0 %v3035_v56  ;;  %v3109_v48 = vld [vmem:[#allocation2 + $0x5c4] ss:$16 sps:$4 sm:$0xff]   ;;  %v3107_v51 = vld [vmem:[#allocation2 + $0x5c0] ss:$16 sps:$4 sm:$0xff]  }
  0x41   :  { %1665 = vmatprep.subr.bf16.mxu1 %v3037_v57  ;;  %v3112_v50 = vld [vmem:[#allocation2 + $0x7c4] ss:$16 sps:$4 sm:$0xff]   ;;  %v3110_v53 = vld [vmem:[#allocation2 + $0x7c0] ss:$16 sps:$4 sm:$0xff]  }
  0x42   :  { %v3115_v54 = vld [vmem:[#allocation2 + $0x5a4] ss:$16 sps:$4 sm:$0xff]   ;;  %v3113_v56 = vld [vmem:[#allocation2 + $0x5a0] ss:$16 sps:$4 sm:$0xff]  }
  0x43   :  { %1625 = vmatpush2.bf16.msra.mxu0 %v3039_v58  ;;  %v3118_v55 = vld [vmem:[#allocation2 + $0x7a4] ss:$16 sps:$4 sm:$0xff]   ;;  %v3116_v57 = vld [vmem:[#allocation2 + $0x7a0] ss:$16 sps:$4 sm:$0xff]  }
  0x44   :  { %1666 = vmatpush2.bf16.msra.mxu1 %v3040_v59  ;;  %1626 = vmatprep.subr.bf16.mxu0 %v3041_v60  ;;  %v3121_v58 = vld [vmem:[#allocation2 + $0x584] ss:$16 sps:$4 sm:$0xff]   ;;  %v3119_v60 = vld [vmem:[#allocation2 + $0x580] ss:$16 sps:$4 sm:$0xff]  }
  0x45   :  { %1667 = vmatprep.subr.bf16.mxu1 %v3043_v61  ;;  %v3124_v59 = vld [vmem:[#allocation2 + $0x784] ss:$16 sps:$4 sm:$0xff]   ;;  %v3122_v61 = vld [vmem:[#allocation2 + $0x780] ss:$16 sps:$4 sm:$0xff]  }
  0x46   :  { %v3131_v4 = vld [vmem:[#allocation2 + $0x540] ss:$16 sps:$4 sm:$0xff]  }
  0x47   :  { %1627 = vmatpush2.bf16.msra.mxu0 %v3045_v62  ;;  %v3127_v62 = vld [vmem:[#allocation2 + $0x564] ss:$16 sps:$4 sm:$0xff]   ;;  %v3134_v5 = vld [vmem:[#allocation2 + $0x740] ss:$16 sps:$4 sm:$0xff]  }
  0x48   :  { %1668 = vmatpush2.bf16.msra.mxu1 %v3046_v63  ;;  %1628 = vmatprep.subr.bf16.mxu0 %v3047_v0  ;;  %v3130_v63 = vld [vmem:[#allocation2 + $0x764] ss:$16 sps:$4 sm:$0xff]   ;;  %v3125_v0 = vld [vmem:[#allocation2 + $0x560] ss:$16 sps:$4 sm:$0xff]  }
  0x49   :  { %1669 = vmatprep.subr.bf16.mxu1 %v3049_v1  ;;  %v3128_v1 = vld [vmem:[#allocation2 + $0x760] ss:$16 sps:$4 sm:$0xff]  }
  0x4b   :  { %1629 = vmatpush2.bf16.msra.mxu0 %v3051_v2  ;;  %v3133_v2 = vld [vmem:[#allocation2 + $0x544] ss:$16 sps:$4 sm:$0xff]  }
  0x4c   :  { %1670 = vmatpush2.bf16.msra.mxu1 %v3052_v3  ;;  %1680 = vmatprep.subr.bf16.mxu0 %v3055_v6  ;;  %v3136_v3 = vld [vmem:[#allocation2 + $0x744] ss:$16 sps:$4 sm:$0xff]  }
  0x4d   :  { %1721 = vmatprep.subr.bf16.mxu1 %v3058_v7  ;;  %v3139_v6 = vld [vmem:[#allocation2 + $0x524] ss:$16 sps:$4 sm:$0xff]  }
  0x4e   :  { %1631 = vmatmul.mubr.bf16.vlgmr.msra.gmra.mxu0 %v3533_v8  ;;  %v3142_v7 = vld [vmem:[#allocation2 + $0x724] ss:$16 sps:$4 sm:$0xff]  }
  0x4f   :  { %1672 = vmatmul.mubr.bf16.vlgmr.msra.gmra.mxu1 %v3535_v9  ;;  %1681 = vmatpush1.bf16.msra.mxu0 %v3053_v10  ;;  %v3137_v10 = vld [vmem:[#allocation2 + $0x520] ss:$16 sps:$4 sm:$0xff]  }
  0x50   :  { %1722 = vmatpush1.bf16.msra.mxu1 %v3056_v11  ;;  %1682 = vmatprep.subr.bf16.mxu0 %v3061_v12  ;;  %v3140_v11 = vld [vmem:[#allocation2 + $0x720] ss:$16 sps:$4 sm:$0xff]   ;;  %v3145_v12 = vld [vmem:[#allocation2 + $0x504] ss:$16 sps:$4 sm:$0xff]  }
  0x51   :  { %1723 = vmatprep.subr.bf16.mxu1 %v3064_v13  ;;  %1712 = vmatprep.mubr.bf16.mxu0 %v3542_v37  ;;  %v3148_v13 = vld [vmem:[#allocation2 + $0x704] ss:$16 sps:$4 sm:$0xff]  }
  0x52   :  { %1753 = vmatprep.mubr.bf16.mxu1 %v3547_v40 }
  0x53   :  { %1683 = vmatpush1.bf16.msra.mxu0 %v3059_v14  ;;  %v3143_v14 = vld [vmem:[#allocation2 + $0x500] ss:$16 sps:$4 sm:$0xff]  }
  0x54   :  { %1724 = vmatpush1.bf16.msra.mxu1 %v3062_v15  ;;  %1684 = vmatprep.subr.bf16.mxu0 %v3067_v16  ;;  %v3146_v15 = vld [vmem:[#allocation2 + $0x700] ss:$16 sps:$4 sm:$0xff]  }
  0x55   :  { %1725 = vmatprep.subr.bf16.mxu1 %v3070_v17  ;;  %v50_v16 = vld [vmem:[%s3916_s0 + $0x20] sm:$0xff]  ;;  %v52_v17 = vld [vmem:[%s3916_s0 + $0x30] sm:$0xff] }
  0x57   :  { %1685 = vmatpush1.bf16.msra.mxu0 %v3065_v18  ;;  %v3151_v18 = vld [vmem:[#allocation2 + $0xec] ss:$16 sps:$4 sm:$0xff]  }
  0x58   :  { %1726 = vmatpush1.bf16.msra.mxu1 %v3068_v19  ;;  %1686 = vmatprep.subr.bf16.mxu0 %v3073_v20  ;;  %v3154_v19 = vld [vmem:[#allocation2 + $0x2ec] ss:$16 sps:$4 sm:$0xff]   ;;  %v3557_v20 = vpack.c.bf16 %v50_v16, %v50_v16 }
  0x59   :  { %1727 = vmatprep.subr.bf16.mxu1 %v3076_v21  ;;  %v3559_v21 = vpack.c.bf16 %v52_v17, %v52_v17  ;;  %v3235_v16 = vld [vmem:[#allocation2 + $0x12c] ss:$16 sps:$4 sm:$0xff]  }
  0x5a   :  { %v3238_v17 = vld [vmem:[#allocation2 + $0x32c] ss:$16 sps:$4 sm:$0xff]  }
  0x5b   :  { %1687 = vmatpush1.bf16.msra.mxu0 %v3071_v22  ;;  %v3149_v22 = vld [vmem:[#allocation2 + $0xe8] ss:$16 sps:$4 sm:$0xff]  }
  0x5c   :  { %1728 = vmatpush1.bf16.msra.mxu1 %v3074_v23  ;;  %1688 = vmatprep.subr.bf16.mxu0 %v3079_v24  ;;  %v3152_v23 = vld [vmem:[#allocation2 + $0x2e8] ss:$16 sps:$4 sm:$0xff]   ;;  %v3157_v24 = vld [vmem:[#allocation2 + $0xcc] ss:$16 sps:$4 sm:$0xff]  }
  0x5d   :  { %1729 = vmatprep.subr.bf16.mxu1 %v3082_v25  ;;  %v3160_v25 = vld [vmem:[#allocation2 + $0x2cc] ss:$16 sps:$4 sm:$0xff]  }
  0x5f   :  { %1689 = vmatpush1.bf16.msra.mxu0 %v3077_v26  ;;  %v3155_v26 = vld [vmem:[#allocation2 + $0xc8] ss:$16 sps:$4 sm:$0xff]  }
  0x60   :  { %1730 = vmatpush1.bf16.msra.mxu1 %v3080_v27  ;;  %1690 = vmatprep.subr.bf16.mxu0 %v3085_v28  ;;  %v3158_v27 = vld [vmem:[#allocation2 + $0x2c8] ss:$16 sps:$4 sm:$0xff]   ;;  %v3163_v28 = vld [vmem:[#allocation2 + $0xac] ss:$16 sps:$4 sm:$0xff]  }
  0x61   :  { %1731 = vmatprep.subr.bf16.mxu1 %v3088_v29  ;;  %v3166_v29 = vld [vmem:[#allocation2 + $0x2ac] ss:$16 sps:$4 sm:$0xff]  }
  0x63   :  { %1691 = vmatpush1.bf16.msra.mxu0 %v3083_v30  ;;  %v3161_v30 = vld [vmem:[#allocation2 + $0xa8] ss:$16 sps:$4 sm:$0xff]  }
  0x64   :  { %1732 = vmatpush1.bf16.msra.mxu1 %v3086_v31  ;;  %1692 = vmatprep.subr.bf16.mxu0 %v3091_v32  ;;  %v3164_v31 = vld [vmem:[#allocation2 + $0x2a8] ss:$16 sps:$4 sm:$0xff]   ;;  %v3169_v32 = vld [vmem:[#allocation2 + $0x8c] ss:$16 sps:$4 sm:$0xff]  }
  0x65   :  { %1733 = vmatprep.subr.bf16.mxu1 %v3094_v33  ;;  %v3172_v33 = vld [vmem:[#allocation2 + $0x28c] ss:$16 sps:$4 sm:$0xff]  }
  0x67   :  { %1693 = vmatpush1.bf16.msra.mxu0 %v3089_v35  ;;  %v3170_v35 = vld [vmem:[#allocation2 + $0x288] ss:$16 sps:$4 sm:$0xff]  }
  0x68   :  { %1734 = vmatpush1.bf16.msra.mxu1 %v3092_v36  ;;  %1694 = vmatprep.subr.bf16.mxu0 %v3097_v39  ;;  %v3175_v36 = vld [vmem:[#allocation2 + $0x6c] ss:$16 sps:$4 sm:$0xff]   ;;  %v3173_v39 = vld [vmem:[#allocation2 + $0x68] ss:$16 sps:$4 sm:$0xff]  }
  0x69   :  { %1735 = vmatprep.subr.bf16.mxu1 %v3100_v41  ;;  %v3184_v41 = vld [vmem:[#allocation2 + $0x24c] ss:$16 sps:$4 sm:$0xff]  }
  0x6b   :  { %1695 = vmatpush1.bf16.msra.mxu0 %v3095_v42  ;;  %v3179_v42 = vld [vmem:[#allocation2 + $0x48] ss:$16 sps:$4 sm:$0xff]  }
  0x6c   :  { %1736 = vmatpush1.bf16.msra.mxu1 %v3098_v43  ;;  %1696 = vmatprep.subr.bf16.mxu0 %v3103_v44  ;;  %v3182_v43 = vld [vmem:[#allocation2 + $0x248] ss:$16 sps:$4 sm:$0xff]   ;;  %v3187_v44 = vld [vmem:[#allocation2 + $0x2c] ss:$16 sps:$4 sm:$0xff]  }
  0x6d   :  { %1737 = vmatprep.subr.bf16.mxu1 %v3106_v45  ;;  %v3190_v45 = vld [vmem:[#allocation2 + $0x22c] ss:$16 sps:$4 sm:$0xff]  }
  0x6f   :  { %1697 = vmatpush2.bf16.msra.mxu0 %v3101_v46  ;;  %v3185_v46 = vld [vmem:[#allocation2 + $0x28] ss:$16 sps:$4 sm:$0xff]  }
  0x70   :  { %1738 = vmatpush2.bf16.msra.mxu1 %v3104_v47  ;;  %1698 = vmatprep.subr.bf16.mxu0 %v3109_v48  ;;  %v3188_v47 = vld [vmem:[#allocation2 + $0x228] ss:$16 sps:$4 sm:$0xff]   ;;  %v3193_v48 = vld [vmem:[#allocation2 + $0xc] ss:$16 sps:$4 sm:$0xff]  }
  0x71   :  { %1739 = vmatprep.subr.bf16.mxu1 %v3112_v50  ;;  %v3196_v50 = vld [vmem:[#allocation2 + $0x20c] ss:$16 sps:$4 sm:$0xff]  }
  0x73   :  { %1699 = vmatpush2.bf16.msra.mxu0 %v3107_v51  ;;  %v3191_v51 = vld [vmem:[#allocation2 + $0x8] ss:$16 sps:$4 sm:$0xff]  }
  0x74   :  { %1740 = vmatpush2.bf16.msra.mxu1 %v3110_v53  ;;  %1700 = vmatprep.subr.bf16.mxu0 %v3115_v54  ;;  %v3194_v53 = vld [vmem:[#allocation2 + $0x208] ss:$16 sps:$4 sm:$0xff]   ;;  %v3199_v54 = vld [vmem:[#allocation2 + $0x1ec] ss:$16 sps:$4 sm:$0xff]  }
  0x75   :  { %1741 = vmatprep.subr.bf16.mxu1 %v3118_v55  ;;  %v3202_v55 = vld [vmem:[#allocation2 + $0x3ec] ss:$16 sps:$4 sm:$0xff]  }
  0x77   :  { %1701 = vmatpush2.bf16.msra.mxu0 %v3113_v56  ;;  %v3197_v56 = vld [vmem:[#allocation2 + $0x1e8] ss:$16 sps:$4 sm:$0xff]  }
  0x78   :  { %1742 = vmatpush2.bf16.msra.mxu1 %v3116_v57  ;;  %1702 = vmatprep.subr.bf16.mxu0 %v3121_v58  ;;  %v3200_v57 = vld [vmem:[#allocation2 + $0x3e8] ss:$16 sps:$4 sm:$0xff]   ;;  %v3205_v58 = vld [vmem:[#allocation2 + $0x1cc] ss:$16 sps:$4 sm:$0xff]  }
  0x79   :  { %1743 = vmatprep.subr.bf16.mxu1 %v3124_v59  ;;  %v3208_v59 = vld [vmem:[#allocation2 + $0x3cc] ss:$16 sps:$4 sm:$0xff]  }
  0x7b   :  { %1703 = vmatpush2.bf16.msra.mxu0 %v3119_v60  ;;  %v3203_v60 = vld [vmem:[#allocation2 + $0x1c8] ss:$16 sps:$4 sm:$0xff]  }
  0x7c   :  { %1744 = vmatpush2.bf16.msra.mxu1 %v3122_v61  ;;  %1704 = vmatprep.subr.bf16.mxu0 %v3127_v62  ;;  %v3206_v61 = vld [vmem:[#allocation2 + $0x3c8] ss:$16 sps:$4 sm:$0xff]   ;;  %v3211_v62 = vld [vmem:[#allocation2 + $0x1ac] ss:$16 sps:$4 sm:$0xff]  }
  0x7d   :  { %1745 = vmatprep.subr.bf16.mxu1 %v3130_v63  ;;  %v3214_v63 = vld [vmem:[#allocation2 + $0x3ac] ss:$16 sps:$4 sm:$0xff]  }
  0x7f   :  { %1705 = vmatpush2.bf16.msra.mxu0 %v3125_v0  ;;  %v3209_v0 = vld [vmem:[#allocation2 + $0x1a8] ss:$16 sps:$4 sm:$0xff]  }
  0x80   :  { %1746 = vmatpush2.bf16.msra.mxu1 %v3128_v1  ;;  %1706 = vmatprep.subr.bf16.mxu0 %v3133_v2  ;;  %v3212_v1 = vld [vmem:[#allocation2 + $0x3a8] ss:$16 sps:$4 sm:$0xff]   ;;  %v3217_v2 = vld [vmem:[#allocation2 + $0x18c] ss:$16 sps:$4 sm:$0xff]  }
  0x81   :  { %1747 = vmatprep.subr.bf16.mxu1 %v3136_v3  ;;  %v3220_v3 = vld [vmem:[#allocation2 + $0x38c] ss:$16 sps:$4 sm:$0xff]  }
  0x83   :  { %1707 = vmatpush2.bf16.msra.mxu0 %v3131_v4  ;;  %v3215_v4 = vld [vmem:[#allocation2 + $0x188] ss:$16 sps:$4 sm:$0xff]  }
  0x84   :  { %1748 = vmatpush2.bf16.msra.mxu1 %v3134_v5  ;;  %1708 = vmatprep.subr.bf16.mxu0 %v3139_v6  ;;  %v3218_v5 = vld [vmem:[#allocation2 + $0x388] ss:$16 sps:$4 sm:$0xff]   ;;  %v3223_v6 = vld [vmem:[#allocation2 + $0x16c] ss:$16 sps:$4 sm:$0xff]  }
  0x85   :  { %1749 = vmatprep.subr.bf16.mxu1 %v3142_v7  ;;  %v3226_v7 = vld [vmem:[#allocation2 + $0x36c] ss:$16 sps:$4 sm:$0xff]  }
  0x87   :  { %1709 = vmatpush2.bf16.msra.mxu0 %v3137_v10  ;;  %v3221_v10 = vld [vmem:[#allocation2 + $0x168] ss:$16 sps:$4 sm:$0xff]  }
  0x88   :  { %1750 = vmatpush2.bf16.msra.mxu1 %v3140_v11  ;;  %1710 = vmatprep.subr.bf16.mxu0 %v3145_v12  ;;  %v3224_v11 = vld [vmem:[#allocation2 + $0x368] ss:$16 sps:$4 sm:$0xff]   ;;  %v3229_v12 = vld [vmem:[#allocation2 + $0x14c] ss:$16 sps:$4 sm:$0xff]  }
  0x89   :  { %1751 = vmatprep.subr.bf16.mxu1 %v3148_v13  ;;  %v3232_v13 = vld [vmem:[#allocation2 + $0x34c] ss:$16 sps:$4 sm:$0xff]  }
  0x8b   :  { %1711 = vmatpush2.bf16.msra.mxu0 %v3143_v14  ;;  %v3227_v14 = vld [vmem:[#allocation2 + $0x148] ss:$16 sps:$4 sm:$0xff]  }
  0x8c   :  { %1752 = vmatpush2.bf16.msra.mxu1 %v3146_v15  ;;  %1762 = vmatprep.subr.bf16.mxu0 %v3151_v18  ;;  %v3230_v15 = vld [vmem:[#allocation2 + $0x348] ss:$16 sps:$4 sm:$0xff]  }
  0x8d   :  { %1803 = vmatprep.subr.bf16.mxu1 %v3154_v19  ;;  %v3233_v18 = vld [vmem:[#allocation2 + $0x128] ss:$16 sps:$4 sm:$0xff]  }
  0x8e   :  { %1713 = vmatmul.mubr.bf16.vlgmr.msra.gmra.mxu0 %v3557_v20  ;;  %v3236_v19 = vld [vmem:[#allocation2 + $0x328] ss:$16 sps:$4 sm:$0xff]  }
  0x8f   :  { %1754 = vmatmul.mubr.bf16.vlgmr.msra.gmra.mxu1 %v3559_v21  ;;  %1763 = vmatpush1.bf16.msra.mxu0 %v3149_v22  ;;  %v3241_v22 = vld [vmem:[#allocation2 + $0x10c] ss:$16 sps:$4 sm:$0xff]  }
  0x90   :  { %1804 = vmatpush1.bf16.msra.mxu1 %v3152_v23  ;;  %1764 = vmatprep.subr.bf16.mxu0 %v3157_v24  ;;  %v3244_v23 = vld [vmem:[#allocation2 + $0x30c] ss:$16 sps:$4 sm:$0xff]   ;;  %v3239_v24 = vld [vmem:[#allocation2 + $0x108] ss:$16 sps:$4 sm:$0xff]  }
  0x91   :  { %1805 = vmatprep.subr.bf16.mxu1 %v3160_v25  ;;  %1794 = vmatprep.mubr.bf16.mxu0 %v3518_v49  ;;  %v3176_v49 = vld [vmem:[#allocation2 + $0x268] ss:$16 sps:$4 sm:$0xff]  }
  0x92   :  { %1835 = vmatprep.mubr.bf16.mxu1 %v3523_v52  ;;  %v3181_v52 = vld [vmem:[#allocation2 + $0x4c] ss:$16 sps:$4 sm:$0xff]   ;;  %v3242_v25 = vld [vmem:[#allocation2 + $0x308] ss:$16 sps:$4 sm:$0xff]  }
  0x93   :  { %1765 = vmatpush1.bf16.msra.mxu0 %v3155_v26  ;;  %v3247_v26 = vld [vmem:[#allocation2 + $0x4ec] ss:$16 sps:$4 sm:$0xff]  }
  0x94   :  { %1806 = vmatpush1.bf16.msra.mxu1 %v3158_v27  ;;  %1766 = vmatprep.subr.bf16.mxu0 %v3163_v28  ;;  %v3250_v27 = vld [vmem:[#allocation2 + $0x6ec] ss:$16 sps:$4 sm:$0xff]   ;;  %v3245_v28 = vld [vmem:[#allocation2 + $0x4e8] ss:$16 sps:$4 sm:$0xff]  }
  0x95   :  { %1807 = vmatprep.subr.bf16.mxu1 %v3166_v29  ;;  %v3248_v29 = vld [vmem:[#allocation2 + $0x6e8] ss:$16 sps:$4 sm:$0xff]  }
  0x97   :  { %1767 = vmatpush1.bf16.msra.mxu0 %v3161_v30  ;;  %v3253_v30 = vld [vmem:[#allocation2 + $0x4cc] ss:$16 sps:$4 sm:$0xff]  }
  0x98   :  { %1808 = vmatpush1.bf16.msra.mxu1 %v3164_v31  ;;  %1768 = vmatprep.subr.bf16.mxu0 %v3169_v32  ;;  %v3256_v31 = vld [vmem:[#allocation2 + $0x6cc] ss:$16 sps:$4 sm:$0xff]   ;;  %v3251_v32 = vld [vmem:[#allocation2 + $0x4c8] ss:$16 sps:$4 sm:$0xff]  }
  0x99   :  { %1809 = vmatprep.subr.bf16.mxu1 %v3172_v33  ;;  %v3254_v33 = vld [vmem:[#allocation2 + $0x6c8] ss:$16 sps:$4 sm:$0xff]  }
  0x9b   :  { %1769 = vmatpush1.bf16.msra.mxu0 %v3167_v34  ;;  %v3259_v34 = vld [vmem:[#allocation2 + $0x4ac] ss:$16 sps:$4 sm:$0xff]  }
  0x9c   :  { %1810 = vmatpush1.bf16.msra.mxu1 %v3170_v35  ;;  %1770 = vmatprep.subr.bf16.mxu0 %v3175_v36  ;;  %v3262_v35 = vld [vmem:[#allocation2 + $0x6ac] ss:$16 sps:$4 sm:$0xff]   ;;  %v3257_v36 = vld [vmem:[#allocation2 + $0x4a8] ss:$16 sps:$4 sm:$0xff]  }
  0x9d   :  { %1811 = vmatprep.subr.bf16.mxu1 %v3178_v38  ;;  %v3260_v38 = vld [vmem:[#allocation2 + $0x6a8] ss:$16 sps:$4 sm:$0xff]  }
  0x9f   :  { %1771 = vmatpush1.bf16.msra.mxu0 %v3173_v39  ;;  %v3265_v39 = vld [vmem:[#allocation2 + $0x48c] ss:$16 sps:$4 sm:$0xff]  }
  0xa0   :  { %1812 = vmatpush1.bf16.msra.mxu1 %v3176_v49  ;;  %1772 = vmatprep.subr.bf16.mxu0 %v3181_v52  ;;  %v3263_v49 = vld [vmem:[#allocation2 + $0x488] ss:$16 sps:$4 sm:$0xff]   ;;  %v3271_v52 = vld [vmem:[#allocation2 + $0x46c] ss:$16 sps:$4 sm:$0xff]  }
  0xa1   :  { %1813 = vmatprep.subr.bf16.mxu1 %v3184_v41  ;;  %v3274_v41 = vld [vmem:[#allocation2 + $0x66c] ss:$16 sps:$4 sm:$0xff]  }
  0xa3   :  { %1773 = vmatpush1.bf16.msra.mxu0 %v3179_v42  ;;  %v3269_v42 = vld [vmem:[#allocation2 + $0x468] ss:$16 sps:$4 sm:$0xff]  }
  0xa4   :  { %1814 = vmatpush1.bf16.msra.mxu1 %v3182_v43  ;;  %1774 = vmatprep.subr.bf16.mxu0 %v3187_v44  ;;  %v3280_v43 = vld [vmem:[#allocation2 + $0x64c] ss:$16 sps:$4 sm:$0xff]   ;;  %v3275_v44 = vld [vmem:[#allocation2 + $0x448] ss:$16 sps:$4 sm:$0xff]  }
  0xa5   :  { %1815 = vmatprep.subr.bf16.mxu1 %v3190_v45  ;;  %v3278_v45 = vld [vmem:[#allocation2 + $0x648] ss:$16 sps:$4 sm:$0xff]  }
  0xa7   :  { %1775 = vmatpush1.bf16.msra.mxu0 %v3185_v46  ;;  %v3283_v46 = vld [vmem:[#allocation2 + $0x42c] ss:$16 sps:$4 sm:$0xff]  }
  0xa8   :  { %1816 = vmatpush1.bf16.msra.mxu1 %v3188_v47  ;;  %1776 = vmatprep.subr.bf16.mxu0 %v3193_v48  ;;  %v3286_v47 = vld [vmem:[#allocation2 + $0x62c] ss:$16 sps:$4 sm:$0xff]   ;;  %v3281_v48 = vld [vmem:[#allocation2 + $0x428] ss:$16 sps:$4 sm:$0xff]  }
  0xa9   :  { %1817 = vmatprep.subr.bf16.mxu1 %v3196_v50  ;;  %v3284_v50 = vld [vmem:[#allocation2 + $0x628] ss:$16 sps:$4 sm:$0xff]  }
  0xab   :  { %1777 = vmatpush1.bf16.msra.mxu0 %v3191_v51  ;;  %v3289_v51 = vld [vmem:[#allocation2 + $0x40c] ss:$16 sps:$4 sm:$0xff]  }
  0xac   :  { %1818 = vmatpush1.bf16.msra.mxu1 %v3194_v53  ;;  %1778 = vmatprep.subr.bf16.mxu0 %v3199_v54  ;;  %v3292_v53 = vld [vmem:[#allocation2 + $0x60c] ss:$16 sps:$4 sm:$0xff]   ;;  %v3287_v54 = vld [vmem:[#allocation2 + $0x408] ss:$16 sps:$4 sm:$0xff]  }
  0xad   :  { %1819 = vmatprep.subr.bf16.mxu1 %v3202_v55  ;;  %v3290_v55 = vld [vmem:[#allocation2 + $0x608] ss:$16 sps:$4 sm:$0xff]  }
  0xaf   :  { %1779 = vmatpush2.bf16.msra.mxu0 %v3197_v56  ;;  %v3295_v56 = vld [vmem:[#allocation2 + $0x5ec] ss:$16 sps:$4 sm:$0xff]  }
  0xb0   :  { %1820 = vmatpush2.bf16.msra.mxu1 %v3200_v57  ;;  %1780 = vmatprep.subr.bf16.mxu0 %v3205_v58  ;;  %v3298_v57 = vld [vmem:[#allocation2 + $0x7ec] ss:$16 sps:$4 sm:$0xff]   ;;  %v3293_v58 = vld [vmem:[#allocation2 + $0x5e8] ss:$16 sps:$4 sm:$0xff]  }
  0xb1   :  { %1821 = vmatprep.subr.bf16.mxu1 %v3208_v59  ;;  %v3296_v59 = vld [vmem:[#allocation2 + $0x7e8] ss:$16 sps:$4 sm:$0xff]  }
  0xb3   :  { %1781 = vmatpush2.bf16.msra.mxu0 %v3203_v60  ;;  %v3301_v60 = vld [vmem:[#allocation2 + $0x5cc] ss:$16 sps:$4 sm:$0xff]  }
  0xb4   :  { %1822 = vmatpush2.bf16.msra.mxu1 %v3206_v61  ;;  %1782 = vmatprep.subr.bf16.mxu0 %v3211_v62  ;;  %v3304_v61 = vld [vmem:[#allocation2 + $0x7cc] ss:$16 sps:$4 sm:$0xff]   ;;  %v3299_v62 = vld [vmem:[#allocation2 + $0x5c8] ss:$16 sps:$4 sm:$0xff]  }
  0xb5   :  { %1823 = vmatprep.subr.bf16.mxu1 %v3214_v63  ;;  %v3302_v63 = vld [vmem:[#allocation2 + $0x7c8] ss:$16 sps:$4 sm:$0xff]  }
  0xb7   :  { %1783 = vmatpush2.bf16.msra.mxu0 %v3209_v0  ;;  %v3307_v0 = vld [vmem:[#allocation2 + $0x5ac] ss:$16 sps:$4 sm:$0xff]  }
  0xb8   :  { %1824 = vmatpush2.bf16.msra.mxu1 %v3212_v1  ;;  %1784 = vmatprep.subr.bf16.mxu0 %v3217_v2  ;;  %v3310_v1 = vld [vmem:[#allocation2 + $0x7ac] ss:$16 sps:$4 sm:$0xff]   ;;  %v3305_v2 = vld [vmem:[#allocation2 + $0x5a8] ss:$16 sps:$4 sm:$0xff]  }
  0xb9   :  { %1825 = vmatprep.subr.bf16.mxu1 %v3220_v3  ;;  %v3308_v3 = vld [vmem:[#allocation2 + $0x7a8] ss:$16 sps:$4 sm:$0xff]  }
  0xbb   :  { %1785 = vmatpush2.bf16.msra.mxu0 %v3215_v4  ;;  %v3313_v4 = vld [vmem:[#allocation2 + $0x58c] ss:$16 sps:$4 sm:$0xff]  }
  0xbc   :  { %1826 = vmatpush2.bf16.msra.mxu1 %v3218_v5  ;;  %1786 = vmatprep.subr.bf16.mxu0 %v3223_v6  ;;  %v3316_v5 = vld [vmem:[#allocation2 + $0x78c] ss:$16 sps:$4 sm:$0xff]   ;;  %v3311_v6 = vld [vmem:[#allocation2 + $0x588] ss:$16 sps:$4 sm:$0xff]  }
  0xbd   :  { %1827 = vmatprep.subr.bf16.mxu1 %v3226_v7  ;;  %v3314_v7 = vld [vmem:[#allocation2 + $0x788] ss:$16 sps:$4 sm:$0xff]  }
  0xbf   :  { %1787 = vmatpush2.bf16.msra.mxu0 %v3221_v10  ;;  %v3319_v10 = vld [vmem:[#allocation2 + $0x56c] ss:$16 sps:$4 sm:$0xff]  }
  0xc0   :  { %1828 = vmatpush2.bf16.msra.mxu1 %v3224_v11  ;;  %1788 = vmatprep.subr.bf16.mxu0 %v3229_v12  ;;  %v3322_v11 = vld [vmem:[#allocation2 + $0x76c] ss:$16 sps:$4 sm:$0xff]   ;;  %v3317_v12 = vld [vmem:[#allocation2 + $0x568] ss:$16 sps:$4 sm:$0xff]  }
  0xc1   :  { %1829 = vmatprep.subr.bf16.mxu1 %v3232_v13  ;;  %v3320_v13 = vld [vmem:[#allocation2 + $0x768] ss:$16 sps:$4 sm:$0xff]  }
  0xc3   :  { %1789 = vmatpush2.bf16.msra.mxu0 %v3227_v14  ;;  %v3325_v14 = vld [vmem:[#allocation2 + $0x54c] ss:$16 sps:$4 sm:$0xff]  }
  0xc4   :  { %1830 = vmatpush2.bf16.msra.mxu1 %v3230_v15  ;;  %1790 = vmatprep.subr.bf16.mxu0 %v3235_v16  ;;  %v3328_v15 = vld [vmem:[#allocation2 + $0x74c] ss:$16 sps:$4 sm:$0xff]   ;;  %v3323_v16 = vld [vmem:[#allocation2 + $0x548] ss:$16 sps:$4 sm:$0xff]  }
  0xc5   :  { %1831 = vmatprep.subr.bf16.mxu1 %v3238_v17  ;;  %v3326_v17 = vld [vmem:[#allocation2 + $0x748] ss:$16 sps:$4 sm:$0xff]  }
  0xc7   :  { %1791 = vmatpush2.bf16.msra.mxu0 %v3233_v18  ;;  %v3331_v18 = vld [vmem:[#allocation2 + $0x52c] ss:$16 sps:$4 sm:$0xff]  }
  0xc8   :  { %1832 = vmatpush2.bf16.msra.mxu1 %v3236_v19  ;;  %1792 = vmatprep.subr.bf16.mxu0 %v3241_v22  ;;  %v3334_v19 = vld [vmem:[#allocation2 + $0x72c] ss:$16 sps:$4 sm:$0xff]   ;;  %v3329_v22 = vld [vmem:[#allocation2 + $0x528] ss:$16 sps:$4 sm:$0xff]  }
  0xc9   :  { %1833 = vmatprep.subr.bf16.mxu1 %v3244_v23  ;;  %v3332_v23 = vld [vmem:[#allocation2 + $0x728] ss:$16 sps:$4 sm:$0xff]  }
  0xcb   :  { %1793 = vmatpush2.bf16.msra.mxu0 %v3239_v24  ;;  %v3337_v24 = vld [vmem:[#allocation2 + $0x50c] ss:$16 sps:$4 sm:$0xff]  }
  0xcc   :  { %1834 = vmatpush2.bf16.msra.mxu1 %v3242_v25  ;;  %1844 = vmatprep.subr.bf16.mxu0 %v3247_v26  ;;  %v3340_v25 = vld [vmem:[#allocation2 + $0x70c] ss:$16 sps:$4 sm:$0xff]   ;;  %v3335_v26 = vld [vmem:[#allocation2 + $0x508] ss:$16 sps:$4 sm:$0xff]  }
  0xcd   :  { %1885 = vmatprep.subr.bf16.mxu1 %v3250_v27  ;;  %v3338_v27 = vld [vmem:[#allocation2 + $0x708] ss:$16 sps:$4 sm:$0xff]  }
  0xce   :  { %1795 = vmatmul.mubr.bf16.vlgmr.msra.gmra.mxu0 %v3533_v8  ;;  %v3268_v8 = vld [vmem:[#allocation2 + $0x68c] ss:$16 sps:$4 sm:$0xff]  }
  0xcf   :  { %1836 = vmatmul.mubr.bf16.vlgmr.msra.gmra.mxu1 %v3535_v9  ;;  %1845 = vmatpush1.bf16.msra.mxu0 %v3245_v28  ;;  %v3266_v9 = vld [vmem:[#allocation2 + $0x688] ss:$16 sps:$4 sm:$0xff]   ;;  %v3343_v28 = vld [vmem:[%s3920_s4 + $0x74] ss:$8 sps:$4 sm:$0xff]  }
  0xd0   :  { %1886 = vmatpush1.bf16.msra.mxu1 %v3248_v29  ;;  %1846 = vmatprep.subr.bf16.mxu0 %v3253_v30  ;;  %v3341_v29 = vld [vmem:[%s3920_s4 + $0x70] ss:$8 sps:$4 sm:$0xff]   ;;  %v3346_v30 = vld [vmem:[%s3920_s4 + $0x64] ss:$8 sps:$4 sm:$0xff]  }
  0xd1   :  { %1887 = vmatprep.subr.bf16.mxu1 %v3256_v31  ;;  %1876 = vmatprep.mubr.bf16.mxu0 %v3542_v37  ;;  %v3272_v37 = vld [vmem:[#allocation2 + $0x668] ss:$16 sps:$4 sm:$0xff]  }
  0xd2   :  { %1917 = vmatprep.mubr.bf16.mxu1 %v3547_v40  ;;  %v3277_v40 = vld [vmem:[#allocation2 + $0x44c] ss:$16 sps:$4 sm:$0xff]  }
  0xd3   :  { %1847 = vmatpush1.bf16.msra.mxu0 %v3251_v32 }
  0xd4   :  { %1888 = vmatpush1.bf16.msra.mxu1 %v3254_v33  ;;  %1848 = vmatprep.subr.bf16.mxu0 %v3259_v34  ;;  %v3344_v34 = vld [vmem:[%s3920_s4 + $0x60] ss:$8 sps:$4 sm:$0xff]  }
  0xd5   :  { %1889 = vmatprep.subr.bf16.mxu1 %v3262_v35 }
  0xd7   :  { %1849 = vmatpush1.bf16.msra.mxu0 %v3257_v36 }
  0xd8   :  { %1890 = vmatpush1.bf16.msra.mxu1 %v3260_v38  ;;  %1850 = vmatprep.subr.bf16.mxu0 %v3265_v39  ;;  %v3349_v38 = vld [vmem:[%s3920_s4 + $0x54] ss:$8 sps:$4 sm:$0xff]  }
  0xd9   :  { %1891 = vmatprep.subr.bf16.mxu1 %v3268_v8 }
  0xdb   :  { %1851 = vmatpush1.bf16.msra.mxu0 %v3263_v49 }
  0xdc   :  { %1892 = vmatpush1.bf16.msra.mxu1 %v3266_v9  ;;  %1852 = vmatprep.subr.bf16.mxu0 %v3271_v52  ;;  %v3352_v9 = vld [vmem:[%s3920_s4 + $0x44] ss:$8 sps:$4 sm:$0xff]   ;;  %v3389_v52 = vld [vmem:[%s3920_s4 + $0x170] ss:$8 sps:$4 sm:$0xff]  }
  0xdd   :  { %1893 = vmatprep.subr.bf16.mxu1 %v3274_v41  ;;  %v3391_v41 = vld [vmem:[%s3920_s4 + $0x174] ss:$8 sps:$4 sm:$0xff]  }
  0xdf   :  { %1853 = vmatpush1.bf16.msra.mxu0 %v3269_v42  ;;  %v3394_v42 = vld [vmem:[%s3920_s4 + $0x164] ss:$8 sps:$4 sm:$0xff]  }
  0xe0   :  { %1894 = vmatpush1.bf16.msra.mxu1 %v3272_v37  ;;  %1854 = vmatprep.subr.bf16.mxu0 %v3277_v40  ;;  %v3350_v37 = vld [vmem:[%s3920_s4 + $0x40] ss:$8 sps:$4 sm:$0xff]  }
  0xe1   :  { %1895 = vmatprep.subr.bf16.mxu1 %v3280_v43  ;;  %v3392_v40 = vld [vmem:[%s3920_s4 + $0x160] ss:$8 sps:$4 sm:$0xff]   ;;  %v3355_v43 = vld [vmem:[%s3920_s4 + $0x34] ss:$8 sps:$4 sm:$0xff]  }
  0xe3   :  { %1855 = vmatpush1.bf16.msra.mxu0 %v3275_v44  ;;  %v3397_v44 = vld [vmem:[%s3920_s4 + $0x154] ss:$8 sps:$4 sm:$0xff]  }
  0xe4   :  { %1896 = vmatpush1.bf16.msra.mxu1 %v3278_v45  ;;  %1856 = vmatprep.subr.bf16.mxu0 %v3283_v46  ;;  %v3353_v45 = vld [vmem:[%s3920_s4 + $0x30] ss:$8 sps:$4 sm:$0xff]  }
  0xe5   :  { %1897 = vmatprep.subr.bf16.mxu1 %v3286_v47  ;;  %v3395_v46 = vld [vmem:[%s3920_s4 + $0x150] ss:$8 sps:$4 sm:$0xff]   ;;  %v3358_v47 = vld [vmem:[%s3920_s4 + $0x24] ss:$8 sps:$4 sm:$0xff]  }
  0xe7   :  { %1857 = vmatpush1.bf16.msra.mxu0 %v3281_v48  ;;  %v3400_v48 = vld [vmem:[%s3920_s4 + $0x144] ss:$8 sps:$4 sm:$0xff]  }
  0xe8   :  { %1898 = vmatpush1.bf16.msra.mxu1 %v3284_v50  ;;  %1858 = vmatprep.subr.bf16.mxu0 %v3289_v51  ;;  %v3356_v50 = vld [vmem:[%s3920_s4 + $0x20] ss:$8 sps:$4 sm:$0xff]  }
  0xe9   :  { %1899 = vmatprep.subr.bf16.mxu1 %v3292_v53  ;;  %v3398_v51 = vld [vmem:[%s3920_s4 + $0x140] ss:$8 sps:$4 sm:$0xff]   ;;  %v3361_v53 = vld [vmem:[%s3920_s4 + $0x14] ss:$8 sps:$4 sm:$0xff]  }
  0xeb   :  { %1859 = vmatpush1.bf16.msra.mxu0 %v3287_v54  ;;  %v3403_v54 = vld [vmem:[%s3920_s4 + $0x134] ss:$8 sps:$4 sm:$0xff]  }
  0xec   :  { %1900 = vmatpush1.bf16.msra.mxu1 %v3290_v55  ;;  %1860 = vmatprep.subr.bf16.mxu0 %v3295_v56  ;;  %v3359_v55 = vld [vmem:[%s3920_s4 + $0x10] ss:$8 sps:$4 sm:$0xff]  }
  0xed   :  { %1901 = vmatprep.subr.bf16.mxu1 %v3298_v57  ;;  %v3401_v56 = vld [vmem:[%s3920_s4 + $0x130] ss:$8 sps:$4 sm:$0xff]   ;;  %v3364_v57 = vld [vmem:[%s3920_s4 + $0x4] ss:$8 sps:$4 sm:$0xff]  }
  0xef   :  { %1861 = vmatpush2.bf16.msra.mxu0 %v3293_v58  ;;  %v3406_v58 = vld [vmem:[%s3920_s4 + $0x124] ss:$8 sps:$4 sm:$0xff]  }
  0xf0   :  { %1902 = vmatpush2.bf16.msra.mxu1 %v3296_v59  ;;  %1862 = vmatprep.subr.bf16.mxu0 %v3301_v60  ;;  %v3362_v59 = vld [vmem:[%s3920_s4] ss:$8 sps:$4 sm:$0xff]  }
  0xf1   :  { %1903 = vmatprep.subr.bf16.mxu1 %v3304_v61  ;;  %v3404_v60 = vld [vmem:[%s3920_s4 + $0x120] ss:$8 sps:$4 sm:$0xff]   ;;  %v3367_v61 = vld [vmem:[%s3920_s4 + $0xf4] ss:$8 sps:$4 sm:$0xff]  }
  0xf3   :  { %1863 = vmatpush2.bf16.msra.mxu0 %v3299_v62  ;;  %v3409_v62 = vld [vmem:[%s3920_s4 + $0x114] ss:$8 sps:$4 sm:$0xff]  }
  0xf4   :  { %1904 = vmatpush2.bf16.msra.mxu1 %v3302_v63  ;;  %1864 = vmatprep.subr.bf16.mxu0 %v3307_v0  ;;  %v3365_v63 = vld [vmem:[%s3920_s4 + $0xf0] ss:$8 sps:$4 sm:$0xff]  }
  0xf5   :  { %1905 = vmatprep.subr.bf16.mxu1 %v3310_v1  ;;  %v3407_v0 = vld [vmem:[%s3920_s4 + $0x110] ss:$8 sps:$4 sm:$0xff]   ;;  %v3370_v1 = vld [vmem:[%s3920_s4 + $0xe4] ss:$8 sps:$4 sm:$0xff]  }
  0xf7   :  { %1865 = vmatpush2.bf16.msra.mxu0 %v3305_v2  ;;  %v3412_v2 = vld [vmem:[%s3920_s4 + $0x104] ss:$8 sps:$4 sm:$0xff]  }
  0xf8   :  { %1906 = vmatpush2.bf16.msra.mxu1 %v3308_v3  ;;  %1866 = vmatprep.subr.bf16.mxu0 %v3313_v4  ;;  %v3368_v3 = vld [vmem:[%s3920_s4 + $0xe0] ss:$8 sps:$4 sm:$0xff]  }
  0xf9   :  { %1907 = vmatprep.subr.bf16.mxu1 %v3316_v5  ;;  %v3410_v4 = vld [vmem:[%s3920_s4 + $0x100] ss:$8 sps:$4 sm:$0xff]   ;;  %v3373_v5 = vld [vmem:[%s3920_s4 + $0xd4] ss:$8 sps:$4 sm:$0xff]  }
  0xfb   :  { %1867 = vmatpush2.bf16.msra.mxu0 %v3311_v6  ;;  %v3415_v6 = vld [vmem:[%s3920_s4 + $0x1f4] ss:$8 sps:$4 sm:$0xff]  }
  0xfc   :  { %1908 = vmatpush2.bf16.msra.mxu1 %v3314_v7  ;;  %1868 = vmatprep.subr.bf16.mxu0 %v3319_v10  ;;  %v3371_v7 = vld [vmem:[%s3920_s4 + $0xd0] ss:$8 sps:$4 sm:$0xff]  }
  0xfd   :  { %1909 = vmatprep.subr.bf16.mxu1 %v3322_v11  ;;  %v3413_v10 = vld [vmem:[%s3920_s4 + $0x1f0] ss:$8 sps:$4 sm:$0xff]   ;;  %v3376_v11 = vld [vmem:[%s3920_s4 + $0xc4] ss:$8 sps:$4 sm:$0xff]  }
  0xff   :  { %1869 = vmatpush2.bf16.msra.mxu0 %v3317_v12  ;;  %v3418_v12 = vld [vmem:[%s3920_s4 + $0x1e4] ss:$8 sps:$4 sm:$0xff]  }
 0x100   :  { %1910 = vmatpush2.bf16.msra.mxu1 %v3320_v13  ;;  %1870 = vmatprep.subr.bf16.mxu0 %v3325_v14  ;;  %v3374_v13 = vld [vmem:[%s3920_s4 + $0xc0] ss:$8 sps:$4 sm:$0xff]  }
 0x101   :  { %1911 = vmatprep.subr.bf16.mxu1 %v3328_v15  ;;  %v3416_v14 = vld [vmem:[%s3920_s4 + $0x1e0] ss:$8 sps:$4 sm:$0xff]   ;;  %v3379_v15 = vld [vmem:[%s3920_s4 + $0xb4] ss:$8 sps:$4 sm:$0xff]  }
 0x103   :  { %1871 = vmatpush2.bf16.msra.mxu0 %v3323_v16  ;;  %v3421_v16 = vld [vmem:[%s3920_s4 + $0x1d4] ss:$8 sps:$4 sm:$0xff]  }
 0x104   :  { %1912 = vmatpush2.bf16.msra.mxu1 %v3326_v17  ;;  %1872 = vmatprep.subr.bf16.mxu0 %v3331_v18  ;;  %v3377_v17 = vld [vmem:[%s3920_s4 + $0xb0] ss:$8 sps:$4 sm:$0xff]  }
 0x105   :  { %1913 = vmatprep.subr.bf16.mxu1 %v3334_v19  ;;  %v3419_v18 = vld [vmem:[%s3920_s4 + $0x1d0] ss:$8 sps:$4 sm:$0xff]   ;;  %v3382_v19 = vld [vmem:[%s3920_s4 + $0xa4] ss:$8 sps:$4 sm:$0xff]  }
 0x107   :  { %1873 = vmatpush2.bf16.msra.mxu0 %v3329_v22  ;;  %v3424_v22 = vld [vmem:[%s3920_s4 + $0x1c4] ss:$8 sps:$4 sm:$0xff]  }
 0x108   :  { %1914 = vmatpush2.bf16.msra.mxu1 %v3332_v23  ;;  %1874 = vmatprep.subr.bf16.mxu0 %v3337_v24  ;;  %v3380_v23 = vld [vmem:[%s3920_s4 + $0xa0] ss:$8 sps:$4 sm:$0xff]  }
 0x109   :  { %1915 = vmatprep.subr.bf16.mxu1 %v3340_v25  ;;  %v3422_v24 = vld [vmem:[%s3920_s4 + $0x1c0] ss:$8 sps:$4 sm:$0xff]   ;;  %v3385_v25 = vld [vmem:[%s3920_s4 + $0x94] ss:$8 sps:$4 sm:$0xff]  }
 0x10b   :  { %1875 = vmatpush2.bf16.msra.mxu0 %v3335_v26  ;;  %v1928_v26 = vlaneseq }
 0x10c   :  { %1916 = vmatpush2.bf16.msra.mxu1 %v3338_v27  ;;  %2370 = vmatprep.subr.bf16.mxu0 %v3343_v28  ;;  %v3383_v27 = vld [vmem:[%s3920_s4 + $0x90] ss:$8 sps:$4 sm:$0xff]   ;;  %v3388_v28 = vld [vmem:[%s3920_s4 + $0x84] ss:$8 sps:$4 sm:$0xff]  }
 0x10d   :  { %2411 = vmatprep.subr.bf16.mxu1 %v3391_v41 }
 0x10e   :  { %v1632_v31 = vpop.f32.mrf.mxu0  ;;  %1877 = vmatmul.mubr.bf16.vlgmr.msra.gmra.mxu0 %v3557_v20 }
 0x10f   :  { %v1673_v32 = vpop.f32.mrf.mxu1  ;;  %1918 = vmatmul.mubr.bf16.vlgmr.msra.gmra.mxu1 %v3559_v21  ;;  %2371 = vmatpush1.bf16.msra.mxu0 %v3341_v29  ;;  %v3347_v21 = vld [vmem:[%s3920_s4 + $0x50] ss:$8 sps:$4 sm:$0xff]   ;;  %v3742_v29 = vshrl.u32 %v1928_v26, 7  ;;  %v2491_v26 = vld [vmem:[%s3923_s7 + $0x48] sm:$0xff] }
 0x110   :  { %v3580_v33 = vadd.f32 %v1673_v32, %v1632_v31  ;;  %v3585_v35 = vpop.f32.mrf.mxu0  ;;  %2372 = vmatprep.subr.bf16.mxu0 %v3346_v30  ;;  %2412 = vmatpush1.bf16.msra.mxu1 %v3389_v52  ;;  %v3386_v30 = vld [vmem:[%s3920_s4 + $0x80] ss:$8 sps:$4 sm:$0xff]  }
 0x111   :  { %v3587_v36 = vpop.f32.mrf.mxu1  ;;  %2413 = vmatprep.subr.bf16.mxu1 %v3394_v42  ;;  %v3748_v31 = vsub.s32 0, %v3742_v29  ;;  %v3753_v32 = vld [vmem:[%s3918_s2] sm:$0xf] }
 0x112   :  { %v1636_v39 = vpop.f32.mrf.mxu0 }
 0x113   :  { %v1677_v20 = vpop.f32.mrf.mxu1  ;;  %2373 = vmatpush1.bf16.msra.mxu0 %v3344_v34  ;;  %v3427_v34 = vld [vmem:[%s3920_s4 + $0x1b4] ss:$8 sps:$4 sm:$0xff]   ;;  %v3425_v39 = vld [vmem:[%s3920_s4 + $0x1b0] ss:$8 sps:$4 sm:$0xff]   ;;  %v1931_v52 = vrot.slane %v3753_v32, %v3748_v31 }
 0x114   :  { %v1637_v8 = vpop.f32.mrf.mxu0  ;;  %2374 = vmatprep.subr.bf16.mxu0 %v3349_v38  ;;  %2414 = vmatpush1.bf16.msra.mxu1 %v3392_v40  ;;  %v3759_v38 = vsub.s32 1, %v3742_v29 }
 0x115   :  { %v1678_v49 = vpop.f32.mrf.mxu1  ;;  %2415 = vmatprep.subr.bf16.mxu1 %v3397_v44  ;;  %v3767_v8 = vld [vmem:[%s3919_s3] sm:$0xf] }
 0x116   :  { %v1676_v49 = vadd.f32 %v3587_v36, %v3585_v35  ;;  %v1935_v35 = vrot.slane %v3753_v32, %v3759_v38 }
 0x117   :  { %2375 = vmatpush1.bf16.msra.mxu0 %v3347_v21 }
 0x118   :  { %2376 = vmatprep.subr.bf16.mxu0 %v3352_v9  ;;  %2416 = vmatpush1.bf16.msra.mxu1 %v3395_v46 }
 0x119   :  { %2417 = vmatprep.subr.bf16.mxu1 %v3400_v48  ;;  %v1961_v48 = vrot.slane %v3767_v8, %v3759_v38 }
 0x11b   :  { %2377 = vmatpush1.bf16.msra.mxu0 %v3350_v37  ;;  %v3430_v37 = vld [vmem:[%s3920_s4 + $0x1a4] ss:$8 sps:$4 sm:$0xff]  }
 0x11c   :  { %2378 = vmatprep.subr.bf16.mxu0 %v3355_v43  ;;  %2418 = vmatpush1.bf16.msra.mxu1 %v3398_v51  ;;  %v1957_v43 = vrot.slane %v3767_v8, %v3748_v31 }
 0x11d   :  { %2419 = vmatprep.subr.bf16.mxu1 %v3403_v54 }
 0x11f   :  { %2379 = vmatpush1.bf16.msra.mxu0 %v3353_v45 }
 0x120   :  { %2380 = vmatprep.subr.bf16.mxu0 %v3358_v47  ;;  %2420 = vmatpush1.bf16.msra.mxu1 %v3401_v56  ;;  %v3431_v56 = vld [vmem:[%s3920_s4 + $0x190] ss:$8 sps:$4 sm:$0xff]  }
 0x121   :  { %2421 = vmatprep.subr.bf16.mxu1 %v3406_v58 }
 0x123   :  { %2381 = vmatpush1.bf16.msra.mxu0 %v3356_v50 }
 0x124   :  { %2382 = vmatprep.subr.bf16.mxu0 %v3361_v53  ;;  %2422 = vmatpush1.bf16.msra.mxu1 %v3404_v60  ;;  %v3433_v53 = vld [vmem:[%s3920_s4 + $0x194] ss:$8 sps:$4 sm:$0xff]  }
 0x125   :  { %2423 = vmatprep.subr.bf16.mxu1 %v3409_v62 }
 0x127   :  { %2383 = vmatpush1.bf16.msra.mxu0 %v3359_v55 }
 0x128   :  { %2384 = vmatprep.subr.bf16.mxu0 %v3364_v57  ;;  %2424 = vmatpush1.bf16.msra.mxu1 %v3407_v0 }
 0x129   :  { %2425 = vmatprep.subr.bf16.mxu1 %v3412_v2 }
 0x12b   :  { %2385 = vmatpush1.bf16.msra.mxu0 %v3362_v59  ;;  %v3436_v59 = vld [vmem:[%s3920_s4 + $0x184] ss:$8 sps:$4 sm:$0xff]  }
 0x12c   :  { %2386 = vmatprep.subr.bf16.mxu0 %v3367_v61  ;;  %2426 = vmatpush1.bf16.msra.mxu1 %v3410_v4  ;;  %v3434_v61 = vld [vmem:[%s3920_s4 + $0x180] ss:$8 sps:$4 sm:$0xff]  }
 0x12d   :  { %2427 = vmatprep.subr.bf16.mxu1 %v3415_v6 }
 0x12f   :  { %2387 = vmatpush2.bf16.msra.mxu0 %v3365_v63 }
 0x130   :  { %2388 = vmatprep.subr.bf16.mxu0 %v3370_v1  ;;  %2428 = vmatpush2.bf16.msra.mxu1 %v3413_v10 }
 0x131   :  { %2429 = vmatprep.subr.bf16.mxu1 %v3418_v12  ;;  %v2497_v12 = vld [vmem:[%s3923_s7 + $0x78] sm:$0xff] }
 0x133   :  { %2389 = vmatpush2.bf16.msra.mxu0 %v3368_v3 }
 0x134   :  { %2390 = vmatprep.subr.bf16.mxu0 %v3373_v5  ;;  %2430 = vmatpush2.bf16.msra.mxu1 %v3416_v14  ;;  %v2496_v14 = vld [vmem:[%s3923_s7 + $0x70] sm:$0xff] }
 0x135   :  { %2431 = vmatprep.subr.bf16.mxu1 %v3421_v16  ;;  %v2495_v16 = vld [vmem:[%s3923_s7 + $0x68] sm:$0xff] }
 0x137   :  { %2391 = vmatpush2.bf16.msra.mxu0 %v3371_v7 }
 0x138   :  { %2392 = vmatprep.subr.bf16.mxu0 %v3376_v11  ;;  %2432 = vmatpush2.bf16.msra.mxu1 %v3419_v18  ;;  %v2513_v11 = vld [vmem:[%s3923_s7 + $0xf8] sm:$0xff]  ;;  %v2494_v18 = vld [vmem:[%s3923_s7 + $0x60] sm:$0xff] }
 0x139   :  { %2433 = vmatprep.subr.bf16.mxu1 %v3424_v22  ;;  %v2493_v22 = vld [vmem:[%s3923_s7 + $0x58] sm:$0xff] }
 0x13b   :  { %2393 = vmatpush2.bf16.msra.mxu0 %v3374_v13  ;;  %v2512_v13 = vld [vmem:[%s3923_s7 + $0xf0] sm:$0xff] }
 0x13c   :  { %2394 = vmatprep.subr.bf16.mxu0 %v3379_v15  ;;  %2434 = vmatpush2.bf16.msra.mxu1 %v3422_v24  ;;  %v2511_v15 = vld [vmem:[%s3923_s7 + $0xe8] sm:$0xff]  ;;  %v2492_v24 = vld [vmem:[%s3923_s7 + $0x50] sm:$0xff] }
 0x13d   :  { %2435 = vmatprep.subr.bf16.mxu1 %v3427_v34  ;;  %v2489_v34 = vld [vmem:[%s3923_s7 + $0x38] sm:$0xff] }
 0x13f   :  { %2395 = vmatpush2.bf16.msra.mxu0 %v3377_v17  ;;  %v2510_v17 = vld [vmem:[%s3923_s7 + $0xe0] sm:$0xff] }
 0x140   :  { %2396 = vmatprep.subr.bf16.mxu0 %v3382_v19  ;;  %2436 = vmatpush2.bf16.msra.mxu1 %v3425_v39  ;;  %v2509_v19 = vld [vmem:[%s3923_s7 + $0xd8] sm:$0xff]  ;;  %v2504_v39 = vld [vmem:[%s3923_s7 + $0xb0] sm:$0xff] }
 0x141   :  { %2437 = vmatprep.subr.bf16.mxu1 %v3430_v37 }
 0x143   :  { %2397 = vmatpush2.bf16.msra.mxu0 %v3380_v23  ;;  %v2508_v23 = vld [vmem:[%s3923_s7 + $0xd0] sm:$0xff] }
 0x144   :  { %2398 = vmatprep.subr.bf16.mxu0 %v3385_v25  ;;  %v2507_v25 = vld [vmem:[%s3923_s7 + $0xc8] sm:$0xff] }
 0x147   :  { %2399 = vmatpush2.bf16.msra.mxu0 %v3383_v27  ;;  %v2506_v27 = vld [vmem:[%s3923_s7 + $0xc0] sm:$0xff] }
 0x148   :  { %2400 = vmatprep.subr.bf16.mxu0 %v3388_v28  ;;  %v2490_v28 = vld [vmem:[%s3923_s7 + $0x40] sm:$0xff] }
 0x14b   :  { %2401 = vmatpush2.bf16.msra.mxu0 %v3386_v30  ;;  %v2505_v30 = vld [vmem:[%s3923_s7 + $0xb8] sm:$0xff] }
 0x14c   :  { %2919 = vmatprep.subr.mxu0 %v2513_v11  ;;  %v2482_v11 = vld [vmem:[%s3923_s7] sm:$0xff] }
 0x14e   :  { %v1714_v20 = vpop.f32.mrf.mxu0 }
 0x14f   :  { %v1755_v21 = vpop.f32.mrf.mxu1  ;;  %v1715_v9 = vadd.f32 %v1714_v20, %v3580_v33  ;;  %v3428_v33 = vld [vmem:[%s3920_s4 + $0x1a0] ss:$8 sps:$4 sm:$0xff]   ;;  %v2488_v20 = vld [vmem:[%s3923_s7 + $0x30] sm:$0xff] }
 0x150   :  { %v1716_v41 = vpop.f32.mrf.mxu0  ;;  %2438 = vmatpush2.bf16.msra.mxu1 %v3428_v33 }
 0x151   :  { %v1757_v42 = vpop.f32.mrf.mxu1  ;;  %v1756_v40 = vadd.f32 %v1755_v21, %v1715_v9  ;;  %v1717_v44 = vadd.f32 %v1716_v41, %v1676_v49  ;;  %2439 = vmatprep.subr.bf16.mxu1 %v3433_v53  ;;  %v1938_v21 = vsub.s32 2, %v3742_v29  ;;  %v1942_v49 = vsub.s32 3, %v3742_v29 }
 0x152   :  { %v1718_v36 = vpop.f32.mrf.mxu0 }
 0x153   :  { %v1759_v45 = vpop.f32.mrf.mxu1  ;;  %v1948_v46 = vmul.f32 %v1931_v52, %v1756_v40  ;;  %v1758_v47 = vadd.f32 %v1757_v42, %v1717_v44  ;;  %v1939_v37 = vrot.slane %v3753_v32, %v1938_v21  ;;  %v1943_v36 = vrot.slane %v3753_v32, %v1942_v49  ;;  %v2503_v32 = vld [vmem:[%s3923_s7 + $0xa8] sm:$0xff] }
 0x154   :  { %v1719_v50 = vpop.f32.mrf.mxu0  ;;  %2440 = vmatpush2.bf16.msra.mxu1 %v3431_v56  ;;  %v1969_v29 = vrot.slane %v3767_v8, %v1942_v49 }
 0x155   :  { %v1760_v51 = vpop.f32.mrf.mxu1  ;;  %v1974_v54 = vadd.f32 %v1957_v43, %v1948_v46  ;;  %v1949_v55 = vmul.f32 %v1935_v35, %v1758_v47  ;;  %2441 = vmatprep.subr.bf16.mxu1 %v3436_v59  ;;  %v1965_v35 = vrot.slane %v3767_v8, %v1938_v21  ;;  %v2487_v8 = vld [vmem:[%s3923_s7 + $0x28] sm:$0xff]  ;;  %v2918_v21 = vld [vmem:[%s3924_s8] ss:$0 sm:$0xff] }
 0x157   :  { %v1975_v57 = vadd.f32 %v1961_v48, %v1949_v55  ;;  %v1978_v58 = vmax.f32 %v1974_v54, 0.0 }
 0x158   :  { %2442 = vmatpush2.bf16.msra.mxu1 %v3434_v61  ;;  %v2502_v61 = vld [vmem:[%s3923_s7 + $0xa0] sm:$0xff] }
 0x159   :  { %v1979_v60 = vmax.f32 %v1975_v57, 0.0  ;;  %v1982_v63 = vpack.c.bf16 %v1978_v58, %v1978_v58 }
 0x15b   :  { %v1983_v62 = vpack.c.bf16 %v1979_v60, %v1979_v60 }
 0x15d   :  { %2402 = vmatprep.mubr.bf16.mxu0 %v1983_v62 }
 0x15e   :  { %2403 = vmatmul.mubr.bf16.vlgmr.msra.gmra.mxu0 %v1982_v63  ;;  %v2486_v63 = vld [vmem:[%s3923_s7 + $0x20] sm:$0xff] }
 0x15f   :  { %2920 = vmatpush3.msra.mxu0 %v2497_v12  ;;  %v2452_v12 = vld [vmem:[%s3921_s5] sm:$0x3] }
 0x160   :  { %2921 = vmatprep.subr.mxu0 %v2512_v13  ;;  %v2457_v13 = vrot.slane %v2452_v12, %v3748_v31 }
 0x161   :  { %2922 = vmatpush3.msra.mxu0 %v2496_v14  ;;  %v2466_v14 = vld [vmem:[%s3922_s6] sm:$0x3] }
 0x162   :  { %2923 = vmatprep.subr.mxu0 %v2511_v15 }
 0x163   :  { %2924 = vmatpush3.msra.mxu0 %v2495_v16 }
 0x164   :  { %2925 = vmatprep.subr.mxu0 %v2510_v17  ;;  %v2461_v17 = vrot.slane %v2452_v12, %v3759_v38 }
 0x165   :  { %2926 = vmatpush3.msra.mxu0 %v2494_v18  ;;  %v2471_v18 = vrot.slane %v2466_v14, %v3748_v31 }
 0x166   :  { %2927 = vmatprep.subr.mxu0 %v2509_v19 }
 0x167   :  { %2928 = vmatpush3.msra.mxu0 %v2493_v22 }
 0x168   :  { %2929 = vmatprep.subr.mxu0 %v2508_v23 }
 0x169   :  { %2930 = vmatpush3.msra.mxu0 %v2492_v24  ;;  %v2475_v24 = vrot.slane %v2466_v14, %v3759_v38 }
 0x16a   :  { %2931 = vmatprep.subr.mxu0 %v2507_v25 }
 0x16b   :  { %2932 = vmatpush3.msra.mxu0 %v2491_v26 }
 0x16c   :  { %2933 = vmatprep.subr.mxu0 %v2506_v27 }
 0x16d   :  { %2934 = vmatpush3.msra.mxu0 %v2490_v28 }
 0x16e   :  { %2935 = vmatprep.subr.mxu0 %v2505_v30 }
 0x16f   :  { %2936 = vmatpush3.msra.mxu0 %v2489_v34 }
 0x170   :  { %2937 = vmatprep.subr.mxu0 %v2504_v39 }
 0x171   :  { %2938 = vmatpush3.msra.mxu0 %v2488_v20 }
 0x172   :  { %2939 = vmatprep.subr.mxu0 %v2503_v32 }
 0x173   :  { %2940 = vmatpush3.msra.mxu0 %v2487_v8 }
 0x174   :  { %2941 = vmatprep.subr.mxu0 %v2502_v61 }
 0x175   :  { %2942 = vmatpush3.msra.mxu0 %v2486_v63 }
 0x18e   :  { %v1796_v0 = vpop.f32.mrf.mxu0 }
 0x18f   :  { %v1837_v1 = vpop.f32.mrf.mxu1 }
 0x190   :  { %v1838_v2 = vadd.f32 %v1837_v1, %v1796_v0  ;;  %v1798_v3 = vpop.f32.mrf.mxu0  ;;  %v2501_v0 = vld [vmem:[%s3923_s7 + $0x98] sm:$0xff] }
 0x191   :  { %v1839_v4 = vpop.f32.mrf.mxu1  ;;  %2943 = vmatprep.subr.mxu0 %v2501_v0 }
 0x192   :  { %v1800_v5 = vpop.f32.mrf.mxu0  ;;  %v1840_v41 = vadd.f32 %v1839_v4, %v1798_v3  ;;  %v2500_v3 = vld [vmem:[%s3923_s7 + $0x90] sm:$0xff] }
 0x193   :  { %v1841_v6 = vpop.f32.mrf.mxu1  ;;  %v2484_v5 = vld [vmem:[%s3923_s7 + $0x10] sm:$0xff] }
 0x194   :  { %v1801_v7 = vpop.f32.mrf.mxu0  ;;  %v2499_v6 = vld [vmem:[%s3923_s7 + $0x88] sm:$0xff] }
 0x195   :  { %v1842_v10 = vpop.f32.mrf.mxu1  ;;  %v2483_v7 = vld [vmem:[%s3923_s7 + $0x8] sm:$0xff] }
 0x196   :  { %v2498_v10 = vld [vmem:[%s3923_s7 + $0x80] sm:$0xff] }
 0x1ce   :  { %v1878_v9 = vpop.f32.mrf.mxu0 }
 0x1cf   :  { %v1919_v52 = vpop.f32.mrf.mxu1  ;;  %v1879_v42 = vadd.f32 %v1878_v9, %v1838_v2  ;;  %v2485_v2 = vld [vmem:[%s3923_s7 + $0x18] sm:$0xff] }
 0x1d0   :  { %v1880_v40 = vpop.f32.mrf.mxu0  ;;  %2944 = vmatpush3.msra.mxu0 %v2485_v2 }
 0x1d1   :  { %v1921_v43 = vpop.f32.mrf.mxu1  ;;  %v1920_v44 = vadd.f32 %v1919_v52, %v1879_v42  ;;  %v1881_v33 = vadd.f32 %v1880_v40, %v1840_v41  ;;  %2945 = vmatprep.subr.mxu0 %v2500_v3 }
 0x1d2   :  { %v1882_v45 = vpop.f32.mrf.mxu0  ;;  %2946 = vmatpush3.msra.mxu0 %v2484_v5 }
 0x1d3   :  { %v1923_v46 = vpop.f32.mrf.mxu1  ;;  %v1950_v47 = vmul.f32 %v1939_v37, %v1920_v44  ;;  %v1922_v48 = vadd.f32 %v1921_v43, %v1881_v33  ;;  %2947 = vmatprep.subr.mxu0 %v2499_v6 }
 0x1d4   :  { %v1883_v50 = vpop.f32.mrf.mxu0  ;;  %2948 = vmatpush3.msra.mxu0 %v2483_v7 }
 0x1d5   :  { %v1924_v51 = vpop.f32.mrf.mxu1  ;;  %v1976_v53 = vadd.f32 %v1965_v35, %v1950_v47  ;;  %v1951_v54 = vmul.f32 %v1943_v36, %v1922_v48  ;;  %2949 = vmatprep.subr.mxu0 %v2498_v10 }
 0x1d6   :  { %2950 = vmatpush3.msra.mxu0 %v2482_v11 }
 0x1d7   :  { %v1977_v55 = vadd.f32 %v1969_v29, %v1951_v54  ;;  %v1980_v56 = vmax.f32 %v1976_v53, 0.0 }
 0x1d9   :  { %v1981_v57 = vmax.f32 %v1977_v55, 0.0  ;;  %v1984_v59 = vpack.c.bf16 %v1980_v56, %v1980_v56 }
 0x1db   :  { %v1985_v58 = vpack.c.bf16 %v1981_v57, %v1981_v57 }
 0x1dd   :  { %2443 = vmatprep.mubr.bf16.mxu1 %v1985_v58 }
 0x1de   :  { %2444 = vmatmul.mubr.bf16.vlgmr.msra.gmra.mxu1 %v1984_v59 }
 0x21e   :  { %v2404_v60 = vpop.f32.mrf.mxu0 }
 0x220   :  { %v2406_v62 = vpop.f32.mrf.mxu0 }
 0x222   :  { %v2408_v1 = vpop.f32.mrf.mxu0 }
 0x224   :  { %v2409_v4 = vpop.f32.mrf.mxu0 }
 0x29e   :  { %v2445_v15 = vpop.f32.mrf.mxu1 }
 0x29f   :  { %v2446_v16 = vadd.f32 %v2445_v15, %v2404_v60 }
 0x2a0   :  { %v2447_v19 = vpop.f32.mrf.mxu1 }
 0x2a1   :  { %v2464_v22 = vmul.f32 %v2457_v13, %v2446_v16  ;;  %v2448_v23 = vadd.f32 %v2447_v19, %v2406_v62 }
 0x2a2   :  { %v2449_v25 = vpop.f32.mrf.mxu1 }
 0x2a3   :  { %v2465_v26 = vmul.f32 %v2461_v17, %v2448_v23  ;;  %v2478_v27 = vadd.f32 %v2471_v18, %v2464_v22 }
 0x2a4   :  { %v2450_v28 = vpop.f32.mrf.mxu1 }
 0x2a5   :  { %v2479_v30 = vadd.f32 %v2475_v24, %v2465_v26  ;;  %v2480_v39 = vmax.f32 %v2478_v27, 0.0 }
 0x2a7   :  { %v2481_v34 = vmax.f32 %v2479_v30, 0.0 }
 0x2a9   :  { %2585 = vmatprep.mubr.f32.mxu0 %v2481_v34 }
 0x2aa   :  { %2586 = vmatmul.mubr.f32.vlgmr.msra.gmra.mxu0 %v2480_v39 }
 0x36a   :  { %v2951_v20 = vpop.f32.mrf.mxu0 }
 0x36c   :  { %v2952_v31 = vpop.f32.mrf.mxu0 }
 0x36d   :  { %v2953_v49 = vadd.f32 %v2952_v31, %v2951_v20 }
 0x36f   :  { %v2588_v9 = vadd.f32 %v2953_v49, %v2918_v21 }
 0x371   :  { %2592 = vst.msk [vmem:[%s3925_s9] sm:$0xff] %vm2591_vm0, %v2588_v9 }
 0x372   :  { %2597 = vsyncpa [#allocation3], 1 }

// kernel: pointnet_dense_cls.7
= control target key start
LH: loop header
LB: loop body
LE: loop exit
PB: predicated region body
PF: predicated region fallthrough
CT: control target
= control target key end

     0   :  { %s3634_s21 = smov 0   ;;  %s3636_s22 = smov 0   ;;  %s4725_s0 = inlined_call_operand.vmem [shape: f32[2,128,3], index: 0, kind: input, shape index: {}]   ;;  %s4726_s1 = inlined_call_operand.vmem [shape: bf16[2,3,64], index: 1, kind: input, shape index: {}]   ;;  %s4727_s2 = inlined_call_operand.vmem [shape: f32[1,64], index: 2, kind: input, shape index: {}]   ;;  %s4728_s3 = inlined_call_operand.vmem [shape: f32[1,64], index: 3, kind: input, shape index: {}]   ;;  %s4729_s4 = inlined_call_operand.vmem [shape: f32[2,1,512], index: 4, kind: input, shape index: {}]   ;;  %s4730_s5 = inlined_call_operand.vmem [shape: bf16[64,512], index: 5, kind: input, shape index: {}]   ;;  %s4731_s6 = inlined_call_operand.vmem [shape: f32[1,512], index: 6, kind: input, shape index: {}]   ;;  %s4732_s7 = inlined_call_operand.vmem [shape: f32[1,512], index: 7, kind: input, shape index: {}]   ;;  %s4733_s8 = inlined_call_operand.vmem [shape: bf16[512,256], index: 8, kind: input, shape index: {}]   ;;  %s4734_s9 = inlined_call_operand.vmem [shape: f32[1,256], index: 9, kind: input, shape index: {}]   ;;  %s4735_s10 = inlined_call_operand.vmem [shape: f32[1,256], index: 10, kind: input, shape index: {}]   ;;  %s4736_s11 = inlined_call_operand.vmem [shape: bf16[256,128], index: 11, kind: input, shape index: {}]   ;;  %s4737_s12 = inlined_call_operand.vmem [shape: f32[1,128], index: 12, kind: input, shape index: {}]   ;;  %s4738_s13 = inlined_call_operand.vmem [shape: f32[1,128], index: 13, kind: input, shape index: {}]   ;;  %s4739_s14 = inlined_call_operand.vmem [shape: f32[128,2], index: 14, kind: input, shape index: {}]   ;;  %s4740_s15 = inlined_call_operand.vmem [shape: f32[1,2], index: 15, kind: input, shape index: {}]   ;;  %s4741_s16 = inlined_call_operand.vmem [shape: f32[2,128,2], index: 16, kind: output, shape index: {}]  }
   0x1   :  { %4742 = sst [smem:[#allocation2_spill]] %s4725_s0  ;;  %s3638_s23 = smov 0  }
   0x2 LB: > { %s38_s24 = sadd.s32 1, %s3541_s22  ;;  %p2982_p0 = scmp.ge.s32.totalorder %s3545_s23, 1  ;;  %s3545_s23 = sphi %s3638_s23, %s26_s23   ;;  %s3541_s22 = sphi %s3636_s22, %s4745_s22   ;;  %s3537_s21 = sphi %s3634_s21, %s4744_s21  }
   0x3   : > { %p40_p1 = scmp.ge.s32.totalorder %s38_s24, 2  ;;  %p501_p2 = scmp.lt.s32.totalorder %s3545_s23, 3 }
   0x5   : > { %s4747_s24 = smov (%p40_p1, %s38_s24), 0  ;;  %p502_p3 = pnand %p2982_p0, %p501_p2 }
   0x6   : > { %p568_p4 = scmp.lt.s32.totalorder (!%p502_p3), %s3537_s21, 1  ;;  %s4743_s29 = sld [smem:[#allocation2_spill]] (!%p502_p3) }
   0x7   : > { %505 = sbr.rel (%p502_p3) target bundleno = 1433 (0x599), region = 84 }
   0xc   : > { %vm646_vm0 = vcmask 1040384   ;;  %vm647_vm1 = vcmask 1041408   ;;  %v3547_v0 = vmov 65535   ;;  %s4749_s21 = smov (!%p568_p4, %s3537_s21), 1  ;;  %v3325_v3 = vld [vmem:[%s4730_s5 + $0x6c] ss:$16 sps:$4 sm:$0xff]  }
   0xd   : > { %v648_v1 = vsel %vm646_vm0, 4294967295, %v3547_v0  ;;  %s3116_s25 = sshll.u32 %s4749_s21, 7  ;;  %s2985_s26 = sshll.u32 %s4749_s21, 1  ;;  %vm621_vm2 = vcmask 23552   ;;  %v3323_v15 = vld [vmem:[%s4730_s5 + $0x68] ss:$16 sps:$4 sm:$0xff]  }
   0xe   : > { %v649_v2 = vsel %vm647_vm1, %v648_v1, 0  ;;  %s3661_s30 = scalar_lea.vmem %s4743_s29, %s3116_s25  ;;  %s580_s18 = scalar_lea.vmem %s4726_s1, %s2985_s26  ;;  %v3328_v16 = vld [vmem:[%s4730_s5 + $0x4c] ss:$16 sps:$4 sm:$0xff]   ;;  %v3326_v19 = vld [vmem:[%s4730_s5 + $0x48] ss:$16 sps:$4 sm:$0xff]   ;;  %v3548_v45 = vmov 0  }
   0xf   : > { %v620_v4 = vld [vmem:[%s580_s18] sm:$0x3]  ;;  %v597_v6 = vld [vmem:[%s3661_s30 + $0x8] sm:$0xff]  ;;  %v598_v9 = vld [vmem:[%s3661_s30 + $0x10] sm:$0xff]  ;;  %995 = vmatprep.mubr.bf16.mxu1 %v3548_v45  ;;  %vm938_vm3 = vcmask 523264   ;;  %s2986_s17 = sshll.u32 %s4749_s21, 2  ;;  %s4666_s19 = scalar_lea.vmem %s4741_s16, %s3116_s25 }
  0x10   : > { %v596_v5 = vld [vmem:[%s3661_s30] sm:$0xff]  ;;  %v651_v7 = vand.u32 %v649_v2, %v620_v4  ;;  %v599_v10 = vld [vmem:[%s3661_s30 + $0x18] sm:$0xff]  ;;  %v601_v12 = vld [vmem:[%s3661_s30 + $0x28] sm:$0xff]  ;;  %s584_s20 = scalar_lea.vmem %s4729_s4, %s2986_s17  ;;  %vm2658_vm4 = vcmask 15360  }
  0x11   : > { %v612_v8 = vpack.c.bf16 %v597_v6, %v596_v5  ;;  %v600_v11 = vld [vmem:[%s3661_s30 + $0x20] sm:$0xff]  ;;  %v613_v13 = vpack.c.bf16 %v599_v10, %v598_v9  ;;  %v602_v17 = vld [vmem:[%s3661_s30 + $0x30] sm:$0xff]  ;;  %v603_v18 = vld [vmem:[%s3661_s30 + $0x38] sm:$0xff] }
  0x12   : > { %3223 = vmatprep.subr.bf16.mxu0 %v651_v7  ;;  %v614_v14 = vpack.c.bf16 %v601_v12, %v600_v11  ;;  %v3332_v20 = vld [vmem:[%s4730_s5 + $0x64] ss:$16 sps:$4 sm:$0xff]   ;;  %v605_v22 = vld [vmem:[%s3661_s30 + $0x48] sm:$0xff]  ;;  %v615_v25 = vpack.c.bf16 %v603_v18, %v602_v17  ;;  %v607_v28 = vld [vmem:[%s3661_s30 + $0x58] sm:$0xff] }
  0x13   : > { %3224 = vmatpush3.bf16.msra.mxu0 %v651_v7  ;;  %3225 = vmatprep.mubr.msk.bf16.mxu0 %vm621_vm2, %v612_v8  ;;  %v604_v21 = vld [vmem:[%s3661_s30 + $0x40] sm:$0xff]  ;;  %v3331_v23 = vld [vmem:[%s4730_s5 + $0x2c] ss:$16 sps:$4 sm:$0xff]   ;;  %v3329_v24 = vld [vmem:[%s4730_s5 + $0x28] ss:$16 sps:$4 sm:$0xff]  }
  0x14   : > { %1084 = vmatprep.subr.bf16.mxu0 %v3325_v3  ;;  %971 = vmatprep.subr.bf16.mxu1 %v3332_v20  ;;  %v616_v26 = vpack.c.bf16 %v605_v22, %v604_v21  ;;  %v606_v27 = vld [vmem:[%s3661_s30 + $0x50] sm:$0xff]  ;;  %v608_v29 = vld [vmem:[%s3661_s30 + $0x60] sm:$0xff]  ;;  %v609_v30 = vld [vmem:[%s3661_s30 + $0x68] sm:$0xff] }
  0x15   : > { %v617_v31 = vpack.c.bf16 %v607_v28, %v606_v27  ;;  %v618_v32 = vpack.c.bf16 %v609_v30, %v608_v29  ;;  %v610_v33 = vld [vmem:[%s3661_s30 + $0x70] sm:$0xff]  ;;  %v611_v34 = vld [vmem:[%s3661_s30 + $0x78] sm:$0xff]  ;;  %v3749_v49 = vld [vmem:[%s4727_s2] ss:$0 sm:$0xff] }
  0x16   : > { %3226 = vmatmul.mubr.msk.bf16.vlgmr.msra.gmra.mxu0 %vm621_vm2, %v613_v13  ;;  %v619_v35 = vpack.c.bf16 %v611_v34, %v610_v33  ;;  %v3334_v36 = vld [vmem:[%s4730_s5 + $0x60] ss:$16 sps:$4 sm:$0xff]   ;;  %v3335_v37 = vld [vmem:[%s4730_s5 + $0x44] ss:$16 sps:$4 sm:$0xff]   ;;  %v3340_v41 = vld [vmem:[%s4730_s5 + $0xc] ss:$16 sps:$4 sm:$0xff]  }
  0x17   : > { %3229 = vmatprep.mubr.msk.bf16.mxu0 %vm621_vm2, %v614_v14  ;;  %1085 = vmatpush1.bf16.msra.mxu0 %v3323_v15  ;;  %v3337_v38 = vld [vmem:[%s4730_s5 + $0x40] ss:$16 sps:$4 sm:$0xff]   ;;  %v3341_v39 = vld [vmem:[%s4730_s5 + $0x24] ss:$16 sps:$4 sm:$0xff]   ;;  %v3338_v43 = vld [vmem:[%s4730_s5 + $0x8] ss:$16 sps:$4 sm:$0xff]  }
  0x18   : > { %1086 = vmatprep.subr.bf16.mxu0 %v3328_v16  ;;  %972 = vmatpush1.bf16.msra.mxu1 %v3334_v36  ;;  %v3343_v40 = vld [vmem:[%s4730_s5 + $0x20] ss:$16 sps:$4 sm:$0xff]   ;;  %v3344_v42 = vld [vmem:[%s4730_s5 + $0x4] ss:$16 sps:$4 sm:$0xff]  }
  0x19   : > { %973 = vmatprep.subr.bf16.mxu1 %v3335_v37  ;;  %v3346_v44 = vld [vmem:[%s4730_s5] ss:$16 sps:$4 sm:$0xff]   ;;  %v3349_v46 = vld [vmem:[%s4733_s8 + $0x74] ss:$8 sps:$4 sm:$0xff]   ;;  %v3355_v6 = vld [vmem:[%s4733_s8 + $0x64] ss:$8 sps:$4 sm:$0xff]  }
  0x1a   : > { %v3352_v47 = vld [vmem:[%s4733_s8 + $0x174] ss:$8 sps:$4 sm:$0xff]   ;;  %v3755_v53 = vld [vmem:[%s4728_s3] ss:$0 sm:$0xff]  ;;  %v3347_v3 = vld [vmem:[%s4733_s8 + $0x70] ss:$8 sps:$4 sm:$0xff]  }
  0x1b   : > { %1087 = vmatpush1.bf16.msra.mxu0 %v3326_v19  ;;  %v3350_v4 = vld [vmem:[%s4733_s8 + $0x170] ss:$8 sps:$4 sm:$0xff]   ;;  %v3358_v7 = vld [vmem:[%s4733_s8 + $0x164] ss:$8 sps:$4 sm:$0xff]   ;;  %v3353_v12 = vld [vmem:[%s4733_s8 + $0x60] ss:$8 sps:$4 sm:$0xff]  }
  0x1c   : > { %1088 = vmatprep.subr.bf16.mxu0 %v3331_v23  ;;  %974 = vmatpush1.bf16.msra.mxu1 %v3337_v38  ;;  %v3356_v13 = vld [vmem:[%s4733_s8 + $0x160] ss:$8 sps:$4 sm:$0xff]   ;;  %v3361_v15 = vld [vmem:[%s4733_s8 + $0x54] ss:$8 sps:$4 sm:$0xff]   ;;  %v3359_v21 = vld [vmem:[%s4733_s8 + $0x50] ss:$8 sps:$4 sm:$0xff]  }
  0x1d   : > { %975 = vmatprep.subr.bf16.mxu1 %v3341_v39  ;;  %v3364_v16 = vld [vmem:[%s4733_s8 + $0x154] ss:$8 sps:$4 sm:$0xff]   ;;  %v3362_v22 = vld [vmem:[%s4733_s8 + $0x150] ss:$8 sps:$4 sm:$0xff]   ;;  %v3365_v30 = vld [vmem:[%s4733_s8 + $0x40] ss:$8 sps:$4 sm:$0xff]  }
  0x1e   : > { %3230 = vmatmul.mubr.msk.bf16.gmra.mxu0 %vm621_vm2, %v615_v25  ;;  %v3370_v25 = vld [vmem:[%s4733_s8 + $0x144] ss:$8 sps:$4 sm:$0xff]   ;;  %v3373_v33 = vld [vmem:[%s4733_s8 + $0x34] ss:$8 sps:$4 sm:$0xff]   ;;  %v3371_v38 = vld [vmem:[%s4733_s8 + $0x30] ss:$8 sps:$4 sm:$0xff]  }
  0x1f   : > { %3233 = vmatprep.mubr.msk.bf16.mxu0 %vm621_vm2, %v616_v26  ;;  %1089 = vmatpush1.bf16.msra.mxu0 %v3329_v24  ;;  %v3367_v24 = vld [vmem:[%s4733_s8 + $0x44] ss:$8 sps:$4 sm:$0xff]   ;;  %v3376_v34 = vld [vmem:[%s4733_s8 + $0x134] ss:$8 sps:$4 sm:$0xff]   ;;  %v3374_v39 = vld [vmem:[%s4733_s8 + $0x130] ss:$8 sps:$4 sm:$0xff]  }
  0x20   : > { %976 = vmatpush1.bf16.msra.mxu1 %v3343_v40  ;;  %1090 = vmatprep.subr.bf16.mxu0 %v3340_v41  ;;  %v3379_v41 = vld [vmem:[%s4733_s8 + $0x24] ss:$8 sps:$4 sm:$0xff]  }
  0x21   : > { %977 = vmatprep.subr.bf16.mxu1 %v3344_v42  ;;  %v3382_v42 = vld [vmem:[%s4733_s8 + $0x124] ss:$8 sps:$4 sm:$0xff]  }
  0x23   : > { %1091 = vmatpush1.bf16.msra.mxu0 %v3338_v43 }
  0x24   : > { %978 = vmatpush1.bf16.msra.mxu1 %v3346_v44  ;;  %1954 = vmatprep.subr.bf16.mxu0 %v3352_v47 }
  0x25   : > { %1841 = vmatprep.subr.bf16.mxu1 %v3349_v46 }
  0x26   : > { %3234 = vmatmul.mubr.msk.bf16.gmra.mxu0 %vm621_vm2, %v617_v31  ;;  %v3368_v31 = vld [vmem:[%s4733_s8 + $0x140] ss:$8 sps:$4 sm:$0xff]  }
  0x27   : > { %3237 = vmatprep.mubr.msk.bf16.mxu0 %vm621_vm2, %v618_v32 }
  0x2e   : > { %3238 = vmatmul.mubr.msk.bf16.gmra.mxu0 %vm621_vm2, %v619_v35 }
  0x2f   : > { %1108 = vmatprep.mubr.bf16.mxu0 %v3548_v45 }
  0xd6   : > { %v3227_v48 = vpop.f32.mrf.mxu0 }
  0xd7   : > { %v759_v61 = vmul.f32 %v3227_v48, %v3749_v49  ;;  %v3377_v48 = vld [vmem:[%s4733_s8 + $0x20] ss:$8 sps:$4 sm:$0xff]  }
  0xd8   : > { %v687_v50 = vpop.f32.mrf.mxu0 }
  0xd9   : > { %v757_v51 = vmul.f32 %v3749_v49, %v687_v50  ;;  %v782_v8 = vadd.f32 %v3755_v53, %v759_v61  ;;  %v3380_v50 = vld [vmem:[%s4733_s8 + $0x120] ss:$8 sps:$4 sm:$0xff]   ;;  %v3391_v61 = vld [vmem:[%s4733_s8 + $0x4] ss:$8 sps:$4 sm:$0xff]  }
  0xda   : > { %v3228_v52 = vpop.f32.mrf.mxu0 }
  0xdb   : > { %v780_v55 = vadd.f32 %v3755_v53, %v757_v51  ;;  %v760_v58 = vmul.f32 %v3228_v52, %v3749_v49  ;;  %v798_v17 = vmax.f32 %v782_v8, 0.0  ;;  %v3385_v52 = vld [vmem:[%s4733_s8 + $0x14] ss:$8 sps:$4 sm:$0xff]  }
  0xdc   : > { %v690_v54 = vpop.f32.mrf.mxu0 }
  0xdd   : > { %v758_v56 = vmul.f32 %v3749_v49, %v690_v54  ;;  %v796_v62 = vmax.f32 %v780_v55, 0.0  ;;  %v783_v1 = vadd.f32 %v3755_v53, %v760_v58  ;;  %v3388_v54 = vld [vmem:[%s4733_s8 + $0x114] ss:$8 sps:$4 sm:$0xff]   ;;  %v3383_v58 = vld [vmem:[%s4733_s8 + $0x10] ss:$8 sps:$4 sm:$0xff]  }
  0xde   : > { %v3231_v57 = vpop.f32.mrf.mxu0 }
  0xdf   : > { %v781_v59 = vadd.f32 %v3755_v53, %v758_v56  ;;  %v799_v9 = vmax.f32 %v783_v1, 0.0  ;;  %v763_v26 = vmul.f32 %v3231_v57, %v3749_v49 }
  0xe0   : > { %v703_v60 = vpop.f32.mrf.mxu0 }
  0xe1   : > { %v797_v63 = vmax.f32 %v781_v59, 0.0  ;;  %v761_v10 = vmul.f32 %v3749_v49, %v703_v60  ;;  %v813_v18 = vpack.c.bf16 %v799_v9, %v798_v17  ;;  %v786_v35 = vadd.f32 %v3755_v53, %v763_v26  ;;  %v3386_v59 = vld [vmem:[%s4733_s8 + $0x110] ss:$8 sps:$4 sm:$0xff]  }
  0xe2   : > { %v3232_v0 = vpop.f32.mrf.mxu0 }
  0xe3   : > { %v812_v2 = vpack.c.bf16 %v797_v63, %v796_v62  ;;  %v784_v19 = vadd.f32 %v3755_v53, %v761_v10  ;;  %v764_v28 = vmul.f32 %v3232_v0, %v3749_v49  ;;  %v802_v43 = vmax.f32 %v786_v35, 0.0  ;;  %v3394_v62 = vld [vmem:[%s4733_s8 + $0x104] ss:$8 sps:$4 sm:$0xff]   ;;  %v3413_v35 = vld [vmem:[%s4733_s8 + $0xc0] ss:$8 sps:$4 sm:$0xff]  }
  0xe4   : > { %v706_v5 = vpop.f32.mrf.mxu0 }
  0xe5   : > { %3015 = vmatmul.mubr.msk.bf16.vlgmr.msra.gmra.mxu1 %vm938_vm3, %v812_v2  ;;  %3023 = vmatmul.mubr.msk.bf16.vlgmr.msra.gmra.mxu0 %vm938_vm3, %v812_v2  ;;  %v762_v11 = vmul.f32 %v3749_v49, %v706_v5  ;;  %v800_v27 = vmax.f32 %v784_v19, 0.0  ;;  %v787_v36 = vadd.f32 %v3755_v53, %v764_v28  ;;  %v3410_v28 = vld [vmem:[%s4733_s8 + $0x1d0] ss:$8 sps:$4 sm:$0xff]  }
  0xe6   : > { %1005 = vmatprep.mubr.bf16.mxu1 %v3548_v45  ;;  %1118 = vmatprep.mubr.bf16.mxu0 %v3548_v45  ;;  %v3788_v14 = vpop.f32.mrf.mxu0 }
  0xe7   : > { %1842 = vmatpush1.bf16.msra.mxu1 %v3347_v3  ;;  %1955 = vmatpush1.bf16.msra.mxu0 %v3350_v4  ;;  %v785_v20 = vadd.f32 %v3755_v53, %v762_v11  ;;  %v803_v44 = vmax.f32 %v787_v36, 0.0  ;;  %v767_v63 = vmul.f32 %v3788_v14, %v3749_v49  ;;  %v3389_v3 = vld [vmem:[%s4733_s8] ss:$8 sps:$4 sm:$0xff]   ;;  %v3395_v11 = vld [vmem:[%s4733_s8 + $0xf0] ss:$8 sps:$4 sm:$0xff]  }
  0xe8   : > { %1843 = vmatprep.subr.bf16.mxu1 %v3355_v6  ;;  %1956 = vmatprep.subr.bf16.mxu0 %v3358_v7  ;;  %v719_v23 = vpop.f32.mrf.mxu0  ;;  %v3392_v4 = vld [vmem:[%s4733_s8 + $0x100] ss:$8 sps:$4 sm:$0xff]   ;;  %v3397_v6 = vld [vmem:[%s4733_s8 + $0xf4] ss:$8 sps:$4 sm:$0xff]   ;;  %v3403_v14 = vld [vmem:[%s4733_s8 + $0xe4] ss:$8 sps:$4 sm:$0xff]  }
  0xe9   : > { %v801_v29 = vmax.f32 %v785_v20, 0.0  ;;  %v765_v46 = vmul.f32 %v3749_v49, %v719_v23  ;;  %v815_v55 = vpack.c.bf16 %v803_v44, %v802_v43  ;;  %v3400_v7 = vld [vmem:[%s4733_s8 + $0x1f4] ss:$8 sps:$4 sm:$0xff]   ;;  %v790_v8 = vadd.f32 %v3755_v53, %v767_v63  ;;  %v3401_v20 = vld [vmem:[%s4733_s8 + $0xe0] ss:$8 sps:$4 sm:$0xff]  }
  0xea   : > { %v3236_v32 = vpop.f32.mrf.mxu0  ;;  %v3412_v23 = vld [vmem:[%s4733_s8 + $0x1d4] ss:$8 sps:$4 sm:$0xff]   ;;  %v3416_v36 = vld [vmem:[%s4733_s8 + $0x1c0] ss:$8 sps:$4 sm:$0xff]   ;;  %v3419_v43 = vld [vmem:[%s4733_s8 + $0xb0] ss:$8 sps:$4 sm:$0xff]  }
  0xeb   : > { %1844 = vmatpush1.bf16.msra.mxu1 %v3353_v12  ;;  %1957 = vmatpush1.bf16.msra.mxu0 %v3356_v13  ;;  %v814_v37 = vpack.c.bf16 %v801_v29, %v800_v27  ;;  %v788_v56 = vadd.f32 %v3755_v53, %v765_v46  ;;  %v768_v1 = vmul.f32 %v3236_v32, %v3749_v49  ;;  %v3398_v12 = vld [vmem:[%s4733_s8 + $0x1f0] ss:$8 sps:$4 sm:$0xff]   ;;  %v3415_v29 = vld [vmem:[%s4733_s8 + $0xc4] ss:$8 sps:$4 sm:$0xff]  }
  0xec   : > { %1845 = vmatprep.subr.bf16.mxu1 %v3361_v15  ;;  %1958 = vmatprep.subr.bf16.mxu0 %v3364_v16  ;;  %v722_v40 = vpop.f32.mrf.mxu0  ;;  %v3406_v15 = vld [vmem:[%s4733_s8 + $0x1e4] ss:$8 sps:$4 sm:$0xff]   ;;  %v806_v16 = vmax.f32 %v790_v8, 0.0  ;;  %v3407_v27 = vld [vmem:[%s4733_s8 + $0xd0] ss:$8 sps:$4 sm:$0xff]  }
  0xed   : > { %3016 = vmatmul.mubr.msk.bf16.gmra.mxu1 %vm938_vm3, %v813_v18  ;;  %3024 = vmatmul.mubr.msk.bf16.gmra.mxu0 %vm938_vm3, %v813_v18  ;;  %v766_v47 = vmul.f32 %v3749_v49, %v722_v40  ;;  %v804_v0 = vmax.f32 %v788_v56, 0.0  ;;  %v791_v9 = vadd.f32 %v3755_v53, %v768_v1  ;;  %v3427_v44 = vld [vmem:[%s4733_s8 + $0xa4] ss:$8 sps:$4 sm:$0xff]  }
  0xee   : > { %1015 = vmatprep.mubr.bf16.mxu1 %v3548_v45  ;;  %1128 = vmatprep.mubr.bf16.mxu0 %v3548_v45  ;;  %v3854_v51 = vpop.f32.mrf.mxu0  ;;  %v3430_v46 = vld [vmem:[%s4733_s8 + $0x1a4] ss:$8 sps:$4 sm:$0xff]  }
  0xef   : > { %1846 = vmatpush1.bf16.msra.mxu1 %v3359_v21  ;;  %1959 = vmatpush1.bf16.msra.mxu0 %v3362_v22  ;;  %v789_v57 = vadd.f32 %v3755_v53, %v766_v47  ;;  %v807_v17 = vmax.f32 %v791_v9, 0.0  ;;  %v3404_v21 = vld [vmem:[%s4733_s8 + $0x1e0] ss:$8 sps:$4 sm:$0xff]   ;;  %v3409_v22 = vld [vmem:[%s4733_s8 + $0xd4] ss:$8 sps:$4 sm:$0xff]  }
  0xf0   : > { %1847 = vmatprep.subr.bf16.mxu1 %v3367_v24  ;;  %1960 = vmatprep.subr.bf16.mxu0 %v3370_v25  ;;  %v735_v60 = vpop.f32.mrf.mxu0  ;;  %v3425_v47 = vld [vmem:[%s4733_s8 + $0xa0] ss:$8 sps:$4 sm:$0xff]   ;;  %v3442_v56 = vld [vmem:[%s4733_s8 + $0x184] ss:$8 sps:$4 sm:$0xff]  }
  0xf1   : > { %v805_v2 = vmax.f32 %v789_v57, 0.0  ;;  %v769_v18 = vmul.f32 %v3749_v49, %v735_v60  ;;  %v817_v24 = vpack.c.bf16 %v807_v17, %v806_v16  ;;  %v3437_v57 = vld [vmem:[%s4733_s8 + $0x80] ss:$8 sps:$4 sm:$0xff]   ;;  %v838_v60 = vlaneseq }
  0xf2   : > { %v3240_v5 = vpop.f32.mrf.mxu0 }
  0xf3   : > { %1848 = vmatpush1.bf16.msra.mxu1 %v3365_v30  ;;  %1961 = vmatpush1.bf16.msra.mxu0 %v3368_v31  ;;  %v816_v10 = vpack.c.bf16 %v805_v2, %v804_v0  ;;  %v792_v25 = vadd.f32 %v3755_v53, %v769_v18  ;;  %v3418_v30 = vld [vmem:[%s4733_s8 + $0x1c4] ss:$8 sps:$4 sm:$0xff]   ;;  %v771_v31 = vmul.f32 %v3854_v51, %v3749_v49  ;;  %v3436_v51 = vld [vmem:[%s4733_s8 + $0x194] ss:$8 sps:$4 sm:$0xff]   ;;  %v836_v0 = vld [vmem:[%s584_s20] sm:$0xf] }
  0xf4   : > { %1849 = vmatprep.subr.bf16.mxu1 %v3373_v33  ;;  %1962 = vmatprep.subr.bf16.mxu0 %v3376_v34  ;;  %v738_v13 = vpop.f32.mrf.mxu0  ;;  %v772_v33 = vmul.f32 %v3240_v5, %v3749_v49  ;;  %v1189_v5 = vld [vmem:[%s4731_s6] sm:$0xf] }
  0xf5   : > { %3017 = vmatmul.mubr.msk.bf16.gmra.mxu1 %vm938_vm3, %v814_v37  ;;  %3025 = vmatmul.mubr.msk.bf16.gmra.mxu0 %vm938_vm3, %v814_v37  ;;  %v770_v19 = vmul.f32 %v3749_v49, %v738_v13  ;;  %v808_v32 = vmax.f32 %v792_v25, 0.0  ;;  %v794_v37 = vadd.f32 %v3755_v53, %v771_v31 }
  0xf6   : > { %1025 = vmatprep.mubr.bf16.mxu1 %v3548_v45  ;;  %1138 = vmatprep.mubr.bf16.mxu0 %v3548_v45 }
  0xf7   : > { %1850 = vmatpush1.bf16.msra.mxu1 %v3371_v38  ;;  %1963 = vmatpush1.bf16.msra.mxu0 %v3374_v39  ;;  %v793_v26 = vadd.f32 %v3755_v53, %v770_v19  ;;  %v795_v38 = vadd.f32 %v3755_v53, %v772_v33  ;;  %v810_v49 = vmax.f32 %v794_v37, 0.0  ;;  %v3421_v53 = vld [vmem:[%s4733_s8 + $0xb4] ss:$8 sps:$4 sm:$0xff]  }
  0xf8   : > { %1851 = vmatprep.subr.bf16.mxu1 %v3379_v41  ;;  %1964 = vmatprep.subr.bf16.mxu0 %v3382_v42  ;;  %v3424_v42 = vld [vmem:[%s4733_s8 + $0x1b4] ss:$8 sps:$4 sm:$0xff]  }
  0xf9   : > { %v809_v34 = vmax.f32 %v793_v26, 0.0  ;;  %v811_v40 = vmax.f32 %v795_v38, 0.0 }
  0xfb   : > { %1852 = vmatpush1.bf16.msra.mxu1 %v3377_v48  ;;  %1965 = vmatpush1.bf16.msra.mxu0 %v3380_v50  ;;  %v818_v39 = vpack.c.bf16 %v809_v34, %v808_v32  ;;  %v819_v41 = vpack.c.bf16 %v811_v40, %v810_v49  ;;  %v3428_v48 = vld [vmem:[%s4733_s8 + $0x1a0] ss:$8 sps:$4 sm:$0xff]   ;;  %v3433_v50 = vld [vmem:[%s4733_s8 + $0x94] ss:$8 sps:$4 sm:$0xff]  }
  0xfc   : > { %1853 = vmatprep.subr.bf16.mxu1 %v3385_v52  ;;  %1966 = vmatprep.subr.bf16.mxu0 %v3388_v54  ;;  %v3431_v52 = vld [vmem:[%s4733_s8 + $0x90] ss:$8 sps:$4 sm:$0xff]  }
  0xfd   : > { %3018 = vmatmul.mubr.msk.bf16.gmra.mxu1 %vm938_vm3, %v815_v55  ;;  %3026 = vmatmul.mubr.msk.bf16.gmra.mxu0 %vm938_vm3, %v815_v55  ;;  %v3434_v54 = vld [vmem:[%s4733_s8 + $0x190] ss:$8 sps:$4 sm:$0xff]   ;;  %v3439_v55 = vld [vmem:[%s4733_s8 + $0x84] ss:$8 sps:$4 sm:$0xff]  }
  0xfe   : > { %1035 = vmatprep.mubr.bf16.mxu1 %v3548_v45  ;;  %1148 = vmatprep.mubr.bf16.mxu0 %v3548_v45 }
  0xff   : > { %1854 = vmatpush1.bf16.msra.mxu1 %v3383_v58  ;;  %1967 = vmatpush1.bf16.msra.mxu0 %v3386_v59  ;;  %v3440_v58 = vld [vmem:[%s4733_s8 + $0x180] ss:$8 sps:$4 sm:$0xff]   ;;  %v3443_v59 = vld [vmem:[%s4736_s11 + $0x78] sm:$0xff]  }
 0x100   : > { %1855 = vmatprep.subr.bf16.mxu1 %v3391_v61  ;;  %1968 = vmatprep.subr.bf16.mxu0 %v3394_v62  ;;  %v839_v61 = vshrl.u32 %v838_v60, 7 }
 0x102   : > { %v4017_v62 = vsub.s32 0, %v839_v61  ;;  %v848_v63 = vsub.s32 2, %v839_v61  ;;  %v4019_v1 = vsub.s32 1, %v839_v61  ;;  %v852_v2 = vsub.s32 3, %v839_v61 }
 0x103   : > { %1856 = vmatpush1.bf16.msra.mxu1 %v3389_v3  ;;  %1969 = vmatpush1.bf16.msra.mxu0 %v3392_v4 }
 0x104   : > { %1857 = vmatprep.subr.bf16.mxu1 %v3397_v6  ;;  %1970 = vmatprep.subr.bf16.mxu0 %v3400_v7  ;;  %v4022_v3 = vrot.slane %v836_v0, %v4017_v62  ;;  %v4024_v4 = vrot.slane %v836_v0, %v848_v63  ;;  %v4030_v8 = vrot.slane %v836_v0, %v4019_v1 }
 0x105   : > { %3019 = vmatmul.mubr.msk.bf16.gmra.mxu1 %vm938_vm3, %v816_v10  ;;  %3027 = vmatmul.mubr.msk.bf16.gmra.mxu0 %vm938_vm3, %v816_v10  ;;  %v4032_v9 = vrot.slane %v836_v0, %v852_v2  ;;  %v1275_v10 = vld [vmem:[%s4732_s7] sm:$0xf] }
 0x106   : > { %1045 = vmatprep.mubr.bf16.mxu1 %v3548_v45  ;;  %1158 = vmatprep.mubr.bf16.mxu0 %v3548_v45  ;;  %v4045_v17 = vrot.slane %v1275_v10, %v4017_v62  ;;  %v4047_v18 = vrot.slane %v1275_v10, %v848_v63  ;;  %v4061_v31 = vrot.slane %v1275_v10, %v4019_v1 }
 0x107   : > { %1858 = vmatpush2.bf16.msra.mxu1 %v3395_v11  ;;  %1971 = vmatpush2.bf16.msra.mxu0 %v3398_v12  ;;  %v4039_v12 = vrot.slane %v1189_v5, %v4017_v62  ;;  %v4063_v32 = vrot.slane %v1275_v10, %v852_v2 }
 0x108   : > { %1859 = vmatprep.subr.bf16.mxu1 %v3403_v14  ;;  %1972 = vmatprep.subr.bf16.mxu0 %v3406_v15  ;;  %v4042_v14 = vrot.slane %v1189_v5, %v848_v63 }
 0x10b   : > { %1860 = vmatpush2.bf16.msra.mxu1 %v3401_v20  ;;  %1973 = vmatpush2.bf16.msra.mxu0 %v3404_v21 }
 0x10c   : > { %1861 = vmatprep.subr.bf16.mxu1 %v3409_v22  ;;  %1974 = vmatprep.subr.bf16.mxu0 %v3412_v23  ;;  %v4051_v22 = vrot.slane %v1189_v5, %v4019_v1 }
 0x10d   : > { %3020 = vmatmul.mubr.msk.bf16.gmra.mxu1 %vm938_vm3, %v817_v24  ;;  %3028 = vmatmul.mubr.msk.bf16.gmra.mxu0 %vm938_vm3, %v817_v24  ;;  %v4054_v24 = vrot.slane %v1189_v5, %v852_v2 }
 0x10e   : > { %1055 = vmatprep.mubr.bf16.mxu1 %v3548_v45  ;;  %1168 = vmatprep.mubr.bf16.mxu0 %v3548_v45 }
 0x10f   : > { %1862 = vmatpush2.bf16.msra.mxu1 %v3407_v27  ;;  %1975 = vmatpush2.bf16.msra.mxu0 %v3410_v28 }
 0x110   : > { %1863 = vmatprep.subr.bf16.mxu1 %v3415_v29  ;;  %1976 = vmatprep.subr.bf16.mxu0 %v3418_v30 }
 0x113   : > { %1864 = vmatpush2.bf16.msra.mxu1 %v3413_v35  ;;  %1977 = vmatpush2.bf16.msra.mxu0 %v3416_v36 }
 0x114   : > { %1865 = vmatprep.subr.bf16.mxu1 %v3421_v53  ;;  %1978 = vmatprep.subr.bf16.mxu0 %v3424_v42 }
 0x115   : > { %3021 = vmatmul.mubr.msk.bf16.gmra.mxu1 %vm938_vm3, %v818_v39  ;;  %3029 = vmatmul.mubr.msk.bf16.gmra.mxu0 %vm938_vm3, %v818_v39 }
 0x116   : > { %1065 = vmatprep.mubr.bf16.mxu1 %v3548_v45  ;;  %1178 = vmatprep.mubr.bf16.mxu0 %v3548_v45  ;;  %v3422_v45 = vld [vmem:[%s4733_s8 + $0x1b0] ss:$8 sps:$4 sm:$0xff]  }
 0x117   : > { %1866 = vmatpush2.bf16.msra.mxu1 %v3419_v43  ;;  %1979 = vmatpush2.bf16.msra.mxu0 %v3422_v45 }
 0x118   : > { %1867 = vmatprep.subr.bf16.mxu1 %v3427_v44  ;;  %1980 = vmatprep.subr.bf16.mxu0 %v3430_v46 }
 0x11b   : > { %1868 = vmatpush2.bf16.msra.mxu1 %v3425_v47  ;;  %1981 = vmatpush2.bf16.msra.mxu0 %v3428_v48 }
 0x11c   : > { %1869 = vmatprep.subr.bf16.mxu1 %v3433_v50  ;;  %1982 = vmatprep.subr.bf16.mxu0 %v3436_v51 }
 0x11d   : > { %3022 = vmatmul.mubr.msk.bf16.gmra.mxu1 %vm938_vm3, %v819_v41  ;;  %3030 = vmatmul.mubr.msk.bf16.gmra.mxu0 %vm938_vm3, %v819_v41 }
 0x11f   : > { %1870 = vmatpush2.bf16.msra.mxu1 %v3431_v52  ;;  %1983 = vmatpush2.bf16.msra.mxu0 %v3434_v54 }
 0x120   : > { %1871 = vmatprep.subr.bf16.mxu1 %v3439_v55  ;;  %1984 = vmatprep.subr.bf16.mxu0 %v3442_v56 }
 0x123   : > { %1872 = vmatpush2.bf16.msra.mxu1 %v3437_v57  ;;  %1985 = vmatpush2.bf16.msra.mxu0 %v3440_v58 }
 0x124   : > { %3127 = vmatprep.subr.bf16.mxu1 %v3443_v59 }
 0x1a5   : > { %v997_v6 = vpop.f32.mrf.mxu1  ;;  %v1110_v7 = vpop.f32.mrf.mxu0 }
 0x1a6   : > { %v998_v11 = vadd.f32 %v997_v6, %v4022_v3  ;;  %v1111_v13 = vadd.f32 %v1110_v7, %v4024_v4 }
 0x1a7   : > { %v999_v15 = vpop.f32.mrf.mxu1  ;;  %v1112_v16 = vpop.f32.mrf.mxu0 }
 0x1a8   : > { %v1000_v21 = vadd.f32 %v999_v15, %v4030_v8  ;;  %v1113_v23 = vadd.f32 %v1112_v16, %v4032_v9  ;;  %v1211_v25 = vmul.f32 %v4039_v12, %v998_v11  ;;  %v1213_v26 = vmul.f32 %v4042_v14, %v1111_v13 }
 0x1a9   : > { %v1001_v19 = vpop.f32.mrf.mxu1  ;;  %v1114_v20 = vpop.f32.mrf.mxu0 }
 0x1aa   : > { %v1002_v27 = vadd.f32 %v1001_v19, %v4022_v3  ;;  %v1115_v28 = vadd.f32 %v1114_v20, %v4024_v4  ;;  %v1212_v39 = vmul.f32 %v4051_v22, %v1000_v21  ;;  %v1214_v49 = vmul.f32 %v4054_v24, %v1113_v23 }
 0x1ab   : > { %v1003_v29 = vpop.f32.mrf.mxu1  ;;  %v1116_v30 = vpop.f32.mrf.mxu0  ;;  %v1297_v53 = vadd.f32 %v4045_v17, %v1211_v25  ;;  %v1299_v42 = vadd.f32 %v4047_v18, %v1213_v26 }
 0x1ac   : > { %v1215_v33 = vmul.f32 %v4039_v12, %v1002_v27  ;;  %v1217_v34 = vmul.f32 %v4042_v14, %v1115_v28  ;;  %v1004_v35 = vadd.f32 %v1003_v29, %v4030_v8  ;;  %v1117_v36 = vadd.f32 %v1116_v30, %v4032_v9 }
 0x1ad   : > { %v1007_v37 = vpop.f32.mrf.mxu1  ;;  %v1120_v38 = vpop.f32.mrf.mxu0  ;;  %v1298_v55 = vadd.f32 %v4061_v31, %v1212_v39  ;;  %v1300_v56 = vadd.f32 %v4063_v32, %v1214_v49  ;;  %v1361_v59 = vmax.f32 %v1297_v53, 0.0  ;;  %v1363_v60 = vmax.f32 %v1299_v42, 0.0  ;;  %v3444_v39 = vld [vmem:[%s4736_s11 + $0x38] sm:$0xff]  }
 0x1ae   : > { %v1008_v40 = vadd.f32 %v1007_v37, %v4022_v3  ;;  %v1121_v41 = vadd.f32 %v1120_v38, %v4024_v4  ;;  %v1216_v43 = vmul.f32 %v4051_v22, %v1004_v35  ;;  %v1218_v45 = vmul.f32 %v4054_v24, %v1117_v36 }
 0x1af   : > { %v1009_v44 = vpop.f32.mrf.mxu1  ;;  %v1122_v46 = vpop.f32.mrf.mxu0  ;;  %v1301_v47 = vadd.f32 %v4045_v17, %v1215_v33  ;;  %v1303_v48 = vadd.f32 %v4047_v18, %v1217_v34  ;;  %v1362_v21 = vmax.f32 %v1298_v55, 0.0  ;;  %v1364_v23 = vmax.f32 %v1300_v56, 0.0 }
 0x1b0   : > { %v1302_v50 = vadd.f32 %v4061_v31, %v1216_v43  ;;  %v1304_v51 = vadd.f32 %v4063_v32, %v1218_v45  ;;  %v1219_v57 = vmul.f32 %v4039_v12, %v1008_v40  ;;  %v1221_v58 = vmul.f32 %v4042_v14, %v1121_v41  ;;  %v3445_v43 = vld [vmem:[%s4736_s11 + $0x70] sm:$0xff]  }
 0x1b1   : > { %v1011_v52 = vpop.f32.mrf.mxu1  ;;  %v1124_v54 = vpop.f32.mrf.mxu0  ;;  %v1010_v61 = vadd.f32 %v1009_v44, %v4030_v8  ;;  %v1123_v63 = vadd.f32 %v1122_v46, %v4032_v9  ;;  %v1365_v5 = vmax.f32 %v1301_v47, 0.0  ;;  %v1367_v6 = vmax.f32 %v1303_v48, 0.0 }
 0x1b2   : > { %v1366_v7 = vmax.f32 %v1302_v50, 0.0  ;;  %v1368_v10 = vmax.f32 %v1304_v51, 0.0  ;;  %v1012_v11 = vadd.f32 %v1011_v52, %v4022_v3  ;;  %v1125_v13 = vadd.f32 %v1124_v54, %v4024_v4 }
 0x1b3   : > { %v1013_v0 = vpop.f32.mrf.mxu1  ;;  %v1126_v2 = vpop.f32.mrf.mxu0  ;;  %v4092_v25 = vadd.f32 %v4045_v17, %v1219_v57  ;;  %v4095_v26 = vadd.f32 %v4047_v18, %v1221_v58  ;;  %v1220_v27 = vmul.f32 %v4051_v22, %v1010_v61  ;;  %v1222_v28 = vmul.f32 %v4054_v24, %v1123_v63 }
 0x1b4   : > { %v1014_v15 = vadd.f32 %v1013_v0, %v4030_v8  ;;  %v1127_v16 = vadd.f32 %v1126_v2, %v4032_v9  ;;  %v1223_v35 = vmul.f32 %v4039_v12, %v1012_v11  ;;  %v1426_v37 = vpack.c.bf16 %v1366_v7, %v1362_v21 }
 0x1b5   : > { %v1017_v19 = vpop.f32.mrf.mxu1  ;;  %v1130_v20 = vpop.f32.mrf.mxu0  ;;  %v1428_v38 = vpack.c.bf16 %v1368_v10, %v1364_v23  ;;  %v1425_v49 = vpack.c.bf16 %v1365_v5, %v1361_v59  ;;  %v1427_v40 = vpack.c.bf16 %v1367_v6, %v1363_v60  ;;  %v1225_v41 = vmul.f32 %v4042_v14, %v1125_v13  ;;  %v3446_v59 = vld [vmem:[%s4736_s11 + $0x30] sm:$0xff]   ;;  %v3447_v6 = vld [vmem:[%s4736_s11 + $0x68] sm:$0xff]  }
 0x1b6   : > { %v1224_v29 = vmul.f32 %v4051_v22, %v1014_v15  ;;  %v1018_v30 = vadd.f32 %v1017_v19, %v4022_v3  ;;  %v1226_v36 = vmul.f32 %v4054_v24, %v1127_v16  ;;  %v1369_v45 = vmax.f32 %v4092_v25, 0.0  ;;  %1873 = vmatprep.mubr.bf16.mxu1 %v1426_v37 }
 0x1b7   : > { %v1019_v33 = vpop.f32.mrf.mxu1  ;;  %v1132_v34 = vpop.f32.mrf.mxu0  ;;  %v1131_v46 = vadd.f32 %v1130_v20, %v4024_v4  ;;  %1986 = vmatprep.mubr.bf16.mxu0 %v1428_v38  ;;  %v1371_v47 = vmax.f32 %v4095_v26, 0.0  ;;  %v1306_v48 = vadd.f32 %v4061_v31, %v1220_v27  ;;  %v1308_v50 = vadd.f32 %v4063_v32, %v1222_v28  ;;  %1874 = vmatmul.mubr.bf16.vlgmr.msra.gmra.mxu1 %v1425_v49  ;;  %v3449_v49 = vld [vmem:[%s4736_s11 + $0x60] sm:$0xff]  }
 0x1b8   : > { %v1310_v44 = vadd.f32 %v4061_v31, %v1224_v29  ;;  %v1020_v51 = vadd.f32 %v1019_v33, %v4030_v8  ;;  %1987 = vmatmul.mubr.bf16.vlgmr.msra.gmra.mxu0 %v1427_v40  ;;  %v1309_v55 = vadd.f32 %v4045_v17, %v1223_v35  ;;  %v1312_v56 = vadd.f32 %v4063_v32, %v1226_v36  ;;  %v3448_v33 = vld [vmem:[%s4736_s11 + $0x28] sm:$0xff]  }
 0x1b9   : > { %v1021_v53 = vpop.f32.mrf.mxu1  ;;  %v1134_v42 = vpop.f32.mrf.mxu0  ;;  %v1227_v57 = vmul.f32 %v4039_v12, %v1018_v30  ;;  %v1133_v58 = vadd.f32 %v1132_v34, %v4032_v9  ;;  %3128 = vmatpush3.bf16.msra.mxu1 %v3444_v39  ;;  %v1311_v60 = vadd.f32 %v4047_v18, %v1225_v41  ;;  %v1229_v10 = vmul.f32 %v4042_v14, %v1131_v46 }
 0x1ba   : > { %v1022_v61 = vadd.f32 %v1021_v53, %v4022_v3  ;;  %3129 = vmatprep.subr.bf16.mxu1 %v3445_v43  ;;  %v1374_v7 = vmax.f32 %v1310_v44, 0.0  ;;  %v1135_v11 = vadd.f32 %v1134_v42, %v4024_v4  ;;  %v1228_v15 = vmul.f32 %v4051_v22, %v1020_v51 }
 0x1bb   : > { %v1023_v52 = vpop.f32.mrf.mxu1  ;;  %v1136_v54 = vpop.f32.mrf.mxu0  ;;  %v1230_v16 = vmul.f32 %v4054_v24, %v1133_v58  ;;  %v1370_v27 = vmax.f32 %v1306_v48, 0.0  ;;  %v1372_v28 = vmax.f32 %v1308_v50, 0.0  ;;  %v1376_v29 = vmax.f32 %v1312_v56, 0.0  ;;  %v3450_v56 = vld [vmem:[%s4736_s11 + $0x20] sm:$0xff]  }
 0x1bc   : > { %v1024_v63 = vadd.f32 %v1023_v52, %v4030_v8  ;;  %v1137_v0 = vadd.f32 %v1136_v54, %v4032_v9  ;;  %v1231_v19 = vmul.f32 %v4039_v12, %v1022_v61  ;;  %v1373_v34 = vmax.f32 %v1309_v55, 0.0 }
 0x1bd   : > { %v1027_v2 = vpop.f32.mrf.mxu1  ;;  %v1140_v5 = vpop.f32.mrf.mxu0  ;;  %3130 = vmatpush3.bf16.msra.mxu1 %v3446_v59  ;;  %v1375_v35 = vmax.f32 %v1311_v60, 0.0  ;;  %v4143_v36 = vadd.f32 %v4045_v17, %v1227_v57  ;;  %v4150_v40 = vadd.f32 %v4047_v18, %v1229_v10  ;;  %v1233_v41 = vmul.f32 %v4042_v14, %v1135_v11 }
 0x1be   : > { %v1028_v13 = vadd.f32 %v1027_v2, %v4022_v3  ;;  %v1141_v20 = vadd.f32 %v1140_v5, %v4024_v4  ;;  %v1232_v30 = vmul.f32 %v4051_v22, %v1024_v63  ;;  %v1234_v37 = vmul.f32 %v4054_v24, %v1137_v0  ;;  %3131 = vmatprep.subr.bf16.mxu1 %v3447_v6  ;;  %v3451_v0 = vld [vmem:[%s4736_s11 + $0x58] sm:$0xff]  }
 0x1bf   : > { %v1029_v21 = vpop.f32.mrf.mxu1  ;;  %v1142_v23 = vpop.f32.mrf.mxu0  ;;  %v1430_v42 = vpack.c.bf16 %v1374_v7, %v1370_v27  ;;  %v1314_v43 = vadd.f32 %v4061_v31, %v1228_v15  ;;  %v4156_v44 = vadd.f32 %v4063_v32, %v1230_v16  ;;  %v4159_v46 = vadd.f32 %v4045_v17, %v1231_v19 }
 0x1c0   : > { %v1235_v53 = vmul.f32 %v4039_v12, %v1028_v13  ;;  %v1237_v48 = vmul.f32 %v4042_v14, %v1141_v20  ;;  %v1318_v52 = vadd.f32 %v4061_v31, %v1232_v30  ;;  %v1432_v54 = vpack.c.bf16 %v1376_v29, %v1372_v28  ;;  %v3452_v20 = vld [vmem:[%s4736_s11 + $0x18] sm:$0xff]  }
 0x1c1   : > { %v1031_v38 = vpop.f32.mrf.mxu1  ;;  %v1144_v39 = vpop.f32.mrf.mxu0  ;;  %1883 = vmatprep.mubr.bf16.mxu1 %v1430_v42  ;;  %v1030_v55 = vadd.f32 %v1029_v21, %v4030_v8  ;;  %3132 = vmatpush3.bf16.msra.mxu1 %v3448_v33  ;;  %v1320_v57 = vadd.f32 %v4063_v32, %v1234_v37  ;;  %v1143_v58 = vadd.f32 %v1142_v23, %v4032_v9  ;;  %v1377_v26 = vmax.f32 %v4143_v36, 0.0  ;;  %v3453_v33 = vld [vmem:[%s4736_s11 + $0x50] sm:$0xff]  }
 0x1c2   : > { %v1429_v59 = vpack.c.bf16 %v1373_v34, %v1369_v45  ;;  %v1431_v60 = vpack.c.bf16 %v1375_v35, %v1371_v47  ;;  %3133 = vmatprep.subr.bf16.mxu1 %v3449_v49  ;;  %v1319_v2 = vadd.f32 %v4047_v18, %v1233_v41  ;;  %v4178_v5 = vadd.f32 %v4045_v17, %v1235_v53 }
 0x1c3   : > { %v1033_v50 = vpop.f32.mrf.mxu1  ;;  %v1146_v51 = vpop.f32.mrf.mxu0  ;;  %1996 = vmatprep.mubr.bf16.mxu0 %v1432_v54  ;;  %v4184_v45 = vadd.f32 %v4047_v18, %v1237_v48  ;;  %v1032_v47 = vadd.f32 %v1031_v38, %v4022_v3  ;;  %v1145_v7 = vadd.f32 %v1144_v39, %v4024_v4  ;;  %v1379_v13 = vmax.f32 %v4150_v40, 0.0 }
 0x1c4   : > { %v1034_v6 = vadd.f32 %v1033_v50, %v4030_v8  ;;  %v1147_v25 = vadd.f32 %v1146_v51, %v4032_v9  ;;  %1884 = vmatmul.mubr.bf16.gmra.mxu1 %v1429_v59  ;;  %1997 = vmatmul.mubr.bf16.gmra.mxu0 %v1431_v60  ;;  %v1382_v15 = vmax.f32 %v1318_v52, 0.0  ;;  %v1236_v16 = vmul.f32 %v4051_v22, %v1030_v55 }
 0x1c5   : > { %v1037_v61 = vpop.f32.mrf.mxu1  ;;  %v1150_v63 = vpop.f32.mrf.mxu0  ;;  %v1238_v19 = vmul.f32 %v4054_v24, %v1143_v58  ;;  %3134 = vmatpush3.bf16.msra.mxu1 %v3450_v56  ;;  %v1378_v21 = vmax.f32 %v1314_v43, 0.0  ;;  %v1384_v23 = vmax.f32 %v1320_v57, 0.0  ;;  %v1380_v34 = vmax.f32 %v4156_v44, 0.0  ;;  %v3454_v56 = vld [vmem:[%s4736_s11 + $0x10] sm:$0xff]  }
 0x1c6   : > { %v1240_v27 = vmul.f32 %v4051_v22, %v1034_v6  ;;  %v1242_v28 = vmul.f32 %v4054_v24, %v1147_v25  ;;  %3135 = vmatprep.subr.bf16.mxu1 %v3451_v0  ;;  %v1381_v35 = vmax.f32 %v4159_v46, 0.0  ;;  %v1383_v36 = vmax.f32 %v1319_v2, 0.0 }
 0x1c7   : > { %v1039_v10 = vpop.f32.mrf.mxu1  ;;  %v1152_v11 = vpop.f32.mrf.mxu0  ;;  %v1385_v37 = vmax.f32 %v4178_v5, 0.0  ;;  %v1387_v38 = vmax.f32 %v4184_v45, 0.0  ;;  %v1239_v39 = vmul.f32 %v4039_v12, %v1032_v47  ;;  %v1241_v49 = vmul.f32 %v4042_v14, %v1145_v7 }
 0x1c8   : > { %v1038_v40 = vadd.f32 %v1037_v61, %v4022_v3  ;;  %v1322_v42 = vadd.f32 %v4061_v31, %v1236_v16  ;;  %v1324_v43 = vadd.f32 %v4063_v32, %v1238_v19  ;;  %v1151_v44 = vadd.f32 %v1150_v63, %v4024_v4 }
 0x1c9   : > { %v1041_v29 = vpop.f32.mrf.mxu1  ;;  %v1154_v30 = vpop.f32.mrf.mxu0  ;;  %v1434_v46 = vpack.c.bf16 %v1382_v15, %v1378_v21  ;;  %3136 = vmatpush3.bf16.msra.mxu1 %v3452_v20  ;;  %v1326_v48 = vadd.f32 %v4061_v31, %v1240_v27  ;;  %v1328_v50 = vadd.f32 %v4063_v32, %v1242_v28  ;;  %v1436_v51 = vpack.c.bf16 %v1384_v23, %v1380_v34 }
 0x1ca   : > { %v1040_v52 = vadd.f32 %v1039_v10, %v4030_v8  ;;  %3137 = vmatprep.subr.bf16.mxu1 %v3453_v33  ;;  %v1153_v57 = vadd.f32 %v1152_v11, %v4032_v9  ;;  %v1433_v58 = vpack.c.bf16 %v1381_v35, %v1377_v26  ;;  %v1435_v59 = vpack.c.bf16 %v1383_v36, %v1379_v13 }
 0x1cb   : > { %v1043_v41 = vpop.f32.mrf.mxu1  ;;  %v1156_v53 = vpop.f32.mrf.mxu0  ;;  %1893 = vmatprep.mubr.bf16.mxu1 %v1434_v46  ;;  %v1042_v60 = vadd.f32 %v1041_v29, %v4022_v3  ;;  %v1325_v61 = vadd.f32 %v4045_v17, %v1239_v39  ;;  %v1327_v63 = vadd.f32 %v4047_v18, %v1241_v49  ;;  %v1243_v0 = vmul.f32 %v4039_v12, %v1038_v40 }
 0x1cc   : > { %2006 = vmatprep.mubr.bf16.mxu0 %v1436_v51  ;;  %v1044_v2 = vadd.f32 %v1043_v41, %v4030_v8  ;;  %v1386_v47 = vmax.f32 %v1322_v42, 0.0  ;;  %v1245_v7 = vmul.f32 %v4042_v14, %v1151_v44  ;;  %1894 = vmatmul.mubr.bf16.gmra.mxu1 %v1433_v58  ;;  %v1155_v26 = vadd.f32 %v1154_v30, %v4024_v4 }
 0x1cd   : > { %v1047_v54 = vpop.f32.mrf.mxu1  ;;  %v1160_v55 = vpop.f32.mrf.mxu0  ;;  %2007 = vmatmul.mubr.bf16.gmra.mxu0 %v1435_v59  ;;  %v1157_v10 = vadd.f32 %v1156_v53, %v4032_v9  ;;  %v1390_v11 = vmax.f32 %v1326_v48, 0.0  ;;  %v1244_v13 = vmul.f32 %v4051_v22, %v1040_v52  ;;  %v1246_v15 = vmul.f32 %v4054_v24, %v1153_v57  ;;  %3138 = vmatpush3.bf16.msra.mxu1 %v3454_v56 }
 0x1ce   : > { %v1048_v16 = vadd.f32 %v1047_v54, %v4022_v3  ;;  %v1392_v21 = vmax.f32 %v1328_v50, 0.0  ;;  %v1247_v23 = vmul.f32 %v4039_v12, %v1042_v60  ;;  %v1248_v27 = vmul.f32 %v4051_v22, %v1044_v2 }
 0x1cf   : > { %v1049_v6 = vpop.f32.mrf.mxu1  ;;  %v1162_v25 = vpop.f32.mrf.mxu0  ;;  %v1161_v28 = vadd.f32 %v1160_v55, %v4024_v4  ;;  %v1388_v29 = vmax.f32 %v1324_v43, 0.0  ;;  %v1389_v30 = vmax.f32 %v1325_v61, 0.0  ;;  %v1391_v33 = vmax.f32 %v1327_v63, 0.0 }
 0x1d0   : > { %v1250_v34 = vmul.f32 %v4054_v24, %v1157_v10  ;;  %v4232_v39 = vadd.f32 %v4045_v17, %v1243_v0  ;;  %v1249_v49 = vmul.f32 %v4042_v14, %v1155_v26  ;;  %v1251_v40 = vmul.f32 %v4039_v12, %v1048_v16 }
 0x1d1   : > { %v1051_v19 = vpop.f32.mrf.mxu1  ;;  %v1164_v20 = vpop.f32.mrf.mxu0  ;;  %v1253_v41 = vmul.f32 %v4042_v14, %v1161_v28  ;;  %v4238_v53 = vadd.f32 %v4047_v18, %v1245_v7  ;;  %v1330_v42 = vadd.f32 %v4061_v31, %v1244_v13  ;;  %v1332_v43 = vadd.f32 %v4063_v32, %v1246_v15 }
 0x1d2   : > { %v1438_v44 = vpack.c.bf16 %v1390_v11, %v1386_v47  ;;  %v1333_v50 = vadd.f32 %v4045_v17, %v1247_v23  ;;  %v1334_v51 = vadd.f32 %v4061_v31, %v1248_v27  ;;  %v1440_v52 = vpack.c.bf16 %v1392_v21, %v1388_v29 }
 0x1d3   : > { %v1053_v35 = vpop.f32.mrf.mxu1  ;;  %v1166_v36 = vpop.f32.mrf.mxu0  ;;  %v1050_v54 = vadd.f32 %v1049_v6, %v4030_v8  ;;  %v1336_v55 = vadd.f32 %v4063_v32, %v1250_v34  ;;  %v1163_v56 = vadd.f32 %v1162_v25, %v4032_v9  ;;  %v1437_v57 = vpack.c.bf16 %v1389_v30, %v1385_v37 }
 0x1d4   : > { %1903 = vmatprep.mubr.bf16.mxu1 %v1438_v44  ;;  %v1439_v58 = vpack.c.bf16 %v1391_v33, %v1387_v38  ;;  %v1335_v61 = vadd.f32 %v4047_v18, %v1249_v49  ;;  %v4253_v63 = vadd.f32 %v4045_v17, %v1251_v40  ;;  %v4256_v0 = vadd.f32 %v4047_v18, %v1253_v41 }
 0x1d5   : > { %v1057_v46 = vpop.f32.mrf.mxu1  ;;  %v1170_v48 = vpop.f32.mrf.mxu0  ;;  %2016 = vmatprep.mubr.bf16.mxu0 %v1440_v52  ;;  %v1052_v2 = vadd.f32 %v1051_v19, %v4022_v3  ;;  %1904 = vmatmul.mubr.bf16.gmra.mxu1 %v1437_v57  ;;  %v1165_v5 = vadd.f32 %v1164_v20, %v4024_v4  ;;  %v1054_v45 = vadd.f32 %v1053_v35, %v4030_v8  ;;  %v1393_v25 = vmax.f32 %v4232_v39, 0.0 }
 0x1d6   : > { %2017 = vmatmul.mubr.bf16.gmra.mxu0 %v1439_v58  ;;  %v1167_v37 = vadd.f32 %v1166_v36, %v4032_v9  ;;  %v1398_v47 = vmax.f32 %v1334_v51, 0.0  ;;  %v1252_v7 = vmul.f32 %v4051_v22, %v1050_v54  ;;  %v1254_v26 = vmul.f32 %v4054_v24, %v1163_v56 }
 0x1d7   : > { %v1059_v59 = vpop.f32.mrf.mxu1  ;;  %v1172_v60 = vpop.f32.mrf.mxu0  ;;  %v1395_v10 = vmax.f32 %v4238_v53, 0.0  ;;  %v1400_v11 = vmax.f32 %v1336_v55, 0.0  ;;  %v1255_v13 = vmul.f32 %v4039_v12, %v1052_v2  ;;  %v1256_v15 = vmul.f32 %v4051_v22, %v1054_v45 }
 0x1d8   : > { %v1394_v20 = vmax.f32 %v1330_v42, 0.0  ;;  %v1396_v21 = vmax.f32 %v1332_v43, 0.0  ;;  %v1397_v23 = vmax.f32 %v1333_v50, 0.0  ;;  %v1258_v27 = vmul.f32 %v4054_v24, %v1167_v37 }
 0x1d9   : > { %v1061_v38 = vpop.f32.mrf.mxu1  ;;  %v1174_v6 = vpop.f32.mrf.mxu0  ;;  %v1399_v28 = vmax.f32 %v1335_v61, 0.0  ;;  %v1401_v29 = vmax.f32 %v4253_v63, 0.0  ;;  %v1403_v30 = vmax.f32 %v4256_v0, 0.0  ;;  %v1257_v33 = vmul.f32 %v4042_v14, %v1165_v5 }
 0x1da   : > { %v1338_v36 = vadd.f32 %v4061_v31, %v1252_v7  ;;  %v1340_v39 = vadd.f32 %v4063_v32, %v1254_v26  ;;  %v1058_v49 = vadd.f32 %v1057_v46, %v4022_v3  ;;  %v1442_v40 = vpack.c.bf16 %v1398_v47, %v1394_v20 }
 0x1db   : > { %v1063_v16 = vpop.f32.mrf.mxu1  ;;  %v1176_v19 = vpop.f32.mrf.mxu0  ;;  %v1341_v41 = vadd.f32 %v4045_v17, %v1255_v13  ;;  %v1342_v53 = vadd.f32 %v4061_v31, %v1256_v15  ;;  %v1171_v42 = vadd.f32 %v1170_v48, %v4024_v4  ;;  %v1444_v43 = vpack.c.bf16 %v1400_v11, %v1396_v21 }
 0x1dc   : > { %v1344_v44 = vadd.f32 %v4063_v32, %v1258_v27  ;;  %1913 = vmatprep.mubr.bf16.mxu1 %v1442_v40  ;;  %v1060_v50 = vadd.f32 %v1059_v59, %v4030_v8  ;;  %v1173_v51 = vadd.f32 %v1172_v60, %v4032_v9  ;;  %v1441_v52 = vpack.c.bf16 %v1397_v23, %v1393_v25 }
 0x1dd   : > { %v1067_v34 = vpop.f32.mrf.mxu1  ;;  %v1180_v35 = vpop.f32.mrf.mxu0  ;;  %v1343_v55 = vadd.f32 %v4047_v18, %v1257_v33  ;;  %2026 = vmatprep.mubr.bf16.mxu0 %v1444_v43  ;;  %v1443_v46 = vpack.c.bf16 %v1399_v28, %v1395_v10  ;;  %v1062_v56 = vadd.f32 %v1061_v38, %v4022_v3  ;;  %v1175_v57 = vadd.f32 %v1174_v6, %v4024_v4 }
 0x1de   : > { %v1259_v48 = vmul.f32 %v4039_v12, %v1058_v49  ;;  %v1260_v61 = vmul.f32 %v4051_v22, %v1060_v50  ;;  %1914 = vmatmul.mubr.bf16.gmra.mxu1 %v1441_v52  ;;  %v1064_v59 = vadd.f32 %v1063_v16, %v4030_v8  ;;  %v1177_v60 = vadd.f32 %v1176_v19, %v4032_v9 }
 0x1df   : > { %v1069_v54 = vpop.f32.mrf.mxu1  ;;  %v1182_v58 = vpop.f32.mrf.mxu0  ;;  %v1402_v2 = vmax.f32 %v1338_v36, 0.0  ;;  %v1406_v5 = vmax.f32 %v1342_v53, 0.0  ;;  %v1261_v45 = vmul.f32 %v4042_v14, %v1171_v42  ;;  %v1262_v37 = vmul.f32 %v4054_v24, %v1173_v51  ;;  %2027 = vmatmul.mubr.bf16.gmra.mxu0 %v1443_v46 }
 0x1e0   : > { %v1408_v38 = vmax.f32 %v1344_v44, 0.0  ;;  %v1263_v6 = vmul.f32 %v4039_v12, %v1062_v56  ;;  %v1264_v25 = vmul.f32 %v4051_v22, %v1064_v59  ;;  %v1266_v47 = vmul.f32 %v4054_v24, %v1177_v60 }
 0x1e1   : > { %v1071_v7 = vpop.f32.mrf.mxu1  ;;  %v1404_v26 = vmax.f32 %v1340_v39, 0.0  ;;  %v1405_v10 = vmax.f32 %v1341_v41, 0.0  ;;  %v1346_v11 = vadd.f32 %v4061_v31, %v1260_v61  ;;  %v1265_v13 = vmul.f32 %v4042_v14, %v1175_v57  ;;  %v1184_v15 = vpop.f32.mrf.mxu0 }
 0x1e2   : > { %v1407_v16 = vmax.f32 %v1343_v55, 0.0  ;;  %v1345_v19 = vadd.f32 %v4045_v17, %v1259_v48  ;;  %v1350_v20 = vadd.f32 %v4061_v31, %v1264_v25  ;;  %v1352_v21 = vadd.f32 %v4063_v32, %v1266_v47 }
 0x1e3   : > { %v1347_v23 = vadd.f32 %v4047_v18, %v1261_v45  ;;  %v1348_v27 = vadd.f32 %v4063_v32, %v1262_v37  ;;  %v1068_v28 = vadd.f32 %v1067_v34, %v4022_v3  ;;  %v1181_v33 = vadd.f32 %v1180_v35, %v4024_v4  ;;  %v1073_v41 = vpop.f32.mrf.mxu1  ;;  %v1186_v50 = vpop.f32.mrf.mxu0 }
 0x1e4   : > { %v1349_v36 = vadd.f32 %v4045_v17, %v1263_v6  ;;  %v1414_v39 = vmax.f32 %v1350_v20, 0.0  ;;  %v1446_v49 = vpack.c.bf16 %v1406_v5, %v1402_v2  ;;  %v1448_v40 = vpack.c.bf16 %v1408_v38, %v1404_v26  ;;  %v3455_v20 = vld [vmem:[%s4736_s11 + $0x48] sm:$0xff]  }
 0x1e5   : > { %v1410_v53 = vmax.f32 %v1346_v11, 0.0  ;;  %v1351_v42 = vadd.f32 %v4047_v18, %v1265_v13  ;;  %v1070_v43 = vadd.f32 %v1069_v54, %v4030_v8  ;;  %v1183_v44 = vadd.f32 %v1182_v58, %v4032_v9  ;;  %3139 = vmatprep.subr.bf16.mxu1 %v3455_v20 }
 0x1e6   : > { %v1416_v51 = vmax.f32 %v1352_v21, 0.0  ;;  %1923 = vmatprep.mubr.bf16.mxu1 %v1446_v49  ;;  %2036 = vmatprep.mubr.bf16.mxu0 %v1448_v40  ;;  %v1445_v34 = vpack.c.bf16 %v1405_v10, %v1401_v29  ;;  %v1447_v35 = vpack.c.bf16 %v1407_v16, %v1403_v30  ;;  %v1072_v52 = vadd.f32 %v1071_v7, %v4022_v3  ;;  %v3458_v21 = vld [vmem:[%s4736_s11] sm:$0xff]   ;;  %v2499_v49 = vld [vmem:[%s4739_s14 + $0x48] sm:$0xff] }
 0x1e7   : > { %v1268_v55 = vmul.f32 %v4051_v22, %v1070_v43  ;;  %v1270_v46 = vmul.f32 %v4054_v24, %v1183_v44  ;;  %v1185_v54 = vadd.f32 %v1184_v15, %v4024_v4  ;;  %v1074_v56 = vadd.f32 %v1073_v41, %v4030_v8  ;;  %v2498_v40 = vld [vmem:[%s4739_s14 + $0x40] sm:$0xff]  ;;  %v2497_v41 = vld [vmem:[%s4739_s14 + $0x38] sm:$0xff] }
 0x1e8   : > { %v1412_v57 = vmax.f32 %v1348_v27, 0.0  ;;  %v1413_v58 = vmax.f32 %v1349_v36, 0.0  ;;  %1924 = vmatmul.mubr.bf16.gmra.mxu1 %v1445_v34  ;;  %2037 = vmatmul.mubr.bf16.gmra.mxu0 %v1447_v35  ;;  %v1187_v63 = vadd.f32 %v1186_v50, %v4032_v9  ;;  %v1450_v29 = vpack.c.bf16 %v1414_v39, %v1410_v53  ;;  %v2504_v27 = vld [vmem:[%s4739_s14 + $0x70] sm:$0xff]  ;;  %v2501_v36 = vld [vmem:[%s4739_s14 + $0x58] sm:$0xff]  ;;  %v2067_v53 = vld [vmem:[%s4734_s9] sm:$0x3] }
 0x1e9   : > { %v1415_v48 = vmax.f32 %v1351_v42, 0.0  ;;  %v1354_v0 = vadd.f32 %v4061_v31, %v1268_v55  ;;  %v1271_v3 = vmul.f32 %v4039_v12, %v1072_v52  ;;  %v1272_v30 = vmul.f32 %v4051_v22, %v1074_v56  ;;  %v2500_v39 = vld [vmem:[%s4739_s14 + $0x50] sm:$0xff]  ;;  %v2111_v52 = vld [vmem:[%s4735_s10] sm:$0x3] }
 0x1ea   : > { %v1356_v61 = vadd.f32 %v4063_v32, %v1270_v46  ;;  %v1273_v4 = vmul.f32 %v4042_v14, %v1185_v54  ;;  %v1274_v8 = vmul.f32 %v4054_v24, %v1187_v63  ;;  %1933 = vmatprep.mubr.bf16.mxu1 %v1450_v29  ;;  %v1452_v59 = vpack.c.bf16 %v1416_v51, %v1412_v57 }
 0x1eb   : > { %v1409_v60 = vmax.f32 %v1345_v19, 0.0  ;;  %v1358_v2 = vadd.f32 %v4061_v31, %v1272_v30  ;;  %v1411_v9 = vmax.f32 %v1347_v23, 0.0  ;;  %v1267_v5 = vmul.f32 %v4039_v12, %v1068_v28  ;;  %v2505_v23 = vld [vmem:[%s4739_s14 + $0x78] sm:$0xff]  ;;  %v2503_v28 = vld [vmem:[%s4739_s14 + $0x68] sm:$0xff] }
 0x1ec   : > { %v1269_v45 = vmul.f32 %v4042_v14, %v1181_v33  ;;  %v1360_v37 = vadd.f32 %v4063_v32, %v1274_v8  ;;  %2046 = vmatprep.mubr.bf16.mxu0 %v1452_v59  ;;  %v1418_v22 = vmax.f32 %v1354_v0, 0.0  ;;  %v1357_v38 = vadd.f32 %v4045_v17, %v1271_v3  ;;  %3241 = vmatprep.subr.mxu0 %v2505_v23  ;;  %v2502_v33 = vld [vmem:[%s4739_s14 + $0x60] sm:$0xff] }
 0x1ed   : > { %v1422_v6 = vmax.f32 %v1358_v2, 0.0  ;;  %v1449_v25 = vpack.c.bf16 %v1413_v58, %v1409_v60  ;;  %v1420_v47 = vmax.f32 %v1356_v61, 0.0  ;;  %v1359_v24 = vadd.f32 %v4047_v18, %v1273_v4  ;;  %3242 = vmatpush3.msra.mxu0 %v2505_v23 }
 0x1ee   : > { %v1424_v7 = vmax.f32 %v1360_v37, 0.0  ;;  %v1451_v26 = vpack.c.bf16 %v1415_v48, %v1411_v9  ;;  %v1353_v31 = vadd.f32 %v4045_v17, %v1267_v5  ;;  %v1355_v12 = vadd.f32 %v4047_v18, %v1269_v45  ;;  %v3456_v17 = vld [vmem:[%s4736_s11 + $0x8] sm:$0xff]   ;;  %v3457_v18 = vld [vmem:[%s4736_s11 + $0x40] sm:$0xff]   ;;  %3243 = vmatprep.subr.mxu0 %v2504_v27 }
 0x1ef   : > { %v1454_v10 = vpack.c.bf16 %v1422_v6, %v1418_v22  ;;  %v1421_v32 = vmax.f32 %v1357_v38, 0.0  ;;  %v1423_v11 = vmax.f32 %v1359_v24, 0.0  ;;  %3140 = vmatpush3.bf16.msra.mxu1 %v3456_v17  ;;  %3244 = vmatpush3.msra.mxu0 %v2504_v27  ;;  %v4373_v44 = vrot.slane %v2067_v53, %v4019_v1 }
 0x1f0   : > { %1934 = vmatmul.mubr.bf16.gmra.mxu1 %v1449_v25  ;;  %2047 = vmatmul.mubr.bf16.gmra.mxu0 %v1451_v26  ;;  %v1456_v14 = vpack.c.bf16 %v1424_v7, %v1420_v47  ;;  %v1417_v13 = vmax.f32 %v1353_v31, 0.0  ;;  %v1419_v15 = vmax.f32 %v1355_v12, 0.0  ;;  %v4376_v51 = vrot.slane %v2067_v53, %v4017_v62 }
 0x1f1   : > { %1943 = vmatprep.mubr.bf16.mxu1 %v1454_v10  ;;  %3141 = vmatprep.subr.bf16.mxu1 %v3457_v18  ;;  %v4383_v57 = vrot.slane %v2111_v52, %v4019_v1  ;;  %v4387_v29 = vrot.slane %v2111_v52, %v4017_v62 }
 0x1f2   : > { %2056 = vmatprep.mubr.bf16.mxu0 %v1456_v14  ;;  %v1453_v16 = vpack.c.bf16 %v1421_v32, %v1417_v13  ;;  %v1455_v19 = vpack.c.bf16 %v1423_v11, %v1419_v15  ;;  %3245 = vmatprep.subr.mxu0 %v2503_v28 }
 0x1f3   : > { %3142 = vmatpush3.bf16.msra.mxu1 %v3458_v21  ;;  %3246 = vmatpush3.msra.mxu0 %v2503_v28 }
 0x1f4   : > { %3247 = vmatprep.subr.mxu0 %v2502_v33 }
 0x1f5   : > { %3248 = vmatpush3.msra.mxu0 %v2502_v33 }
 0x1f6   : > { %3249 = vmatprep.subr.mxu0 %v2501_v36 }
 0x1f7   : > { %3250 = vmatpush3.msra.mxu0 %v2501_v36 }
 0x1f8   : > { %1944 = vmatmul.mubr.bf16.gmra.mxu1 %v1453_v16  ;;  %2057 = vmatmul.mubr.bf16.gmra.mxu0 %v1455_v19 }
 0x1f9   : > { %3251 = vmatprep.subr.mxu0 %v2500_v39 }
 0x1fa   : > { %3252 = vmatpush3.msra.mxu0 %v2500_v39 }
 0x1fb   : > { %3253 = vmatprep.subr.mxu0 %v2499_v49 }
 0x1fc   : > { %3254 = vmatpush3.msra.mxu0 %v2499_v49 }
 0x1fd   : > { %3255 = vmatprep.subr.mxu0 %v2498_v40 }
 0x1fe   : > { %3256 = vmatpush3.msra.mxu0 %v2498_v40 }
 0x1ff   : > { %3257 = vmatprep.subr.mxu0 %v2497_v41 }
 0x200   : > { %3258 = vmatpush3.msra.mxu0 %v2497_v41 }
 0x277   : > { %v1875_v42 = vpop.f32.mrf.mxu1 }
 0x278   : > { %v1988_v43 = vpop.f32.mrf.mxu0 }
 0x279   : > { %v1989_v50 = vadd.f32 %v1988_v43, %v1875_v42  ;;  %v1877_v34 = vpop.f32.mrf.mxu1 }
 0x27a   : > { %v1990_v35 = vpop.f32.mrf.mxu0 }
 0x27b   : > { %v1991_v55 = vadd.f32 %v1990_v35, %v1877_v34  ;;  %v1879_v46 = vpop.f32.mrf.mxu1  ;;  %v2079_v63 = vmul.f32 %v4376_v51, %v1989_v50 }
 0x27c   : > { %v1992_v54 = vpop.f32.mrf.mxu0 }
 0x27d   : > { %v2080_v56 = vmul.f32 %v4373_v44, %v1991_v55  ;;  %v1993_v58 = vadd.f32 %v1992_v54, %v1879_v46  ;;  %v1881_v48 = vpop.f32.mrf.mxu1  ;;  %v2123_v1 = vadd.f32 %v4387_v29, %v2079_v63 }
 0x27e   : > { %v1994_v0 = vpop.f32.mrf.mxu0 }
 0x27f   : > { %v2081_v3 = vmul.f32 %v4376_v51, %v1993_v58  ;;  %v1995_v30 = vadd.f32 %v1994_v0, %v1881_v48  ;;  %v2124_v61 = vadd.f32 %v4383_v57, %v2080_v56  ;;  %v2155_v45 = vmax.f32 %v2123_v1, 0.0 }
 0x281   : > { %v2125_v4 = vadd.f32 %v4387_v29, %v2081_v3  ;;  %v2082_v8 = vmul.f32 %v4373_v44, %v1995_v30  ;;  %v2156_v62 = vmax.f32 %v2124_v61, 0.0 }
 0x283   : > { %v2126_v59 = vadd.f32 %v4383_v57, %v2082_v8  ;;  %v2157_v60 = vmax.f32 %v2125_v4, 0.0 }
 0x284   : > { %v1885_v2 = vpop.f32.mrf.mxu1  ;;  %v1998_v9 = vpop.f32.mrf.mxu0 }
 0x285   : > { %v2158_v5 = vmax.f32 %v2126_v59, 0.0  ;;  %v1999_v37 = vadd.f32 %v1998_v9, %v1885_v2  ;;  %v2187_v47 = vpack.c.bf16 %v2157_v60, %v2155_v45 }
 0x286   : > { %v1887_v22 = vpop.f32.mrf.mxu1  ;;  %v2000_v38 = vpop.f32.mrf.mxu0 }
 0x287   : > { %v2001_v6 = vadd.f32 %v2000_v38, %v1887_v22  ;;  %v2188_v25 = vpack.c.bf16 %v2158_v5, %v2156_v62  ;;  %v2083_v31 = vmul.f32 %v4376_v51, %v1999_v37 }
 0x288   : > { %v1889_v24 = vpop.f32.mrf.mxu1  ;;  %v2002_v7 = vpop.f32.mrf.mxu0 }
 0x289   : > { %v2084_v26 = vmul.f32 %v4373_v44, %v2001_v6  ;;  %v2003_v10 = vadd.f32 %v2002_v7, %v1889_v24  ;;  %2363 = vmatprep.mubr.bf16.mxu1 %v2188_v25  ;;  %v2127_v17 = vadd.f32 %v4387_v29, %v2083_v31 }
 0x28a   : > { %v1891_v12 = vpop.f32.mrf.mxu1  ;;  %v2004_v14 = vpop.f32.mrf.mxu0  ;;  %2364 = vmatmul.mubr.bf16.vlgmr.msra.gmra.mxu1 %v2187_v47 }
 0x28b   : > { %v2085_v32 = vmul.f32 %v4376_v51, %v2003_v10  ;;  %v2005_v11 = vadd.f32 %v2004_v14, %v1891_v12  ;;  %v2128_v13 = vadd.f32 %v4383_v57, %v2084_v26  ;;  %v2159_v41 = vmax.f32 %v2127_v17, 0.0 }
 0x28c   : > { %v1895_v19 = vpop.f32.mrf.mxu1 }
 0x28d   : > { %v2129_v15 = vadd.f32 %v4387_v29, %v2085_v32  ;;  %v2086_v16 = vmul.f32 %v4373_v44, %v2005_v11  ;;  %v2008_v20 = vpop.f32.mrf.mxu0  ;;  %v2160_v36 = vmax.f32 %v2128_v13, 0.0 }
 0x28e   : > { %v2009_v21 = vadd.f32 %v2008_v20, %v1895_v19  ;;  %v1897_v23 = vpop.f32.mrf.mxu1 }
 0x28f   : > { %v2130_v18 = vadd.f32 %v4383_v57, %v2086_v16  ;;  %v2010_v27 = vpop.f32.mrf.mxu0  ;;  %v2161_v28 = vmax.f32 %v2129_v15, 0.0 }
 0x290   : > { %v2011_v33 = vadd.f32 %v2010_v27, %v1897_v23  ;;  %v1899_v49 = vpop.f32.mrf.mxu1  ;;  %v2087_v43 = vmul.f32 %v4376_v51, %v2009_v21 }
 0x291   : > { %v2162_v39 = vmax.f32 %v2130_v18, 0.0  ;;  %v2012_v40 = vpop.f32.mrf.mxu0  ;;  %v2189_v46 = vpack.c.bf16 %v2161_v28, %v2159_v41 }
 0x292   : > { %v2088_v53 = vmul.f32 %v4373_v44, %v2011_v33  ;;  %v2013_v42 = vadd.f32 %v2012_v40, %v1899_v49  ;;  %v1901_v50 = vpop.f32.mrf.mxu1  ;;  %v2131_v0 = vadd.f32 %v4387_v29, %v2087_v43 }
 0x293   : > { %v2014_v34 = vpop.f32.mrf.mxu0  ;;  %v2190_v35 = vpack.c.bf16 %v2162_v39, %v2160_v36 }
 0x294   : > { %v2089_v52 = vmul.f32 %v4376_v51, %v2013_v42  ;;  %v2015_v55 = vadd.f32 %v2014_v34, %v1901_v50  ;;  %v2132_v54 = vadd.f32 %v4383_v57, %v2088_v53  ;;  %v2163_v62 = vmax.f32 %v2131_v0, 0.0 }
 0x295   : > { %2371 = vmatprep.mubr.bf16.mxu1 %v2190_v35  ;;  %v1905_v63 = vpop.f32.mrf.mxu1 }
 0x296   : > { %v2133_v56 = vadd.f32 %v4387_v29, %v2089_v52  ;;  %v2090_v58 = vmul.f32 %v4373_v44, %v2015_v55  ;;  %v2018_v48 = vpop.f32.mrf.mxu0  ;;  %2372 = vmatmul.mubr.bf16.gmra.mxu1 %v2189_v46  ;;  %v2164_v59 = vmax.f32 %v2132_v54, 0.0 }
 0x297   : > { %v2019_v30 = vadd.f32 %v2018_v48, %v1905_v63  ;;  %v1907_v61 = vpop.f32.mrf.mxu1 }
 0x298   : > { %v2134_v3 = vadd.f32 %v4383_v57, %v2090_v58  ;;  %v2020_v4 = vpop.f32.mrf.mxu0  ;;  %v2165_v8 = vmax.f32 %v2133_v56, 0.0 }
 0x299   : > { %v2021_v1 = vadd.f32 %v2020_v4, %v1907_v61  ;;  %v1909_v2 = vpop.f32.mrf.mxu1  ;;  %v2091_v37 = vmul.f32 %v4376_v51, %v2019_v30 }
 0x29a   : > { %v2166_v60 = vmax.f32 %v2134_v3, 0.0  ;;  %v2022_v9 = vpop.f32.mrf.mxu0  ;;  %v2191_v24 = vpack.c.bf16 %v2165_v8, %v2163_v62 }
 0x29b   : > { %v2092_v5 = vmul.f32 %v4373_v44, %v2021_v1  ;;  %v2023_v45 = vadd.f32 %v2022_v9, %v1909_v2  ;;  %v1911_v22 = vpop.f32.mrf.mxu1  ;;  %v2135_v12 = vadd.f32 %v4387_v29, %v2091_v37 }
 0x29c   : > { %v2024_v38 = vpop.f32.mrf.mxu0  ;;  %v2192_v6 = vpack.c.bf16 %v2166_v60, %v2164_v59 }
 0x29d   : > { %v2093_v25 = vmul.f32 %v4376_v51, %v2023_v45  ;;  %v2025_v47 = vadd.f32 %v2024_v38, %v1911_v22  ;;  %v2136_v7 = vadd.f32 %v4383_v57, %v2092_v5  ;;  %v2167_v21 = vmax.f32 %v2135_v12, 0.0 }
 0x29e   : > { %2379 = vmatprep.mubr.bf16.mxu1 %v2192_v6  ;;  %v1915_v31 = vpop.f32.mrf.mxu1 }
 0x29f   : > { %v2137_v26 = vadd.f32 %v4387_v29, %v2093_v25  ;;  %v2094_v10 = vmul.f32 %v4373_v44, %v2025_v47  ;;  %2380 = vmatmul.mubr.bf16.gmra.mxu1 %v2191_v24  ;;  %v2028_v14 = vpop.f32.mrf.mxu0  ;;  %v2168_v19 = vmax.f32 %v2136_v7, 0.0 }
 0x2a0   : > { %v1917_v11 = vpop.f32.mrf.mxu1  ;;  %v2029_v15 = vadd.f32 %v2028_v14, %v1915_v31 }
 0x2a1   : > { %v2138_v32 = vadd.f32 %v4383_v57, %v2094_v10  ;;  %v2169_v13 = vmax.f32 %v2137_v26, 0.0  ;;  %v2030_v16 = vpop.f32.mrf.mxu0 }
 0x2a2   : > { %v2031_v17 = vadd.f32 %v2030_v16, %v1917_v11  ;;  %v1919_v18 = vpop.f32.mrf.mxu1  ;;  %v2095_v39 = vmul.f32 %v4376_v51, %v2029_v15 }
 0x2a3   : > { %v2170_v20 = vmax.f32 %v2138_v32, 0.0  ;;  %v2032_v23 = vpop.f32.mrf.mxu0  ;;  %v2193_v40 = vpack.c.bf16 %v2169_v13, %v2167_v21 }
 0x2a4   : > { %v2096_v27 = vmul.f32 %v4373_v44, %v2031_v17  ;;  %v2033_v28 = vadd.f32 %v2032_v23, %v1919_v18  ;;  %v1921_v33 = vpop.f32.mrf.mxu1  ;;  %v2139_v52 = vadd.f32 %v4387_v29, %v2095_v39 }
 0x2a5   : > { %v2194_v36 = vpack.c.bf16 %v2170_v20, %v2168_v19  ;;  %v2034_v49 = vpop.f32.mrf.mxu0 }
 0x2a6   : > { %v2097_v41 = vmul.f32 %v4376_v51, %v2033_v28  ;;  %v2035_v53 = vadd.f32 %v2034_v49, %v1921_v33  ;;  %v2140_v42 = vadd.f32 %v4383_v57, %v2096_v27  ;;  %v2171_v61 = vmax.f32 %v2139_v52, 0.0 }
 0x2a7   : > { %2387 = vmatprep.mubr.bf16.mxu1 %v2194_v36 }
 0x2a8   : > { %2388 = vmatmul.mubr.bf16.gmra.mxu1 %v2193_v40  ;;  %v2141_v43 = vadd.f32 %v4387_v29, %v2097_v41  ;;  %v2098_v50 = vmul.f32 %v4373_v44, %v2035_v53  ;;  %v1925_v34 = vpop.f32.mrf.mxu1  ;;  %v2038_v35 = vpop.f32.mrf.mxu0  ;;  %v2172_v48 = vmax.f32 %v2140_v42, 0.0 }
 0x2a9   : > { %v2039_v58 = vadd.f32 %v2038_v35, %v1925_v34 }
 0x2aa   : > { %v2142_v55 = vadd.f32 %v4383_v57, %v2098_v50  ;;  %v1927_v46 = vpop.f32.mrf.mxu1  ;;  %v2040_v54 = vpop.f32.mrf.mxu0  ;;  %v2173_v56 = vmax.f32 %v2141_v43, 0.0 }
 0x2ab   : > { %v2041_v63 = vadd.f32 %v2040_v54, %v1927_v46  ;;  %v2099_v2 = vmul.f32 %v4376_v51, %v2039_v58 }
 0x2ac   : > { %v2174_v0 = vmax.f32 %v2142_v55, 0.0  ;;  %v1929_v3 = vpop.f32.mrf.mxu1  ;;  %v2042_v30 = vpop.f32.mrf.mxu0  ;;  %v2195_v5 = vpack.c.bf16 %v2173_v56, %v2171_v61 }
 0x2ad   : > { %v2043_v4 = vadd.f32 %v2042_v30, %v1929_v3  ;;  %v2100_v8 = vmul.f32 %v4373_v44, %v2041_v63  ;;  %v2143_v24 = vadd.f32 %v4387_v29, %v2099_v2 }
 0x2ae   : > { %v1931_v1 = vpop.f32.mrf.mxu1  ;;  %v2044_v59 = vpop.f32.mrf.mxu0  ;;  %v2196_v60 = vpack.c.bf16 %v2174_v0, %v2172_v48 }
 0x2af   : > { %v2101_v9 = vmul.f32 %v4376_v51, %v2043_v4  ;;  %v2045_v62 = vadd.f32 %v2044_v59, %v1931_v1  ;;  %v2144_v6 = vadd.f32 %v4383_v57, %v2100_v8  ;;  %v2175_v20 = vmax.f32 %v2143_v24, 0.0 }
 0x2b0   : > { %v1935_v45 = vpop.f32.mrf.mxu1  ;;  %v2048_v37 = vpop.f32.mrf.mxu0  ;;  %2395 = vmatprep.mubr.bf16.mxu1 %v2196_v60 }
 0x2b1   : > { %v2145_v22 = vadd.f32 %v4387_v29, %v2101_v9  ;;  %v2102_v38 = vmul.f32 %v4373_v44, %v2045_v62  ;;  %2396 = vmatmul.mubr.bf16.gmra.mxu1 %v2195_v5  ;;  %v2049_v26 = vadd.f32 %v2048_v37, %v1935_v45  ;;  %v2176_v13 = vmax.f32 %v2144_v6, 0.0  ;;  %v2491_v6 = vld [vmem:[%s4739_s14 + $0x8] sm:$0xff] }
 0x2b2   : > { %v1937_v25 = vpop.f32.mrf.mxu1  ;;  %v2050_v47 = vpop.f32.mrf.mxu0 }
 0x2b3   : > { %v2146_v7 = vadd.f32 %v4383_v57, %v2102_v38  ;;  %v2051_v10 = vadd.f32 %v2050_v47, %v1937_v25  ;;  %v2177_v14 = vmax.f32 %v2145_v22, 0.0  ;;  %v2103_v17 = vmul.f32 %v4376_v51, %v2049_v26  ;;  %v2496_v22 = vld [vmem:[%s4739_s14 + $0x30] sm:$0xff]  ;;  %v2490_v25 = vld [vmem:[%s4739_s14] sm:$0xff] }
 0x2b4   : > { %v1939_v31 = vpop.f32.mrf.mxu1  ;;  %v2052_v12 = vpop.f32.mrf.mxu0  ;;  %3259 = vmatprep.subr.mxu0 %v2496_v22  ;;  %v2492_v38 = vld [vmem:[%s4739_s14 + $0x10] sm:$0xff] }
 0x2b5   : > { %v2178_v32 = vmax.f32 %v2146_v7, 0.0  ;;  %v2053_v11 = vadd.f32 %v2052_v12, %v1939_v31  ;;  %v2104_v15 = vmul.f32 %v4373_v44, %v2051_v10  ;;  %v2197_v39 = vpack.c.bf16 %v2177_v14, %v2175_v20  ;;  %3260 = vmatpush3.msra.mxu0 %v2496_v22  ;;  %v4475_v7 = vld [vmem:[%s4737_s12] ss:$0 sm:$0xff] }
 0x2b6   : > { %v1941_v16 = vpop.f32.mrf.mxu1  ;;  %v2054_v19 = vpop.f32.mrf.mxu0  ;;  %v2147_v53 = vadd.f32 %v4387_v29, %v2103_v17  ;;  %v4480_v31 = vld [vmem:[%s4738_s13] ss:$0 sm:$0xff] }
 0x2b7   : > { %v2105_v18 = vmul.f32 %v4376_v51, %v2053_v11  ;;  %v2055_v21 = vadd.f32 %v2054_v19, %v1941_v16  ;;  %v2198_v28 = vpack.c.bf16 %v2178_v32, %v2176_v13  ;;  %v2148_v49 = vadd.f32 %v4383_v57, %v2104_v15 }
 0x2b8   : > { %v1945_v23 = vpop.f32.mrf.mxu1  ;;  %v2058_v27 = vpop.f32.mrf.mxu0  ;;  %v2179_v48 = vmax.f32 %v2147_v53, 0.0 }
 0x2b9   : > { %v2149_v33 = vadd.f32 %v4387_v29, %v2105_v18  ;;  %v2106_v36 = vmul.f32 %v4373_v44, %v2055_v21  ;;  %2403 = vmatprep.mubr.bf16.mxu1 %v2198_v28  ;;  %v2059_v43 = vadd.f32 %v2058_v27, %v1945_v23  ;;  %v2180_v56 = vmax.f32 %v2148_v49, 0.0 }
 0x2ba   : > { %v1947_v40 = vpop.f32.mrf.mxu1  ;;  %v2060_v41 = vpop.f32.mrf.mxu0  ;;  %2404 = vmatmul.mubr.bf16.gmra.mxu1 %v2197_v39 }
 0x2bb   : > { %v2150_v42 = vadd.f32 %v4383_v57, %v2106_v36  ;;  %v2061_v50 = vadd.f32 %v2060_v41, %v1947_v40  ;;  %v2181_v52 = vmax.f32 %v2149_v33, 0.0  ;;  %v2107_v0 = vmul.f32 %v4376_v51, %v2059_v43 }
 0x2bc   : > { %v1949_v34 = vpop.f32.mrf.mxu1  ;;  %v2062_v35 = vpop.f32.mrf.mxu0 }
 0x2bd   : > { %v2182_v55 = vmax.f32 %v2150_v42, 0.0  ;;  %v2108_v46 = vmul.f32 %v4373_v44, %v2061_v50  ;;  %v2063_v54 = vadd.f32 %v2062_v35, %v1949_v34  ;;  %v2199_v59 = vpack.c.bf16 %v2181_v52, %v2179_v48 }
 0x2be   : > { %v1951_v58 = vpop.f32.mrf.mxu1  ;;  %v2064_v63 = vpop.f32.mrf.mxu0  ;;  %v2151_v60 = vadd.f32 %v4387_v29, %v2107_v0 }
 0x2bf   : > { %v2109_v3 = vmul.f32 %v4376_v51, %v2063_v54  ;;  %v2065_v30 = vadd.f32 %v2064_v63, %v1951_v58  ;;  %v2200_v61 = vpack.c.bf16 %v2182_v55, %v2180_v56  ;;  %v2152_v4 = vadd.f32 %v4383_v57, %v2108_v46 }
 0x2c0   : > { %v2183_v45 = vmax.f32 %v2151_v60, 0.0 }
 0x2c1   : > { %v2153_v8 = vadd.f32 %v4387_v29, %v2109_v3  ;;  %v2110_v1 = vmul.f32 %v4373_v44, %v2065_v30  ;;  %2411 = vmatprep.mubr.bf16.mxu1 %v2200_v61  ;;  %v2184_v9 = vmax.f32 %v2152_v4, 0.0  ;;  %v2495_v44 = vld [vmem:[%s4739_s14 + $0x28] sm:$0xff]  ;;  %v2493_v29 = vld [vmem:[%s4739_s14 + $0x18] sm:$0xff] }
 0x2c2   : > { %2412 = vmatmul.mubr.bf16.gmra.mxu1 %v2199_v59  ;;  %3261 = vmatprep.subr.mxu0 %v2495_v44 }
 0x2c3   : > { %v2154_v2 = vadd.f32 %v4383_v57, %v2110_v1  ;;  %v2185_v62 = vmax.f32 %v2153_v8, 0.0  ;;  %v2494_v57 = vld [vmem:[%s4739_s14 + $0x20] sm:$0xff]  ;;  %3262 = vmatpush3.msra.mxu0 %v2495_v44 }
 0x2c4   : > { %3263 = vmatprep.subr.mxu0 %v2494_v57 }
 0x2c5   : > { %v2186_v5 = vmax.f32 %v2154_v2, 0.0  ;;  %v2201_v37 = vpack.c.bf16 %v2185_v62, %v2183_v45  ;;  %3264 = vmatpush3.msra.mxu0 %v2494_v57 }
 0x2c6   : > { %3265 = vmatprep.subr.mxu0 %v2493_v29 }
 0x2c7   : > { %v2202_v51 = vpack.c.bf16 %v2186_v5, %v2184_v9  ;;  %3266 = vmatpush3.msra.mxu0 %v2493_v29 }
 0x2c8   : > { %3267 = vmatprep.subr.mxu0 %v2492_v38 }
 0x2c9   : > { %2419 = vmatprep.mubr.bf16.mxu1 %v2202_v51  ;;  %3268 = vmatpush3.msra.mxu0 %v2492_v38 }
 0x2ca   : > { %2420 = vmatmul.mubr.bf16.gmra.mxu1 %v2201_v37  ;;  %3269 = vmatprep.subr.mxu0 %v2491_v6 }
 0x2cb   : > { %3270 = vmatpush3.msra.mxu0 %v2491_v6 }
 0x2cc   : > { %3271 = vmatprep.subr.mxu0 %v2490_v25 }
 0x2cd   : > { %3272 = vmatpush3.msra.mxu0 %v2490_v25 }
 0x34a   : > { %v3143_v47 = vpop.f32.mrf.mxu1 }
 0x34c   : > { %v3144_v24 = vpop.f32.mrf.mxu1 }
 0x34d   : > { %v3145_v26 = vadd.f32 %v3144_v24, %v3143_v47 }
 0x34e   : > { %v3146_v10 = vpop.f32.mrf.mxu1 }
 0x34f   : > { %v2435_v12 = vmul.f32 %v3145_v26, %v4475_v7 }
 0x350   : > { %v3147_v14 = vpop.f32.mrf.mxu1 }
 0x351   : > { %v3148_v32 = vadd.f32 %v3147_v14, %v3146_v10  ;;  %v2458_v11 = vadd.f32 %v4480_v31, %v2435_v12 }
 0x353   : > { %v2436_v13 = vmul.f32 %v3148_v32, %v4475_v7  ;;  %v2474_v15 = vmax.f32 %v2458_v11, 0.0 }
 0x355   : > { %v2459_v16 = vadd.f32 %v4480_v31, %v2436_v13  ;;  %3273 = vmatprep.mubr.f32.mxu0 %v2474_v15 }
 0x356   : > { %v3149_v19 = vpop.f32.mrf.mxu1 }
 0x357   : > { %v2475_v20 = vmax.f32 %v2459_v16, 0.0 }
 0x358   : > { %v3150_v17 = vpop.f32.mrf.mxu1 }
 0x359   : > { %v3151_v18 = vadd.f32 %v3150_v17, %v3149_v19  ;;  %3274 = vmatmul.mubr.f32.vlgmr.msra.gmra.mxu0 %v2475_v20 }
 0x35a   : > { %v3152_v21 = vpop.f32.mrf.mxu1 }
 0x35b   : > { %v2437_v23 = vmul.f32 %v3151_v18, %v4475_v7 }
 0x35c   : > { %v3153_v27 = vpop.f32.mrf.mxu1 }
 0x35d   : > { %v3154_v28 = vadd.f32 %v3153_v27, %v3152_v21  ;;  %v2460_v33 = vadd.f32 %v4480_v31, %v2437_v23 }
 0x35f   : > { %v2438_v36 = vmul.f32 %v3154_v28, %v4475_v7  ;;  %v3155_v39 = vpop.f32.mrf.mxu1  ;;  %v2476_v49 = vmax.f32 %v2460_v33, 0.0 }
 0x361   : > { %v3156_v40 = vpop.f32.mrf.mxu1  ;;  %3276 = vmatprep.mubr.f32.mxu0 %v2476_v49  ;;  %v2461_v41 = vadd.f32 %v4480_v31, %v2438_v36 }
 0x362   : > { %v3157_v53 = vadd.f32 %v3156_v40, %v3155_v39 }
 0x363   : > { %v3158_v42 = vpop.f32.mrf.mxu1  ;;  %v2477_v43 = vmax.f32 %v2461_v41, 0.0 }
 0x364   : > { %v2439_v50 = vmul.f32 %v3157_v53, %v4475_v7 }
 0x365   : > { %v3159_v34 = vpop.f32.mrf.mxu1  ;;  %3277 = vmatmul.mubr.f32.gmra.mxu0 %v2477_v43 }
 0x366   : > { %v3160_v35 = vadd.f32 %v3159_v34, %v3158_v42  ;;  %v2462_v52 = vadd.f32 %v4480_v31, %v2439_v50 }
 0x368   : > { %v2440_v55 = vmul.f32 %v3160_v35, %v4475_v7  ;;  %v3161_v46 = vpop.f32.mrf.mxu1  ;;  %v2478_v54 = vmax.f32 %v2462_v52, 0.0 }
 0x36a   : > { %v3162_v56 = vpop.f32.mrf.mxu1  ;;  %3279 = vmatprep.mubr.f32.mxu0 %v2478_v54  ;;  %v2463_v58 = vadd.f32 %v4480_v31, %v2440_v55  ;;  %v3113_v54 = vld [vmem:[%s4740_s15] ss:$0 sm:$0xff] }
 0x36b   : > { %v3163_v63 = vadd.f32 %v3162_v56, %v3161_v46 }
 0x36c   : > { %v3164_v48 = vpop.f32.mrf.mxu1  ;;  %v2479_v0 = vmax.f32 %v2463_v58, 0.0 }
 0x36d   : > { %v2441_v3 = vmul.f32 %v3163_v63, %v4475_v7 }
 0x36e   : > { %v3165_v30 = vpop.f32.mrf.mxu1  ;;  %3280 = vmatmul.mubr.f32.gmra.mxu0 %v2479_v0 }
 0x36f   : > { %v3166_v61 = vadd.f32 %v3165_v30, %v3164_v48  ;;  %v2464_v4 = vadd.f32 %v4480_v31, %v2441_v3 }
 0x371   : > { %v2442_v8 = vmul.f32 %v3166_v61, %v4475_v7  ;;  %v2480_v1 = vmax.f32 %v2464_v4, 0.0  ;;  %v3167_v59 = vpop.f32.mrf.mxu1 }
 0x373   : > { %3282 = vmatprep.mubr.f32.mxu0 %v2480_v1  ;;  %v2465_v60 = vadd.f32 %v4480_v31, %v2442_v8  ;;  %v3168_v2 = vpop.f32.mrf.mxu1 }
 0x374   : > { %v3169_v9 = vadd.f32 %v3168_v2, %v3167_v59 }
 0x375   : > { %v2481_v62 = vmax.f32 %v2465_v60, 0.0  ;;  %v3170_v5 = vpop.f32.mrf.mxu1 }
 0x376   : > { %v2443_v45 = vmul.f32 %v3169_v9, %v4475_v7 }
 0x377   : > { %3283 = vmatmul.mubr.f32.gmra.mxu0 %v2481_v62  ;;  %v3171_v51 = vpop.f32.mrf.mxu1 }
 0x378   : > { %v3172_v37 = vadd.f32 %v3171_v51, %v3170_v5  ;;  %v2466_v22 = vadd.f32 %v4480_v31, %v2443_v45 }
 0x37a   : > { %v2444_v44 = vmul.f32 %v3172_v37, %v4475_v7  ;;  %v2482_v57 = vmax.f32 %v2466_v22, 0.0  ;;  %v3173_v29 = vpop.f32.mrf.mxu1 }
 0x37c   : > { %3285 = vmatprep.mubr.f32.mxu0 %v2482_v57  ;;  %v2467_v38 = vadd.f32 %v4480_v31, %v2444_v44  ;;  %v3174_v6 = vpop.f32.mrf.mxu1 }
 0x37d   : > { %v3175_v25 = vadd.f32 %v3174_v6, %v3173_v29 }
 0x37e   : > { %v2483_v47 = vmax.f32 %v2467_v38, 0.0  ;;  %v3176_v24 = vpop.f32.mrf.mxu1 }
 0x37f   : > { %v2445_v26 = vmul.f32 %v3175_v25, %v4475_v7 }
 0x380   : > { %3286 = vmatmul.mubr.f32.gmra.mxu0 %v2483_v47  ;;  %v3177_v10 = vpop.f32.mrf.mxu1 }
 0x381   : > { %v3178_v12 = vadd.f32 %v3177_v10, %v3176_v24  ;;  %v2468_v14 = vadd.f32 %v4480_v31, %v2445_v26 }
 0x382   : > { %v3179_v32 = vpop.f32.mrf.mxu1 }
 0x383   : > { %v2446_v11 = vmul.f32 %v3178_v12, %v4475_v7  ;;  %v2484_v13 = vmax.f32 %v2468_v14, 0.0 }
 0x384   : > { %v3180_v15 = vpop.f32.mrf.mxu1 }
 0x385   : > { %v3181_v16 = vadd.f32 %v3180_v15, %v3179_v32  ;;  %3288 = vmatprep.mubr.f32.mxu0 %v2484_v13  ;;  %v2469_v19 = vadd.f32 %v4480_v31, %v2446_v11 }
 0x386   : > { %v3182_v20 = vpop.f32.mrf.mxu1 }
 0x387   : > { %v2447_v17 = vmul.f32 %v3181_v16, %v4475_v7  ;;  %v2485_v18 = vmax.f32 %v2469_v19, 0.0 }
 0x388   : > { %v3183_v21 = vpop.f32.mrf.mxu1 }
 0x389   : > { %v3184_v23 = vadd.f32 %v3183_v21, %v3182_v20  ;;  %3289 = vmatmul.mubr.f32.gmra.mxu0 %v2485_v18  ;;  %v2470_v27 = vadd.f32 %v4480_v31, %v2447_v17 }
 0x38a   : > { %v3185_v28 = vpop.f32.mrf.mxu1 }
 0x38b   : > { %v2448_v33 = vmul.f32 %v3184_v23, %v4475_v7  ;;  %v2486_v36 = vmax.f32 %v2470_v27, 0.0 }
 0x38c   : > { %v3186_v39 = vpop.f32.mrf.mxu1 }
 0x38d   : > { %v3187_v49 = vadd.f32 %v3186_v39, %v3185_v28  ;;  %3291 = vmatprep.mubr.f32.mxu0 %v2486_v36  ;;  %v2471_v40 = vadd.f32 %v4480_v31, %v2448_v33 }
 0x38e   : > { %v3188_v41 = vpop.f32.mrf.mxu1 }
 0x38f   : > { %v2449_v53 = vmul.f32 %v3187_v49, %v4475_v7  ;;  %v2487_v42 = vmax.f32 %v2471_v40, 0.0 }
 0x390   : > { %v3189_v43 = vpop.f32.mrf.mxu1 }
 0x391   : > { %v3190_v50 = vadd.f32 %v3189_v43, %v3188_v41  ;;  %3292 = vmatmul.mubr.f32.gmra.mxu0 %v2487_v42  ;;  %v2472_v34 = vadd.f32 %v4480_v31, %v2449_v53 }
 0x393   : > { %v2450_v35 = vmul.f32 %v3190_v50, %v4475_v7  ;;  %v2488_v52 = vmax.f32 %v2472_v34, 0.0 }
 0x395   : > { %3294 = vmatprep.mubr.f32.mxu0 %v2488_v52  ;;  %v2473_v55 = vadd.f32 %v4480_v31, %v2450_v35 }
 0x397   : > { %v2489_v46 = vmax.f32 %v2473_v55, 0.0 }
 0x399   : > { %3295 = vmatmul.mubr.f32.gmra.mxu0 %v2489_v46 }
 0x419   : > { %v3275_v56 = vpop.f32.mrf.mxu0 }
 0x41a   : > { %v4517_v58 = vadd.f32 %v3275_v56, %v3113_v54 }
 0x41b   : > { %v2579_v63 = vpop.f32.mrf.mxu0 }
 0x41c   : > { %v4519_v48 = vadd.f32 %v3113_v54, %v2579_v63  ;;  %v2662_v7 = vsel %vm2658_vm4, %v4517_v58, -inf }
 0x41d   : > { %2663 = vmax.xlane.f32.xlu0 %v2662_v7 }
 0x41e   : > { %v2659_v31 = vsel %vm2658_vm4, %v4519_v48, -inf }
 0x421   : > { %2660 = vmax.xlane.f32.xlu0 %v2659_v31 }
 0x425   : > { %v3278_v0 = vpop.f32.mrf.mxu0 }
 0x426   : > { %v4525_v3 = vadd.f32 %v3278_v0, %v3113_v54 }
 0x427   : > { %v2589_v30 = vpop.f32.mrf.mxu0 }
 0x428   : > { %v4527_v61 = vadd.f32 %v3113_v54, %v2589_v30  ;;  %v2668_v4 = vsel %vm2658_vm4, %v4525_v3, -inf }
 0x429   : > { %2669 = vmax.xlane.f32.xlu1 %v2668_v4 }
 0x42a   : > { %v2665_v8 = vsel %vm2658_vm4, %v4527_v61, -inf }
 0x42d   : > { %2666 = vmax.xlane.f32.xlu1 %v2665_v8 }
 0x42e   : > { %v3281_v1 = vpop.f32.mrf.mxu0 }
 0x42f   : > { %v4533_v59 = vadd.f32 %v3281_v1, %v3113_v54 }
 0x430   : > { %v2599_v60 = vpop.f32.mrf.mxu0 }
 0x431   : > { %v4535_v2 = vadd.f32 %v3113_v54, %v2599_v60  ;;  %v2674_v9 = vsel %vm2658_vm4, %v4533_v59, -inf }
 0x432   : > { %2675 = vmax.xlane.f32.xlu1 %v2674_v9 }
 0x433   : > { %v2671_v62 = vsel %vm2658_vm4, %v4535_v2, -inf }
 0x434   : > { %2672 = vmax.xlane.f32.xlu0 %v2671_v62 }
 0x437   : > { %v3284_v5 = vpop.f32.mrf.mxu0 }
 0x438   : > { %v4541_v45 = vadd.f32 %v3284_v5, %v3113_v54 }
 0x439   : > { %v2609_v51 = vpop.f32.mrf.mxu0 }
 0x43a   : > { %v4543_v37 = vadd.f32 %v3113_v54, %v2609_v51  ;;  %v2680_v22 = vsel %vm2658_vm4, %v4541_v45, -inf }
 0x43b   : > { %2681 = vmax.xlane.f32.xlu1 %v2680_v22 }
 0x43c   : > { %v2677_v44 = vsel %vm2658_vm4, %v4543_v37, -inf }
 0x43d   : > { %2678 = vmax.xlane.f32.xlu0 %v2677_v44 }
 0x440   : > { %v3287_v57 = vpop.f32.mrf.mxu0 }
 0x441   : > { %v4549_v29 = vadd.f32 %v3287_v57, %v3113_v54 }
 0x442   : > { %v2619_v38 = vpop.f32.mrf.mxu0 }
 0x443   : > { %v4551_v6 = vadd.f32 %v3113_v54, %v2619_v38  ;;  %v2686_v25 = vsel %vm2658_vm4, %v4549_v29, -inf }
 0x444   : > { %2687 = vmax.xlane.f32.xlu1 %v2686_v25 }
 0x445   : > { %v2683_v47 = vsel %vm2658_vm4, %v4551_v6, -inf }
 0x446   : > { %2684 = vmax.xlane.f32.xlu0 %v2683_v47 }
 0x449   : > { %v3290_v24 = vpop.f32.mrf.mxu0 }
 0x44a   : > { %v4557_v26 = vadd.f32 %v3290_v24, %v3113_v54 }
 0x44b   : > { %v2629_v10 = vpop.f32.mrf.mxu0 }
 0x44c   : > { %v4559_v12 = vadd.f32 %v3113_v54, %v2629_v10  ;;  %v2692_v14 = vsel %vm2658_vm4, %v4557_v26, -inf }
 0x44d   : > { %2693 = vmax.xlane.f32.xlu1 %v2692_v14 }
 0x44e   : > { %v2689_v32 = vsel %vm2658_vm4, %v4559_v12, -inf }
 0x44f   : > { %2690 = vmax.xlane.f32.xlu0 %v2689_v32 }
 0x451   : > { %v3293_v11 = vpop.f32.mrf.mxu0 }
 0x452   : > { %v4565_v13 = vadd.f32 %v3293_v11, %v3113_v54 }
 0x453   : > { %v2639_v15 = vpop.f32.mrf.mxu0 }
 0x454   : > { %v4567_v16 = vadd.f32 %v3113_v54, %v2639_v15  ;;  %v2698_v19 = vsel %vm2658_vm4, %v4565_v13, -inf }
 0x455   : > { %2699 = vmax.xlane.f32.xlu1 %v2698_v19 }
 0x456   : > { %v2695_v20 = vsel %vm2658_vm4, %v4567_v16, -inf }
 0x457   : > { %2696 = vmax.xlane.f32.xlu0 %v2695_v20 }
 0x459   : > { %v3296_v17 = vpop.f32.mrf.mxu0 }
 0x45a   : > { %v4573_v18 = vadd.f32 %v3296_v17, %v3113_v54 }
 0x45b   : > { %v2649_v21 = vpop.f32.mrf.mxu0 }
 0x45c   : > { %v4575_v23 = vadd.f32 %v3113_v54, %v2649_v21  ;;  %v2704_v27 = vsel %vm2658_vm4, %v4573_v18, -inf }
 0x45d   : > { %2705 = vmax.xlane.f32.xlu1 %v2704_v27 }
 0x45e   : > { %v2701_v28 = vsel %vm2658_vm4, %v4575_v23, -inf }
 0x45f   : > { %2702 = vmax.xlane.f32.xlu0 %v2701_v28 }
 0x4a6   : > { %v2664_v33 = vpop.xlane.xlu0 %2663 }
 0x4a7   : > { %v4582_v36 = vsub.f32 %v4517_v58, %v2664_v33 }
 0x4a9   : > { %v2725_v39 = vmul.f32 1.442695, %v4582_v36 }
 0x4aa   : > { %v2661_v49 = vpop.xlane.xlu0 %2660 }
 0x4ab   : > { %3459 = vpow2.f32 %v2725_v39  ;;  %v4586_v40 = vsub.f32 %v4519_v48, %v2661_v49 }
 0x4ad   : > { %v2723_v41 = vmul.f32 1.442695, %v4586_v40 }
 0x4af   : > { %3461 = vpow2.f32 %v2723_v41 }
 0x4b2   : > { %v2670_v53 = vpop.xlane.xlu1 %2669 }
 0x4b3   : > { %v4590_v42 = vsub.f32 %v4525_v3, %v2670_v53 }
 0x4b5   : > { %v2729_v43 = vmul.f32 1.442695, %v4590_v42 }
 0x4b6   : > { %v2667_v50 = vpop.xlane.xlu1 %2666 }
 0x4b7   : > { %3463 = vpow2.f32 %v2729_v43  ;;  %v4594_v34 = vsub.f32 %v4527_v61, %v2667_v50 }
 0x4b8   : > { %v3460_v35 = vpop.eup %3459 }
 0x4b9   : > { %v2727_v52 = vmul.f32 1.442695, %v4594_v34  ;;  %v2758_v55 = vsel %vm2658_vm4, %v3460_v35, 0.0 }
 0x4ba   : > { %2759 = vadd.xlane.f32.xlu1 %v2758_v55 }
 0x4bb   : > { %3465 = vpow2.f32 %v2727_v52  ;;  %v2676_v46 = vpop.xlane.xlu1 %2675 }
 0x4bc   : > { %v3462_v54 = vpop.eup %3461  ;;  %v4599_v56 = vsub.f32 %v4533_v59, %v2676_v46 }
 0x4bd   : > { %v2673_v58 = vpop.xlane.xlu0 %2672  ;;  %v2755_v63 = vsel %vm2658_vm4, %v3462_v54, 0.0 }
 0x4be   : > { %v2733_v48 = vmul.f32 1.442695, %v4599_v56  ;;  %v4604_v7 = vsub.f32 %v4535_v2, %v2673_v58  ;;  %2756 = vadd.xlane.f32.xlu0 %v2755_v63 }
 0x4c0   : > { %3467 = vpow2.f32 %v2733_v48  ;;  %v2731_v31 = vmul.f32 1.442695, %v4604_v7 }
 0x4c2   : > { %3469 = vpow2.f32 %v2731_v31 }
 0x4c4   : > { %v3464_v0 = vpop.eup %3463  ;;  %v2682_v3 = vpop.xlane.xlu1 %2681 }
 0x4c5   : > { %v4608_v30 = vsub.f32 %v4541_v45, %v2682_v3  ;;  %v2764_v61 = vsel %vm2658_vm4, %v3464_v0, 0.0 }
 0x4c6   : > { %v2679_v4 = vpop.xlane.xlu0 %2678  ;;  %2765 = vadd.xlane.f32.xlu1 %v2764_v61 }
 0x4c7   : > { %v2737_v8 = vmul.f32 1.442695, %v4608_v30  ;;  %v4613_v1 = vsub.f32 %v4543_v37, %v2679_v4 }
 0x4c8   : > { %v3466_v59 = vpop.eup %3465 }
 0x4c9   : > { %3471 = vpow2.f32 %v2737_v8  ;;  %v2735_v60 = vmul.f32 1.442695, %v4613_v1  ;;  %v2761_v2 = vsel %vm2658_vm4, %v3466_v59, 0.0 }
 0x4ca   : > { %2762 = vadd.xlane.f32.xlu0 %v2761_v2 }
 0x4cb   : > { %3473 = vpow2.f32 %v2735_v60 }
 0x4cd   : > { %v3468_v9 = vpop.eup %3467  ;;  %v2688_v62 = vpop.xlane.xlu1 %2687 }
 0x4ce   : > { %v2770_v5 = vsel %vm2658_vm4, %v3468_v9, 0.0  ;;  %v4619_v51 = vsub.f32 %v4549_v29, %v2688_v62 }
 0x4cf   : > { %v3470_v45 = vpop.eup %3469  ;;  %2771 = vadd.xlane.f32.xlu1 %v2770_v5  ;;  %v2685_v22 = vpop.xlane.xlu0 %2684 }
 0x4d0   : > { %v2767_v37 = vsel %vm2658_vm4, %v3470_v45, 0.0  ;;  %v2741_v44 = vmul.f32 1.442695, %v4619_v51  ;;  %v4624_v57 = vsub.f32 %v4551_v6, %v2685_v22 }
 0x4d1   : > { %2768 = vadd.xlane.f32.xlu0 %v2767_v37 }
 0x4d2   : > { %3475 = vpow2.f32 %v2741_v44  ;;  %v2739_v38 = vmul.f32 1.442695, %v4624_v57 }
 0x4d4   : > { %3477 = vpow2.f32 %v2739_v38 }
 0x4d6   : > { %v3472_v25 = vpop.eup %3471  ;;  %v2694_v29 = vpop.xlane.xlu1 %2693 }
 0x4d7   : > { %v2776_v47 = vsel %vm2658_vm4, %v3472_v25, 0.0  ;;  %v4629_v10 = vsub.f32 %v4557_v26, %v2694_v29 }
 0x4d8   : > { %v3474_v24 = vpop.eup %3473  ;;  %2777 = vadd.xlane.f32.xlu1 %v2776_v47  ;;  %v2691_v32 = vpop.xlane.xlu0 %2690 }
 0x4d9   : > { %v2773_v14 = vsel %vm2658_vm4, %v3474_v24, 0.0  ;;  %v2745_v6 = vmul.f32 1.442695, %v4629_v10  ;;  %v4634_v11 = vsub.f32 %v4559_v12, %v2691_v32 }
 0x4da   : > { %2774 = vadd.xlane.f32.xlu0 %v2773_v14 }
 0x4db   : > { %3479 = vpow2.f32 %v2745_v6  ;;  %v2743_v15 = vmul.f32 1.442695, %v4634_v11 }
 0x4dd   : > { %3481 = vpow2.f32 %v2743_v15 }
 0x4de   : > { %v2700_v20 = vpop.xlane.xlu1 %2699 }
 0x4df   : > { %v3476_v19 = vpop.eup %3475  ;;  %v4638_v17 = vsub.f32 %v4565_v13, %v2700_v20 }
 0x4e0   : > { %v2782_v26 = vsel %vm2658_vm4, %v3476_v19, 0.0  ;;  %v2697_v27 = vpop.xlane.xlu0 %2696 }
 0x4e1   : > { %v3478_v21 = vpop.eup %3477  ;;  %2783 = vadd.xlane.f32.xlu1 %v2782_v26  ;;  %v2749_v28 = vmul.f32 1.442695, %v4638_v17  ;;  %v4643_v33 = vsub.f32 %v4567_v16, %v2697_v27 }
 0x4e2   : > { %v2779_v12 = vsel %vm2658_vm4, %v3478_v21, 0.0 }
 0x4e3   : > { %2780 = vadd.xlane.f32.xlu0 %v2779_v12  ;;  %3483 = vpow2.f32 %v2749_v28  ;;  %v2747_v39 = vmul.f32 1.442695, %v4643_v33 }
 0x4e5   : > { %3485 = vpow2.f32 %v2747_v39 }
 0x4e6   : > { %v2706_v49 = vpop.xlane.xlu1 %2705 }
 0x4e7   : > { %v4648_v13 = vsub.f32 %v4573_v18, %v2706_v49 }
 0x4e8   : > { %v3480_v41 = vpop.eup %3479  ;;  %v2703_v53 = vpop.xlane.xlu0 %2702 }
 0x4e9   : > { %v2753_v43 = vmul.f32 1.442695, %v4648_v13  ;;  %v4652_v50 = vsub.f32 %v4575_v23, %v2703_v53  ;;  %v2788_v16 = vsel %vm2658_vm4, %v3480_v41, 0.0 }
 0x4ea   : > { %v3482_v35 = vpop.eup %3481  ;;  %2789 = vadd.xlane.f32.xlu1 %v2788_v16 }
 0x4eb   : > { %3487 = vpow2.f32 %v2753_v43  ;;  %v2751_v52 = vmul.f32 1.442695, %v4652_v50  ;;  %v2785_v55 = vsel %vm2658_vm4, %v3482_v35, 0.0 }
 0x4ec   : > { %2786 = vadd.xlane.f32.xlu0 %v2785_v55 }
 0x4ed   : > { %3489 = vpow2.f32 %v2751_v52 }
 0x4f0   : > { %v3484_v18 = vpop.eup %3483 }
 0x4f1   : > { %v2794_v46 = vsel %vm2658_vm4, %v3484_v18, 0.0 }
 0x4f2   : > { %v3486_v54 = vpop.eup %3485  ;;  %2795 = vadd.xlane.f32.xlu1 %v2794_v46 }
 0x4f3   : > { %v2791_v58 = vsel %vm2658_vm4, %v3486_v54, 0.0 }
 0x4f4   : > { %2792 = vadd.xlane.f32.xlu0 %v2791_v58 }
 0x4f8   : > { %v3488_v23 = vpop.eup %3487 }
 0x4f9   : > { %v2800_v63 = vsel %vm2658_vm4, %v3488_v23, 0.0 }
 0x4fa   : > { %v3490_v48 = vpop.eup %3489  ;;  %2801 = vadd.xlane.f32.xlu1 %v2800_v63 }
 0x4fb   : > { %v2797_v31 = vsel %vm2658_vm4, %v3490_v48, 0.0 }
 0x4fc   : > { %2798 = vadd.xlane.f32.xlu0 %v2797_v31 }
 0x543   : > { %v2760_v0 = vpop.xlane.xlu1 %2759 }
 0x544   : > { %3491 = vlog2.f32 %v2760_v0 }
 0x547   : > { %v2757_v3 = vpop.xlane.xlu0 %2756 }
 0x548   : > { %3493 = vlog2.f32 %v2757_v3 }
 0x54f   : > { %v2766_v61 = vpop.xlane.xlu1 %2765 }
 0x550   : > { %3495 = vlog2.f32 %v2766_v61 }
 0x551   : > { %v3492_v4 = vpop.eup %3491 }
 0x552   : > { %v2806_v8 = vmul.f32 0.6931472, %v3492_v4 }
 0x553   : > { %v2763_v59 = vpop.xlane.xlu0 %2762 }
 0x554   : > { %v2836_v60 = vsub.f32 %v4582_v36, %v2806_v8  ;;  %3497 = vlog2.f32 %v2763_v59 }
 0x555   : > { %v3494_v2 = vpop.eup %3493 }
 0x556   : > { %2852 = vst.msk [vmem:[%s4666_s19 + $0x8] sm:$0xff] %vm2658_vm4, %v2836_v60  ;;  %v2804_v9 = vmul.f32 0.6931472, %v3494_v2 }
 0x558   : > { %v2835_v62 = vsub.f32 %v4586_v40, %v2804_v9  ;;  %v2772_v5 = vpop.xlane.xlu1 %2771 }
 0x559   : > { %3499 = vlog2.f32 %v2772_v5 }
 0x55a   : > { %2851 = vst.msk [vmem:[%s4666_s19] sm:$0xff] %vm2658_vm4, %v2835_v62  ;;  %v2769_v45 = vpop.xlane.xlu0 %2768 }
 0x55b   : > { %3501 = vlog2.f32 %v2769_v45 }
 0x55d   : > { %v3496_v22 = vpop.eup %3495 }
 0x55e   : > { %v2810_v37 = vmul.f32 0.6931472, %v3496_v22 }
 0x560   : > { %v2838_v36 = vsub.f32 %v4590_v42, %v2810_v37 }
 0x561   : > { %v3498_v44 = vpop.eup %3497  ;;  %v2778_v38 = vpop.xlane.xlu1 %2777 }
 0x562   : > { %2854 = vst.msk [vmem:[%s4666_s19 + $0x18] sm:$0xff] %vm2658_vm4, %v2838_v36  ;;  %v2808_v25 = vmul.f32 0.6931472, %v3498_v44  ;;  %3503 = vlog2.f32 %v2778_v38 }
 0x563   : > { %v2775_v40 = vpop.xlane.xlu0 %2774 }
 0x564   : > { %v2837_v47 = vsub.f32 %v4594_v34, %v2808_v25  ;;  %3505 = vlog2.f32 %v2775_v40 }
 0x566   : > { %v3500_v24 = vpop.eup %3499  ;;  %2853 = vst.msk [vmem:[%s4666_s19 + $0x10] sm:$0xff] %vm2658_vm4, %v2837_v47 }
 0x567   : > { %v2814_v29 = vmul.f32 0.6931472, %v3500_v24 }
 0x568   : > { %v3502_v14 = vpop.eup %3501 }
 0x569   : > { %v2840_v32 = vsub.f32 %v4599_v56, %v2814_v29  ;;  %v2812_v42 = vmul.f32 0.6931472, %v3502_v14 }
 0x56a   : > { %v2784_v15 = vpop.xlane.xlu1 %2783 }
 0x56b   : > { %2856 = vst.msk [vmem:[%s4666_s19 + $0x28] sm:$0xff] %vm2658_vm4, %v2840_v32  ;;  %v2839_v6 = vsub.f32 %v4604_v7, %v2812_v42  ;;  %3507 = vlog2.f32 %v2784_v15 }
 0x56c   : > { %v2781_v34 = vpop.xlane.xlu0 %2780 }
 0x56d   : > { %2855 = vst.msk [vmem:[%s4666_s19 + $0x20] sm:$0xff] %vm2658_vm4, %v2839_v6  ;;  %3509 = vlog2.f32 %v2781_v34 }
 0x56f   : > { %v3504_v19 = vpop.eup %3503 }
 0x570   : > { %v2818_v20 = vmul.f32 0.6931472, %v3504_v19 }
 0x571   : > { %v3506_v26 = vpop.eup %3505 }
 0x572   : > { %v2842_v21 = vsub.f32 %v4608_v30, %v2818_v20  ;;  %v2816_v27 = vmul.f32 0.6931472, %v3506_v26 }
 0x573   : > { %v2790_v28 = vpop.xlane.xlu1 %2789 }
 0x574   : > { %2858 = vst.msk [vmem:[%s4666_s19 + $0x38] sm:$0xff] %vm2658_vm4, %v2842_v21  ;;  %v2841_v56 = vsub.f32 %v4613_v1, %v2816_v27  ;;  %3511 = vlog2.f32 %v2790_v28 }
 0x575   : > { %v2787_v7 = vpop.xlane.xlu0 %2786 }
 0x576   : > { %2857 = vst.msk [vmem:[%s4666_s19 + $0x30] sm:$0xff] %vm2658_vm4, %v2841_v56  ;;  %3513 = vlog2.f32 %v2787_v7 }
 0x578   : > { %v3508_v12 = vpop.eup %3507 }
 0x579   : > { %v2822_v39 = vmul.f32 0.6931472, %v3508_v12 }
 0x57a   : > { %v3510_v49 = vpop.eup %3509 }
 0x57b   : > { %v2844_v41 = vsub.f32 %v4619_v51, %v2822_v39  ;;  %v2820_v53 = vmul.f32 0.6931472, %v3510_v49  ;;  %v2796_v30 = vpop.xlane.xlu1 %2795 }
 0x57c   : > { %3515 = vlog2.f32 %v2796_v30 }
 0x57d   : > { %2860 = vst.msk [vmem:[%s4666_s19 + $0x48] sm:$0xff] %vm2658_vm4, %v2844_v41  ;;  %v2843_v43 = vsub.f32 %v4624_v57, %v2820_v53  ;;  %v2793_v1 = vpop.xlane.xlu0 %2792 }
 0x57e   : > { %3517 = vlog2.f32 %v2793_v1 }
 0x57f   : > { %2859 = vst.msk [vmem:[%s4666_s19 + $0x40] sm:$0xff] %vm2658_vm4, %v2843_v43 }
 0x581   : > { %v3512_v16 = vpop.eup %3511 }
 0x582   : > { %v2826_v35 = vmul.f32 0.6931472, %v3512_v16 }
 0x583   : > { %v3514_v52 = vpop.eup %3513  ;;  %v2802_v55 = vpop.xlane.xlu1 %2801 }
 0x584   : > { %v2846_v51 = vsub.f32 %v4629_v10, %v2826_v35  ;;  %v2824_v18 = vmul.f32 0.6931472, %v3514_v52  ;;  %3519 = vlog2.f32 %v2802_v55 }
 0x585   : > { %v2799_v46 = vpop.xlane.xlu0 %2798 }
 0x586   : > { %2862 = vst.msk [vmem:[%s4666_s19 + $0x58] sm:$0xff] %vm2658_vm4, %v2846_v51  ;;  %v2845_v57 = vsub.f32 %v4634_v11, %v2824_v18  ;;  %3521 = vlog2.f32 %v2799_v46 }
 0x588   : > { %2861 = vst.msk [vmem:[%s4666_s19 + $0x50] sm:$0xff] %vm2658_vm4, %v2845_v57 }
 0x589   : > { %v3516_v54 = vpop.eup %3515 }
 0x58a   : > { %v2830_v58 = vmul.f32 0.6931472, %v3516_v54 }
 0x58b   : > { %v3518_v23 = vpop.eup %3517 }
 0x58c   : > { %v2848_v63 = vsub.f32 %v4638_v17, %v2830_v58  ;;  %v2828_v48 = vmul.f32 0.6931472, %v3518_v23 }
 0x58e   : > { %2864 = vst.msk [vmem:[%s4666_s19 + $0x68] sm:$0xff] %vm2658_vm4, %v2848_v63  ;;  %v2847_v10 = vsub.f32 %v4643_v33, %v2828_v48 }
 0x590   : > { %2863 = vst.msk [vmem:[%s4666_s19 + $0x60] sm:$0xff] %vm2658_vm4, %v2847_v10 }
 0x591   : > { %v3520_v31 = vpop.eup %3519 }
 0x592   : > { %v2834_v0 = vmul.f32 0.6931472, %v3520_v31 }
 0x593   : > { %v3522_v11 = vpop.eup %3521 }
 0x594   : > { %v2850_v3 = vsub.f32 %v4648_v13, %v2834_v0  ;;  %v2832_v61 = vmul.f32 0.6931472, %v3522_v11 }
 0x596   : > { %2866 = vst.msk [vmem:[%s4666_s19 + $0x78] sm:$0xff] %vm2658_vm4, %v2850_v3  ;;  %v2849_v4 = vsub.f32 %v4652_v50, %v2832_v61 }
 0x598   : > { %2865 = vst.msk [vmem:[%s4666_s19 + $0x70] sm:$0xff] %vm2658_vm4, %v2849_v4 }
 0x599 PF: > { %s26_s23 = sadd.s32 1, %s3545_s23   ;;  %s4744_s21 = smov %s3541_s22 }
 0x59a   : > { %p23_p5 = scmp.ge.s32.totalorder %s26_s23, 4   ;;  %s4745_s22 = smov %s4747_s24 }
 0x59c   :  { %25 = sbr.rel (!%p23_p5) target bundleno = 2 (0x2), region = 120 }

</bundles_post_ra>
